<compile_context>
chip_gen: v7x
topology: tpu7x:2x2x1
jax: 0.10.0
libtpu: 0.0.40
codegen_flags: <defaults>
</compile_context>

<pallas_src>
import functools

import jax
import jax.numpy as jnp
from jax.experimental import pallas as pl
from jax.experimental.pallas import tpu as pltpu


# ----------------------------------------------------------------------------- config

_PREF_TILE = 512          # preferred row / reduction tile for the adjacency matmuls
_PREF_EDGE_TILE = 1024    # preferred edge tile for the edge-reconstruction loss
_VMEM_LIMIT = 48 * 1024 * 1024      # fits v7x's 64 MiB physical, >> v5e's 16 MiB scoped default
_RESIDENT_LIMIT = 16 * 1024 * 1024  # budget (incl. double buffering) for a VMEM-resident operand


def _pick_tile(n, pref=_PREF_TILE, quantum=128):
    """Largest multiple of `quantum` that divides n and is <= pref (falls back to n)."""
    t = min(pref, n)
    t -= t % quantum
    while t >= quantum and n % t:
        t -= quantum
    if t < quantum or n % t:
        # TODO(synk): pad N to a multiple of 128 for ragged graphs instead of whole-extent blocks.
        t = n
    return t


# ----------------------------------------------------------------------------- kernels

def _xw_kernel(x_ref, w_ref, o_ref):
    # XW tile: (TM, D) @ (D, H) -> (TM, H); bf16 MXU inputs, f32 accumulate, bf16 store.
    o_ref[...] = jnp.dot(x_ref[...], w_ref[...],
                         preferred_element_type=jnp.float32).astype(o_ref.dtype)


def _encoder_kernel(adj_ref, xw_ref, b_ref, pos_ref, neg_ref, acc_ref, *, h, tk, resident):
    # One tiled pass computes BOTH positive and negative embeddings:
    #   relu( A_hat @ [XW, P(XW)] + [b, b] )  ->  (positive, negative)
    k = pl.program_id(1)

    @pl.when(k == 0)
    def _init():
        acc_ref[...] = jnp.zeros_like(acc_ref)

    if resident:
        # Full XW_cat sits in VMEM; slice the k-th reduction chunk in-kernel.
        start = pl.multiple_of(k * tk, tk)
        xw_blk = xw_ref[pl.ds(start, tk), :]
    else:
        xw_blk = xw_ref[...]

    acc_ref[...] += jnp.dot(adj_ref[...], xw_blk, preferred_element_type=jnp.float32)

    @pl.when(k == pl.num_programs(1) - 1)
    def _finalize():
        act = jnp.maximum(acc_ref[...] + b_ref[...], 0.0)
        pos_ref[...] = act[:, :h].astype(pos_ref.dtype)
        neg_ref[...] = act[:, h:].astype(neg_ref.dtype)


def _graph_embed_kernel(adj_ref, x_ref, invn_ref, o_ref, acc_ref, *, tk, resident):
    # graph_embeds = sigmoid( (subgraph_adj @ X) * (1 / subgraph_adj_norm) )
    k = pl.program_id(1)

    @pl.when(k == 0)
    def _init():
        acc_ref[...] = jnp.zeros_like(acc_ref)

    if resident:
        start = pl.multiple_of(k * tk, tk)
        x_blk = x_ref[pl.ds(start, tk), :]
    else:
        x_blk = x_ref[...]

    acc_ref[...] += jnp.dot(adj_ref[...], x_blk, preferred_element_type=jnp.float32)

    @pl.when(k == pl.num_programs(1) - 1)
    def _finalize():
        o_ref[...] = jax.nn.sigmoid(acc_ref[...] * invn_ref[...]).astype(o_ref.dtype)


def _bce_sum(score, label):
    # numerically-stable BCEWithLogits summed over the tile (score is (TM, 1))
    return jnp.sum(jnp.maximum(score, 0.0) - score * label
                   + jnp.log1p(jnp.exp(-jnp.abs(score))))


def _partial_block(values):
    # Pack a short list of scalar partials into an (8, 128) block: row 0, lanes 0..len-1.
    row = jax.lax.broadcasted_iota(jnp.int32, (8, 128), 0)
    lane = jax.lax.broadcasted_iota(jnp.int32, (8, 128), 1)
    out = jnp.zeros((8, 128), jnp.float32)
    for j, v in enumerate(values):
        out = out + jnp.where((row == 0) & (lane == j), v, 0.0)
    return out


def _disc_kernel(pos_ref, neg_ref, ge_ref, feat_ref, w_ref, o_ref, *, inv_n):
    # All four discriminator losses per row tile; c @ W_disc is computed once per
    # summary (bf16 MXU) and reused for the pos/neg labels.  Per-tile partial losses
    # are written to an independent (1, 8, 128) block -> grid axis is "parallel".
    w = w_ref[...]
    gw = jnp.dot(ge_ref[...], w, preferred_element_type=jnp.float32)
    fw = jnp.dot(feat_ref[...], w, preferred_element_type=jnp.float32)
    pos = pos_ref[...]
    neg = neg_ref[...]

    s_pj = jnp.sum(pos * gw, axis=1, keepdims=True)   # (TM, 1)
    s_nj = jnp.sum(neg * gw, axis=1, keepdims=True)
    s_pi = jnp.sum(pos * fw, axis=1, keepdims=True)
    s_ni = jnp.sum(neg * fw, axis=1, keepdims=True)

    o_ref[0] = _partial_block([
        _bce_sum(s_pj, 1.0) * inv_n,
        _bce_sum(s_nj, 0.0) * inv_n,
        _bce_sum(s_pi, 1.0) * inv_n,
        _bce_sum(s_ni, 0.0) * inv_n,
    ])


def _edge_recon_kernel(pu_ref, pv_ref, mask_ref, o_ref, *, inv_n):
    # MSE( sigmoid(<pos_u, pos_v>), 1, reduction='sum') / N over valid (unpadded) edges.
    s = jax.nn.sigmoid(jnp.sum(pu_ref[...] * pv_ref[...], axis=1, keepdims=True))
    d = s - 1.0
    partial = jnp.sum(mask_ref[...] * d * d) * inv_n
    o_ref[0] = _partial_block([partial])


# ----------------------------------------------------------------------------- wrappers

def xw_matmul(x_bf, w_bf):
    n, d = x_bf.shape
    h = w_bf.shape[1]
    tm = _pick_tile(n)
    return pl.pallas_call(
        _xw_kernel,
        out_shape=jax.ShapeDtypeStruct((n, h), jnp.bfloat16),
        grid=(n // tm,),
        in_specs=[
            pl.BlockSpec((tm, d), lambda i: (i, 0)),
            pl.BlockSpec((d, h), lambda i: (0, 0)),
        ],
        out_specs=pl.BlockSpec((tm, h), lambda i: (i, 0)),
        compiler_params=pltpu.CompilerParams(
            dimension_semantics=("parallel",),
            vmem_limit_bytes=_VMEM_LIMIT),
    )(x_bf, w_bf)


def fused_encoder(adj_bf, xw_cat_bf, b_cat):
    n = adj_bf.shape[0]
    h2 = xw_cat_bf.shape[1]
    h = h2 // 2
    tm = _pick_tile(n)
    tk = _pick_tile(n)
    # Hold XW_cat resident in VMEM when it fits (incl. double buffering);
    # otherwise stream (tk, 2H) blocks (the larger tk already cuts re-fetch 4x vs 128).
    resident = (2 * n * h2 * 2) <= _RESIDENT_LIMIT
    xw_spec = (pl.BlockSpec((n, h2), lambda i, k: (0, 0)) if resident
               else pl.BlockSpec((tk, h2), lambda i, k: (k, 0)))
    kernel = functools.partial(_encoder_kernel, h=h, tk=tk, resident=resident)
    return pl.pallas_call(
        kernel,
        out_shape=(jax.ShapeDtypeStruct((n, h), jnp.float32),
                   jax.ShapeDtypeStruct((n, h), jnp.float32)),
        grid=(n // tm, n // tk),
        in_specs=[
            pl.BlockSpec((tm, tk), lambda i, k: (i, k)),
            xw_spec,
            pl.BlockSpec((1, h2), lambda i, k: (0, 0)),
        ],
        out_specs=(pl.BlockSpec((tm, h), lambda i, k: (i, 0)),
                   pl.BlockSpec((tm, h), lambda i, k: (i, 0))),
        scratch_shapes=[pltpu.VMEM((tm, h2), jnp.float32)],
        compiler_params=pltpu.CompilerParams(
            dimension_semantics=("parallel", "arbitrary"),
            vmem_limit_bytes=_VMEM_LIMIT),
    )(adj_bf, xw_cat_bf, b_cat.astype(jnp.float32))


def graph_embed(sub_adj_bf, feat_bf, inv_norm):
    n, d = feat_bf.shape
    tm = _pick_tile(n)
    tk = _pick_tile(n)
    resident = (2 * n * d * 2) <= _RESIDENT_LIMIT
    x_spec = (pl.BlockSpec((n, d), lambda i, k: (0, 0)) if resident
              else pl.BlockSpec((tk, d), lambda i, k: (k, 0)))
    kernel = functools.partial(_graph_embed_kernel, tk=tk, resident=resident)
    return pl.pallas_call(
        kernel,
        out_shape=jax.ShapeDtypeStruct((n, d), jnp.bfloat16),
        grid=(n // tm, n // tk),
        in_specs=[
            pl.BlockSpec((tm, tk), lambda i, k: (i, k)),
            x_spec,
            pl.BlockSpec((tm, 1), lambda i, k: (i, 0)),
        ],
        out_specs=pl.BlockSpec((tm, d), lambda i, k: (i, 0)),
        scratch_shapes=[pltpu.VMEM((tm, d), jnp.float32)],
        compiler_params=pltpu.CompilerParams(
            dimension_semantics=("parallel", "arbitrary"),
            vmem_limit_bytes=_VMEM_LIMIT),
    )(sub_adj_bf, feat_bf, inv_norm.astype(jnp.float32))


def fused_discriminator(pos, neg, ge_bf, feat_bf, w_disc_bf):
    n, h = pos.shape
    tm = _pick_tile(n)
    t = n // tm
    kernel = functools.partial(_disc_kernel, inv_n=1.0 / n)
    partials = pl.pallas_call(
        kernel,
        out_shape=jax.ShapeDtypeStruct((t, 8, 128), jnp.float32),
        grid=(t,),
        in_specs=[
            pl.BlockSpec((tm, h), lambda i: (i, 0)),
            pl.BlockSpec((tm, h), lambda i: (i, 0)),
            pl.BlockSpec((tm, h), lambda i: (i, 0)),
            pl.BlockSpec((tm, h), lambda i: (i, 0)),
            pl.BlockSpec((h, h), lambda i: (0, 0)),
        ],
        out_specs=pl.BlockSpec((1, 8, 128), lambda i: (i, 0, 0)),
        compiler_params=pltpu.CompilerParams(
            dimension_semantics=("parallel",),
            vmem_limit_bytes=_VMEM_LIMIT),
    )(pos, neg, ge_bf, feat_bf, w_disc_bf)
    return jnp.sum(partials, axis=0)[0, :4]


def edge_recon(pu, pv, mask, n_nodes):
    e, h = pu.shape
    te = _pick_tile(e, pref=_PREF_EDGE_TILE)
    t = e // te
    kernel = functools.partial(_edge_recon_kernel, inv_n=1.0 / n_nodes)
    partials = pl.pallas_call(
        kernel,
        out_shape=jax.ShapeDtypeStruct((t, 8, 128), jnp.float32),
        grid=(t,),
        in_specs=[
            pl.BlockSpec((te, h), lambda i: (i, 0)),
            pl.BlockSpec((te, h), lambda i: (i, 0)),
            pl.BlockSpec((te, 1), lambda i: (i, 0)),
        ],
        out_specs=pl.BlockSpec((1, 8, 128), lambda i: (i, 0, 0)),
        compiler_params=pltpu.CompilerParams(
            dimension_semantics=("parallel",),
            vmem_limit_bytes=_VMEM_LIMIT),
    )(pu, pv, mask)
    return jnp.sum(partials)


# ----------------------------------------------------------------------------- forward

@jax.jit
def informax_forward(params, features, adj_hat_bf, sub_adj_bf, sub_norm, edges, edge_mask, perm):
    w_enc, b_enc, w_disc = params
    n = features.shape[0]

    # cast small operands to bf16 ONCE and share across kernels (adjacencies are
    # already bf16 -- pre-cast outside this function, so the astype is a no-op).
    feat_bf = features.astype(jnp.bfloat16)
    w_enc_bf = w_enc.astype(jnp.bfloat16)
    w_disc_bf = w_disc.astype(jnp.bfloat16)
    adj_hat_bf = adj_hat_bf.astype(jnp.bfloat16)
    sub_adj_bf = sub_adj_bf.astype(jnp.bfloat16)

    # Shared X @ W_enc (positive/negative reuse it via (P X) W = P (X W)); bf16 out.
    xw = xw_matmul(feat_bf, w_enc_bf)                                      # (N, H) bf16
    # TODO(synk): corruption row-permutation is a data-dependent gather; it stays
    # in plain JAX (could move in-kernel with PrefetchScalarGridSpec + pl.Element).
    xw_cat = jnp.concatenate([xw, jnp.take(xw, perm, axis=0)], axis=-1)    # (N, 2H) bf16
    b_cat = jnp.concatenate([b_enc, b_enc], axis=-1)                       # (1, 2H)

    positive, negative = fused_encoder(adj_hat_bf, xw_cat, b_cat)          # (N, H) f32 each

    inv_norm = 1.0 / sub_norm                                              # (N, 1) f32
    graph_embeds = graph_embed(sub_adj_bf, feat_bf, inv_norm)              # (N, D) bf16

    losses = fused_discriminator(positive, negative, graph_embeds, feat_bf, w_disc_bf)

    # TODO(synk): edge-list row gather (data-dependent) stays in plain JAX; could be
    # moved in-kernel with scalar-prefetched edge indices + a resident `positive`.
    pu = jnp.take(positive, edges[:, 0], axis=0)
    pv = jnp.take(positive, edges[:, 1], axis=0)
    adj_rebuilt = edge_recon(pu, pv, edge_mask, n)

    return (losses[0], losses[1], losses[2], losses[3], adj_rebuilt)


# ----------------------------------------------------------------------------- main

if __name__ == "__main__":
    # n_in == n_h required by discriminator(positive, features); 128 keeps every
    # tensor lane-dense on the 128-lane vregs (unmasked stores, full MXU columns).
    N, n_in, n_h = 256, 128, 128

    key = jax.random.PRNGKey(0)
    k_feat, k_adj, k_w, k_d, k_perm = jax.random.split(key, 5)

    features = jax.random.normal(k_feat, (N, n_in), jnp.float32)

    # deterministic random undirected graph, no self loops
    upper = jax.random.bernoulli(k_adj, 0.05, (N, N))
    a = jnp.triu(upper, k=1)
    a = (a | a.T).astype(jnp.float32)

    # GCN-normalized adjacency for the encoder: D^{-1/2} (A + I) D^{-1/2}
    a_self = a + jnp.eye(N, dtype=jnp.float32)
    dinv = 1.0 / jnp.sqrt(jnp.sum(a_self, axis=1))
    adj_hat = a_self * dinv[:, None] * dinv[None, :]

    # subgraph adjacency (dense stand-in for the sparse tensor) and its row norm
    sub_adj = a_self
    sub_norm = jnp.sum(sub_adj, axis=1, keepdims=True)                 # (N, 1) f32

    # pre-cast both N x N adjacency streams to bf16 ONCE (stored bf16), so the
    # HBM-bound matmul kernels never pay a per-call conversion pass.
    adj_hat_bf = adj_hat.astype(jnp.bfloat16)
    sub_adj_bf = sub_adj.astype(jnp.bfloat16)

    # graph_adj_data: (E, 2) edge list, padded to a multiple of the edge tile so the
    # edge-recon kernel sees static, sublane-aligned tiles; padded rows masked out.
    u, v = jnp.nonzero(a)                                              # eager: concrete E
    edges = jnp.stack([u, v], axis=1).astype(jnp.int32)
    e = int(edges.shape[0])
    e_pad = max(_PREF_EDGE_TILE, ((e + _PREF_EDGE_TILE - 1) // _PREF_EDGE_TILE) * _PREF_EDGE_TILE)
    edges = jnp.pad(edges, ((0, e_pad - e), (0, 0)))
    edge_mask = (jnp.arange(e_pad) < e).astype(jnp.float32)[:, None]   # (E_pad, 1)

    # deterministic parameter init
    w_enc = jax.random.normal(k_w, (n_in, n_h), jnp.float32) * (1.0 / jnp.sqrt(n_in))
    b_enc = jnp.zeros((1, n_h), jnp.float32)
    bound = 1.0 / jnp.sqrt(n_h)
    w_disc = jax.random.uniform(k_d, (n_h, n_h), jnp.float32, -bound, bound)

    # fixed "corruption" permutation (stand-in for torch.randperm drawn per call)
    perm = jax.random.permutation(k_perm, N)

    outs = informax_forward((w_enc, b_enc, w_disc), features, adj_hat_bf,
                            sub_adj_bf, sub_norm, edges, edge_mask, perm)
    outs = jax.block_until_ready(outs)
    assert all(bool(jnp.isfinite(o)) for o in outs)
    print("KERNEL_OK")
</pallas_src>

<mosaic_0001>
module attributes {stable_mosaic.version = 11 : i64} {
  func.func @_xw_kernel(%arg0: i32, %arg1: memref<256x128xbf16, #tpu.memory_space<vmem>>, %arg2: memref<128x128xbf16, #tpu.memory_space<vmem>>, %arg3: memref<256x128xbf16, #tpu.memory_space<vmem>>) attributes {dimension_semantics = [#tpu.dimension_semantics<parallel>], iteration_bounds = array<i64: 1>, scalar_prefetch = 0 : i64, scratch_operands = 0 : i64, tpu.core_type = #tpu.core_type<tc>, window_params = [{transform_indices = @transform_0, window_bounds = array<i64: 256, 128>}, {pipeline_mode = #tpu.pipeline_mode<synchronous>, transform_indices = @transform_1, window_bounds = array<i64: 128, 128>}, {transform_indices = @transform_2, window_bounds = array<i64: 256, 128>}]} {
    %c0 = arith.constant 0 : index
    %c0_0 = arith.constant 0 : index
    %0 = vector.load %arg1[%c0, %c0_0] : memref<256x128xbf16, #tpu.memory_space<vmem>>, vector<256x128xbf16>
    %c0_1 = arith.constant 0 : index
    %c0_2 = arith.constant 0 : index
    %1 = vector.load %arg2[%c0_1, %c0_2] : memref<128x128xbf16, #tpu.memory_space<vmem>>, vector<128x128xbf16>
    %cst = arith.constant dense<0.000000e+00> : vector<256x128xf32>
    %2 = tpu.matmul %0, %1, %cst {dimension_numbers = #tpu.dot_dimension_numbers<[1], [0], [0], [1], [0, 0, 1, 1], [], []>} : vector<256x128xbf16>, vector<128x128xbf16>, vector<256x128xf32> -> vector<256x128xf32>
    %3 = arith.truncf %2 : vector<256x128xf32> to vector<256x128xbf16>
    %c0_3 = arith.constant 0 : index
    %c0_4 = arith.constant 0 : index
    %4 = vector.load %arg3[%c0_3, %c0_4] : memref<256x128xbf16, #tpu.memory_space<vmem>>, vector<256x128xbf16>
    tpu.vector_store %arg3[%c0_3, %c0_4], %3 {strides = array<i32>} : memref<256x128xbf16, #tpu.memory_space<vmem>>, vector<256x128xbf16>,
    return
  }
  func.func @transform_0(%arg0: i32) -> (i32, i32) {
    %c0_i32 = arith.constant 0 : i32
    %c0_i32_0 = arith.constant 0 : i32
    return %arg0, %c0_i32 : i32, i32
  }
  func.func @transform_1(%arg0: i32) -> (i32, i32) {
    %c0_i32 = arith.constant 0 : i32
    %c0_i32_0 = arith.constant 0 : i32
    %c0_i32_1 = arith.constant 0 : i32
    return %c0_i32, %c0_i32_0 : i32, i32
  }
  func.func @transform_2(%arg0: i32) -> (i32, i32) {
    %c0_i32 = arith.constant 0 : i32
    %c0_i32_0 = arith.constant 0 : i32
    return %arg0, %c0_i32 : i32, i32
  }
}

module attributes {stable_mosaic.version = 11 : i64} {
  func.func @_encoder_kernel(%arg0: i32, %arg1: i32, %arg2: memref<256x256xbf16, #tpu.memory_space<vmem>>, %arg3: memref<256x256xbf16, #tpu.memory_space<vmem>>, %arg4: memref<1x256xf32, #tpu.memory_space<vmem>>, %arg5: memref<256x128xf32, #tpu.memory_space<vmem>>, %arg6: memref<256x128xf32, #tpu.memory_space<vmem>>, %arg7: memref<256x256xf32, #tpu.memory_space<vmem>>) attributes {dimension_semantics = [#tpu.dimension_semantics<parallel>, #tpu.dimension_semantics<arbitrary>], iteration_bounds = array<i64: 1, 1>, scalar_prefetch = 0 : i64, scratch_operands = 1 : i64, tpu.core_type = #tpu.core_type<tc>, window_params = [{transform_indices = @transform_0, window_bounds = array<i64: 256, 256>}, {pipeline_mode = #tpu.pipeline_mode<synchronous>, transform_indices = @transform_1, window_bounds = array<i64: 256, 256>}, {pipeline_mode = #tpu.pipeline_mode<synchronous>, transform_indices = @transform_2, window_bounds = array<i64: 1, 256>}, {transform_indices = @transform_3, window_bounds = array<i64: 256, 128>}, {transform_indices = @transform_4, window_bounds = array<i64: 256, 128>}]} {
    %c0_i32 = arith.constant 0 : i32
    %0 = arith.cmpi eq, %arg1, %c0_i32 : i32
    %1 = arith.extui %0 : i1 to i32
    %c0_i32_0 = arith.constant 0 : i32
    %2 = arith.cmpi ne, %1, %c0_i32_0 : i32
    scf.if %2 {
      %cst_9 = arith.constant 0.000000e+00 : f32
      %15 = vector.broadcast %cst_9 : f32 to vector<256x256xf32>
      %c0_10 = arith.constant 0 : index
      %c0_11 = arith.constant 0 : index
      %16 = vector.load %arg7[%c0_10, %c0_11] : memref<256x256xf32, #tpu.memory_space<vmem>>, vector<256x256xf32>
      tpu.vector_store %arg7[%c0_10, %c0_11], %15 {strides = array<i32>} : memref<256x256xf32, #tpu.memory_space<vmem>>, vector<256x256xf32>,
    } else {
    }
    %c256_i32 = arith.constant 256 : i32
    %3 = arith.muli %arg1, %c256_i32 : i32
    %4 = tpu.assume_multiple %3, 256 : i32
    %5 = arith.index_cast %4 : i32 to index
    %c0 = arith.constant 0 : index
    %6 = vector.load %arg3[%5, %c0] : memref<256x256xbf16, #tpu.memory_space<vmem>>, vector<256x256xbf16>
    %c0_1 = arith.constant 0 : index
    %c0_2 = arith.constant 0 : index
    %7 = vector.load %arg7[%c0_1, %c0_2] : memref<256x256xf32, #tpu.memory_space<vmem>>, vector<256x256xf32>
    %c0_3 = arith.constant 0 : index
    %c0_4 = arith.constant 0 : index
    %8 = vector.load %arg2[%c0_3, %c0_4] : memref<256x256xbf16, #tpu.memory_space<vmem>>, vector<256x256xbf16>
    %cst = arith.constant dense<0.000000e+00> : vector<256x256xf32>
    %9 = tpu.matmul %8, %6, %cst {dimension_numbers = #tpu.dot_dimension_numbers<[1], [0], [0], [1], [0, 0, 1, 1], [], []>} : vector<256x256xbf16>, vector<256x256xbf16>, vector<256x256xf32> -> vector<256x256xf32>
    %10 = arith.addf %7, %9 : vector<256x256xf32>
    %c0_5 = arith.constant 0 : index
    %c0_6 = arith.constant 0 : index
    %11 = vector.load %arg7[%c0_5, %c0_6] : memref<256x256xf32, #tpu.memory_space<vmem>>, vector<256x256xf32>
    tpu.vector_store %arg7[%c0_5, %c0_6], %10 {strides = array<i32>} : memref<256x256xf32, #tpu.memory_space<vmem>>, vector<256x256xf32>,
    %c0_i32_7 = arith.constant 0 : i32
    %12 = arith.cmpi eq, %arg1, %c0_i32_7 : i32
    %13 = arith.extui %12 : i1 to i32
    %c0_i32_8 = arith.constant 0 : i32
    %14 = arith.cmpi ne, %13, %c0_i32_8 : i32
    scf.if %14 {
      %c0_9 = arith.constant 0 : index
      %c0_10 = arith.constant 0 : index
      %15 = vector.load %arg7[%c0_9, %c0_10] : memref<256x256xf32, #tpu.memory_space<vmem>>, vector<256x256xf32>
      %c0_11 = arith.constant 0 : index
      %c0_12 = arith.constant 0 : index
      %16 = vector.load %arg4[%c0_11, %c0_12] : memref<1x256xf32, #tpu.memory_space<vmem>>, vector<1x256xf32>
      %17 = vector.broadcast %16 : vector<1x256xf32> to vector<256x256xf32>
      %18 = arith.addf %15, %17 : vector<256x256xf32>
      %cst_13 = arith.constant 0.000000e+00 : f32
      %19 = vector.broadcast %cst_13 : f32 to vector<256x256xf32>
      %20 = arith.maximumf %18, %19 : vector<256x256xf32>
      %21 = vector.extract_strided_slice %20 {offsets = [0, 0], sizes = [256, 128], strides = [1, 1]} : vector<256x256xf32> to vector<256x128xf32>
      %c0_14 = arith.constant 0 : index
      %c0_15 = arith.constant 0 : index
      %22 = vector.load %arg5[%c0_14, %c0_15] : memref<256x128xf32, #tpu.memory_space<vmem>>, vector<256x128xf32>
      tpu.vector_store %arg5[%c0_14, %c0_15], %21 {strides = array<i32>} : memref<256x128xf32, #tpu.memory_space<vmem>>, vector<256x128xf32>,
      %23 = vector.extract_strided_slice %20 {offsets = [0, 128], sizes = [256, 128], strides = [1, 1]} : vector<256x256xf32> to vector<256x128xf32>
      %c0_16 = arith.constant 0 : index
      %c0_17 = arith.constant 0 : index
      %24 = vector.load %arg6[%c0_16, %c0_17] : memref<256x128xf32, #tpu.memory_space<vmem>>, vector<256x128xf32>
      tpu.vector_store %arg6[%c0_16, %c0_17], %23 {strides = array<i32>} : memref<256x128xf32, #tpu.memory_space<vmem>>, vector<256x128xf32>,
    } else {
    }
    return
  }
  func.func @transform_0(%arg0: i32, %arg1: i32) -> (i32, i32) {
    %c0_i32 = arith.constant 0 : i32
    return %arg0, %arg1 : i32, i32
  }
  func.func @transform_1(%arg0: i32, %arg1: i32) -> (i32, i32) {
    %c0_i32 = arith.constant 0 : i32
    %c0_i32_0 = arith.constant 0 : i32
    %c0_i32_1 = arith.constant 0 : i32
    return %c0_i32, %c0_i32_0 : i32, i32
  }
  func.func @transform_2(%arg0: i32, %arg1: i32) -> (i32, i32) {
    %c0_i32 = arith.constant 0 : i32
    %c0_i32_0 = arith.constant 0 : i32
    %c0_i32_1 = arith.constant 0 : i32
    return %c0_i32, %c0_i32_0 : i32, i32
  }
  func.func @transform_3(%arg0: i32, %arg1: i32) -> (i32, i32) {
    %c0_i32 = arith.constant 0 : i32
    %c0_i32_0 = arith.constant 0 : i32
    return %arg0, %c0_i32 : i32, i32
  }
  func.func @transform_4(%arg0: i32, %arg1: i32) -> (i32, i32) {
    %c0_i32 = arith.constant 0 : i32
    %c0_i32_0 = arith.constant 0 : i32
    return %arg0, %c0_i32 : i32, i32
  }
}

module attributes {stable_mosaic.version = 11 : i64} {
  func.func @_graph_embed_kernel(%arg0: i32, %arg1: i32, %arg2: memref<256x256xbf16, #tpu.memory_space<vmem>>, %arg3: memref<256x128xbf16, #tpu.memory_space<vmem>>, %arg4: memref<256x1xf32, #tpu.memory_space<vmem>>, %arg5: memref<256x128xbf16, #tpu.memory_space<vmem>>, %arg6: memref<256x128xf32, #tpu.memory_space<vmem>>) attributes {dimension_semantics = [#tpu.dimension_semantics<parallel>, #tpu.dimension_semantics<arbitrary>], iteration_bounds = array<i64: 1, 1>, scalar_prefetch = 0 : i64, scratch_operands = 1 : i64, tpu.core_type = #tpu.core_type<tc>, window_params = [{transform_indices = @transform_0, window_bounds = array<i64: 256, 256>}, {pipeline_mode = #tpu.pipeline_mode<synchronous>, transform_indices = @transform_1, window_bounds = array<i64: 256, 128>}, {transform_indices = @transform_2, window_bounds = array<i64: 256, 1>}, {transform_indices = @transform_3, window_bounds = array<i64: 256, 128>}]} {
    %c0_i32 = arith.constant 0 : i32
    %0 = arith.cmpi eq, %arg1, %c0_i32 : i32
    %1 = arith.extui %0 : i1 to i32
    %c0_i32_0 = arith.constant 0 : i32
    %2 = arith.cmpi ne, %1, %c0_i32_0 : i32
    scf.if %2 {
      %cst_9 = arith.constant 0.000000e+00 : f32
      %15 = vector.broadcast %cst_9 : f32 to vector<256x128xf32>
      %c0_10 = arith.constant 0 : index
      %c0_11 = arith.constant 0 : index
      %16 = vector.load %arg6[%c0_10, %c0_11] : memref<256x128xf32, #tpu.memory_space<vmem>>, vector<256x128xf32>
      tpu.vector_store %arg6[%c0_10, %c0_11], %15 {strides = array<i32>} : memref<256x128xf32, #tpu.memory_space<vmem>>, vector<256x128xf32>,
    } else {
    }
    %c256_i32 = arith.constant 256 : i32
    %3 = arith.muli %arg1, %c256_i32 : i32
    %4 = tpu.assume_multiple %3, 256 : i32
    %5 = arith.index_cast %4 : i32 to index
    %c0 = arith.constant 0 : index
    %6 = vector.load %arg3[%5, %c0] : memref<256x128xbf16, #tpu.memory_space<vmem>>, vector<256x128xbf16>
    %c0_1 = arith.constant 0 : index
    %c0_2 = arith.constant 0 : index
    %7 = vector.load %arg6[%c0_1, %c0_2] : memref<256x128xf32, #tpu.memory_space<vmem>>, vector<256x128xf32>
    %c0_3 = arith.constant 0 : index
    %c0_4 = arith.constant 0 : index
    %8 = vector.load %arg2[%c0_3, %c0_4] : memref<256x256xbf16, #tpu.memory_space<vmem>>, vector<256x256xbf16>
    %cst = arith.constant dense<0.000000e+00> : vector<256x128xf32>
    %9 = tpu.matmul %8, %6, %cst {dimension_numbers = #tpu.dot_dimension_numbers<[1], [0], [0], [1], [0, 0, 1, 1], [], []>} : vector<256x256xbf16>, vector<256x128xbf16>, vector<256x128xf32> -> vector<256x128xf32>
    %10 = arith.addf %7, %9 : vector<256x128xf32>
    %c0_5 = arith.constant 0 : index
    %c0_6 = arith.constant 0 : index
    %11 = vector.load %arg6[%c0_5, %c0_6] : memref<256x128xf32, #tpu.memory_space<vmem>>, vector<256x128xf32>
    tpu.vector_store %arg6[%c0_5, %c0_6], %10 {strides = array<i32>} : memref<256x128xf32, #tpu.memory_space<vmem>>, vector<256x128xf32>,
    %c0_i32_7 = arith.constant 0 : i32
    %12 = arith.cmpi eq, %arg1, %c0_i32_7 : i32
    %13 = arith.extui %12 : i1 to i32
    %c0_i32_8 = arith.constant 0 : i32
    %14 = arith.cmpi ne, %13, %c0_i32_8 : i32
    scf.if %14 {
      %c0_9 = arith.constant 0 : index
      %c0_10 = arith.constant 0 : index
      %15 = vector.load %arg6[%c0_9, %c0_10] : memref<256x128xf32, #tpu.memory_space<vmem>>, vector<256x128xf32>
      %c0_11 = arith.constant 0 : index
      %c0_12 = arith.constant 0 : index
      %16 = vector.load %arg4[%c0_11, %c0_12] : memref<256x1xf32, #tpu.memory_space<vmem>>, vector<256x1xf32>
      %17 = vector.broadcast %16 : vector<256x1xf32> to vector<256x128xf32>
      %18 = arith.mulf %15, %17 : vector<256x128xf32>
      %19 = arith.negf %18 : vector<256x128xf32>
      %20 = math.exp %19 : vector<256x128xf32>
      %cst_13 = arith.constant 1.000000e+00 : f32
      %21 = vector.broadcast %cst_13 : f32 to vector<256x128xf32>
      %22 = arith.addf %21, %20 : vector<256x128xf32>
      %23 = arith.divf %21, %22 : vector<256x128xf32>
      %24 = arith.truncf %23 : vector<256x128xf32> to vector<256x128xbf16>
      %c0_14 = arith.constant 0 : index
      %c0_15 = arith.constant 0 : index
      %25 = vector.load %arg5[%c0_14, %c0_15] : memref<256x128xbf16, #tpu.memory_space<vmem>>, vector<256x128xbf16>
      tpu.vector_store %arg5[%c0_14, %c0_15], %24 {strides = array<i32>} : memref<256x128xbf16, #tpu.memory_space<vmem>>, vector<256x128xbf16>,
    } else {
    }
    return
  }
  func.func @transform_0(%arg0: i32, %arg1: i32) -> (i32, i32) {
    %c0_i32 = arith.constant 0 : i32
    return %arg0, %arg1 : i32, i32
  }
  func.func @transform_1(%arg0: i32, %arg1: i32) -> (i32, i32) {
    %c0_i32 = arith.constant 0 : i32
    %c0_i32_0 = arith.constant 0 : i32
    %c0_i32_1 = arith.constant 0 : i32
    return %c0_i32, %c0_i32_0 : i32, i32
  }
  func.func @transform_2(%arg0: i32, %arg1: i32) -> (i32, i32) {
    %c0_i32 = arith.constant 0 : i32
    %c0_i32_0 = arith.constant 0 : i32
    return %arg0, %c0_i32 : i32, i32
  }
  func.func @transform_3(%arg0: i32, %arg1: i32) -> (i32, i32) {
    %c0_i32 = arith.constant 0 : i32
    %c0_i32_0 = arith.constant 0 : i32
    return %arg0, %c0_i32 : i32, i32
  }
}

module attributes {stable_mosaic.version = 11 : i64} {
  func.func @_disc_kernel(%arg0: i32, %arg1: memref<256x128xf32, #tpu.memory_space<vmem>>, %arg2: memref<256x128xf32, #tpu.memory_space<vmem>>, %arg3: memref<256x128xbf16, #tpu.memory_space<vmem>>, %arg4: memref<256x128xbf16, #tpu.memory_space<vmem>>, %arg5: memref<128x128xbf16, #tpu.memory_space<vmem>>, %arg6: memref<1x8x128xf32, #tpu.memory_space<vmem>>) attributes {dimension_semantics = [#tpu.dimension_semantics<parallel>], iteration_bounds = array<i64: 1>, scalar_prefetch = 0 : i64, scratch_operands = 0 : i64, tpu.core_type = #tpu.core_type<tc>, window_params = [{transform_indices = @transform_0, window_bounds = array<i64: 256, 128>}, {transform_indices = @transform_1, window_bounds = array<i64: 256, 128>}, {transform_indices = @transform_2, window_bounds = array<i64: 256, 128>}, {transform_indices = @transform_3, window_bounds = array<i64: 256, 128>}, {pipeline_mode = #tpu.pipeline_mode<synchronous>, transform_indices = @transform_4, window_bounds = array<i64: 128, 128>}, {transform_indices = @transform_5, window_bounds = array<i64: 1, 8, 128>}]} {
    %c0 = arith.constant 0 : index
    %c0_0 = arith.constant 0 : index
    %0 = vector.load %arg5[%c0, %c0_0] : memref<128x128xbf16, #tpu.memory_space<vmem>>, vector<128x128xbf16>
    %c0_1 = arith.constant 0 : index
    %c0_2 = arith.constant 0 : index
    %1 = vector.load %arg3[%c0_1, %c0_2] : memref<256x128xbf16, #tpu.memory_space<vmem>>, vector<256x128xbf16>
    %cst = arith.constant dense<0.000000e+00> : vector<256x128xf32>
    %2 = tpu.matmul %1, %0, %cst {dimension_numbers = #tpu.dot_dimension_numbers<[1], [0], [0], [1], [0, 0, 1, 1], [], []>} : vector<256x128xbf16>, vector<128x128xbf16>, vector<256x128xf32> -> vector<256x128xf32>
    %c0_3 = arith.constant 0 : index
    %c0_4 = arith.constant 0 : index
    %3 = vector.load %arg4[%c0_3, %c0_4] : memref<256x128xbf16, #tpu.memory_space<vmem>>, vector<256x128xbf16>
    %cst_5 = arith.constant dense<0.000000e+00> : vector<256x128xf32>
    %4 = tpu.matmul %3, %0, %cst_5 {dimension_numbers = #tpu.dot_dimension_numbers<[1], [0], [0], [1], [0, 0, 1, 1], [], []>} : vector<256x128xbf16>, vector<128x128xbf16>, vector<256x128xf32> -> vector<256x128xf32>
    %c0_6 = arith.constant 0 : index
    %c0_7 = arith.constant 0 : index
    %5 = vector.load %arg1[%c0_6, %c0_7] : memref<256x128xf32, #tpu.memory_space<vmem>>, vector<256x128xf32>
    %c0_8 = arith.constant 0 : index
    %c0_9 = arith.constant 0 : index
    %6 = vector.load %arg2[%c0_8, %c0_9] : memref<256x128xf32, #tpu.memory_space<vmem>>, vector<256x128xf32>
    %7 = arith.mulf %5, %2 : vector<256x128xf32>
    %cst_10 = arith.constant dense<0.000000e+00> : vector<256xf32>
    %8 = vector.multi_reduction <add>, %7, %cst_10 [1] : vector<256x128xf32> to vector<256xf32>
    %9 = vector.shape_cast %8 : vector<256xf32> to vector<256x1xf32>
    %10 = arith.mulf %6, %2 : vector<256x128xf32>
    %cst_11 = arith.constant dense<0.000000e+00> : vector<256xf32>
    %11 = vector.multi_reduction <add>, %10, %cst_11 [1] : vector<256x128xf32> to vector<256xf32>
    %12 = vector.shape_cast %11 : vector<256xf32> to vector<256x1xf32>
    %13 = arith.mulf %5, %4 : vector<256x128xf32>
    %cst_12 = arith.constant dense<0.000000e+00> : vector<256xf32>
    %14 = vector.multi_reduction <add>, %13, %cst_12 [1] : vector<256x128xf32> to vector<256xf32>
    %15 = vector.shape_cast %14 : vector<256xf32> to vector<256x1xf32>
    %16 = arith.mulf %6, %4 : vector<256x128xf32>
    %cst_13 = arith.constant dense<0.000000e+00> : vector<256xf32>
    %17 = vector.multi_reduction <add>, %16, %cst_13 [1] : vector<256x128xf32> to vector<256xf32>
    %18 = vector.shape_cast %17 : vector<256xf32> to vector<256x1xf32>
    %cst_14 = arith.constant 0.000000e+00 : f32
    %19 = vector.broadcast %cst_14 : f32 to vector<256x1xf32>
    %20 = arith.maximumf %9, %19 : vector<256x1xf32>
    %cst_15 = arith.constant 1.000000e+00 : f32
    %21 = vector.broadcast %cst_15 : f32 to vector<256x1xf32>
    %22 = arith.mulf %9, %21 : vector<256x1xf32>
    %23 = arith.subf %20, %22 : vector<256x1xf32>
    %24 = math.absf %9 : vector<256x1xf32>
    %cst_16 = arith.constant 0.000000e+00 : f32
    %25 = vector.broadcast %cst_16 : f32 to vector<256x1xf32>
    %26 = arith.subf %25, %24 : vector<256x1xf32>
    %27 = math.exp %26 : vector<256x1xf32>
    %28 = math.log1p %27 : vector<256x1xf32>
    %29 = arith.addf %23, %28 : vector<256x1xf32>
    %30 = vector.shape_cast %29 : vector<256x1xf32> to vector<1x256x1xf32>
    %cst_17 = arith.constant dense<0.000000e+00> : vector<1xf32>
    %31 = vector.multi_reduction <add>, %30, %cst_17 [1, 2] : vector<1x256x1xf32> to vector<1xf32>
    %32 = vector.shape_cast %31 : vector<1xf32> to vector<1x1x1xf32>
    %33 = vector.extract %32[0, 0, 0] : f32 from vector<1x1x1xf32>
    %cst_18 = arith.constant 3.906250e-03 : f32
    %34 = arith.mulf %33, %cst_18 : f32
    %cst_19 = arith.constant 0.000000e+00 : f32
    %35 = vector.broadcast %cst_19 : f32 to vector<256x1xf32>
    %36 = arith.maximumf %12, %35 : vector<256x1xf32>
    %cst_20 = arith.constant 0.000000e+00 : f32
    %37 = vector.broadcast %cst_20 : f32 to vector<256x1xf32>
    %38 = arith.mulf %12, %37 : vector<256x1xf32>
    %39 = arith.subf %36, %38 : vector<256x1xf32>
    %40 = math.absf %12 : vector<256x1xf32>
    %cst_21 = arith.constant 0.000000e+00 : f32
    %41 = vector.broadcast %cst_21 : f32 to vector<256x1xf32>
    %42 = arith.subf %41, %40 : vector<256x1xf32>
    %43 = math.exp %42 : vector<256x1xf32>
    %44 = math.log1p %43 : vector<256x1xf32>
    %45 = arith.addf %39, %44 : vector<256x1xf32>
    %46 = vector.shape_cast %45 : vector<256x1xf32> to vector<1x256x1xf32>
    %cst_22 = arith.constant dense<0.000000e+00> : vector<1xf32>
    %47 = vector.multi_reduction <add>, %46, %cst_22 [1, 2] : vector<1x256x1xf32> to vector<1xf32>
    %48 = vector.shape_cast %47 : vector<1xf32> to vector<1x1x1xf32>
    %49 = vector.extract %48[0, 0, 0] : f32 from vector<1x1x1xf32>
    %cst_23 = arith.constant 3.906250e-03 : f32
    %50 = arith.mulf %49, %cst_23 : f32
    %cst_24 = arith.constant 0.000000e+00 : f32
    %51 = vector.broadcast %cst_24 : f32 to vector<256x1xf32>
    %52 = arith.maximumf %15, %51 : vector<256x1xf32>
    %cst_25 = arith.constant 1.000000e+00 : f32
    %53 = vector.broadcast %cst_25 : f32 to vector<256x1xf32>
    %54 = arith.mulf %15, %53 : vector<256x1xf32>
    %55 = arith.subf %52, %54 : vector<256x1xf32>
    %56 = math.absf %15 : vector<256x1xf32>
    %cst_26 = arith.constant 0.000000e+00 : f32
    %57 = vector.broadcast %cst_26 : f32 to vector<256x1xf32>
    %58 = arith.subf %57, %56 : vector<256x1xf32>
    %59 = math.exp %58 : vector<256x1xf32>
    %60 = math.log1p %59 : vector<256x1xf32>
    %61 = arith.addf %55, %60 : vector<256x1xf32>
    %62 = vector.shape_cast %61 : vector<256x1xf32> to vector<1x256x1xf32>
    %cst_27 = arith.constant dense<0.000000e+00> : vector<1xf32>
    %63 = vector.multi_reduction <add>, %62, %cst_27 [1, 2] : vector<1x256x1xf32> to vector<1xf32>
    %64 = vector.shape_cast %63 : vector<1xf32> to vector<1x1x1xf32>
    %65 = vector.extract %64[0, 0, 0] : f32 from vector<1x1x1xf32>
    %cst_28 = arith.constant 3.906250e-03 : f32
    %66 = arith.mulf %65, %cst_28 : f32
    %cst_29 = arith.constant 0.000000e+00 : f32
    %67 = vector.broadcast %cst_29 : f32 to vector<256x1xf32>
    %68 = arith.maximumf %18, %67 : vector<256x1xf32>
    %cst_30 = arith.constant 0.000000e+00 : f32
    %69 = vector.broadcast %cst_30 : f32 to vector<256x1xf32>
    %70 = arith.mulf %18, %69 : vector<256x1xf32>
    %71 = arith.subf %68, %70 : vector<256x1xf32>
    %72 = math.absf %18 : vector<256x1xf32>
    %cst_31 = arith.constant 0.000000e+00 : f32
    %73 = vector.broadcast %cst_31 : f32 to vector<256x1xf32>
    %74 = arith.subf %73, %72 : vector<256x1xf32>
    %75 = math.exp %74 : vector<256x1xf32>
    %76 = math.log1p %75 : vector<256x1xf32>
    %77 = arith.addf %71, %76 : vector<256x1xf32>
    %78 = vector.shape_cast %77 : vector<256x1xf32> to vector<1x256x1xf32>
    %cst_32 = arith.constant dense<0.000000e+00> : vector<1xf32>
    %79 = vector.multi_reduction <add>, %78, %cst_32 [1, 2] : vector<1x256x1xf32> to vector<1xf32>
    %80 = vector.shape_cast %79 : vector<1xf32> to vector<1x1x1xf32>
    %81 = vector.extract %80[0, 0, 0] : f32 from vector<1x1x1xf32>
    %cst_33 = arith.constant 3.906250e-03 : f32
    %82 = arith.mulf %81, %cst_33 : f32
    %83 = tpu.iota {dimensions = array<i32: 0>} : vector<8x128xi32>
    %84 = tpu.iota {dimensions = array<i32: 1>} : vector<8x128xi32>
    %cst_34 = arith.constant 0.000000e+00 : f32
    %85 = vector.broadcast %cst_34 : f32 to vector<8x128xf32>
    %c0_i32 = arith.constant 0 : i32
    %86 = vector.broadcast %c0_i32 : i32 to vector<8x128xi32>
    %87 = arith.cmpi eq, %83, %86 : vector<8x128xi32>
    %c0_i32_35 = arith.constant 0 : i32
    %88 = vector.broadcast %c0_i32_35 : i32 to vector<8x128xi32>
    %89 = arith.cmpi eq, %84, %88 : vector<8x128xi32>
    %90 = arith.andi %87, %89 : vector<8x128xi1>
    %cst_36 = arith.constant 0.000000e+00 : f32
    %91 = vector.broadcast %34 : f32 to vector<8x128xf32>
    %92 = vector.broadcast %cst_36 : f32 to vector<8x128xf32>
    %93 = arith.select %90, %91, %92 : vector<8x128xi1>, vector<8x128xf32>
    %94 = arith.addf %85, %93 : vector<8x128xf32>
    %c0_i32_37 = arith.constant 0 : i32
    %95 = vector.broadcast %c0_i32_37 : i32 to vector<8x128xi32>
    %96 = arith.cmpi eq, %83, %95 : vector<8x128xi32>
    %c1_i32 = arith.constant 1 : i32
    %97 = vector.broadcast %c1_i32 : i32 to vector<8x128xi32>
    %98 = arith.cmpi eq, %84, %97 : vector<8x128xi32>
    %99 = arith.andi %96, %98 : vector<8x128xi1>
    %cst_38 = arith.constant 0.000000e+00 : f32
    %100 = vector.broadcast %50 : f32 to vector<8x128xf32>
    %101 = vector.broadcast %cst_38 : f32 to vector<8x128xf32>
    %102 = arith.select %99, %100, %101 : vector<8x128xi1>, vector<8x128xf32>
    %103 = arith.addf %94, %102 : vector<8x128xf32>
    %c0_i32_39 = arith.constant 0 : i32
    %104 = vector.broadcast %c0_i32_39 : i32 to vector<8x128xi32>
    %105 = arith.cmpi eq, %83, %104 : vector<8x128xi32>
    %c2_i32 = arith.constant 2 : i32
    %106 = vector.broadcast %c2_i32 : i32 to vector<8x128xi32>
    %107 = arith.cmpi eq, %84, %106 : vector<8x128xi32>
    %108 = arith.andi %105, %107 : vector<8x128xi1>
    %cst_40 = arith.constant 0.000000e+00 : f32
    %109 = vector.broadcast %66 : f32 to vector<8x128xf32>
    %110 = vector.broadcast %cst_40 : f32 to vector<8x128xf32>
    %111 = arith.select %108, %109, %110 : vector<8x128xi1>, vector<8x128xf32>
    %112 = arith.addf %103, %111 : vector<8x128xf32>
    %c0_i32_41 = arith.constant 0 : i32
    %113 = vector.broadcast %c0_i32_41 : i32 to vector<8x128xi32>
    %114 = arith.cmpi eq, %83, %113 : vector<8x128xi32>
    %c3_i32 = arith.constant 3 : i32
    %115 = vector.broadcast %c3_i32 : i32 to vector<8x128xi32>
    %116 = arith.cmpi eq, %84, %115 : vector<8x128xi32>
    %117 = arith.andi %114, %116 : vector<8x128xi1>
    %cst_42 = arith.constant 0.000000e+00 : f32
    %118 = vector.broadcast %82 : f32 to vector<8x128xf32>
    %119 = vector.broadcast %cst_42 : f32 to vector<8x128xf32>
    %120 = arith.select %117, %118, %119 : vector<8x128xi1>, vector<8x128xf32>
    %121 = arith.addf %112, %120 : vector<8x128xf32>
    %c0_43 = arith.constant 0 : index
    %c0_44 = arith.constant 0 : index
    %c0_45 = arith.constant 0 : index
    %122 = vector.load %arg6[%c0_43, %c0_44, %c0_45] : memref<1x8x128xf32, #tpu.memory_space<vmem>>, vector<1x8x128xf32>
    %123 = vector.shape_cast %122 : vector<1x8x128xf32> to vector<8x128xf32>
    %124 = vector.shape_cast %121 : vector<8x128xf32> to vector<1x8x128xf32>
    tpu.vector_store %arg6[%c0_43, %c0_44, %c0_45], %124 {strides = array<i32>} : memref<1x8x128xf32, #tpu.memory_space<vmem>>, vector<1x8x128xf32>,
    return
  }
  func.func @transform_0(%arg0: i32) -> (i32, i32) {
    %c0_i32 = arith.constant 0 : i32
    %c0_i32_0 = arith.constant 0 : i32
    return %arg0, %c0_i32 : i32, i32
  }
  func.func @transform_1(%arg0: i32) -> (i32, i32) {
    %c0_i32 = arith.constant 0 : i32
    %c0_i32_0 = arith.constant 0 : i32
    return %arg0, %c0_i32 : i32, i32
  }
  func.func @transform_2(%arg0: i32) -> (i32, i32) {
    %c0_i32 = arith.constant 0 : i32
    %c0_i32_0 = arith.constant 0 : i32
    return %arg0, %c0_i32 : i32, i32
  }
  func.func @transform_3(%arg0: i32) -> (i32, i32) {
    %c0_i32 = arith.constant 0 : i32
    %c0_i32_0 = arith.constant 0 : i32
    return %arg0, %c0_i32 : i32, i32
  }
  func.func @transform_4(%arg0: i32) -> (i32, i32) {
    %c0_i32 = arith.constant 0 : i32
    %c0_i32_0 = arith.constant 0 : i32
    %c0_i32_1 = arith.constant 0 : i32
    return %c0_i32, %c0_i32_0 : i32, i32
  }
  func.func @transform_5(%arg0: i32) -> (i32, i32, i32) {
    %c0_i32 = arith.constant 0 : i32
    %c0_i32_0 = arith.constant 0 : i32
    %c0_i32_1 = arith.constant 0 : i32
    return %arg0, %c0_i32, %c0_i32_0 : i32, i32, i32
  }
}

module attributes {stable_mosaic.version = 11 : i64} {
  func.func @_edge_recon_kernel(%arg0: i32, %arg1: memref<1024x128xf32, #tpu.memory_space<vmem>>, %arg2: memref<1024x128xf32, #tpu.memory_space<vmem>>, %arg3: memref<1024x1xf32, #tpu.memory_space<vmem>>, %arg4: memref<1x8x128xf32, #tpu.memory_space<vmem>>) attributes {dimension_semantics = [#tpu.dimension_semantics<parallel>], iteration_bounds = array<i64: 4>, scalar_prefetch = 0 : i64, scratch_operands = 0 : i64, tpu.core_type = #tpu.core_type<tc>, window_params = [{transform_indices = @transform_0, window_bounds = array<i64: 1024, 128>}, {transform_indices = @transform_1, window_bounds = array<i64: 1024, 128>}, {transform_indices = @transform_2, window_bounds = array<i64: 1024, 1>}, {transform_indices = @transform_3, window_bounds = array<i64: 1, 8, 128>}]} {
    %c0 = arith.constant 0 : index
    %c0_0 = arith.constant 0 : index
    %0 = vector.load %arg1[%c0, %c0_0] : memref<1024x128xf32, #tpu.memory_space<vmem>>, vector<1024x128xf32>
    %c0_1 = arith.constant 0 : index
    %c0_2 = arith.constant 0 : index
    %1 = vector.load %arg2[%c0_1, %c0_2] : memref<1024x128xf32, #tpu.memory_space<vmem>>, vector<1024x128xf32>
    %2 = arith.mulf %0, %1 : vector<1024x128xf32>
    %cst = arith.constant dense<0.000000e+00> : vector<1024xf32>
    %3 = vector.multi_reduction <add>, %2, %cst [1] : vector<1024x128xf32> to vector<1024xf32>
    %4 = vector.shape_cast %3 : vector<1024xf32> to vector<1024x1xf32>
    %5 = arith.negf %4 : vector<1024x1xf32>
    %6 = math.exp %5 : vector<1024x1xf32>
    %cst_3 = arith.constant 1.000000e+00 : f32
    %7 = vector.broadcast %cst_3 : f32 to vector<1024x1xf32>
    %8 = arith.addf %7, %6 : vector<1024x1xf32>
    %9 = arith.divf %7, %8 : vector<1024x1xf32>
    %cst_4 = arith.constant 1.000000e+00 : f32
    %10 = vector.broadcast %cst_4 : f32 to vector<1024x1xf32>
    %11 = arith.subf %9, %10 : vector<1024x1xf32>
    %c0_5 = arith.constant 0 : index
    %c0_6 = arith.constant 0 : index
    %12 = vector.load %arg3[%c0_5, %c0_6] : memref<1024x1xf32, #tpu.memory_space<vmem>>, vector<1024x1xf32>
    %13 = arith.mulf %12, %11 : vector<1024x1xf32>
    %14 = arith.mulf %13, %11 : vector<1024x1xf32>
    %15 = vector.shape_cast %14 : vector<1024x1xf32> to vector<1x1024x1xf32>
    %cst_7 = arith.constant dense<0.000000e+00> : vector<1xf32>
    %16 = vector.multi_reduction <add>, %15, %cst_7 [1, 2] : vector<1x1024x1xf32> to vector<1xf32>
    %17 = vector.shape_cast %16 : vector<1xf32> to vector<1x1x1xf32>
    %18 = vector.extract %17[0, 0, 0] : f32 from vector<1x1x1xf32>
    %cst_8 = arith.constant 3.906250e-03 : f32
    %19 = arith.mulf %18, %cst_8 : f32
    %20 = tpu.iota {dimensions = array<i32: 0>} : vector<8x128xi32>
    %21 = tpu.iota {dimensions = array<i32: 1>} : vector<8x128xi32>
    %cst_9 = arith.constant 0.000000e+00 : f32
    %22 = vector.broadcast %cst_9 : f32 to vector<8x128xf32>
    %c0_i32 = arith.constant 0 : i32
    %23 = vector.broadcast %c0_i32 : i32 to vector<8x128xi32>
    %24 = arith.cmpi eq, %20, %23 : vector<8x128xi32>
    %c0_i32_10 = arith.constant 0 : i32
    %25 = vector.broadcast %c0_i32_10 : i32 to vector<8x128xi32>
    %26 = arith.cmpi eq, %21, %25 : vector<8x128xi32>
    %27 = arith.andi %24, %26 : vector<8x128xi1>
    %cst_11 = arith.constant 0.000000e+00 : f32
    %28 = vector.broadcast %19 : f32 to vector<8x128xf32>
    %29 = vector.broadcast %cst_11 : f32 to vector<8x128xf32>
    %30 = arith.select %27, %28, %29 : vector<8x128xi1>, vector<8x128xf32>
    %31 = arith.addf %22, %30 : vector<8x128xf32>
    %c0_12 = arith.constant 0 : index
    %c0_13 = arith.constant 0 : index
    %c0_14 = arith.constant 0 : index
    %32 = vector.load %arg4[%c0_12, %c0_13, %c0_14] : memref<1x8x128xf32, #tpu.memory_space<vmem>>, vector<1x8x128xf32>
    %33 = vector.shape_cast %32 : vector<1x8x128xf32> to vector<8x128xf32>
    %34 = vector.shape_cast %31 : vector<8x128xf32> to vector<1x8x128xf32>
    tpu.vector_store %arg4[%c0_12, %c0_13, %c0_14], %34 {strides = array<i32>} : memref<1x8x128xf32, #tpu.memory_space<vmem>>, vector<1x8x128xf32>,
    return
  }
  func.func @transform_0(%arg0: i32) -> (i32, i32) {
    %c0_i32 = arith.constant 0 : i32
    %c0_i32_0 = arith.constant 0 : i32
    return %arg0, %c0_i32 : i32, i32
  }
  func.func @transform_1(%arg0: i32) -> (i32, i32) {
    %c0_i32 = arith.constant 0 : i32
    %c0_i32_0 = arith.constant 0 : i32
    return %arg0, %c0_i32 : i32, i32
  }
  func.func @transform_2(%arg0: i32) -> (i32, i32) {
    %c0_i32 = arith.constant 0 : i32
    %c0_i32_0 = arith.constant 0 : i32
    return %arg0, %c0_i32 : i32, i32
  }
  func.func @transform_3(%arg0: i32) -> (i32, i32, i32) {
    %c0_i32 = arith.constant 0 : i32
    %c0_i32_0 = arith.constant 0 : i32
    %c0_i32_1 = arith.constant 0 : i32
    return %arg0, %c0_i32, %c0_i32_0 : i32, i32, i32
  }
}

</mosaic_0001>

<bundles_post_ra>
// kernel: informax_forward.5
= control target key start
LH: loop header
LB: loop body
LE: loop exit
PB: predicated region body
PF: predicated region fallthrough
CT: control target
= control target key end

     0   :  { %s959_s1 = inlined_call_operand.vmem [shape: bf16[128,128], index: 1, kind: input, shape index: {}]   ;;  %s960_s0 = inlined_call_operand.vmem [shape: bf16[256,128], index: 0, kind: input, shape index: {}]   ;;  %s961_s2 = inlined_call_operand.vmem [shape: bf16[256,128], index: 2, kind: output, shape index: {}]  }
   0x1   :  { %v800_v0 = vld [vmem:[%s959_s1] sm:$0xff]   ;;  %v801_v1 = vld [vmem:[%s959_s1 + $0x8] sm:$0xff]   ;;  %v802_v2 = vld [vmem:[%s959_s1 + $0x10] sm:$0xff]  }
   0x2   :  { %736 = vmatprep.subr.bf16.mxu0 %v800_v0  ;;  %784 = vmatprep.subr.bf16.mxu1 %v800_v0  ;;  %v803_v3 = vld [vmem:[%s959_s1 + $0x18] sm:$0xff]   ;;  %v808_v4 = vld [vmem:[%s960_s0] sm:$0xff]   ;;  %v805_v7 = vld [vmem:[%s959_s1 + $0x28] sm:$0xff]  }
   0x3   :  { %737 = vmatpush3.bf16.msra.mxu0 %v800_v0  ;;  %792 = vmatpush3.bf16.msra.mxu1 %v800_v0  ;;  %v809_v5 = vld [vmem:[%s960_s0 + $0x40] sm:$0xff]   ;;  %v806_v8 = vld [vmem:[%s959_s1 + $0x30] sm:$0xff]   ;;  %v807_v9 = vld [vmem:[%s959_s1 + $0x38] sm:$0xff]  }
   0x4   :  { %738 = vmatprep.subr.bf16.mxu0 %v801_v1  ;;  %785 = vmatprep.subr.bf16.mxu1 %v801_v1  ;;  %v804_v6 = vld [vmem:[%s959_s1 + $0x20] sm:$0xff]   ;;  %v810_v10 = vld [vmem:[%s960_s0 + $0x8] sm:$0xff]   ;;  %v812_v12 = vld [vmem:[%s960_s0 + $0x10] sm:$0xff]  }
   0x5   :  { %752 = vmatprep.mubr.bf16.mxu0 %v808_v4  ;;  %768 = vmatprep.mubr.bf16.mxu1 %v809_v5  ;;  %v811_v11 = vld [vmem:[%s960_s0 + $0x48] sm:$0xff]   ;;  %v813_v13 = vld [vmem:[%s960_s0 + $0x50] sm:$0xff]   ;;  %v814_v14 = vld [vmem:[%s960_s0 + $0x18] sm:$0xff]  }
   0x6   :  { %v815_v15 = vld [vmem:[%s960_s0 + $0x58] sm:$0xff]   ;;  %v816_v16 = vld [vmem:[%s960_s0 + $0x20] sm:$0xff]   ;;  %v818_v18 = vld [vmem:[%s960_s0 + $0x28] sm:$0xff]  }
   0x7   :  { %739 = vmatpush3.bf16.msra.mxu0 %v801_v1  ;;  %793 = vmatpush3.bf16.msra.mxu1 %v801_v1  ;;  %v817_v17 = vld [vmem:[%s960_s0 + $0x60] sm:$0xff]   ;;  %v819_v19 = vld [vmem:[%s960_s0 + $0x68] sm:$0xff]   ;;  %v820_v20 = vld [vmem:[%s960_s0 + $0x30] sm:$0xff]  }
   0x8   :  { %740 = vmatprep.subr.bf16.mxu0 %v802_v2  ;;  %786 = vmatprep.subr.bf16.mxu1 %v802_v2  ;;  %v821_v21 = vld [vmem:[%s960_s0 + $0x70] sm:$0xff]   ;;  %v822_v22 = vld [vmem:[%s960_s0 + $0x38] sm:$0xff]  }
   0x9   :  { %v823_v23 = vld [vmem:[%s960_s0 + $0x78] sm:$0xff]  }
   0xb   :  { %741 = vmatpush3.bf16.msra.mxu0 %v802_v2  ;;  %794 = vmatpush3.bf16.msra.mxu1 %v802_v2 }
   0xc   :  { %742 = vmatprep.subr.bf16.mxu0 %v803_v3  ;;  %787 = vmatprep.subr.bf16.mxu1 %v803_v3 }
   0xf   :  { %743 = vmatpush3.bf16.msra.mxu0 %v803_v3  ;;  %795 = vmatpush3.bf16.msra.mxu1 %v803_v3 }
  0x10   :  { %744 = vmatprep.subr.bf16.mxu0 %v804_v6  ;;  %788 = vmatprep.subr.bf16.mxu1 %v804_v6 }
  0x13   :  { %745 = vmatpush3.bf16.msra.mxu0 %v804_v6  ;;  %796 = vmatpush3.bf16.msra.mxu1 %v804_v6 }
  0x14   :  { %746 = vmatprep.subr.bf16.mxu0 %v805_v7  ;;  %789 = vmatprep.subr.bf16.mxu1 %v805_v7 }
  0x17   :  { %747 = vmatpush3.bf16.msra.mxu0 %v805_v7  ;;  %797 = vmatpush3.bf16.msra.mxu1 %v805_v7 }
  0x18   :  { %748 = vmatprep.subr.bf16.mxu0 %v806_v8  ;;  %790 = vmatprep.subr.bf16.mxu1 %v806_v8 }
  0x1b   :  { %749 = vmatpush3.bf16.msra.mxu0 %v806_v8  ;;  %798 = vmatpush3.bf16.msra.mxu1 %v806_v8 }
  0x1c   :  { %750 = vmatprep.subr.bf16.mxu0 %v807_v9  ;;  %791 = vmatprep.subr.bf16.mxu1 %v807_v9 }
  0x1f   :  { %751 = vmatpush3.bf16.msra.mxu0 %v807_v9  ;;  %799 = vmatpush3.bf16.msra.mxu1 %v807_v9 }
  0x22   :  { %753 = vmatmul.mubr.bf16.vlgmr.msra.gmra.mrb[0].mxu0 %v810_v10  ;;  %769 = vmatmul.mubr.bf16.vlgmr.msra.gmra.mrb[0].mxu1 %v811_v11 }
  0x23   :  { %756 = vmatprep.mubr.bf16.mxu0 %v812_v12  ;;  %772 = vmatprep.mubr.bf16.mxu1 %v813_v13 }
  0x2a   :  { %757 = vmatmul.mubr.bf16.gmra.mrb[4].mxu0 %v814_v14  ;;  %773 = vmatmul.mubr.bf16.gmra.mrb[4].mxu1 %v815_v15 }
  0x2b   :  { %760 = vmatprep.mubr.bf16.mxu0 %v816_v16  ;;  %776 = vmatprep.mubr.bf16.mxu1 %v817_v17 }
  0x32   :  { %761 = vmatmul.mubr.bf16.gmra.mrb[8].mxu0 %v818_v18  ;;  %777 = vmatmul.mubr.bf16.gmra.mrb[8].mxu1 %v819_v19 }
  0x33   :  { %764 = vmatprep.mubr.bf16.mxu0 %v820_v20  ;;  %780 = vmatprep.mubr.bf16.mxu1 %v821_v21 }
  0x3a   :  { %765 = vmatmul.mubr.bf16.gmra.mrb[12].mxu0 %v822_v22  ;;  %781 = vmatmul.mubr.bf16.gmra.mrb[12].mxu1 %v823_v23 }
  0xf5   :  { %v754_v24 = vpop.f32.mrb[0].mxu0  ;;  %v770_v25 = vpop.f32.mrb[0].mxu1 }
  0xf6   :  { %v238_v26 = vpop.f32.mrb[1].mxu0  ;;  %v302_v27 = vpop.f32.mrb[1].mxu1 }
  0xf7   :  { %v755_v28 = vpop.f32.mrb[2].mxu0  ;;  %v771_v29 = vpop.f32.mrb[2].mxu1 }
  0xf8   :  { %v625_v30 = vpack.c.bf16 %v755_v28, %v754_v24  ;;  %v665_v31 = vpack.c.bf16 %v771_v29, %v770_v25  ;;  %v241_v32 = vpop.f32.mrb[3].mxu0  ;;  %v305_v33 = vpop.f32.mrb[3].mxu1 }
  0xf9   :  { %v620_v34 = vpack.c.bf16 %v241_v32, %v238_v26  ;;  %v660_v35 = vpack.c.bf16 %v305_v33, %v302_v27 }
  0xfa   :  { %697 = vst [vmem:[%s961_s2 + $0x8] sm:$0xff] %v625_v30   ;;  %705 = vst [vmem:[%s961_s2 + $0x48] sm:$0xff] %v665_v31  }
  0xfb   :  { %621 = vst [vmem:[%s961_s2] sm:$0xff] %v620_v34   ;;  %704 = vst [vmem:[%s961_s2 + $0x40] sm:$0xff] %v660_v35  }
  0xfd   :  { %v758_v36 = vpop.f32.mrb[4].mxu0  ;;  %v774_v37 = vpop.f32.mrb[4].mxu1 }
  0xfe   :  { %v254_v38 = vpop.f32.mrb[5].mxu0  ;;  %v318_v39 = vpop.f32.mrb[5].mxu1 }
  0xff   :  { %v759_v40 = vpop.f32.mrb[6].mxu0  ;;  %v775_v41 = vpop.f32.mrb[6].mxu1 }
 0x100   :  { %v635_v42 = vpack.c.bf16 %v759_v40, %v758_v36  ;;  %v675_v43 = vpack.c.bf16 %v775_v41, %v774_v37  ;;  %v257_v44 = vpop.f32.mrb[7].mxu0  ;;  %v321_v45 = vpop.f32.mrb[7].mxu1 }
 0x101   :  { %v630_v46 = vpack.c.bf16 %v257_v44, %v254_v38  ;;  %v670_v47 = vpack.c.bf16 %v321_v45, %v318_v39 }
 0x102   :  { %699 = vst [vmem:[%s961_s2 + $0x18] sm:$0xff] %v635_v42   ;;  %707 = vst [vmem:[%s961_s2 + $0x58] sm:$0xff] %v675_v43  }
 0x103   :  { %698 = vst [vmem:[%s961_s2 + $0x10] sm:$0xff] %v630_v46   ;;  %706 = vst [vmem:[%s961_s2 + $0x50] sm:$0xff] %v670_v47  }
 0x105   :  { %v762_v48 = vpop.f32.mrb[8].mxu0  ;;  %v778_v49 = vpop.f32.mrb[8].mxu1 }
 0x106   :  { %v270_v50 = vpop.f32.mrb[9].mxu0  ;;  %v334_v51 = vpop.f32.mrb[9].mxu1 }
 0x107   :  { %v763_v52 = vpop.f32.mrb[10].mxu0  ;;  %v779_v53 = vpop.f32.mrb[10].mxu1 }
 0x108   :  { %v645_v54 = vpack.c.bf16 %v763_v52, %v762_v48  ;;  %v685_v55 = vpack.c.bf16 %v779_v53, %v778_v49  ;;  %v273_v56 = vpop.f32.mrb[11].mxu0  ;;  %v337_v57 = vpop.f32.mrb[11].mxu1 }
 0x109   :  { %v640_v58 = vpack.c.bf16 %v273_v56, %v270_v50  ;;  %v680_v59 = vpack.c.bf16 %v337_v57, %v334_v51 }
 0x10a   :  { %701 = vst [vmem:[%s961_s2 + $0x28] sm:$0xff] %v645_v54   ;;  %709 = vst [vmem:[%s961_s2 + $0x68] sm:$0xff] %v685_v55  }
 0x10b   :  { %700 = vst [vmem:[%s961_s2 + $0x20] sm:$0xff] %v640_v58   ;;  %708 = vst [vmem:[%s961_s2 + $0x60] sm:$0xff] %v680_v59  }
 0x10d   :  { %v766_v60 = vpop.f32.mrb[12].mxu0  ;;  %v782_v61 = vpop.f32.mrb[12].mxu1 }
 0x10e   :  { %v286_v62 = vpop.f32.mrb[13].mxu0  ;;  %v350_v63 = vpop.f32.mrb[13].mxu1 }
 0x10f   :  { %v767_v0 = vpop.f32.mrb[14].mxu0  ;;  %v783_v1 = vpop.f32.mrb[14].mxu1 }
 0x110   :  { %v655_v2 = vpack.c.bf16 %v767_v0, %v766_v60  ;;  %v695_v3 = vpack.c.bf16 %v783_v1, %v782_v61  ;;  %v289_v4 = vpop.f32.mrb[15].mxu0  ;;  %v353_v5 = vpop.f32.mrb[15].mxu1 }
 0x111   :  { %v650_v6 = vpack.c.bf16 %v289_v4, %v286_v62  ;;  %v690_v7 = vpack.c.bf16 %v353_v5, %v350_v63 }
 0x112   :  { %703 = vst [vmem:[%s961_s2 + $0x38] sm:$0xff] %v655_v2   ;;  %711 = vst [vmem:[%s961_s2 + $0x78] sm:$0xff] %v695_v3  }
 0x113   :  { %702 = vst [vmem:[%s961_s2 + $0x30] sm:$0xff] %v650_v6   ;;  %710 = vst [vmem:[%s961_s2 + $0x70] sm:$0xff] %v690_v7  }

// kernel: informax_forward.6
= control target key start
LH: loop header
LB: loop body
LE: loop exit
PB: predicated region body
PF: predicated region fallthrough
CT: control target
= control target key end

     0   :  { %10 = vsyncpa [#allocation4], 0  ;;  %s1374_s15 = smov [#allocation3]   ;;  %s1773_s0 = inlined_call_operand.hbm [shape: bf16[256,256], index: 0, kind: input, shape index: {}]   ;;  %s1774_s1 = inlined_call_operand.vmem [shape: bf16[256,256], index: 1, kind: input, shape index: {}]   ;;  %s1775_s2 = inlined_call_operand.vmem [shape: f32[1,256], index: 2, kind: input, shape index: {}]   ;;  %s1776_s3 = inlined_call_operand.vmem [shape: f32[256,128], index: 3, kind: output, shape index: {0}]   ;;  %s1777_s4 = inlined_call_operand.vmem [shape: f32[256,128], index: 4, kind: output, shape index: {1}]  }
   0x1   :  { %s16_s16 = sshll.u32 %s1374_s15, 4  ;;  %s1350_s19 = scalar_lea.hbm %s1773_s0, 4096  ;;  %s17_s16 = int_to_ptr.vmem [resolvable:$true] %s16_s16 }
   0x2   :  { %p1351_p0 = scmp.ne.s32.totalorder %s1773_s0, %s1350_s19  ;;  %p1354_p1 = scmp.lt.u32.totalorder %s1350_s19, %s1773_s0 }
   0x4   :  { %p1356_p2 = pnand %p1354_p1, %p1351_p0 }
   0x6   :  { %1359 = shalt.err (!%p1356_p2)
}
   0x7   :  { %s1360_s24 = scalar_lea.vmem %s17_s16, 4096  ;;  %p1365_p4 = scmp.lt.s32.totalorder %s17_s16, %s17_s16 }
   0x8   :  { %p1361_p3 = scmp.ne.s32.totalorder %s17_s16, %s1360_s24  ;;  %p1366_p5 = scmp.lt.s32.totalorder %s1360_s24, %s1360_s24 }
   0xa   :  { %p1367_p6 = por %p1366_p5, %p1365_p4 }
   0xc   :  { %p1368_p7 = pnand %p1367_p6, %p1361_p3 }
   0xe   :  { %1371 = shalt.err (!%p1368_p7)
}
   0xf   :  { %s1375_s25 = smov 128   ;;  %s1376_s26 = smov 8  }
  0x10   :  { %22 = dma.hbm_to_vmem [thread:$0]  %s1773_s0, 4096, %s17_s16, [#allocation4], %s1375_s25, %s1375_s25, %s1376_s26  }
  0x11   :  { %1372 = dma.done.wait [#allocation4], 4096  }
  0x12   :  { %1373 = vsyncadd [#allocation4], 4294963200  ;;  %v1254_v0 = vld [vmem:[%s1774_s1 + $0x4] ss:$8 sps:$4 sm:$0xff]   ;;  %v1256_v1 = vld [vmem:[%s1774_s1] ss:$8 sps:$4 sm:$0xff]  }
  0x13   :  { %552 = vmatprep.subr.bf16.mxu0 %v1254_v0  ;;  %1219 = vmatprep.subr.bf16.mxu1 %v1254_v0  ;;  %v1257_v2 = vld [vmem:[%s1774_s1 + $0x14] ss:$8 sps:$4 sm:$0xff]   ;;  %v1259_v3 = vld [vmem:[%s1774_s1 + $0x10] ss:$8 sps:$4 sm:$0xff]   ;;  %v1260_v4 = vld [vmem:[%s1774_s1 + $0x24] ss:$8 sps:$4 sm:$0xff]   ;;  %v942_v0 = vlaneseq }
  0x14   :  { %553 = vmatpush1.bf16.msra.mxu0 %v1256_v1  ;;  %1235 = vmatpush1.bf16.msra.mxu1 %v1256_v1  ;;  %v1262_v5 = vld [vmem:[%s1774_s1 + $0x20] ss:$8 sps:$4 sm:$0xff]   ;;  %v1263_v6 = vld [vmem:[%s1774_s1 + $0x34] ss:$8 sps:$4 sm:$0xff]   ;;  %v1265_v7 = vld [vmem:[%s1774_s1 + $0x30] ss:$8 sps:$4 sm:$0xff]  }
  0x15   :  { %554 = vmatprep.subr.bf16.mxu0 %v1257_v2  ;;  %1220 = vmatprep.subr.bf16.mxu1 %v1257_v2  ;;  %v1266_v8 = vld [vmem:[%s1774_s1 + $0x44] ss:$8 sps:$4 sm:$0xff]   ;;  %v1268_v9 = vld [vmem:[%s1774_s1 + $0x40] ss:$8 sps:$4 sm:$0xff]   ;;  %v1269_v10 = vld [vmem:[%s1774_s1 + $0x54] ss:$8 sps:$4 sm:$0xff]  }
  0x16   :  { %v1271_v11 = vld [vmem:[%s1774_s1 + $0x50] ss:$8 sps:$4 sm:$0xff]   ;;  %v1272_v12 = vld [vmem:[%s1774_s1 + $0x64] ss:$8 sps:$4 sm:$0xff]   ;;  %v1274_v14 = vld [vmem:[%s1774_s1 + $0x60] ss:$8 sps:$4 sm:$0xff]  }
  0x17   :  { %v1304_v13 = vld [vmem:[#allocation3 + $0x4] ss:$8 sps:$4 sm:$0xff]   ;;  %v1275_v16 = vld [vmem:[%s1774_s1 + $0x74] ss:$8 sps:$4 sm:$0xff]   ;;  %v1277_v17 = vld [vmem:[%s1774_s1 + $0x70] ss:$8 sps:$4 sm:$0xff]  }
  0x18   :  { %555 = vmatpush1.bf16.msra.mxu0 %v1259_v3  ;;  %1236 = vmatpush1.bf16.msra.mxu1 %v1259_v3  ;;  %v1307_v15 = vld [vmem:[#allocation3 + $0x84] ss:$8 sps:$4 sm:$0xff]   ;;  %v1280_v19 = vld [vmem:[%s1774_s1 + $0x80] ss:$8 sps:$4 sm:$0xff]   ;;  %v1281_v20 = vld [vmem:[%s1774_s1 + $0x94] ss:$8 sps:$4 sm:$0xff]  }
  0x19   :  { %556 = vmatprep.subr.bf16.mxu0 %v1260_v4  ;;  %1221 = vmatprep.subr.bf16.mxu1 %v1260_v4  ;;  %v1278_v18 = vld [vmem:[%s1774_s1 + $0x84] ss:$8 sps:$4 sm:$0xff]   ;;  %v1283_v21 = vld [vmem:[%s1774_s1 + $0x90] ss:$8 sps:$4 sm:$0xff]   ;;  %v1286_v23 = vld [vmem:[%s1774_s1 + $0xa0] ss:$8 sps:$4 sm:$0xff]  }
  0x1a   :  { %584 = vmatprep.mubr.bf16.mxu0 %v1304_v13  ;;  %664 = vmatprep.mubr.bf16.mxu1 %v1307_v15  ;;  %v1284_v22 = vld [vmem:[%s1774_s1 + $0xa4] ss:$8 sps:$4 sm:$0xff]   ;;  %v1287_v24 = vld [vmem:[%s1774_s1 + $0xb4] ss:$8 sps:$4 sm:$0xff]   ;;  %v1289_v25 = vld [vmem:[%s1774_s1 + $0xb0] ss:$8 sps:$4 sm:$0xff]  }
  0x1b   :  { %v1290_v26 = vld [vmem:[%s1774_s1 + $0xc4] ss:$8 sps:$4 sm:$0xff]   ;;  %v1292_v27 = vld [vmem:[%s1774_s1 + $0xc0] ss:$8 sps:$4 sm:$0xff]   ;;  %v1293_v28 = vld [vmem:[%s1774_s1 + $0xd4] ss:$8 sps:$4 sm:$0xff]  }
  0x1c   :  { %557 = vmatpush1.bf16.msra.mxu0 %v1262_v5  ;;  %1237 = vmatpush1.bf16.msra.mxu1 %v1262_v5  ;;  %v1295_v29 = vld [vmem:[%s1774_s1 + $0xd0] ss:$8 sps:$4 sm:$0xff]   ;;  %v1296_v30 = vld [vmem:[%s1774_s1 + $0xe4] ss:$8 sps:$4 sm:$0xff]   ;;  %v1298_v31 = vld [vmem:[%s1774_s1 + $0xe0] ss:$8 sps:$4 sm:$0xff]  }
  0x1d   :  { %558 = vmatprep.subr.bf16.mxu0 %v1263_v6  ;;  %1222 = vmatprep.subr.bf16.mxu1 %v1263_v6  ;;  %v1299_v32 = vld [vmem:[%s1774_s1 + $0xf4] ss:$8 sps:$4 sm:$0xff]   ;;  %v1301_v33 = vld [vmem:[%s1774_s1 + $0xf0] ss:$8 sps:$4 sm:$0xff]   ;;  %v1302_v34 = vld [vmem:[#allocation3] ss:$8 sps:$4 sm:$0xff]  }
  0x1e   :  { %v1305_v35 = vld [vmem:[#allocation3 + $0x80] ss:$8 sps:$4 sm:$0xff]   ;;  %v1308_v36 = vld [vmem:[#allocation3 + $0x14] ss:$8 sps:$4 sm:$0xff]   ;;  %v1312_v38 = vld [vmem:[#allocation3 + $0x10] ss:$8 sps:$4 sm:$0xff]  }
  0x1f   :  { %v1310_v37 = vld [vmem:[#allocation3 + $0x94] ss:$8 sps:$4 sm:$0xff]   ;;  %v1313_v39 = vld [vmem:[#allocation3 + $0x90] ss:$8 sps:$4 sm:$0xff]   ;;  %v1314_v40 = vld [vmem:[#allocation3 + $0x24] ss:$8 sps:$4 sm:$0xff]  }
  0x20   :  { %559 = vmatpush1.bf16.msra.mxu0 %v1265_v7  ;;  %1238 = vmatpush1.bf16.msra.mxu1 %v1265_v7  ;;  %v1316_v41 = vld [vmem:[#allocation3 + $0xa4] ss:$8 sps:$4 sm:$0xff]   ;;  %v1318_v42 = vld [vmem:[#allocation3 + $0x20] ss:$8 sps:$4 sm:$0xff]   ;;  %v1320_v44 = vld [vmem:[#allocation3 + $0x34] ss:$8 sps:$4 sm:$0xff]  }
  0x21   :  { %560 = vmatprep.subr.bf16.mxu0 %v1266_v8  ;;  %1223 = vmatprep.subr.bf16.mxu1 %v1266_v8  ;;  %v1319_v43 = vld [vmem:[#allocation3 + $0xa0] ss:$8 sps:$4 sm:$0xff]   ;;  %v1322_v45 = vld [vmem:[#allocation3 + $0xb4] ss:$8 sps:$4 sm:$0xff]   ;;  %v1324_v46 = vld [vmem:[#allocation3 + $0x30] ss:$8 sps:$4 sm:$0xff]  }
  0x22   :  { %v1325_v47 = vld [vmem:[#allocation3 + $0xb0] ss:$8 sps:$4 sm:$0xff]   ;;  %v1326_v48 = vld [vmem:[#allocation3 + $0x44] ss:$8 sps:$4 sm:$0xff]   ;;  %v1330_v50 = vld [vmem:[#allocation3 + $0x40] ss:$8 sps:$4 sm:$0xff]  }
  0x23   :  { %v1328_v49 = vld [vmem:[#allocation3 + $0xc4] ss:$8 sps:$4 sm:$0xff]   ;;  %v1331_v51 = vld [vmem:[#allocation3 + $0xc0] ss:$8 sps:$4 sm:$0xff]   ;;  %v1332_v52 = vld [vmem:[#allocation3 + $0x54] ss:$8 sps:$4 sm:$0xff]  }
  0x24   :  { %561 = vmatpush1.bf16.msra.mxu0 %v1268_v9  ;;  %1239 = vmatpush1.bf16.msra.mxu1 %v1268_v9  ;;  %v1334_v53 = vld [vmem:[#allocation3 + $0xd4] ss:$8 sps:$4 sm:$0xff]   ;;  %v1336_v54 = vld [vmem:[#allocation3 + $0x50] ss:$8 sps:$4 sm:$0xff]   ;;  %v1338_v56 = vld [vmem:[#allocation3 + $0x64] ss:$8 sps:$4 sm:$0xff]  }
  0x25   :  { %562 = vmatprep.subr.bf16.mxu0 %v1269_v10  ;;  %1224 = vmatprep.subr.bf16.mxu1 %v1269_v10  ;;  %v1337_v55 = vld [vmem:[#allocation3 + $0xd0] ss:$8 sps:$4 sm:$0xff]   ;;  %v1340_v57 = vld [vmem:[#allocation3 + $0xe4] ss:$8 sps:$4 sm:$0xff]   ;;  %v1342_v58 = vld [vmem:[#allocation3 + $0x60] ss:$8 sps:$4 sm:$0xff]  }
  0x26   :  { %v1343_v59 = vld [vmem:[#allocation3 + $0xe0] ss:$8 sps:$4 sm:$0xff]   ;;  %v1344_v60 = vld [vmem:[#allocation3 + $0x74] ss:$8 sps:$4 sm:$0xff]   ;;  %v1348_v62 = vld [vmem:[#allocation3 + $0x70] ss:$8 sps:$4 sm:$0xff]  }
  0x27   :  { %v1346_v61 = vld [vmem:[#allocation3 + $0xf4] ss:$8 sps:$4 sm:$0xff]   ;;  %v1349_v63 = vld [vmem:[#allocation3 + $0xf0] ss:$8 sps:$4 sm:$0xff]   ;;  %v943_v1 = vshrl.u32 %v942_v0, 7 }
  0x28   :  { %563 = vmatpush1.bf16.msra.mxu0 %v1271_v11  ;;  %1240 = vmatpush1.bf16.msra.mxu1 %v1271_v11  ;;  %v940_v3 = vld [vmem:[%s1775_s2] sm:$0x3] }
  0x29   :  { %564 = vmatprep.subr.bf16.mxu0 %v1272_v12  ;;  %1225 = vmatprep.subr.bf16.mxu1 %v1272_v12  ;;  %v944_v2 = vsub.s32 0, %v943_v1  ;;  %v948_v4 = vsub.s32 1, %v943_v1 }
  0x2b   :  { %v1513_v5 = vrot.slane %v940_v3, %v944_v2  ;;  %v1515_v6 = vrot.slane %v940_v3, %v948_v4 }
  0x2c   :  { %565 = vmatpush1.bf16.msra.mxu0 %v1274_v14  ;;  %1241 = vmatpush1.bf16.msra.mxu1 %v1274_v14 }
  0x2d   :  { %566 = vmatprep.subr.bf16.mxu0 %v1275_v16  ;;  %1226 = vmatprep.subr.bf16.mxu1 %v1275_v16 }
  0x30   :  { %567 = vmatpush1.bf16.msra.mxu0 %v1277_v17  ;;  %1242 = vmatpush1.bf16.msra.mxu1 %v1277_v17 }
  0x31   :  { %568 = vmatprep.subr.bf16.mxu0 %v1278_v18  ;;  %1227 = vmatprep.subr.bf16.mxu1 %v1278_v18 }
  0x34   :  { %569 = vmatpush1.bf16.msra.mxu0 %v1280_v19  ;;  %1243 = vmatpush1.bf16.msra.mxu1 %v1280_v19 }
  0x35   :  { %570 = vmatprep.subr.bf16.mxu0 %v1281_v20  ;;  %1228 = vmatprep.subr.bf16.mxu1 %v1281_v20 }
  0x38   :  { %571 = vmatpush1.bf16.msra.mxu0 %v1283_v21  ;;  %1244 = vmatpush1.bf16.msra.mxu1 %v1283_v21 }
  0x39   :  { %572 = vmatprep.subr.bf16.mxu0 %v1284_v22  ;;  %1229 = vmatprep.subr.bf16.mxu1 %v1284_v22 }
  0x3c   :  { %573 = vmatpush1.bf16.msra.mxu0 %v1286_v23  ;;  %1245 = vmatpush1.bf16.msra.mxu1 %v1286_v23 }
  0x3d   :  { %574 = vmatprep.subr.bf16.mxu0 %v1287_v24  ;;  %1230 = vmatprep.subr.bf16.mxu1 %v1287_v24 }
  0x40   :  { %575 = vmatpush1.bf16.msra.mxu0 %v1289_v25  ;;  %1246 = vmatpush1.bf16.msra.mxu1 %v1289_v25 }
  0x41   :  { %576 = vmatprep.subr.bf16.mxu0 %v1290_v26  ;;  %1231 = vmatprep.subr.bf16.mxu1 %v1290_v26 }
  0x44   :  { %577 = vmatpush1.bf16.msra.mxu0 %v1292_v27  ;;  %1247 = vmatpush1.bf16.msra.mxu1 %v1292_v27 }
  0x45   :  { %578 = vmatprep.subr.bf16.mxu0 %v1293_v28  ;;  %1232 = vmatprep.subr.bf16.mxu1 %v1293_v28 }
  0x48   :  { %579 = vmatpush1.bf16.msra.mxu0 %v1295_v29  ;;  %1248 = vmatpush1.bf16.msra.mxu1 %v1295_v29 }
  0x49   :  { %580 = vmatprep.subr.bf16.mxu0 %v1296_v30  ;;  %1233 = vmatprep.subr.bf16.mxu1 %v1296_v30 }
  0x4c   :  { %581 = vmatpush1.bf16.msra.mxu0 %v1298_v31  ;;  %1249 = vmatpush1.bf16.msra.mxu1 %v1298_v31 }
  0x4d   :  { %582 = vmatprep.subr.bf16.mxu0 %v1299_v32  ;;  %1234 = vmatprep.subr.bf16.mxu1 %v1299_v32 }
  0x50   :  { %583 = vmatpush1.bf16.msra.mxu0 %v1301_v33  ;;  %1250 = vmatpush1.bf16.msra.mxu1 %v1301_v33 }
  0x53   :  { %585 = vmatmul.mubr.bf16.vlgmr.msra.gmra.mrb[0].mxu0 %v1302_v34  ;;  %665 = vmatmul.mubr.bf16.vlgmr.msra.gmra.mrb[0].mxu1 %v1305_v35 }
  0x54   :  { %594 = vmatprep.mubr.bf16.mxu0 %v1308_v36  ;;  %674 = vmatprep.mubr.bf16.mxu1 %v1310_v37 }
  0x5b   :  { %595 = vmatmul.mubr.bf16.gmra.mrb[4].mxu0 %v1312_v38  ;;  %675 = vmatmul.mubr.bf16.gmra.mrb[4].mxu1 %v1313_v39 }
  0x5c   :  { %604 = vmatprep.mubr.bf16.mxu0 %v1314_v40  ;;  %684 = vmatprep.mubr.bf16.mxu1 %v1316_v41 }
  0x63   :  { %605 = vmatmul.mubr.bf16.gmra.mrb[8].mxu0 %v1318_v42  ;;  %685 = vmatmul.mubr.bf16.gmra.mrb[8].mxu1 %v1319_v43 }
  0x64   :  { %614 = vmatprep.mubr.bf16.mxu0 %v1320_v44  ;;  %694 = vmatprep.mubr.bf16.mxu1 %v1322_v45 }
  0x6b   :  { %615 = vmatmul.mubr.bf16.gmra.mrb[12].mxu0 %v1324_v46  ;;  %695 = vmatmul.mubr.bf16.gmra.mrb[12].mxu1 %v1325_v47 }
  0x6c   :  { %624 = vmatprep.mubr.bf16.mxu0 %v1326_v48  ;;  %704 = vmatprep.mubr.bf16.mxu1 %v1328_v49 }
  0x73   :  { %625 = vmatmul.mubr.bf16.gmra.mrb[16].mxu0 %v1330_v50  ;;  %705 = vmatmul.mubr.bf16.gmra.mrb[16].mxu1 %v1331_v51 }
  0x74   :  { %634 = vmatprep.mubr.bf16.mxu0 %v1332_v52  ;;  %714 = vmatprep.mubr.bf16.mxu1 %v1334_v53 }
  0x7b   :  { %635 = vmatmul.mubr.bf16.gmra.mrb[20].mxu0 %v1336_v54  ;;  %715 = vmatmul.mubr.bf16.gmra.mrb[20].mxu1 %v1337_v55 }
  0x7c   :  { %644 = vmatprep.mubr.bf16.mxu0 %v1338_v56  ;;  %724 = vmatprep.mubr.bf16.mxu1 %v1340_v57 }
  0x83   :  { %645 = vmatmul.mubr.bf16.gmra.mrb[24].mxu0 %v1342_v58  ;;  %725 = vmatmul.mubr.bf16.gmra.mrb[24].mxu1 %v1343_v59 }
  0x84   :  { %654 = vmatprep.mubr.bf16.mxu0 %v1344_v60  ;;  %734 = vmatprep.mubr.bf16.mxu1 %v1346_v61 }
  0x8b   :  { %655 = vmatmul.mubr.bf16.gmra.mrb[28].mxu0 %v1348_v62  ;;  %735 = vmatmul.mubr.bf16.gmra.mrb[28].mxu1 %v1349_v63 }
 0x126   :  { %v586_v7 = vpop.f32.mrb[0].mxu0  ;;  %v666_v8 = vpop.f32.mrb[0].mxu1 }
 0x127   :  { %v952_v9 = vadd.f32 %v1513_v5, %v586_v7  ;;  %v984_v10 = vadd.f32 %v1513_v5, %v666_v8  ;;  %v588_v11 = vpop.f32.mrb[1].mxu0  ;;  %v668_v12 = vpop.f32.mrb[1].mxu1 }
 0x128   :  { %v953_v13 = vadd.f32 %v1515_v6, %v588_v11  ;;  %v985_v14 = vadd.f32 %v1515_v6, %v668_v12  ;;  %v590_v15 = vpop.f32.mrb[2].mxu0  ;;  %v670_v16 = vpop.f32.mrb[2].mxu1 }
 0x129   :  { %v1016_v17 = vmax.f32 %v952_v9, 0.0  ;;  %v1048_v18 = vmax.f32 %v984_v10, 0.0  ;;  %v954_v19 = vadd.f32 %v1513_v5, %v590_v15  ;;  %v986_v20 = vadd.f32 %v1513_v5, %v670_v16  ;;  %v592_v21 = vpop.f32.mrb[3].mxu0  ;;  %v672_v22 = vpop.f32.mrb[3].mxu1 }
 0x12a   :  { %v1017_v23 = vmax.f32 %v953_v13, 0.0  ;;  %v1049_v24 = vmax.f32 %v985_v14, 0.0  ;;  %v955_v25 = vadd.f32 %v1515_v6, %v592_v21  ;;  %v987_v26 = vadd.f32 %v1515_v6, %v672_v22 }
 0x12b   :  { %1080 = vst [vmem:[%s1776_s3] sm:$0xff] %v1016_v17  ;;  %1096 = vst [vmem:[%s1776_s3 + $0x80] sm:$0xff] %v1048_v18  ;;  %v1018_v27 = vmax.f32 %v954_v19, 0.0  ;;  %v1050_v28 = vmax.f32 %v986_v20, 0.0 }
 0x12c   :  { %1112 = vst [vmem:[%s1777_s4] sm:$0xff] %v1017_v23  ;;  %1128 = vst [vmem:[%s1777_s4 + $0x80] sm:$0xff] %v1049_v24  ;;  %v1019_v29 = vmax.f32 %v955_v25, 0.0  ;;  %v1051_v30 = vmax.f32 %v987_v26, 0.0 }
 0x12d   :  { %1081 = vst [vmem:[%s1776_s3 + $0x8] sm:$0xff] %v1018_v27  ;;  %1097 = vst [vmem:[%s1776_s3 + $0x88] sm:$0xff] %v1050_v28 }
 0x12e   :  { %1113 = vst [vmem:[%s1777_s4 + $0x8] sm:$0xff] %v1019_v29  ;;  %1129 = vst [vmem:[%s1777_s4 + $0x88] sm:$0xff] %v1051_v30  ;;  %v596_v31 = vpop.f32.mrb[4].mxu0  ;;  %v676_v32 = vpop.f32.mrb[4].mxu1 }
 0x12f   :  { %v956_v33 = vadd.f32 %v1513_v5, %v596_v31  ;;  %v988_v34 = vadd.f32 %v1513_v5, %v676_v32  ;;  %v598_v35 = vpop.f32.mrb[5].mxu0  ;;  %v678_v36 = vpop.f32.mrb[5].mxu1 }
 0x130   :  { %v957_v37 = vadd.f32 %v1515_v6, %v598_v35  ;;  %v989_v38 = vadd.f32 %v1515_v6, %v678_v36  ;;  %v600_v39 = vpop.f32.mrb[6].mxu0  ;;  %v680_v40 = vpop.f32.mrb[6].mxu1 }
 0x131   :  { %v1020_v41 = vmax.f32 %v956_v33, 0.0  ;;  %v1052_v42 = vmax.f32 %v988_v34, 0.0  ;;  %v958_v43 = vadd.f32 %v1513_v5, %v600_v39  ;;  %v990_v44 = vadd.f32 %v1513_v5, %v680_v40  ;;  %v602_v45 = vpop.f32.mrb[7].mxu0  ;;  %v682_v46 = vpop.f32.mrb[7].mxu1 }
 0x132   :  { %v1021_v47 = vmax.f32 %v957_v37, 0.0  ;;  %v1053_v48 = vmax.f32 %v989_v38, 0.0  ;;  %v959_v49 = vadd.f32 %v1515_v6, %v602_v45  ;;  %v991_v50 = vadd.f32 %v1515_v6, %v682_v46 }
 0x133   :  { %1082 = vst [vmem:[%s1776_s3 + $0x10] sm:$0xff] %v1020_v41  ;;  %1098 = vst [vmem:[%s1776_s3 + $0x90] sm:$0xff] %v1052_v42  ;;  %v1022_v51 = vmax.f32 %v958_v43, 0.0  ;;  %v1054_v52 = vmax.f32 %v990_v44, 0.0 }
 0x134   :  { %1114 = vst [vmem:[%s1777_s4 + $0x10] sm:$0xff] %v1021_v47  ;;  %1130 = vst [vmem:[%s1777_s4 + $0x90] sm:$0xff] %v1053_v48  ;;  %v1023_v53 = vmax.f32 %v959_v49, 0.0  ;;  %v1055_v54 = vmax.f32 %v991_v50, 0.0 }
 0x135   :  { %1083 = vst [vmem:[%s1776_s3 + $0x18] sm:$0xff] %v1022_v51  ;;  %1099 = vst [vmem:[%s1776_s3 + $0x98] sm:$0xff] %v1054_v52 }
 0x136   :  { %1115 = vst [vmem:[%s1777_s4 + $0x18] sm:$0xff] %v1023_v53  ;;  %1131 = vst [vmem:[%s1777_s4 + $0x98] sm:$0xff] %v1055_v54  ;;  %v606_v55 = vpop.f32.mrb[8].mxu0  ;;  %v686_v56 = vpop.f32.mrb[8].mxu1 }
 0x137   :  { %v960_v57 = vadd.f32 %v1513_v5, %v606_v55  ;;  %v992_v58 = vadd.f32 %v1513_v5, %v686_v56  ;;  %v608_v59 = vpop.f32.mrb[9].mxu0  ;;  %v688_v60 = vpop.f32.mrb[9].mxu1 }
 0x138   :  { %v961_v61 = vadd.f32 %v1515_v6, %v608_v59  ;;  %v993_v62 = vadd.f32 %v1515_v6, %v688_v60  ;;  %v610_v63 = vpop.f32.mrb[10].mxu0  ;;  %v690_v0 = vpop.f32.mrb[10].mxu1 }
 0x139   :  { %v1024_v1 = vmax.f32 %v960_v57, 0.0  ;;  %v1056_v2 = vmax.f32 %v992_v58, 0.0  ;;  %v962_v3 = vadd.f32 %v1513_v5, %v610_v63  ;;  %v994_v4 = vadd.f32 %v1513_v5, %v690_v0  ;;  %v612_v7 = vpop.f32.mrb[11].mxu0  ;;  %v692_v8 = vpop.f32.mrb[11].mxu1 }
 0x13a   :  { %v1025_v9 = vmax.f32 %v961_v61, 0.0  ;;  %v1057_v10 = vmax.f32 %v993_v62, 0.0  ;;  %v963_v11 = vadd.f32 %v1515_v6, %v612_v7  ;;  %v995_v12 = vadd.f32 %v1515_v6, %v692_v8 }
 0x13b   :  { %1084 = vst [vmem:[%s1776_s3 + $0x20] sm:$0xff] %v1024_v1  ;;  %1100 = vst [vmem:[%s1776_s3 + $0xa0] sm:$0xff] %v1056_v2  ;;  %v1026_v13 = vmax.f32 %v962_v3, 0.0  ;;  %v1058_v14 = vmax.f32 %v994_v4, 0.0 }
 0x13c   :  { %1116 = vst [vmem:[%s1777_s4 + $0x20] sm:$0xff] %v1025_v9  ;;  %1132 = vst [vmem:[%s1777_s4 + $0xa0] sm:$0xff] %v1057_v10  ;;  %v1027_v15 = vmax.f32 %v963_v11, 0.0  ;;  %v1059_v16 = vmax.f32 %v995_v12, 0.0 }
 0x13d   :  { %1085 = vst [vmem:[%s1776_s3 + $0x28] sm:$0xff] %v1026_v13  ;;  %1101 = vst [vmem:[%s1776_s3 + $0xa8] sm:$0xff] %v1058_v14 }
 0x13e   :  { %1117 = vst [vmem:[%s1777_s4 + $0x28] sm:$0xff] %v1027_v15  ;;  %1133 = vst [vmem:[%s1777_s4 + $0xa8] sm:$0xff] %v1059_v16  ;;  %v616_v17 = vpop.f32.mrb[12].mxu0  ;;  %v696_v18 = vpop.f32.mrb[12].mxu1 }
 0x13f   :  { %v964_v19 = vadd.f32 %v1513_v5, %v616_v17  ;;  %v996_v20 = vadd.f32 %v1513_v5, %v696_v18  ;;  %v618_v21 = vpop.f32.mrb[13].mxu0  ;;  %v698_v22 = vpop.f32.mrb[13].mxu1 }
 0x140   :  { %v965_v23 = vadd.f32 %v1515_v6, %v618_v21  ;;  %v997_v24 = vadd.f32 %v1515_v6, %v698_v22  ;;  %v620_v25 = vpop.f32.mrb[14].mxu0  ;;  %v700_v26 = vpop.f32.mrb[14].mxu1 }
 0x141   :  { %v1028_v27 = vmax.f32 %v964_v19, 0.0  ;;  %v1060_v28 = vmax.f32 %v996_v20, 0.0  ;;  %v966_v29 = vadd.f32 %v1513_v5, %v620_v25  ;;  %v998_v30 = vadd.f32 %v1513_v5, %v700_v26  ;;  %v622_v31 = vpop.f32.mrb[15].mxu0  ;;  %v702_v32 = vpop.f32.mrb[15].mxu1 }
 0x142   :  { %v1029_v33 = vmax.f32 %v965_v23, 0.0  ;;  %v1061_v34 = vmax.f32 %v997_v24, 0.0  ;;  %v967_v35 = vadd.f32 %v1515_v6, %v622_v31  ;;  %v999_v36 = vadd.f32 %v1515_v6, %v702_v32 }
 0x143   :  { %1086 = vst [vmem:[%s1776_s3 + $0x30] sm:$0xff] %v1028_v27  ;;  %1102 = vst [vmem:[%s1776_s3 + $0xb0] sm:$0xff] %v1060_v28  ;;  %v1030_v37 = vmax.f32 %v966_v29, 0.0  ;;  %v1062_v38 = vmax.f32 %v998_v30, 0.0 }
 0x144   :  { %1118 = vst [vmem:[%s1777_s4 + $0x30] sm:$0xff] %v1029_v33  ;;  %1134 = vst [vmem:[%s1777_s4 + $0xb0] sm:$0xff] %v1061_v34  ;;  %v1031_v39 = vmax.f32 %v967_v35, 0.0  ;;  %v1063_v40 = vmax.f32 %v999_v36, 0.0 }
 0x145   :  { %1087 = vst [vmem:[%s1776_s3 + $0x38] sm:$0xff] %v1030_v37  ;;  %1103 = vst [vmem:[%s1776_s3 + $0xb8] sm:$0xff] %v1062_v38 }
 0x146   :  { %1119 = vst [vmem:[%s1777_s4 + $0x38] sm:$0xff] %v1031_v39  ;;  %1135 = vst [vmem:[%s1777_s4 + $0xb8] sm:$0xff] %v1063_v40  ;;  %v626_v41 = vpop.f32.mrb[16].mxu0  ;;  %v706_v42 = vpop.f32.mrb[16].mxu1 }
 0x147   :  { %v968_v43 = vadd.f32 %v1513_v5, %v626_v41  ;;  %v1000_v44 = vadd.f32 %v1513_v5, %v706_v42  ;;  %v628_v45 = vpop.f32.mrb[17].mxu0  ;;  %v708_v46 = vpop.f32.mrb[17].mxu1 }
 0x148   :  { %v969_v47 = vadd.f32 %v1515_v6, %v628_v45  ;;  %v1001_v48 = vadd.f32 %v1515_v6, %v708_v46  ;;  %v630_v49 = vpop.f32.mrb[18].mxu0  ;;  %v710_v50 = vpop.f32.mrb[18].mxu1 }
 0x149   :  { %v1032_v51 = vmax.f32 %v968_v43, 0.0  ;;  %v1064_v52 = vmax.f32 %v1000_v44, 0.0  ;;  %v970_v53 = vadd.f32 %v1513_v5, %v630_v49  ;;  %v1002_v54 = vadd.f32 %v1513_v5, %v710_v50  ;;  %v632_v55 = vpop.f32.mrb[19].mxu0  ;;  %v712_v56 = vpop.f32.mrb[19].mxu1 }
 0x14a   :  { %v1033_v57 = vmax.f32 %v969_v47, 0.0  ;;  %v1065_v58 = vmax.f32 %v1001_v48, 0.0  ;;  %v971_v59 = vadd.f32 %v1515_v6, %v632_v55  ;;  %v1003_v60 = vadd.f32 %v1515_v6, %v712_v56 }
 0x14b   :  { %1088 = vst [vmem:[%s1776_s3 + $0x40] sm:$0xff] %v1032_v51  ;;  %1104 = vst [vmem:[%s1776_s3 + $0xc0] sm:$0xff] %v1064_v52  ;;  %v1034_v61 = vmax.f32 %v970_v53, 0.0  ;;  %v1066_v62 = vmax.f32 %v1002_v54, 0.0 }
 0x14c   :  { %1120 = vst [vmem:[%s1777_s4 + $0x40] sm:$0xff] %v1033_v57  ;;  %1136 = vst [vmem:[%s1777_s4 + $0xc0] sm:$0xff] %v1065_v58  ;;  %v1035_v63 = vmax.f32 %v971_v59, 0.0  ;;  %v1067_v0 = vmax.f32 %v1003_v60, 0.0 }
 0x14d   :  { %1089 = vst [vmem:[%s1776_s3 + $0x48] sm:$0xff] %v1034_v61  ;;  %1105 = vst [vmem:[%s1776_s3 + $0xc8] sm:$0xff] %v1066_v62 }
 0x14e   :  { %1121 = vst [vmem:[%s1777_s4 + $0x48] sm:$0xff] %v1035_v63  ;;  %1137 = vst [vmem:[%s1777_s4 + $0xc8] sm:$0xff] %v1067_v0  ;;  %v636_v1 = vpop.f32.mrb[20].mxu0  ;;  %v716_v2 = vpop.f32.mrb[20].mxu1 }
 0x14f   :  { %v972_v3 = vadd.f32 %v1513_v5, %v636_v1  ;;  %v1004_v4 = vadd.f32 %v1513_v5, %v716_v2  ;;  %v638_v7 = vpop.f32.mrb[21].mxu0  ;;  %v718_v8 = vpop.f32.mrb[21].mxu1 }
 0x150   :  { %v973_v9 = vadd.f32 %v1515_v6, %v638_v7  ;;  %v1005_v10 = vadd.f32 %v1515_v6, %v718_v8  ;;  %v640_v11 = vpop.f32.mrb[22].mxu0  ;;  %v720_v12 = vpop.f32.mrb[22].mxu1 }
 0x151   :  { %v1036_v13 = vmax.f32 %v972_v3, 0.0  ;;  %v1068_v14 = vmax.f32 %v1004_v4, 0.0  ;;  %v974_v15 = vadd.f32 %v1513_v5, %v640_v11  ;;  %v1006_v16 = vadd.f32 %v1513_v5, %v720_v12  ;;  %v642_v17 = vpop.f32.mrb[23].mxu0  ;;  %v722_v18 = vpop.f32.mrb[23].mxu1 }
 0x152   :  { %v1037_v19 = vmax.f32 %v973_v9, 0.0  ;;  %v1069_v20 = vmax.f32 %v1005_v10, 0.0  ;;  %v975_v21 = vadd.f32 %v1515_v6, %v642_v17  ;;  %v1007_v22 = vadd.f32 %v1515_v6, %v722_v18 }
 0x153   :  { %1090 = vst [vmem:[%s1776_s3 + $0x50] sm:$0xff] %v1036_v13  ;;  %1106 = vst [vmem:[%s1776_s3 + $0xd0] sm:$0xff] %v1068_v14  ;;  %v1038_v23 = vmax.f32 %v974_v15, 0.0  ;;  %v1070_v24 = vmax.f32 %v1006_v16, 0.0 }
 0x154   :  { %1122 = vst [vmem:[%s1777_s4 + $0x50] sm:$0xff] %v1037_v19  ;;  %1138 = vst [vmem:[%s1777_s4 + $0xd0] sm:$0xff] %v1069_v20  ;;  %v1039_v25 = vmax.f32 %v975_v21, 0.0  ;;  %v1071_v26 = vmax.f32 %v1007_v22, 0.0 }
 0x155   :  { %1091 = vst [vmem:[%s1776_s3 + $0x58] sm:$0xff] %v1038_v23  ;;  %1107 = vst [vmem:[%s1776_s3 + $0xd8] sm:$0xff] %v1070_v24 }
 0x156   :  { %1123 = vst [vmem:[%s1777_s4 + $0x58] sm:$0xff] %v1039_v25  ;;  %1139 = vst [vmem:[%s1777_s4 + $0xd8] sm:$0xff] %v1071_v26  ;;  %v646_v27 = vpop.f32.mrb[24].mxu0  ;;  %v726_v28 = vpop.f32.mrb[24].mxu1 }
 0x157   :  { %v976_v29 = vadd.f32 %v1513_v5, %v646_v27  ;;  %v1008_v30 = vadd.f32 %v1513_v5, %v726_v28  ;;  %v648_v31 = vpop.f32.mrb[25].mxu0  ;;  %v728_v32 = vpop.f32.mrb[25].mxu1 }
 0x158   :  { %v977_v33 = vadd.f32 %v1515_v6, %v648_v31  ;;  %v1009_v34 = vadd.f32 %v1515_v6, %v728_v32  ;;  %v650_v35 = vpop.f32.mrb[26].mxu0  ;;  %v730_v36 = vpop.f32.mrb[26].mxu1 }
 0x159   :  { %v1040_v37 = vmax.f32 %v976_v29, 0.0  ;;  %v1072_v38 = vmax.f32 %v1008_v30, 0.0  ;;  %v978_v39 = vadd.f32 %v1513_v5, %v650_v35  ;;  %v1010_v40 = vadd.f32 %v1513_v5, %v730_v36  ;;  %v652_v41 = vpop.f32.mrb[27].mxu0  ;;  %v732_v42 = vpop.f32.mrb[27].mxu1 }
 0x15a   :  { %v1041_v43 = vmax.f32 %v977_v33, 0.0  ;;  %v1073_v44 = vmax.f32 %v1009_v34, 0.0  ;;  %v979_v45 = vadd.f32 %v1515_v6, %v652_v41  ;;  %v1011_v46 = vadd.f32 %v1515_v6, %v732_v42 }
 0x15b   :  { %1092 = vst [vmem:[%s1776_s3 + $0x60] sm:$0xff] %v1040_v37  ;;  %1108 = vst [vmem:[%s1776_s3 + $0xe0] sm:$0xff] %v1072_v38  ;;  %v1042_v47 = vmax.f32 %v978_v39, 0.0  ;;  %v1074_v48 = vmax.f32 %v1010_v40, 0.0 }
 0x15c   :  { %1124 = vst [vmem:[%s1777_s4 + $0x60] sm:$0xff] %v1041_v43  ;;  %1140 = vst [vmem:[%s1777_s4 + $0xe0] sm:$0xff] %v1073_v44  ;;  %v1043_v49 = vmax.f32 %v979_v45, 0.0  ;;  %v1075_v50 = vmax.f32 %v1011_v46, 0.0 }
 0x15d   :  { %1093 = vst [vmem:[%s1776_s3 + $0x68] sm:$0xff] %v1042_v47  ;;  %1109 = vst [vmem:[%s1776_s3 + $0xe8] sm:$0xff] %v1074_v48 }
 0x15e   :  { %1125 = vst [vmem:[%s1777_s4 + $0x68] sm:$0xff] %v1043_v49  ;;  %1141 = vst [vmem:[%s1777_s4 + $0xe8] sm:$0xff] %v1075_v50  ;;  %v656_v51 = vpop.f32.mrb[28].mxu0  ;;  %v736_v52 = vpop.f32.mrb[28].mxu1 }
 0x15f   :  { %v980_v53 = vadd.f32 %v1513_v5, %v656_v51  ;;  %v1012_v54 = vadd.f32 %v1513_v5, %v736_v52  ;;  %v658_v55 = vpop.f32.mrb[29].mxu0  ;;  %v738_v56 = vpop.f32.mrb[29].mxu1 }
 0x160   :  { %v981_v57 = vadd.f32 %v1515_v6, %v658_v55  ;;  %v1013_v58 = vadd.f32 %v1515_v6, %v738_v56  ;;  %v660_v59 = vpop.f32.mrb[30].mxu0  ;;  %v740_v60 = vpop.f32.mrb[30].mxu1 }
 0x161   :  { %v1044_v61 = vmax.f32 %v980_v53, 0.0  ;;  %v1076_v62 = vmax.f32 %v1012_v54, 0.0  ;;  %v982_v63 = vadd.f32 %v1513_v5, %v660_v59  ;;  %v1014_v0 = vadd.f32 %v1513_v5, %v740_v60  ;;  %v662_v1 = vpop.f32.mrb[31].mxu0  ;;  %v742_v2 = vpop.f32.mrb[31].mxu1 }
 0x162   :  { %v1045_v3 = vmax.f32 %v981_v57, 0.0  ;;  %v1077_v4 = vmax.f32 %v1013_v58, 0.0  ;;  %v983_v7 = vadd.f32 %v1515_v6, %v662_v1  ;;  %v1015_v8 = vadd.f32 %v1515_v6, %v742_v2 }
 0x163   :  { %1094 = vst [vmem:[%s1776_s3 + $0x70] sm:$0xff] %v1044_v61  ;;  %1110 = vst [vmem:[%s1776_s3 + $0xf0] sm:$0xff] %v1076_v62  ;;  %v1046_v9 = vmax.f32 %v982_v63, 0.0  ;;  %v1078_v10 = vmax.f32 %v1014_v0, 0.0 }
 0x164   :  { %1126 = vst [vmem:[%s1777_s4 + $0x70] sm:$0xff] %v1045_v3  ;;  %1142 = vst [vmem:[%s1777_s4 + $0xf0] sm:$0xff] %v1077_v4  ;;  %v1047_v5 = vmax.f32 %v983_v7, 0.0  ;;  %v1079_v6 = vmax.f32 %v1015_v8, 0.0 }
 0x165   :  { %1095 = vst [vmem:[%s1776_s3 + $0x78] sm:$0xff] %v1046_v9  ;;  %1111 = vst [vmem:[%s1776_s3 + $0xf8] sm:$0xff] %v1078_v10 }
 0x166   :  { %1127 = vst [vmem:[%s1777_s4 + $0x78] sm:$0xff] %v1047_v5  ;;  %1143 = vst [vmem:[%s1777_s4 + $0xf8] sm:$0xff] %v1079_v6 }
 0x167   :  { %1152 = vsyncpa [#allocation4], 1 }

// kernel: informax_forward.7
= control target key start
LH: loop header
LB: loop body
LE: loop exit
PB: predicated region body
PF: predicated region fallthrough
CT: control target
= control target key end

     0   :  { %v1812_v1 = vmov 0   ;;  %s2157_s1 = inlined_call_operand.vmem [shape: bf16[256,128], index: 1, kind: input, shape index: {}]   ;;  %s2158_s0 = inlined_call_operand.vmem [shape: bf16[256,256], index: 0, kind: input, shape index: {}]   ;;  %s2159_s2 = inlined_call_operand.vmem [shape: f32[256,1], index: 2, kind: input, shape index: {}]   ;;  %s2160_s3 = inlined_call_operand.vmem [shape: bf16[256,128], index: 3, kind: output, shape index: {}]  }
   0x1   :  { %v1620_v0 = vld [vmem:[%s2157_s1 + $0x40] sm:$0xff]   ;;  %1619 = vset.pattern.permute.xlu1 %v1812_v1  ;;  %1618 = vset.pattern.permute.xlu0 %v1812_v1  ;;  %v1622_v3 = vld [vmem:[%s2157_s1 + $0x48] sm:$0xff]   ;;  %v1624_v5 = vld [vmem:[%s2157_s1 + $0x50] sm:$0xff]  }
   0x2   :  { %v1621_v2 = vld [vmem:[%s2157_s1] sm:$0xff]   ;;  %1489 = vmatprep.subr.bf16.mxu0 %v1620_v0  ;;  %1601 = vmatprep.subr.bf16.mxu1 %v1620_v0  ;;  %v1623_v4 = vld [vmem:[%s2157_s1 + $0x8] sm:$0xff]   ;;  %v1625_v6 = vld [vmem:[%s2157_s1 + $0x10] sm:$0xff]  }
   0x3   :  { %1490 = vmatpush3.bf16.msra.mxu0 %v1621_v2  ;;  %1609 = vmatpush3.bf16.msra.mxu1 %v1621_v2  ;;  %v1626_v7 = vld [vmem:[%s2157_s1 + $0x58] sm:$0xff]   ;;  %v1628_v9 = vld [vmem:[%s2157_s1 + $0x60] sm:$0xff]   ;;  %v1630_v11 = vld [vmem:[%s2157_s1 + $0x68] sm:$0xff]  }
   0x4   :  { %1491 = vmatprep.subr.bf16.mxu0 %v1622_v3  ;;  %1602 = vmatprep.subr.bf16.mxu1 %v1622_v3  ;;  %v1627_v8 = vld [vmem:[%s2157_s1 + $0x18] sm:$0xff]   ;;  %v1629_v10 = vld [vmem:[%s2157_s1 + $0x20] sm:$0xff]   ;;  %v1631_v14 = vld [vmem:[%s2157_s1 + $0x28] sm:$0xff]  }
   0x5   :  { %v1638_v12 = vld [vmem:[%s2158_s0 + $0x4] ss:$8 sps:$4 sm:$0xff]   ;;  %v1632_v15 = vld [vmem:[%s2157_s1 + $0x70] sm:$0xff]   ;;  %v1634_v17 = vld [vmem:[%s2157_s1 + $0x78] sm:$0xff]  }
   0x6   :  { %v1641_v13 = vld [vmem:[%s2158_s0 + $0x84] ss:$8 sps:$4 sm:$0xff]   ;;  %440 = vmatprep.mubr.bf16.mxu0 %v1638_v12  ;;  %v1633_v16 = vld [vmem:[%s2157_s1 + $0x30] sm:$0xff]   ;;  %v1635_v19 = vld [vmem:[%s2157_s1 + $0x38] sm:$0xff]  }
   0x7   :  { %1492 = vmatpush3.bf16.msra.mxu0 %v1623_v4  ;;  %1610 = vmatpush3.bf16.msra.mxu1 %v1623_v4  ;;  %v670_v18 = vld [vmem:[%s2159_s2 + $0x10] sm:$0xff]  ;;  %v668_v20 = vld [vmem:[%s2159_s2] sm:$0xff]  ;;  %v671_v23 = vld [vmem:[%s2159_s2 + $0x18] sm:$0xff] }
   0x8   :  { %1493 = vmatprep.subr.bf16.mxu0 %v1624_v5  ;;  %1603 = vmatprep.subr.bf16.mxu1 %v1624_v5  ;;  %v1636_v21 = vld [vmem:[%s2158_s0] ss:$8 sps:$4 sm:$0xff]   ;;  %v1642_v25 = vld [vmem:[%s2158_s0 + $0x14] ss:$8 sps:$4 sm:$0xff]   ;;  %v1646_v29 = vld [vmem:[%s2158_s0 + $0x10] ss:$8 sps:$4 sm:$0xff]  }
   0x9   :  { %504 = vmatprep.mubr.bf16.mxu1 %v1641_v13  ;;  %712 = vperm.xlu1 %1619, %v670_v18   ;;  %v1639_v22 = vld [vmem:[%s2158_s0 + $0x80] ss:$8 sps:$4 sm:$0xff]   ;;  %v1644_v26 = vld [vmem:[%s2158_s0 + $0x94] ss:$8 sps:$4 sm:$0xff]   ;;  %v1647_v30 = vld [vmem:[%s2158_s0 + $0x90] ss:$8 sps:$4 sm:$0xff]  }
   0xa   :  { %702 = vperm.xlu0 %1618, %v668_v20   ;;  %v669_v24 = vld [vmem:[%s2159_s2 + $0x8] sm:$0xff]  ;;  %v672_v28 = vld [vmem:[%s2159_s2 + $0x20] sm:$0xff]  ;;  %v675_v31 = vld [vmem:[%s2159_s2 + $0x38] sm:$0xff] }
   0xb   :  { %1494 = vmatpush3.bf16.msra.mxu0 %v1625_v6  ;;  %1611 = vmatpush3.bf16.msra.mxu1 %v1625_v6  ;;  %v673_v27 = vld [vmem:[%s2159_s2 + $0x28] sm:$0xff]  ;;  %v674_v32 = vld [vmem:[%s2159_s2 + $0x30] sm:$0xff]  ;;  %v676_v36 = vld [vmem:[%s2159_s2 + $0x40] sm:$0xff] }
   0xc   :  { %1495 = vmatprep.subr.bf16.mxu0 %v1626_v7  ;;  %1604 = vmatprep.subr.bf16.mxu1 %v1626_v7  ;;  %v1648_v33 = vld [vmem:[%s2158_s0 + $0x24] ss:$8 sps:$4 sm:$0xff]   ;;  %v1652_v37 = vld [vmem:[%s2158_s0 + $0x20] ss:$8 sps:$4 sm:$0xff]   ;;  %v679_v39 = vld [vmem:[%s2159_s2 + $0x58] sm:$0xff] }
   0xd   :  { %717 = vperm.xlu1 %1619, %v671_v23   ;;  %v1650_v34 = vld [vmem:[%s2158_s0 + $0xa4] ss:$8 sps:$4 sm:$0xff]   ;;  %v1653_v38 = vld [vmem:[%s2158_s0 + $0xa0] ss:$8 sps:$4 sm:$0xff]   ;;  %v678_v40 = vld [vmem:[%s2159_s2 + $0x50] sm:$0xff] }
   0xe   :  { %707 = vperm.xlu0 %1618, %v669_v24   ;;  %v677_v35 = vld [vmem:[%s2159_s2 + $0x48] sm:$0xff]  ;;  %v1654_v41 = vld [vmem:[%s2158_s0 + $0x34] ss:$8 sps:$4 sm:$0xff]   ;;  %v680_v44 = vld [vmem:[%s2159_s2 + $0x60] sm:$0xff] }
   0xf   :  { %1496 = vmatpush3.bf16.msra.mxu0 %v1627_v8  ;;  %1612 = vmatpush3.bf16.msra.mxu1 %v1627_v8  ;;  %v1656_v42 = vld [vmem:[%s2158_s0 + $0xb4] ss:$8 sps:$4 sm:$0xff]   ;;  %v681_v43 = vld [vmem:[%s2159_s2 + $0x68] sm:$0xff]  ;;  %v1658_v45 = vld [vmem:[%s2158_s0 + $0x30] ss:$8 sps:$4 sm:$0xff]  }
  0x10   :  { %1497 = vmatprep.subr.bf16.mxu0 %v1628_v9  ;;  %1605 = vmatprep.subr.bf16.mxu1 %v1628_v9  ;;  %v1659_v46 = vld [vmem:[%s2158_s0 + $0xb0] ss:$8 sps:$4 sm:$0xff]   ;;  %v1660_v49 = vld [vmem:[%s2158_s0 + $0x44] ss:$8 sps:$4 sm:$0xff]   ;;  %v1664_v53 = vld [vmem:[%s2158_s0 + $0x40] ss:$8 sps:$4 sm:$0xff]  }
  0x11   :  { %727 = vperm.xlu1 %1619, %v673_v27   ;;  %v683_v47 = vld [vmem:[%s2159_s2 + $0x78] sm:$0xff]  ;;  %v682_v48 = vld [vmem:[%s2159_s2 + $0x70] sm:$0xff]  ;;  %v1662_v50 = vld [vmem:[%s2158_s0 + $0xc4] ss:$8 sps:$4 sm:$0xff]  }
  0x12   :  { %722 = vperm.xlu0 %1618, %v672_v28   ;;  %v685_v51 = vld [vmem:[%s2159_s2 + $0x88] sm:$0xff]  ;;  %v684_v52 = vld [vmem:[%s2159_s2 + $0x80] sm:$0xff]  ;;  %v687_v55 = vld [vmem:[%s2159_s2 + $0x98] sm:$0xff] }
  0x13   :  { %1498 = vmatpush3.bf16.msra.mxu0 %v1629_v10  ;;  %1613 = vmatpush3.bf16.msra.mxu1 %v1629_v10  ;;  %v1665_v54 = vld [vmem:[%s2158_s0 + $0xc0] ss:$8 sps:$4 sm:$0xff]   ;;  %v686_v56 = vld [vmem:[%s2159_s2 + $0x90] sm:$0xff]  ;;  %v691_v63 = vld [vmem:[%s2159_s2 + $0xb8] sm:$0xff] }
  0x14   :  { %1499 = vmatprep.subr.bf16.mxu0 %v1630_v11  ;;  %1606 = vmatprep.subr.bf16.mxu1 %v1630_v11  ;;  %v1666_v57 = vld [vmem:[%s2158_s0 + $0x54] ss:$8 sps:$4 sm:$0xff]   ;;  %v689_v59 = vld [vmem:[%s2159_s2 + $0xa8] sm:$0xff]  ;;  %v688_v60 = vld [vmem:[%s2159_s2 + $0xa0] sm:$0xff] }
  0x15   :  { %737 = vperm.xlu1 %1619, %v675_v31   ;;  %v1668_v58 = vld [vmem:[%s2158_s0 + $0xd4] ss:$8 sps:$4 sm:$0xff]   ;;  %v1670_v61 = vld [vmem:[%s2158_s0 + $0x50] ss:$8 sps:$4 sm:$0xff]   ;;  %v1672_v1 = vld [vmem:[%s2158_s0 + $0x64] ss:$8 sps:$4 sm:$0xff]  }
  0x16   :  { %732 = vperm.xlu0 %1618, %v674_v32   ;;  %v1671_v62 = vld [vmem:[%s2158_s0 + $0xd0] ss:$8 sps:$4 sm:$0xff]   ;;  %v1674_v2 = vld [vmem:[%s2158_s0 + $0xe4] ss:$8 sps:$4 sm:$0xff]   ;;  %v1676_v5 = vld [vmem:[%s2158_s0 + $0x60] ss:$8 sps:$4 sm:$0xff]  }
  0x17   :  { %1500 = vmatpush3.bf16.msra.mxu0 %v1631_v14  ;;  %1614 = vmatpush3.bf16.msra.mxu1 %v1631_v14  ;;  %v690_v0 = vld [vmem:[%s2159_s2 + $0xb0] sm:$0xff]  ;;  %v693_v3 = vld [vmem:[%s2159_s2 + $0xc8] sm:$0xff]  ;;  %v692_v4 = vld [vmem:[%s2159_s2 + $0xc0] sm:$0xff] }
  0x18   :  { %1501 = vmatprep.subr.bf16.mxu0 %v1632_v15  ;;  %1607 = vmatprep.subr.bf16.mxu1 %v1632_v15  ;;  %v1677_v6 = vld [vmem:[%s2158_s0 + $0xe0] ss:$8 sps:$4 sm:$0xff]   ;;  %v695_v7 = vld [vmem:[%s2159_s2 + $0xd8] sm:$0xff]  ;;  %v694_v8 = vld [vmem:[%s2159_s2 + $0xd0] sm:$0xff] }
  0x19   :  { %747 = vperm.xlu1 %1619, %v677_v35   ;;  %v1678_v9 = vld [vmem:[%s2158_s0 + $0x74] ss:$8 sps:$4 sm:$0xff]   ;;  %v697_v11 = vld [vmem:[%s2159_s2 + $0xe8] sm:$0xff]  ;;  %v696_v12 = vld [vmem:[%s2159_s2 + $0xe0] sm:$0xff] }
  0x1a   :  { %742 = vperm.xlu0 %1618, %v676_v36   ;;  %v1680_v10 = vld [vmem:[%s2158_s0 + $0xf4] ss:$8 sps:$4 sm:$0xff]   ;;  %v1682_v13 = vld [vmem:[%s2158_s0 + $0x70] ss:$8 sps:$4 sm:$0xff]  }
  0x1b   :  { %1502 = vmatpush3.bf16.msra.mxu0 %v1633_v16  ;;  %1615 = vmatpush3.bf16.msra.mxu1 %v1633_v16  ;;  %v1683_v14 = vld [vmem:[%s2158_s0 + $0xf0] ss:$8 sps:$4 sm:$0xff]  }
  0x1c   :  { %1503 = vmatprep.subr.bf16.mxu0 %v1634_v17  ;;  %1608 = vmatprep.subr.bf16.mxu1 %v1634_v17  ;;  %v699_v15 = vld [vmem:[%s2159_s2 + $0xf8] sm:$0xff]  ;;  %v698_v16 = vld [vmem:[%s2159_s2 + $0xf0] sm:$0xff] }
  0x1d   :  { %757 = vperm.xlu1 %1619, %v679_v39  }
  0x1e   :  { %752 = vperm.xlu0 %1618, %v678_v40  }
  0x1f   :  { %1504 = vmatpush3.bf16.msra.mxu0 %v1635_v19  ;;  %1616 = vmatpush3.bf16.msra.mxu1 %v1635_v19 }
  0x21   :  { %767 = vperm.xlu1 %1619, %v681_v43  }
  0x22   :  { %441 = vmatmul.mubr.bf16.vlgmr.msra.gmra.mrb[0].mxu0 %v1636_v21  ;;  %505 = vmatmul.mubr.bf16.vlgmr.msra.gmra.mrb[0].mxu1 %v1639_v22 }
  0x23   :  { %448 = vmatprep.mubr.bf16.mxu0 %v1642_v25  ;;  %512 = vmatprep.mubr.bf16.mxu1 %v1644_v26 }
  0x24   :  { %762 = vperm.xlu0 %1618, %v680_v44  }
  0x25   :  { %777 = vperm.xlu1 %1619, %v683_v47  }
  0x28   :  { %772 = vperm.xlu0 %1618, %v682_v48  }
  0x29   :  { %787 = vperm.xlu1 %1619, %v685_v51  }
  0x2a   :  { %449 = vmatmul.mubr.bf16.gmra.mrb[4].mxu0 %v1646_v29  ;;  %513 = vmatmul.mubr.bf16.gmra.mrb[4].mxu1 %v1647_v30 }
  0x2b   :  { %456 = vmatprep.mubr.bf16.mxu0 %v1648_v33  ;;  %520 = vmatprep.mubr.bf16.mxu1 %v1650_v34 }
  0x2c   :  { %782 = vperm.xlu0 %1618, %v684_v52  }
  0x2d   :  { %797 = vperm.xlu1 %1619, %v687_v55  }
  0x30   :  { %792 = vperm.xlu0 %1618, %v686_v56  }
  0x31   :  { %807 = vperm.xlu1 %1619, %v689_v59  }
  0x32   :  { %457 = vmatmul.mubr.bf16.gmra.mrb[8].mxu0 %v1652_v37  ;;  %521 = vmatmul.mubr.bf16.gmra.mrb[8].mxu1 %v1653_v38 }
  0x33   :  { %464 = vmatprep.mubr.bf16.mxu0 %v1654_v41  ;;  %528 = vmatprep.mubr.bf16.mxu1 %v1656_v42 }
  0x34   :  { %802 = vperm.xlu0 %1618, %v688_v60  }
  0x35   :  { %817 = vperm.xlu1 %1619, %v691_v63  }
  0x38   :  { %812 = vperm.xlu0 %1618, %v690_v0  }
  0x39   :  { %827 = vperm.xlu1 %1619, %v693_v3  }
  0x3a   :  { %465 = vmatmul.mubr.bf16.gmra.mrb[12].mxu0 %v1658_v45  ;;  %529 = vmatmul.mubr.bf16.gmra.mrb[12].mxu1 %v1659_v46 }
  0x3b   :  { %472 = vmatprep.mubr.bf16.mxu0 %v1660_v49  ;;  %536 = vmatprep.mubr.bf16.mxu1 %v1662_v50 }
  0x3c   :  { %822 = vperm.xlu0 %1618, %v692_v4  }
  0x3d   :  { %837 = vperm.xlu1 %1619, %v695_v7  }
  0x40   :  { %832 = vperm.xlu0 %1618, %v694_v8  }
  0x41   :  { %847 = vperm.xlu1 %1619, %v697_v11  }
  0x42   :  { %473 = vmatmul.mubr.bf16.gmra.mrb[16].mxu0 %v1664_v53  ;;  %537 = vmatmul.mubr.bf16.gmra.mrb[16].mxu1 %v1665_v54 }
  0x43   :  { %480 = vmatprep.mubr.bf16.mxu0 %v1666_v57  ;;  %544 = vmatprep.mubr.bf16.mxu1 %v1668_v58 }
  0x44   :  { %842 = vperm.xlu0 %1618, %v696_v12  }
  0x45   :  { %857 = vperm.xlu1 %1619, %v699_v15  }
  0x48   :  { %852 = vperm.xlu0 %1618, %v698_v16  }
  0x4a   :  { %481 = vmatmul.mubr.bf16.gmra.mrb[20].mxu0 %v1670_v61  ;;  %545 = vmatmul.mubr.bf16.gmra.mrb[20].mxu1 %v1671_v62 }
  0x4b   :  { %488 = vmatprep.mubr.bf16.mxu0 %v1672_v1  ;;  %552 = vmatprep.mubr.bf16.mxu1 %v1674_v2 }
  0x52   :  { %489 = vmatmul.mubr.bf16.gmra.mrb[24].mxu0 %v1676_v5  ;;  %553 = vmatmul.mubr.bf16.gmra.mrb[24].mxu1 %v1677_v6 }
  0x53   :  { %496 = vmatprep.mubr.bf16.mxu0 %v1678_v9  ;;  %560 = vmatprep.mubr.bf16.mxu1 %v1680_v10 }
  0x5a   :  { %497 = vmatmul.mubr.bf16.gmra.mrb[28].mxu0 %v1682_v13  ;;  %561 = vmatmul.mubr.bf16.gmra.mrb[28].mxu1 %v1683_v14 }
  0x88   :  { %v713_v18 = vpop.permute.xlu1 %712 }
  0x89   :  { %v703_v17 = vpop.permute.xlu0 %702 }
  0x8c   :  { %v718_v20 = vpop.permute.xlu1 %717 }
  0x8d   :  { %v708_v19 = vpop.permute.xlu0 %707 }
  0x90   :  { %v2075_v22 = vpop.permute.xlu1 %727 }
  0x91   :  { %v2073_v21 = vpop.permute.xlu0 %722 }
  0x94   :  { %v2079_v24 = vpop.permute.xlu1 %737 }
  0x95   :  { %v2077_v23 = vpop.permute.xlu0 %732 }
  0x98   :  { %v2083_v26 = vpop.permute.xlu1 %747 }
  0x99   :  { %v2081_v25 = vpop.permute.xlu0 %742 }
  0x9c   :  { %v2087_v28 = vpop.permute.xlu1 %757 }
  0x9d   :  { %v2085_v27 = vpop.permute.xlu0 %752 }
  0xa0   :  { %v2091_v30 = vpop.permute.xlu1 %767 }
  0xa3   :  { %v2089_v29 = vpop.permute.xlu0 %762 }
  0xa4   :  { %v2095_v32 = vpop.permute.xlu1 %777 }
  0xa7   :  { %v2093_v31 = vpop.permute.xlu0 %772 }
  0xa8   :  { %v788_v48 = vpop.permute.xlu1 %787 }
  0xab   :  { %v783_v33 = vpop.permute.xlu0 %782 }
  0xac   :  { %v798_v6 = vpop.permute.xlu1 %797 }
  0xaf   :  { %v793_v53 = vpop.permute.xlu0 %792 }
  0xb3   :  { %v803_v11 = vpop.permute.xlu0 %802 }
  0xf5   :  { %v1505_v34 = vpop.f32.mrb[0].mxu0  ;;  %v1553_v35 = vpop.f32.mrb[0].mxu1 }
  0xf6   :  { %v1506_v36 = vpop.f32.mrb[1].mxu0  ;;  %v1554_v37 = vpop.f32.mrb[1].mxu1 }
  0xf7   :  { %v1507_v38 = vadd.f32 %v1506_v36, %v1505_v34  ;;  %v1555_v39 = vadd.f32 %v1554_v37, %v1553_v35  ;;  %v1508_v40 = vpop.f32.mrb[2].mxu0  ;;  %v1556_v41 = vpop.f32.mrb[2].mxu1 }
  0xf8   :  { %v1509_v42 = vpop.f32.mrb[3].mxu0  ;;  %v1557_v43 = vpop.f32.mrb[3].mxu1 }
  0xf9   :  { %v860_v44 = vmul.f32 %v1507_v38, %v703_v17  ;;  %v876_v45 = vmul.f32 %v1555_v39, %v783_v33  ;;  %v1510_v46 = vadd.f32 %v1509_v42, %v1508_v40  ;;  %v1558_v47 = vadd.f32 %v1557_v43, %v1556_v41 }
  0xfb   :  { %v1298_v49 = vmul.f32 -1.442695, %v860_v44  ;;  %v1314_v50 = vmul.f32 -1.442695, %v876_v45  ;;  %v861_v51 = vmul.f32 %v1510_v46, %v708_v19  ;;  %v877_v52 = vmul.f32 %v1558_v47, %v788_v48  ;;  %v808_v47 = vpop.permute.xlu1 %807 }
  0xfd   :  { %1684 = vpow2.f32 %v1298_v49  ;;  %v1299_v54 = vmul.f32 -1.442695, %v861_v51  ;;  %v1315_v55 = vmul.f32 -1.442695, %v877_v52  ;;  %v1511_v56 = vpop.f32.mrb[4].mxu0  ;;  %v1559_v57 = vpop.f32.mrb[4].mxu1 }
  0xfe   :  { %1686 = vpow2.f32 %v1314_v50  ;;  %v1512_v58 = vpop.f32.mrb[5].mxu0  ;;  %v1560_v59 = vpop.f32.mrb[5].mxu1 }
  0xff   :  { %1688 = vpow2.f32 %v1299_v54  ;;  %v1513_v60 = vadd.f32 %v1512_v58, %v1511_v56  ;;  %v1561_v61 = vadd.f32 %v1560_v59, %v1559_v57  ;;  %v1514_v62 = vpop.f32.mrb[6].mxu0  ;;  %v1562_v63 = vpop.f32.mrb[6].mxu1 }
 0x100   :  { %1690 = vpow2.f32 %v1315_v55  ;;  %v1515_v0 = vpop.f32.mrb[7].mxu0  ;;  %v1563_v1 = vpop.f32.mrb[7].mxu1 }
 0x101   :  { %v862_v2 = vmul.f32 %v1513_v60, %v713_v18  ;;  %v878_v3 = vmul.f32 %v1561_v61, %v793_v53  ;;  %v1516_v4 = vadd.f32 %v1515_v0, %v1514_v62  ;;  %v1564_v5 = vadd.f32 %v1563_v1, %v1562_v63  ;;  %v813_v51 = vpop.permute.xlu0 %812 }
 0x103   :  { %v1300_v7 = vmul.f32 -1.442695, %v862_v2  ;;  %v1316_v8 = vmul.f32 -1.442695, %v878_v3  ;;  %v863_v9 = vmul.f32 %v1516_v4, %v718_v20  ;;  %v879_v10 = vmul.f32 %v1564_v5, %v798_v6 }
 0x105   :  { %1692 = vpow2.f32 %v1300_v7  ;;  %v1301_v12 = vmul.f32 -1.442695, %v863_v9  ;;  %v1317_v13 = vmul.f32 -1.442695, %v879_v10  ;;  %v1517_v14 = vpop.f32.mrb[8].mxu0  ;;  %v1565_v15 = vpop.f32.mrb[8].mxu1 }
 0x106   :  { %1694 = vpow2.f32 %v1316_v8  ;;  %v1518_v16 = vpop.f32.mrb[9].mxu0  ;;  %v1566_v17 = vpop.f32.mrb[9].mxu1 }
 0x107   :  { %v1685_v19 = vpop.eup %1684  ;;  %1696 = vpow2.f32 %v1301_v12  ;;  %v1519_v18 = vadd.f32 %v1518_v16, %v1517_v14  ;;  %v1567_v33 = vadd.f32 %v1566_v17, %v1565_v15  ;;  %v1520_v34 = vpop.f32.mrb[10].mxu0 }
 0x108   :  { %v1568_v35 = vpop.f32.mrb[10].mxu1  ;;  %v1687_v36 = vpop.eup %1686  ;;  %v988_v37 = vadd.f32 1.0, %v1685_v19  ;;  %1698 = vpow2.f32 %v1317_v13 }
 0x109   :  { %v1521_v20 = vpop.f32.mrb[11].mxu0  ;;  %v1569_v38 = vpop.f32.mrb[11].mxu1  ;;  %v1004_v40 = vadd.f32 1.0, %v1687_v36  ;;  %v864_v41 = vmul.f32 %v1519_v18, %v2073_v21  ;;  %v880_v42 = vmul.f32 %v1567_v33, %v803_v11 }
 0x10a   :  { %v1689_v39 = vpop.eup %1688  ;;  %v1522_v43 = vadd.f32 %v1521_v20, %v1520_v34  ;;  %1700 = vrcp.f32 %v988_v37  ;;  %v1570_v46 = vadd.f32 %v1569_v38, %v1568_v35  ;;  %v818_v11 = vpop.permute.xlu1 %817 }
 0x10b   :  { %v1691_v44 = vpop.eup %1690  ;;  %v989_v45 = vadd.f32 1.0, %v1689_v39  ;;  %1702 = vrcp.f32 %v1004_v40  ;;  %v1302_v49 = vmul.f32 -1.442695, %v864_v41  ;;  %v1318_v50 = vmul.f32 -1.442695, %v880_v42  ;;  %v823_v16 = vpop.permute.xlu0 %822 }
 0x10c   :  { %v1005_v48 = vadd.f32 1.0, %v1691_v44  ;;  %v865_v52 = vmul.f32 %v1522_v43, %v2075_v22  ;;  %v881_v53 = vmul.f32 %v1570_v46, %v808_v47 }
 0x10d   :  { %1704 = vrcp.f32 %v989_v45  ;;  %v1523_v54 = vpop.f32.mrb[12].mxu0  ;;  %v1571_v55 = vpop.f32.mrb[12].mxu1 }
 0x10e   :  { %1706 = vrcp.f32 %v1005_v48  ;;  %v1303_v21 = vmul.f32 -1.442695, %v865_v52  ;;  %v1319_v56 = vmul.f32 -1.442695, %v881_v53  ;;  %v1524_v57 = vpop.f32.mrb[13].mxu0  ;;  %v1572_v58 = vpop.f32.mrb[13].mxu1 }
 0x10f   :  { %1708 = vpow2.f32 %v1302_v49  ;;  %v1693_v59 = vpop.eup %1692  ;;  %v1525_v60 = vadd.f32 %v1524_v57, %v1523_v54  ;;  %v1573_v61 = vadd.f32 %v1572_v58, %v1571_v55  ;;  %v1526_v62 = vpop.f32.mrb[14].mxu0 }
 0x110   :  { %1710 = vpow2.f32 %v1318_v50  ;;  %v1574_v63 = vpop.f32.mrb[14].mxu1  ;;  %v1695_v0 = vpop.eup %1694  ;;  %v990_v1 = vadd.f32 1.0, %v1693_v59 }
 0x111   :  { %1712 = vpow2.f32 %v1303_v21  ;;  %v1527_v2 = vpop.f32.mrb[15].mxu0  ;;  %v1575_v22 = vpop.f32.mrb[15].mxu1  ;;  %v1006_v4 = vadd.f32 1.0, %v1695_v0  ;;  %v866_v5 = vmul.f32 %v1525_v60, %v2077_v23  ;;  %v882_v6 = vmul.f32 %v1573_v61, %v813_v51 }
 0x112   :  { %v1697_v3 = vpop.eup %1696  ;;  %1714 = vpow2.f32 %v1319_v56  ;;  %v1528_v9 = vadd.f32 %v1527_v2, %v1526_v62  ;;  %v1576_v10 = vadd.f32 %v1575_v22, %v1574_v63  ;;  %v828_v21 = vpop.permute.xlu1 %827 }
 0x113   :  { %v1699_v7 = vpop.eup %1698  ;;  %1716 = vrcp.f32 %v990_v1  ;;  %v991_v8 = vadd.f32 1.0, %v1697_v3  ;;  %v1304_v13 = vmul.f32 -1.442695, %v866_v5  ;;  %v1320_v14 = vmul.f32 -1.442695, %v882_v6  ;;  %v833_v60 = vpop.permute.xlu0 %832 }
 0x114   :  { %1718 = vrcp.f32 %v1006_v4  ;;  %v1007_v12 = vadd.f32 1.0, %v1699_v7  ;;  %v1701_v15 = vpop.eup %1700  ;;  %v867_v17 = vmul.f32 %v1528_v9, %v2079_v24  ;;  %v883_v19 = vmul.f32 %v1576_v10, %v818_v11 }
 0x115   :  { %1720 = vrcp.f32 %v991_v8  ;;  %v1703_v18 = vpop.eup %1702  ;;  %v1529_v23 = vpop.f32.mrb[16].mxu0 }
 0x116   :  { %1722 = vrcp.f32 %v1007_v12  ;;  %v1577_v33 = vpop.f32.mrb[16].mxu1  ;;  %v1305_v35 = vmul.f32 -1.442695, %v867_v17  ;;  %v1321_v36 = vmul.f32 -1.442695, %v883_v19  ;;  %v1530_v37 = vpop.f32.mrb[17].mxu0 }
 0x117   :  { %v1705_v34 = vpop.eup %1704  ;;  %1724 = vpow2.f32 %v1304_v13  ;;  %v1578_v20 = vpop.f32.mrb[17].mxu1  ;;  %v1531_v40 = vadd.f32 %v1530_v37, %v1529_v23 }
 0x118   :  { %v1707_v38 = vpop.eup %1706  ;;  %v1397_v39 = vpack.c.bf16 %v1705_v34, %v1701_v15  ;;  %1726 = vpow2.f32 %v1320_v14  ;;  %v1579_v41 = vadd.f32 %v1578_v20, %v1577_v33  ;;  %v1532_v42 = vpop.f32.mrb[18].mxu0 }
 0x119   :  { %v1580_v43 = vpop.f32.mrb[18].mxu1  ;;  %v1709_v44 = vpop.eup %1708  ;;  %v1437_v24 = vpack.c.bf16 %v1707_v38, %v1703_v18  ;;  %1728 = vpow2.f32 %v1305_v35  ;;  %v868_v49 = vmul.f32 %v1531_v40, %v2081_v25 }
 0x11a   :  { %v1533_v45 = vpop.f32.mrb[19].mxu0  ;;  %v1581_v46 = vpop.f32.mrb[19].mxu1  ;;  %1398 = vst [vmem:[%s2160_s3] sm:$0xff] %v1397_v39   ;;  %v992_v48 = vadd.f32 1.0, %v1709_v44  ;;  %1730 = vpow2.f32 %v1321_v36  ;;  %v884_v50 = vmul.f32 %v1579_v41, %v823_v16 }
 0x11b   :  { %v1711_v47 = vpop.eup %1710  ;;  %1481 = vst [vmem:[%s2160_s3 + $0x40] sm:$0xff] %v1437_v24   ;;  %v1534_v53 = vadd.f32 %v1533_v45, %v1532_v42  ;;  %v1582_v54 = vadd.f32 %v1581_v46, %v1580_v43  ;;  %v1306_v57 = vmul.f32 -1.442695, %v868_v49  ;;  %v838_v36 = vpop.permute.xlu1 %837 }
 0x11c   :  { %v1713_v51 = vpop.eup %1712  ;;  %v1008_v52 = vadd.f32 1.0, %v1711_v47  ;;  %1732 = vrcp.f32 %v992_v48  ;;  %v1322_v58 = vmul.f32 -1.442695, %v884_v50  ;;  %v843_v39 = vpop.permute.xlu0 %842 }
 0x11d   :  { %v1715_v55 = vpop.eup %1714  ;;  %v993_v56 = vadd.f32 1.0, %v1713_v51  ;;  %v869_v25 = vmul.f32 %v1534_v53, %v2083_v26  ;;  %v885_v62 = vmul.f32 %v1582_v54, %v828_v21  ;;  %v1535_v0 = vpop.f32.mrb[20].mxu0 }
 0x11e   :  { %v1717_v59 = vpop.eup %1716  ;;  %1734 = vrcp.f32 %v1008_v52  ;;  %v1009_v61 = vadd.f32 1.0, %v1715_v55  ;;  %v1583_v1 = vpop.f32.mrb[20].mxu1 }
 0x11f   :  { %v1719_v63 = vpop.eup %1718  ;;  %1736 = vrcp.f32 %v993_v56  ;;  %v1307_v22 = vmul.f32 -1.442695, %v869_v25  ;;  %v1323_v3 = vmul.f32 -1.442695, %v885_v62  ;;  %v1536_v4 = vpop.f32.mrb[21].mxu0 }
 0x120   :  { %v1721_v2 = vpop.eup %1720  ;;  %1738 = vrcp.f32 %v1009_v61  ;;  %v1584_v5 = vpop.f32.mrb[21].mxu1  ;;  %v1537_v8 = vadd.f32 %v1536_v4, %v1535_v0 }
 0x121   :  { %v1723_v6 = vpop.eup %1722  ;;  %v1402_v7 = vpack.c.bf16 %v1721_v2, %v1717_v59  ;;  %1740 = vpow2.f32 %v1306_v57  ;;  %v1585_v9 = vadd.f32 %v1584_v5, %v1583_v1  ;;  %v1538_v10 = vpop.f32.mrb[22].mxu0 }
 0x122   :  { %v1586_v11 = vpop.f32.mrb[22].mxu1  ;;  %v1725_v12 = vpop.eup %1724  ;;  %v1442_v26 = vpack.c.bf16 %v1723_v6, %v1719_v63  ;;  %1742 = vpow2.f32 %v1322_v58  ;;  %v870_v17 = vmul.f32 %v1537_v8, %v2085_v27 }
 0x123   :  { %v1539_v13 = vpop.f32.mrb[23].mxu0  ;;  %v1587_v14 = vpop.f32.mrb[23].mxu1  ;;  %1474 = vst [vmem:[%s2160_s3 + $0x8] sm:$0xff] %v1402_v7   ;;  %v994_v16 = vadd.f32 1.0, %v1725_v12  ;;  %1744 = vpow2.f32 %v1307_v22  ;;  %v886_v19 = vmul.f32 %v1585_v9, %v833_v60 }
 0x124   :  { %v1727_v15 = vpop.eup %1726  ;;  %1482 = vst [vmem:[%s2160_s3 + $0x48] sm:$0xff] %v1442_v26   ;;  %1746 = vpow2.f32 %v1323_v3  ;;  %v1540_v33 = vadd.f32 %v1539_v13, %v1538_v10  ;;  %v1588_v34 = vadd.f32 %v1587_v14, %v1586_v11  ;;  %v1308_v20 = vmul.f32 -1.442695, %v870_v17  ;;  %v848_v0 = vpop.permute.xlu1 %847 }
 0x125   :  { %v1729_v18 = vpop.eup %1728  ;;  %v1010_v23 = vadd.f32 1.0, %v1727_v15  ;;  %1748 = vrcp.f32 %v994_v16  ;;  %v1324_v38 = vmul.f32 -1.442695, %v886_v19  ;;  %v1541_v43 = vpop.f32.mrb[24].mxu0 }
 0x126   :  { %v1731_v35 = vpop.eup %1730  ;;  %v995_v37 = vadd.f32 1.0, %v1729_v18  ;;  %v871_v27 = vmul.f32 %v1540_v33, %v2087_v28  ;;  %v887_v41 = vmul.f32 %v1588_v34, %v838_v36  ;;  %v1589_v44 = vpop.f32.mrb[24].mxu1 }
 0x127   :  { %1750 = vrcp.f32 %v1010_v23  ;;  %v1011_v40 = vadd.f32 1.0, %v1731_v35  ;;  %v1733_v42 = vpop.eup %1732  ;;  %v1542_v47 = vpop.f32.mrb[25].mxu0 }
 0x128   :  { %1752 = vrcp.f32 %v995_v37  ;;  %v1735_v24 = vpop.eup %1734  ;;  %v1309_v45 = vmul.f32 -1.442695, %v871_v27  ;;  %v1325_v46 = vmul.f32 -1.442695, %v887_v41  ;;  %v1590_v48 = vpop.f32.mrb[25].mxu1  ;;  %v1543_v50 = vadd.f32 %v1542_v47, %v1541_v43 }
 0x129   :  { %1754 = vrcp.f32 %v1011_v40  ;;  %v1737_v49 = vpop.eup %1736  ;;  %v1591_v51 = vadd.f32 %v1590_v48, %v1589_v44  ;;  %v1544_v52 = vpop.f32.mrb[26].mxu0 }
 0x12a   :  { %1756 = vpow2.f32 %v1308_v20  ;;  %v1592_v53 = vpop.f32.mrb[26].mxu1  ;;  %v1739_v54 = vpop.eup %1738  ;;  %v1407_v55 = vpack.c.bf16 %v1737_v49, %v1733_v42  ;;  %v872_v58 = vmul.f32 %v1543_v50, %v2089_v29 }
 0x12b   :  { %1758 = vpow2.f32 %v1324_v38  ;;  %v1545_v28 = vpop.f32.mrb[27].mxu0  ;;  %v1593_v21 = vpop.f32.mrb[27].mxu1  ;;  %v1447_v57 = vpack.c.bf16 %v1739_v54, %v1735_v24  ;;  %v888_v59 = vmul.f32 %v1591_v51, %v843_v39 }
 0x12c   :  { %v1741_v56 = vpop.eup %1740  ;;  %1760 = vpow2.f32 %v1309_v45  ;;  %1475 = vst [vmem:[%s2160_s3 + $0x10] sm:$0xff] %v1407_v55   ;;  %v1546_v25 = vadd.f32 %v1545_v28, %v1544_v52  ;;  %v1594_v62 = vadd.f32 %v1593_v21, %v1592_v53  ;;  %v1310_v2 = vmul.f32 -1.442695, %v872_v58  ;;  %v853_v29 = vpop.permute.xlu0 %852 }
 0x12d   :  { %v1743_v60 = vpop.eup %1742  ;;  %v996_v61 = vadd.f32 1.0, %v1741_v56  ;;  %1762 = vpow2.f32 %v1325_v46  ;;  %1483 = vst [vmem:[%s2160_s3 + $0x50] sm:$0xff] %v1447_v57   ;;  %v1326_v8 = vmul.f32 -1.442695, %v888_v59  ;;  %v1547_v9 = vpop.f32.mrb[28].mxu0 }
 0x12e   :  { %v1745_v63 = vpop.eup %1744  ;;  %v1012_v1 = vadd.f32 1.0, %v1743_v60  ;;  %v873_v4 = vmul.f32 %v1546_v25, %v2091_v30  ;;  %v889_v5 = vmul.f32 %v1594_v62, %v848_v0  ;;  %v1595_v10 = vpop.f32.mrb[28].mxu1 }
 0x12f   :  { %v1747_v22 = vpop.eup %1746  ;;  %1764 = vrcp.f32 %v996_v61  ;;  %v997_v3 = vadd.f32 1.0, %v1745_v63  ;;  %v1548_v26 = vpop.f32.mrb[29].mxu0 }
 0x130   :  { %v1749_v6 = vpop.eup %1748  ;;  %1766 = vrcp.f32 %v1012_v1  ;;  %v1013_v7 = vadd.f32 1.0, %v1747_v22  ;;  %v1311_v12 = vmul.f32 -1.442695, %v873_v4  ;;  %v1596_v13 = vpop.f32.mrb[29].mxu1  ;;  %v1327_v15 = vmul.f32 -1.442695, %v889_v5 }
 0x131   :  { %v1751_v11 = vpop.eup %1750  ;;  %1768 = vrcp.f32 %v997_v3  ;;  %v1549_v16 = vadd.f32 %v1548_v26, %v1547_v9  ;;  %v1597_v17 = vadd.f32 %v1596_v13, %v1595_v10  ;;  %v1550_v19 = vpop.f32.mrb[30].mxu0 }
 0x132   :  { %v1753_v14 = vpop.eup %1752  ;;  %1770 = vrcp.f32 %v1013_v7  ;;  %v1598_v18 = vpop.f32.mrb[30].mxu1 }
 0x133   :  { %v1755_v30 = vpop.eup %1754  ;;  %v1412_v23 = vpack.c.bf16 %v1753_v14, %v1749_v6  ;;  %1772 = vpow2.f32 %v1310_v2  ;;  %v1551_v33 = vpop.f32.mrb[31].mxu0  ;;  %v874_v37 = vmul.f32 %v1549_v16, %v2093_v31  ;;  %v890_v20 = vmul.f32 %v1597_v17, %v853_v29 }
 0x134   :  { %v1599_v34 = vpop.f32.mrb[31].mxu1  ;;  %v1757_v35 = vpop.eup %1756  ;;  %v1452_v36 = vpack.c.bf16 %v1755_v30, %v1751_v11  ;;  %1774 = vpow2.f32 %v1326_v8  ;;  %v1552_v40 = vadd.f32 %v1551_v33, %v1550_v19 }
 0x135   :  { %v1759_v38 = vpop.eup %1758  ;;  %1476 = vst [vmem:[%s2160_s3 + $0x18] sm:$0xff] %v1412_v23   ;;  %v998_v39 = vadd.f32 1.0, %v1757_v35  ;;  %1776 = vpow2.f32 %v1311_v12  ;;  %v1600_v27 = vadd.f32 %v1599_v34, %v1598_v18  ;;  %v858_v42 = vpop.permute.xlu1 %857  ;;  %v1312_v44 = vmul.f32 -1.442695, %v874_v37 }
 0x136   :  { %v1761_v41 = vpop.eup %1760  ;;  %1484 = vst [vmem:[%s2160_s3 + $0x58] sm:$0xff] %v1452_v36   ;;  %v1014_v43 = vadd.f32 1.0, %v1759_v38  ;;  %1778 = vpow2.f32 %v1327_v15  ;;  %v875_v45 = vmul.f32 %v1552_v40, %v2095_v32  ;;  %v1328_v48 = vmul.f32 -1.442695, %v890_v20 }
 0x137   :  { %v1763_v31 = vpop.eup %1762  ;;  %1780 = vrcp.f32 %v998_v39  ;;  %v999_v24 = vadd.f32 1.0, %v1761_v41  ;;  %v891_v46 = vmul.f32 %v1600_v27, %v858_v42 }
 0x138   :  { %1782 = vrcp.f32 %v1014_v43  ;;  %v1015_v47 = vadd.f32 1.0, %v1763_v31  ;;  %v1313_v50 = vmul.f32 -1.442695, %v875_v45 }
 0x139   :  { %v1765_v49 = vpop.eup %1764  ;;  %1784 = vrcp.f32 %v999_v24  ;;  %v1329_v52 = vmul.f32 -1.442695, %v891_v46 }
 0x13a   :  { %v1767_v51 = vpop.eup %1766  ;;  %1786 = vrcp.f32 %v1015_v47 }
 0x13b   :  { %v1769_v53 = vpop.eup %1768  ;;  %1788 = vpow2.f32 %v1312_v44 }
 0x13c   :  { %v1771_v54 = vpop.eup %1770  ;;  %v1417_v55 = vpack.c.bf16 %v1769_v53, %v1765_v49  ;;  %1790 = vpow2.f32 %v1328_v48 }
 0x13d   :  { %v1773_v28 = vpop.eup %1772  ;;  %v1457_v21 = vpack.c.bf16 %v1771_v54, %v1767_v51  ;;  %1792 = vpow2.f32 %v1313_v50 }
 0x13e   :  { %v1775_v56 = vpop.eup %1774  ;;  %1477 = vst [vmem:[%s2160_s3 + $0x20] sm:$0xff] %v1417_v55   ;;  %v1000_v32 = vadd.f32 1.0, %v1773_v28  ;;  %1794 = vpow2.f32 %v1329_v52 }
 0x13f   :  { %v1777_v57 = vpop.eup %1776  ;;  %1485 = vst [vmem:[%s2160_s3 + $0x60] sm:$0xff] %v1457_v21   ;;  %v1016_v58 = vadd.f32 1.0, %v1775_v56 }
 0x140   :  { %v1779_v59 = vpop.eup %1778  ;;  %1796 = vrcp.f32 %v1000_v32  ;;  %v1001_v60 = vadd.f32 1.0, %v1777_v57 }
 0x141   :  { %v1781_v61 = vpop.eup %1780  ;;  %1798 = vrcp.f32 %v1016_v58  ;;  %v1017_v25 = vadd.f32 1.0, %v1779_v59 }
 0x142   :  { %v1783_v62 = vpop.eup %1782  ;;  %1800 = vrcp.f32 %v1001_v60 }
 0x143   :  { %v1785_v63 = vpop.eup %1784  ;;  %1802 = vrcp.f32 %v1017_v25 }
 0x144   :  { %v1787_v0 = vpop.eup %1786  ;;  %v1422_v1 = vpack.c.bf16 %v1785_v63, %v1781_v61 }
 0x145   :  { %v1789_v2 = vpop.eup %1788  ;;  %v1462_v22 = vpack.c.bf16 %v1787_v0, %v1783_v62 }
 0x146   :  { %v1791_v29 = vpop.eup %1790  ;;  %1478 = vst [vmem:[%s2160_s3 + $0x28] sm:$0xff] %v1422_v1   ;;  %v1002_v3 = vadd.f32 1.0, %v1789_v2 }
 0x147   :  { %v1793_v4 = vpop.eup %1792  ;;  %1486 = vst [vmem:[%s2160_s3 + $0x68] sm:$0xff] %v1462_v22   ;;  %v1018_v5 = vadd.f32 1.0, %v1791_v29 }
 0x148   :  { %v1795_v6 = vpop.eup %1794  ;;  %1804 = vrcp.f32 %v1002_v3  ;;  %v1003_v7 = vadd.f32 1.0, %v1793_v4 }
 0x149   :  { %1806 = vrcp.f32 %v1018_v5  ;;  %v1019_v8 = vadd.f32 1.0, %v1795_v6 }
 0x14a   :  { %v1797_v9 = vpop.eup %1796  ;;  %1808 = vrcp.f32 %v1003_v7 }
 0x14b   :  { %v1799_v10 = vpop.eup %1798  ;;  %1810 = vrcp.f32 %v1019_v8 }
 0x14c   :  { %v1801_v11 = vpop.eup %1800 }
 0x14d   :  { %v1803_v12 = vpop.eup %1802  ;;  %v1427_v26 = vpack.c.bf16 %v1801_v11, %v1797_v9 }
 0x14e   :  { %v1467_v13 = vpack.c.bf16 %v1803_v12, %v1799_v10 }
 0x14f   :  { %1479 = vst [vmem:[%s2160_s3 + $0x30] sm:$0xff] %v1427_v26  }
 0x150   :  { %1487 = vst [vmem:[%s2160_s3 + $0x70] sm:$0xff] %v1467_v13  }
 0x152   :  { %v1805_v14 = vpop.eup %1804 }
 0x153   :  { %v1807_v15 = vpop.eup %1806 }
 0x154   :  { %v1809_v16 = vpop.eup %1808 }
 0x155   :  { %v1811_v17 = vpop.eup %1810  ;;  %v1432_v19 = vpack.c.bf16 %v1809_v16, %v1805_v14 }
 0x156   :  { %v1472_v18 = vpack.c.bf16 %v1811_v17, %v1807_v15 }
 0x157   :  { %1480 = vst [vmem:[%s2160_s3 + $0x38] sm:$0xff] %v1432_v19  }
 0x158   :  { %1488 = vst [vmem:[%s2160_s3 + $0x78] sm:$0xff] %v1472_v18  }

// kernel: informax_forward.8
= control target key start
LH: loop header
LB: loop body
LE: loop exit
PB: predicated region body
PF: predicated region fallthrough
CT: control target
= control target key end

     0   :  { %vm1623_vm2 = vcmask 7168   ;;  %s7931_s4 = inlined_call_operand.vmem [shape: bf16[128,128], index: 4, kind: input, shape index: {}]   ;;  %s7932_s2 = inlined_call_operand.vmem [shape: bf16[256,128], index: 2, kind: input, shape index: {}]   ;;  %s7933_s3 = inlined_call_operand.vmem [shape: bf16[256,128], index: 3, kind: input, shape index: {}]   ;;  %s7934_s1 = inlined_call_operand.vmem [shape: f32[256,128], index: 1, kind: input, shape index: {}]   ;;  %s7935_s0 = inlined_call_operand.vmem [shape: f32[256,128], index: 0, kind: input, shape index: {}]   ;;  %s7936_s5 = inlined_call_operand.vmem [shape: f32[1,8,128], index: 5, kind: output, shape index: {}]  }
   0x1   :  { %v3738_v0 = vld [vmem:[%s7931_s4] sm:$0xff]   ;;  %v3739_v1 = vld [vmem:[%s7931_s4 + $0x8] sm:$0xff]   ;;  %v3740_v2 = vld [vmem:[%s7931_s4 + $0x10] sm:$0xff]  }
   0x2   :  { %3634 = vmatprep.subr.bf16.mxu0 %v3738_v0  ;;  %3682 = vmatprep.subr.bf16.mxu1 %v3738_v0  ;;  %v3741_v3 = vld [vmem:[%s7931_s4 + $0x18] sm:$0xff]   ;;  %v3746_v4 = vld [vmem:[%s7932_s2] sm:$0xff]   ;;  %v3743_v7 = vld [vmem:[%s7931_s4 + $0x28] sm:$0xff]  }
   0x3   :  { %3635 = vmatpush3.bf16.msra.mxu0 %v3738_v0  ;;  %3683 = vmatpush3.bf16.msra.mxu1 %v3738_v0  ;;  %v3748_v5 = vld [vmem:[%s7933_s3] sm:$0xff]   ;;  %v3744_v8 = vld [vmem:[%s7931_s4 + $0x30] sm:$0xff]   ;;  %v3745_v9 = vld [vmem:[%s7931_s4 + $0x38] sm:$0xff]  }
   0x4   :  { %3636 = vmatprep.subr.bf16.mxu0 %v3739_v1  ;;  %3684 = vmatprep.subr.bf16.mxu1 %v3739_v1  ;;  %v3742_v6 = vld [vmem:[%s7931_s4 + $0x20] sm:$0xff]   ;;  %v3747_v10 = vld [vmem:[%s7932_s2 + $0x8] sm:$0xff]   ;;  %v3750_v12 = vld [vmem:[%s7932_s2 + $0x10] sm:$0xff]  }
   0x5   :  { %3650 = vmatprep.mubr.bf16.mxu0 %v3746_v4  ;;  %3698 = vmatprep.mubr.bf16.mxu1 %v3748_v5  ;;  %v3749_v11 = vld [vmem:[%s7933_s3 + $0x8] sm:$0xff]   ;;  %v3752_v13 = vld [vmem:[%s7933_s3 + $0x10] sm:$0xff]   ;;  %v3751_v14 = vld [vmem:[%s7932_s2 + $0x18] sm:$0xff]  }
   0x6   :  { %v3753_v15 = vld [vmem:[%s7933_s3 + $0x18] sm:$0xff]   ;;  %v3754_v16 = vld [vmem:[%s7932_s2 + $0x20] sm:$0xff]   ;;  %v3755_v18 = vld [vmem:[%s7932_s2 + $0x28] sm:$0xff]  }
   0x7   :  { %3637 = vmatpush3.bf16.msra.mxu0 %v3739_v1  ;;  %3685 = vmatpush3.bf16.msra.mxu1 %v3739_v1  ;;  %v3756_v17 = vld [vmem:[%s7933_s3 + $0x20] sm:$0xff]   ;;  %v3757_v19 = vld [vmem:[%s7933_s3 + $0x28] sm:$0xff]   ;;  %v3758_v20 = vld [vmem:[%s7932_s2 + $0x30] sm:$0xff]  }
   0x8   :  { %3638 = vmatprep.subr.bf16.mxu0 %v3740_v2  ;;  %3686 = vmatprep.subr.bf16.mxu1 %v3740_v2  ;;  %v3760_v21 = vld [vmem:[%s7933_s3 + $0x30] sm:$0xff]   ;;  %v3759_v22 = vld [vmem:[%s7932_s2 + $0x38] sm:$0xff]   ;;  %v3762_v24 = vld [vmem:[%s7932_s2 + $0x40] sm:$0xff]  }
   0x9   :  { %v3761_v23 = vld [vmem:[%s7933_s3 + $0x38] sm:$0xff]   ;;  %v3764_v25 = vld [vmem:[%s7933_s3 + $0x40] sm:$0xff]   ;;  %v3763_v26 = vld [vmem:[%s7932_s2 + $0x48] sm:$0xff]  }
   0xa   :  { %v3765_v27 = vld [vmem:[%s7933_s3 + $0x48] sm:$0xff]   ;;  %v3766_v28 = vld [vmem:[%s7932_s2 + $0x50] sm:$0xff]   ;;  %v3767_v30 = vld [vmem:[%s7932_s2 + $0x58] sm:$0xff]  }
   0xb   :  { %3639 = vmatpush3.bf16.msra.mxu0 %v3740_v2  ;;  %3687 = vmatpush3.bf16.msra.mxu1 %v3740_v2  ;;  %v3768_v29 = vld [vmem:[%s7933_s3 + $0x50] sm:$0xff]   ;;  %v3769_v31 = vld [vmem:[%s7933_s3 + $0x58] sm:$0xff]   ;;  %v3770_v32 = vld [vmem:[%s7932_s2 + $0x60] sm:$0xff]  }
   0xc   :  { %3640 = vmatprep.subr.bf16.mxu0 %v3741_v3  ;;  %3688 = vmatprep.subr.bf16.mxu1 %v3741_v3  ;;  %v3772_v33 = vld [vmem:[%s7933_s3 + $0x60] sm:$0xff]   ;;  %v3771_v34 = vld [vmem:[%s7932_s2 + $0x68] sm:$0xff]   ;;  %v3774_v36 = vld [vmem:[%s7932_s2 + $0x70] sm:$0xff]  }
   0xd   :  { %v3773_v35 = vld [vmem:[%s7933_s3 + $0x68] sm:$0xff]   ;;  %v3775_v37 = vld [vmem:[%s7932_s2 + $0x78] sm:$0xff]   ;;  %v3776_v38 = vld [vmem:[%s7933_s3 + $0x70] sm:$0xff]  }
   0xe   :  { %v3777_v39 = vld [vmem:[%s7933_s3 + $0x78] sm:$0xff]   ;;  %v697_v40 = vld [vmem:[%s7934_s1 + $0x10] sm:$0xff]  ;;  %v695_v50 = vld [vmem:[%s7934_s1] sm:$0xff] }
   0xf   :  { %3641 = vmatpush3.bf16.msra.mxu0 %v3741_v3  ;;  %3689 = vmatpush3.bf16.msra.mxu1 %v3741_v3  ;;  %v665_v41 = vld [vmem:[%s7935_s0 + $0x10] sm:$0xff]  ;;  %v698_v61 = vld [vmem:[%s7934_s1 + $0x18] sm:$0xff]  ;;  %v663_v62 = vld [vmem:[%s7935_s0] sm:$0xff] }
  0x10   :  { %3642 = vmatprep.subr.bf16.mxu0 %v3742_v6  ;;  %3690 = vmatprep.subr.bf16.mxu1 %v3742_v6  ;;  %v666_v5 = vld [vmem:[%s7935_s0 + $0x18] sm:$0xff] }
  0x13   :  { %3643 = vmatpush3.bf16.msra.mxu0 %v3742_v6  ;;  %3691 = vmatpush3.bf16.msra.mxu1 %v3742_v6 }
  0x14   :  { %3644 = vmatprep.subr.bf16.mxu0 %v3743_v7  ;;  %3692 = vmatprep.subr.bf16.mxu1 %v3743_v7 }
  0x17   :  { %3645 = vmatpush3.bf16.msra.mxu0 %v3743_v7  ;;  %3693 = vmatpush3.bf16.msra.mxu1 %v3743_v7 }
  0x18   :  { %3646 = vmatprep.subr.bf16.mxu0 %v3744_v8  ;;  %3694 = vmatprep.subr.bf16.mxu1 %v3744_v8 }
  0x1b   :  { %3647 = vmatpush3.bf16.msra.mxu0 %v3744_v8  ;;  %3695 = vmatpush3.bf16.msra.mxu1 %v3744_v8 }
  0x1c   :  { %3648 = vmatprep.subr.bf16.mxu0 %v3745_v9  ;;  %3696 = vmatprep.subr.bf16.mxu1 %v3745_v9 }
  0x1f   :  { %3649 = vmatpush3.bf16.msra.mxu0 %v3745_v9  ;;  %3697 = vmatpush3.bf16.msra.mxu1 %v3745_v9 }
  0x22   :  { %3651 = vmatmul.mubr.bf16.vlgmr.msra.gmra.mrb[0].mxu0 %v3747_v10  ;;  %3699 = vmatmul.mubr.bf16.vlgmr.msra.gmra.mrb[0].mxu1 %v3749_v11 }
  0x23   :  { %3654 = vmatprep.mubr.bf16.mxu0 %v3750_v12  ;;  %3702 = vmatprep.mubr.bf16.mxu1 %v3752_v13  ;;  %v696_v12 = vld [vmem:[%s7934_s1 + $0x8] sm:$0xff] }
  0x2a   :  { %3655 = vmatmul.mubr.bf16.gmra.mrb[4].mxu0 %v3751_v14  ;;  %3703 = vmatmul.mubr.bf16.gmra.mrb[4].mxu1 %v3753_v15 }
  0x2b   :  { %3658 = vmatprep.mubr.bf16.mxu0 %v3754_v16  ;;  %3706 = vmatprep.mubr.bf16.mxu1 %v3756_v17 }
  0x32   :  { %3659 = vmatmul.mubr.bf16.gmra.mrb[8].mxu0 %v3755_v18  ;;  %3707 = vmatmul.mubr.bf16.gmra.mrb[8].mxu1 %v3757_v19  ;;  %v664_v19 = vld [vmem:[%s7935_s0 + $0x8] sm:$0xff] }
  0x33   :  { %3662 = vmatprep.mubr.bf16.mxu0 %v3758_v20  ;;  %3710 = vmatprep.mubr.bf16.mxu1 %v3760_v21  ;;  %v669_v20 = vld [vmem:[%s7935_s0 + $0x30] sm:$0xff] }
  0x3a   :  { %3663 = vmatmul.mubr.bf16.gmra.mrb[12].mxu0 %v3759_v22  ;;  %3711 = vmatmul.mubr.bf16.gmra.mrb[12].mxu1 %v3761_v23 }
  0x3b   :  { %3666 = vmatprep.mubr.bf16.mxu0 %v3762_v24  ;;  %3714 = vmatprep.mubr.bf16.mxu1 %v3764_v25 }
  0x42   :  { %3667 = vmatmul.mubr.bf16.gmra.mrb[16].mxu0 %v3763_v26  ;;  %3715 = vmatmul.mubr.bf16.gmra.mrb[16].mxu1 %v3765_v27 }
  0x43   :  { %3670 = vmatprep.mubr.bf16.mxu0 %v3766_v28  ;;  %3718 = vmatprep.mubr.bf16.mxu1 %v3768_v29 }
  0x4a   :  { %3671 = vmatmul.mubr.bf16.gmra.mrb[20].mxu0 %v3767_v30  ;;  %3719 = vmatmul.mubr.bf16.gmra.mrb[20].mxu1 %v3769_v31 }
  0x4b   :  { %3674 = vmatprep.mubr.bf16.mxu0 %v3770_v32  ;;  %3722 = vmatprep.mubr.bf16.mxu1 %v3772_v33 }
  0x52   :  { %3675 = vmatmul.mubr.bf16.gmra.mrb[24].mxu0 %v3771_v34  ;;  %3723 = vmatmul.mubr.bf16.gmra.mrb[24].mxu1 %v3773_v35 }
  0x53   :  { %3678 = vmatprep.mubr.bf16.mxu0 %v3774_v36  ;;  %3726 = vmatprep.mubr.bf16.mxu1 %v3776_v38 }
  0x5a   :  { %3679 = vmatmul.mubr.bf16.gmra.mrb[28].mxu0 %v3775_v37  ;;  %3727 = vmatmul.mubr.bf16.gmra.mrb[28].mxu1 %v3777_v39  ;;  %v667_v39 = vld [vmem:[%s7935_s0 + $0x20] sm:$0xff] }
  0xf5   :  { %v3652_v42 = vpop.f32.mrb[0].mxu0  ;;  %v3700_v43 = vpop.f32.mrb[0].mxu1 }
  0xf6   :  { %v247_v44 = vpop.f32.mrb[1].mxu0  ;;  %v536_v45 = vpop.f32.mrb[1].mxu1  ;;  %v825_v46 = vmul.f32 %v3652_v42, %v697_v40  ;;  %v729_v47 = vmul.f32 %v3652_v42, %v665_v41  ;;  %v921_v53 = vmul.f32 %v3700_v43, %v665_v41  ;;  %v1017_v58 = vmul.f32 %v3700_v43, %v697_v40  ;;  %v701_v40 = vld [vmem:[%s7934_s1 + $0x30] sm:$0xff] }
  0xf7   :  { %v3653_v48 = vpop.f32.mrb[2].mxu0  ;;  %v3701_v49 = vpop.f32.mrb[2].mxu1  ;;  %v823_v54 = vmul.f32 %v695_v50, %v247_v44  ;;  %v1015_v57 = vmul.f32 %v695_v50, %v536_v45  ;;  %v727_v4 = vmul.f32 %v663_v62, %v247_v44  ;;  %v919_v9 = vmul.f32 %v663_v62, %v536_v45 }
  0xf8   :  { %v250_v51 = vpop.f32.mrb[3].mxu0  ;;  %859 = vadd.xlane.f32.xlu1 %v825_v46  ;;  %763 = vadd.xlane.f32.xlu0 %v729_v47  ;;  %v539_v52 = vpop.f32.mrb[3].mxu1  ;;  %v826_v3 = vmul.f32 %v3653_v48, %v698_v61  ;;  %v922_v8 = vmul.f32 %v3701_v49, %v666_v5  ;;  %v730_v18 = vmul.f32 %v3653_v48, %v666_v5  ;;  %v668_v5 = vld [vmem:[%s7935_s0 + $0x28] sm:$0xff] }
  0xf9   :  { %v824_v17 = vmul.f32 %v696_v12, %v250_v51  ;;  %v920_v23 = vmul.f32 %v664_v19, %v539_v52  ;;  %v1018_v24 = vmul.f32 %v3701_v49, %v698_v61  ;;  %v728_v32 = vmul.f32 %v664_v19, %v250_v51  ;;  %v670_v51 = vld [vmem:[%s7935_s0 + $0x38] sm:$0xff] }
  0xfa   :  { %v1016_v36 = vmul.f32 %v696_v12, %v539_v52  ;;  %v699_v52 = vld [vmem:[%s7934_s1 + $0x20] sm:$0xff] }
  0xfc   :  { %855 = vadd.xlane.f32.xlu1 %v823_v54  ;;  %955 = vadd.xlane.f32.xlu0 %v921_v53 }
  0xfd   :  { %v4449_v55 = vpop.f32.mrb[4].mxu0  ;;  %v4451_v56 = vpop.f32.mrb[4].mxu1 }
  0xfe   :  { %v4453_v59 = vpop.f32.mrb[5].mxu0  ;;  %v4455_v60 = vpop.f32.mrb[5].mxu1  ;;  %v733_v29 = vmul.f32 %v4449_v55, %v669_v20  ;;  %v925_v33 = vmul.f32 %v4451_v56, %v669_v20  ;;  %v829_v46 = vmul.f32 %v4449_v55, %v701_v40  ;;  %v1021_v49 = vmul.f32 %v4451_v56, %v701_v40 }
  0xff   :  { %v4463_v63 = vpop.f32.mrb[6].mxu0  ;;  %v4465_v0 = vpop.f32.mrb[6].mxu1  ;;  %v731_v45 = vmul.f32 %v667_v39, %v4453_v59  ;;  %v923_v48 = vmul.f32 %v667_v39, %v4455_v60 }
 0x100   :  { %1047 = vadd.xlane.f32.xlu1 %v1015_v57  ;;  %1051 = vadd.xlane.f32.xlu0 %v1017_v58  ;;  %v4467_v1 = vpop.f32.mrb[7].mxu0  ;;  %v4469_v2 = vpop.f32.mrb[7].mxu1  ;;  %v734_v56 = vmul.f32 %v4463_v63, %v670_v51  ;;  %v827_v57 = vmul.f32 %v699_v52, %v4453_v59  ;;  %v702_v59 = vld [vmem:[%s7934_s1 + $0x38] sm:$0xff] }
 0x101   :  { %v924_v12 = vmul.f32 %v668_v5, %v4469_v2 }
 0x104   :  { %861 = vadd.xlane.f32.xlu1 %v826_v3  ;;  %759 = vadd.xlane.f32.xlu0 %v727_v4  ;;  %v926_v3 = vmul.f32 %v4465_v0, %v670_v51  ;;  %v1019_v4 = vmul.f32 %v699_v52, %v4455_v60  ;;  %v673_v60 = vld [vmem:[%s7935_s0 + $0x50] sm:$0xff]  ;;  %v704_v52 = vld [vmem:[%s7934_s1 + $0x48] sm:$0xff] }
 0x105   :  { %v4474_v6 = vpop.f32.mrb[8].mxu0  ;;  %v4476_v7 = vpop.f32.mrb[8].mxu1 }
 0x106   :  { %v4478_v10 = vpop.f32.mrb[9].mxu0  ;;  %v4480_v11 = vpop.f32.mrb[9].mxu1  ;;  %v737_v19 = vmul.f32 %v4474_v6, %v673_v60  ;;  %v929_v20 = vmul.f32 %v4476_v7, %v673_v60 }
 0x107   :  { %v4485_v13 = vpop.f32.mrb[10].mxu0  ;;  %v4487_v14 = vpop.f32.mrb[10].mxu1 }
 0x108   :  { %957 = vadd.xlane.f32.xlu1 %v922_v8  ;;  %951 = vadd.xlane.f32.xlu0 %v919_v9  ;;  %v4489_v15 = vpop.f32.mrb[11].mxu0  ;;  %v4491_v16 = vpop.f32.mrb[11].mxu1  ;;  %v732_v8 = vmul.f32 %v668_v5, %v4467_v1  ;;  %v830_v9 = vmul.f32 %v4463_v63, %v702_v59 }
 0x10c   :  { %857 = vadd.xlane.f32.xlu1 %v824_v17  ;;  %765 = vadd.xlane.f32.xlu0 %v730_v18  ;;  %v1022_v17 = vmul.f32 %v4465_v0, %v702_v59  ;;  %v700_v18 = vld [vmem:[%s7934_s1 + $0x28] sm:$0xff]  ;;  %v671_v0 = vld [vmem:[%s7935_s0 + $0x40] sm:$0xff] }
 0x10d   :  { %v4499_v21 = vpop.f32.mrb[12].mxu0  ;;  %v4501_v22 = vpop.f32.mrb[12].mxu1  ;;  %v828_v63 = vmul.f32 %v700_v18, %v4467_v1 }
 0x10e   :  { %v4503_v25 = vpop.f32.mrb[13].mxu0  ;;  %v4505_v26 = vpop.f32.mrb[13].mxu1 }
 0x10f   :  { %v4507_v27 = vpop.f32.mrb[14].mxu0  ;;  %v4509_v28 = vpop.f32.mrb[14].mxu1 }
 0x110   :  { %953 = vadd.xlane.f32.xlu1 %v920_v23  ;;  %1053 = vadd.xlane.f32.xlu0 %v1018_v24  ;;  %v4512_v30 = vpop.f32.mrb[15].mxu0  ;;  %v4514_v31 = vpop.f32.mrb[15].mxu1  ;;  %v1020_v23 = vmul.f32 %v700_v18, %v4469_v2  ;;  %v705_v24 = vld [vmem:[%s7934_s1 + $0x50] sm:$0xff] }
 0x111   :  { %v833_v1 = vmul.f32 %v4474_v6, %v705_v24  ;;  %v1025_v2 = vmul.f32 %v4476_v7, %v705_v24 }
 0x114   :  { %771 = vadd.xlane.f32.xlu1 %v733_v29  ;;  %761 = vadd.xlane.f32.xlu0 %v728_v32  ;;  %v735_v29 = vmul.f32 %v671_v0, %v4478_v10  ;;  %v927_v32 = vmul.f32 %v671_v0, %v4480_v11 }
 0x115   :  { %v4517_v34 = vpop.f32.mrb[16].mxu0  ;;  %v4519_v35 = vpop.f32.mrb[16].mxu1 }
 0x116   :  { %v4521_v37 = vpop.f32.mrb[17].mxu0  ;;  %v4523_v38 = vpop.f32.mrb[17].mxu1 }
 0x117   :  { %v4531_v41 = vpop.f32.mrb[18].mxu0  ;;  %v4533_v42 = vpop.f32.mrb[18].mxu1 }
 0x118   :  { %963 = vadd.xlane.f32.xlu1 %v925_v33  ;;  %1049 = vadd.xlane.f32.xlu0 %v1016_v36  ;;  %v4535_v43 = vpop.f32.mrb[19].mxu0  ;;  %v4537_v44 = vpop.f32.mrb[19].mxu1  ;;  %v674_v33 = vld [vmem:[%s7935_s0 + $0x58] sm:$0xff]  ;;  %v703_v36 = vld [vmem:[%s7934_s1 + $0x40] sm:$0xff] }
 0x119   :  { %v738_v39 = vmul.f32 %v4485_v13, %v674_v33  ;;  %v831_v6 = vmul.f32 %v703_v36, %v4478_v10  ;;  %v930_v40 = vmul.f32 %v4487_v14, %v674_v33  ;;  %v1023_v7 = vmul.f32 %v703_v36, %v4480_v11  ;;  %v677_v11 = vld [vmem:[%s7935_s0 + $0x70] sm:$0xff] }
 0x11c   :  { %767 = vadd.xlane.f32.xlu1 %v731_v45  ;;  %867 = vadd.xlane.f32.xlu0 %v829_v46  ;;  %v672_v45 = vld [vmem:[%s7935_s0 + $0x48] sm:$0xff]  ;;  %v706_v46 = vld [vmem:[%s7934_s1 + $0x58] sm:$0xff] }
 0x11d   :  { %v4541_v47 = vpop.f32.mrb[20].mxu0  ;;  %v4557_v55 = vpop.f32.mrb[20].mxu1  ;;  %v834_v10 = vmul.f32 %v4485_v13, %v706_v46  ;;  %v1026_v51 = vmul.f32 %v4487_v14, %v706_v46  ;;  %v832_v13 = vmul.f32 %v704_v52, %v4489_v15  ;;  %v675_v14 = vld [vmem:[%s7935_s0 + $0x60] sm:$0xff] }
 0x11e   :  { %v4545_v50 = vpop.f32.mrb[21].mxu0  ;;  %v4561_v58 = vpop.f32.mrb[21].mxu1  ;;  %v739_v5 = vmul.f32 %v675_v14, %v4503_v25  ;;  %v931_v59 = vmul.f32 %v675_v14, %v4505_v26 }
 0x11f   :  { %v4553_v53 = vpop.f32.mrb[22].mxu0  ;;  %v4563_v61 = vpop.f32.mrb[22].mxu1 }
 0x120   :  { %959 = vadd.xlane.f32.xlu1 %v923_v48  ;;  %1059 = vadd.xlane.f32.xlu0 %v1021_v49  ;;  %v4555_v54 = vpop.f32.mrb[23].mxu0  ;;  %v4565_v62 = vpop.f32.mrb[23].mxu1  ;;  %v736_v48 = vmul.f32 %v672_v45, %v4489_v15  ;;  %v928_v49 = vmul.f32 %v672_v45, %v4491_v16 }
 0x124   :  { %773 = vadd.xlane.f32.xlu1 %v734_v56  ;;  %863 = vadd.xlane.f32.xlu0 %v827_v57  ;;  %v741_v56 = vmul.f32 %v4499_v21, %v677_v11  ;;  %v933_v57 = vmul.f32 %v4501_v22, %v677_v11 }
 0x125   :  { %v4645_v60 = vpop.f32.mrb[24].mxu0 }
 0x128   :  { %965 = vadd.xlane.f32.xlu1 %v926_v3  ;;  %1055 = vadd.xlane.f32.xlu0 %v1019_v4  ;;  %v1024_v3 = vmul.f32 %v704_v52, %v4491_v16  ;;  %v709_v4 = vld [vmem:[%s7934_s1 + $0x70] sm:$0xff] }
 0x129   :  { %v837_v15 = vmul.f32 %v4499_v21, %v709_v4  ;;  %v1029_v16 = vmul.f32 %v4501_v22, %v709_v4 }
 0x12c   :  { %769 = vadd.xlane.f32.xlu1 %v732_v8  ;;  %869 = vadd.xlane.f32.xlu0 %v830_v9  ;;  %v678_v8 = vld [vmem:[%s7935_s0 + $0x78] sm:$0xff]  ;;  %v707_v9 = vld [vmem:[%s7934_s1 + $0x60] sm:$0xff] }
 0x12d   :  { %v742_v21 = vmul.f32 %v4507_v27, %v678_v8  ;;  %v934_v22 = vmul.f32 %v4509_v28, %v678_v8  ;;  %v1027_v18 = vmul.f32 %v707_v9, %v4505_v26 }
 0x130   :  { %961 = vadd.xlane.f32.xlu1 %v924_v12  ;;  %1061 = vadd.xlane.f32.xlu0 %v1022_v17  ;;  %v4647_v12 = vpop.f32.mrb[25].mxu0  ;;  %v835_v17 = vmul.f32 %v707_v9, %v4503_v25  ;;  %v4663_v25 = vpop.f32.mrb[24].mxu1 }
 0x131   :  { %v4667_v24 = vpop.f32.mrb[25].mxu1 }
 0x134   :  { %779 = vadd.xlane.f32.xlu1 %v737_v19  ;;  %865 = vadd.xlane.f32.xlu0 %v828_v63  ;;  %v676_v19 = vld [vmem:[%s7935_s0 + $0x68] sm:$0xff]  ;;  %v710_v63 = vld [vmem:[%s7934_s1 + $0x78] sm:$0xff] }
 0x135   :  { %v740_v0 = vmul.f32 %v676_v19, %v4512_v30  ;;  %v838_v26 = vmul.f32 %v4507_v27, %v710_v63  ;;  %v708_v27 = vld [vmem:[%s7934_s1 + $0x68] sm:$0xff] }
 0x138   :  { %971 = vadd.xlane.f32.xlu1 %v929_v20  ;;  %1057 = vadd.xlane.f32.xlu0 %v1020_v23  ;;  %v4659_v20 = vpop.f32.mrb[26].mxu0 }
 0x139   :  { %v4661_v23 = vpop.f32.mrb[27].mxu0 }
 0x13c   :  { %775 = vadd.xlane.f32.xlu1 %v735_v29  ;;  %875 = vadd.xlane.f32.xlu0 %v833_v1  ;;  %v681_v29 = vld [vmem:[%s7935_s0 + $0x90] sm:$0xff]  ;;  %v4672_v1 = vpop.f32.mrb[26].mxu1 }
 0x13d   :  { %v4676_v33 = vpop.f32.mrb[27].mxu1  ;;  %v745_v36 = vmul.f32 %v4517_v34, %v681_v29 }
 0x140   :  { %967 = vadd.xlane.f32.xlu1 %v927_v32  ;;  %1067 = vadd.xlane.f32.xlu0 %v1025_v2  ;;  %v932_v32 = vmul.f32 %v676_v19, %v4514_v31  ;;  %v1030_v2 = vmul.f32 %v4509_v28, %v710_v63  ;;  %v679_v28 = vld [vmem:[%s7935_s0 + $0x80] sm:$0xff]  ;;  %v685_v19 = vld [vmem:[%s7935_s0 + $0xb0] sm:$0xff] }
 0x141   :  { %v743_v45 = vmul.f32 %v679_v28, %v4521_v37  ;;  %v935_v46 = vmul.f32 %v679_v28, %v4523_v38 }
 0x144   :  { %781 = vadd.xlane.f32.xlu1 %v738_v39  ;;  %871 = vadd.xlane.f32.xlu0 %v831_v6  ;;  %v836_v39 = vmul.f32 %v708_v27, %v4512_v30  ;;  %v937_v6 = vmul.f32 %v4519_v35, %v681_v29  ;;  %v712_v29 = vld [vmem:[%s7934_s1 + $0x88] sm:$0xff] }
 0x148   :  { %973 = vadd.xlane.f32.xlu1 %v930_v40  ;;  %1063 = vadd.xlane.f32.xlu0 %v1023_v7  ;;  %v1028_v40 = vmul.f32 %v708_v27, %v4514_v31  ;;  %v713_v7 = vld [vmem:[%s7934_s1 + $0x90] sm:$0xff]  ;;  %v749_v27 = vmul.f32 %v4541_v47, %v685_v19 }
 0x149   :  { %v841_v30 = vmul.f32 %v4517_v34, %v713_v7  ;;  %v1033_v31 = vmul.f32 %v4519_v35, %v713_v7  ;;  %v715_v7 = vld [vmem:[%s7934_s1 + $0xa0] sm:$0xff] }
 0x14c   :  { %777 = vadd.xlane.f32.xlu1 %v736_v48  ;;  %877 = vadd.xlane.f32.xlu0 %v834_v10  ;;  %v682_v48 = vld [vmem:[%s7935_s0 + $0x98] sm:$0xff]  ;;  %v711_v10 = vld [vmem:[%s7934_s1 + $0x80] sm:$0xff] }
 0x14d   :  { %v746_v11 = vmul.f32 %v4531_v41, %v682_v48  ;;  %v839_v34 = vmul.f32 %v711_v10, %v4521_v37  ;;  %v938_v52 = vmul.f32 %v4533_v42, %v682_v48  ;;  %v714_v37 = vld [vmem:[%s7934_s1 + $0x98] sm:$0xff] }
 0x150   :  { %969 = vadd.xlane.f32.xlu1 %v928_v49  ;;  %1069 = vadd.xlane.f32.xlu0 %v1026_v51 }
 0x154   :  { %787 = vadd.xlane.f32.xlu1 %v741_v56  ;;  %873 = vadd.xlane.f32.xlu0 %v832_v13  ;;  %v1031_v56 = vmul.f32 %v711_v10, %v4523_v38 }
 0x158   :  { %979 = vadd.xlane.f32.xlu1 %v933_v57  ;;  %1065 = vadd.xlane.f32.xlu0 %v1024_v3  ;;  %v680_v57 = vld [vmem:[%s7935_s0 + $0x88] sm:$0xff] }
 0x15c   :  { %783 = vadd.xlane.f32.xlu1 %v739_v5  ;;  %883 = vadd.xlane.f32.xlu0 %v837_v15  ;;  %v744_v15 = vmul.f32 %v680_v57, %v4535_v43 }
 0x160   :  { %975 = vadd.xlane.f32.xlu1 %v931_v59  ;;  %1075 = vadd.xlane.f32.xlu0 %v1029_v16  ;;  %v842_v59 = vmul.f32 %v4531_v41, %v714_v37  ;;  %v936_v41 = vmul.f32 %v680_v57, %v4537_v44 }
 0x164   :  { %789 = vadd.xlane.f32.xlu1 %v742_v21  ;;  %879 = vadd.xlane.f32.xlu0 %v835_v17 }
 0x168   :  { %981 = vadd.xlane.f32.xlu1 %v934_v22  ;;  %1071 = vadd.xlane.f32.xlu0 %v1027_v18 }
 0x16c   :  { %785 = vadd.xlane.f32.xlu1 %v740_v0  ;;  %885 = vadd.xlane.f32.xlu0 %v838_v26  ;;  %v1034_v0 = vmul.f32 %v4533_v42, %v714_v37  ;;  %v717_v42 = vld [vmem:[%s7934_s1 + $0xb0] sm:$0xff] }
 0x16d   :  { %v845_v10 = vmul.f32 %v4541_v47, %v717_v42  ;;  %v4773_v47 = vmul.f32 %v715_v7, %v4545_v50  ;;  %v4779_v57 = vmul.f32 %v4557_v55, %v717_v42  ;;  %v721_v37 = vld [vmem:[%s7934_s1 + $0xd0] sm:$0xff] }
 0x170   :  { %977 = vadd.xlane.f32.xlu1 %v932_v32  ;;  %1077 = vadd.xlane.f32.xlu0 %v1030_v2 }
 0x174   :  { %795 = vadd.xlane.f32.xlu1 %v745_v36  ;;  %881 = vadd.xlane.f32.xlu0 %v836_v39  ;;  %v683_v36 = vld [vmem:[%s7935_s0 + $0xa0] sm:$0xff]  ;;  %v686_v39 = vld [vmem:[%s7935_s0 + $0xb8] sm:$0xff] }
 0x175   :  { %v747_v48 = vmul.f32 %v683_v36, %v4545_v50  ;;  %v719_v50 = vld [vmem:[%s7934_s1 + $0xc0] sm:$0xff] }
 0x178   :  { %987 = vadd.xlane.f32.xlu1 %v937_v6  ;;  %1073 = vadd.xlane.f32.xlu0 %v1028_v40 }
 0x17c   :  { %791 = vadd.xlane.f32.xlu1 %v743_v45  ;;  %891 = vadd.xlane.f32.xlu0 %v841_v30  ;;  %v840_v30 = vmul.f32 %v712_v29, %v4535_v43 }
 0x180   :  { %983 = vadd.xlane.f32.xlu1 %v935_v46  ;;  %1083 = vadd.xlane.f32.xlu0 %v1033_v31  ;;  %v1032_v46 = vmul.f32 %v712_v29, %v4537_v44  ;;  %v941_v31 = vmul.f32 %v4557_v55, %v685_v19  ;;  %v4770_v44 = vmul.f32 %v683_v36, %v4561_v58 }
 0x184   :  { %797 = vadd.xlane.f32.xlu1 %v746_v11  ;;  %887 = vadd.xlane.f32.xlu0 %v839_v34  ;;  %v4761_v11 = vmul.f32 %v4553_v53, %v686_v39  ;;  %v684_v34 = vld [vmem:[%s7935_s0 + $0xa8] sm:$0xff] }
 0x185   :  { %v4703_v49 = vpop.xlane.xlu1 %859  ;;  %v4705_v51 = vpop.xlane.xlu0 %763  ;;  %v4797_v55 = vmul.f32 %v684_v34, %v4555_v54 }
 0x186   :  { %v1795_v35 = vand.u32 2147483647, %v4703_v49  ;;  %v1177_v13 = vand.u32 2147483647, %v4705_v51  ;;  %v1699_v42 = vmax.f32 %v4703_v49, 0.0 }
 0x188   :  { %v1827_v3 = vsub.f32 0.0, %v1795_v35  ;;  %989 = vadd.xlane.f32.xlu1 %v938_v52  ;;  %1079 = vadd.xlane.f32.xlu0 %v1031_v56  ;;  %v1209_v14 = vsub.f32 0.0, %v1177_v13  ;;  %v718_v35 = vld [vmem:[%s7934_s1 + $0xb8] sm:$0xff]  ;;  %v716_v52 = vld [vmem:[%s7934_s1 + $0xa8] sm:$0xff] }
 0x189   :  { %v4717_v4 = vpop.xlane.xlu1 %855  ;;  %v4719_v5 = vpop.xlane.xlu0 %955  ;;  %v4827_v19 = vmul.f32 %v716_v52, %v4565_v62 }
 0x18a   :  { %v1793_v38 = vand.u32 2147483647, %v4717_v4  ;;  %v2380_v16 = vand.u32 2147483647, %v4719_v5  ;;  %v1861_v8 = vmul.f32 1.442695, %v1827_v3 }
 0x18b   :  { %v1243_v21 = vmul.f32 1.442695, %v1209_v14  ;;  %v687_v3 = vld [vmem:[%s7935_s0 + $0xc0] sm:$0xff]  ;;  %v4791_v14 = vmul.f32 %v4563_v61, %v686_v39 }
 0x18c   :  { %v1825_v9 = vsub.f32 0.0, %v1793_v38  ;;  %793 = vadd.xlane.f32.xlu1 %v744_v15  ;;  %893 = vadd.xlane.f32.xlu0 %v842_v59  ;;  %v2412_v17 = vsub.f32 0.0, %v2380_v16  ;;  %3778 = vpow2.f32 %v1861_v8  ;;  %v4794_v38 = vmul.f32 %v715_v7, %v4561_v58  ;;  %v690_v59 = vld [vmem:[%s7935_s0 + $0xd8] sm:$0xff]  ;;  %v689_v16 = vld [vmem:[%s7935_s0 + $0xd0] sm:$0xff] }
 0x18d   :  { %v4725_v22 = vpop.xlane.xlu1 %1047  ;;  %v4727_v18 = vpop.xlane.xlu0 %1051  ;;  %3780 = vpow2.f32 %v1243_v21  ;;  %v4800_v15 = vmul.f32 %v4553_v53, %v718_v35  ;;  %v4809_v8 = vmul.f32 %v684_v34, %v4565_v62  ;;  %v4812_v58 = vmul.f32 %v4563_v61, %v718_v35  ;;  %v688_v53 = vld [vmem:[%s7935_s0 + $0xc8] sm:$0xff] }
 0x18e   :  { %v2995_v63 = vand.u32 2147483647, %v4725_v22  ;;  %v2997_v26 = vand.u32 2147483647, %v4727_v18  ;;  %v1857_v32 = vmul.f32 1.442695, %v1825_v9  ;;  %v4844_v62 = vmul.f32 %v4645_v60, %v689_v16 }
 0x18f   :  { %v2446_v6 = vmul.f32 1.442695, %v2412_v17  ;;  %v722_v9 = vld [vmem:[%s7934_s1 + $0xd8] sm:$0xff]  ;;  %v720_v21 = vld [vmem:[%s7934_s1 + $0xc8] sm:$0xff]  ;;  %v4824_v17 = vmul.f32 %v716_v52, %v4555_v54  ;;  %v4865_v39 = vmul.f32 %v687_v3, %v4667_v24  ;;  %v4874_v7 = vmul.f32 %v4663_v25, %v689_v16 }
 0x190   :  { %v3027_v2 = vsub.f32 0.0, %v2995_v63  ;;  %985 = vadd.xlane.f32.xlu1 %v936_v41  ;;  %1085 = vadd.xlane.f32.xlu0 %v1034_v0  ;;  %v3029_v40 = vsub.f32 0.0, %v2997_v26  ;;  %3782 = vpow2.f32 %v1857_v32  ;;  %v4832_v63 = vmul.f32 %v4645_v60, %v721_v37 }
 0x191   :  { %v4749_v28 = vpop.xlane.xlu1 %861  ;;  %3784 = vpow2.f32 %v2446_v6  ;;  %v4829_v61 = vpop.xlane.xlu0 %759  ;;  %v4835_v41 = vmul.f32 %v687_v3, %v4647_v12  ;;  %v4838_v0 = vmul.f32 %v719_v50, %v4647_v12  ;;  %v4841_v26 = vmul.f32 %v4659_v20, %v690_v59 }
 0x192   :  { %v1796_v45 = vand.u32 2147483647, %v4749_v28  ;;  %v3059_v43 = vmul.f32 1.442695, %v3027_v2  ;;  %v3063_v56 = vmul.f32 1.442695, %v3029_v40  ;;  %v4849_v32 = vmul.f32 %v4659_v20, %v722_v9 }
 0x193   :  { %v4852_v2 = vmul.f32 %v688_v53, %v4661_v23  ;;  %v4858_v12 = vmul.f32 %v4663_v25, %v721_v37  ;;  %v1731_v60 = vmul.f32 0.0, %v4703_v49  ;;  %v4868_v20 = vmul.f32 %v719_v50, %v4667_v24 }
 0x194   :  { %803 = vadd.xlane.f32.xlu1 %v749_v27  ;;  %889 = vadd.xlane.f32.xlu0 %v840_v30  ;;  %v1828_v13 = vsub.f32 0.0, %v1796_v45  ;;  %3786 = vpow2.f32 %v3059_v43  ;;  %v4855_v27 = vmul.f32 %v720_v21, %v4661_v23  ;;  %v1113_v6 = vmax.f32 %v4705_v51, 0.0 }
 0x195   :  { %3788 = vpow2.f32 %v3063_v56  ;;  %v1697_v23 = vmax.f32 %v4717_v4, 0.0  ;;  %v1729_v40 = vmul.f32 0.0, %v4717_v4  ;;  %v2316_v49 = vmax.f32 %v4719_v5, 0.0 }
 0x196   :  { %v1863_v54 = vmul.f32 1.442695, %v1828_v13  ;;  %v4846_v29 = vpop.eup %3778  ;;  %v4879_v30 = vmul.f32 %v4672_v1, %v690_v59  ;;  %v2931_v4 = vmul.f32 0.0, %v4725_v22  ;;  %v4889_v25 = vmul.f32 %v4672_v1, %v722_v9 }
 0x197   :  { %v4860_v36 = vpop.eup %3780  ;;  %v1939_v45 = vadd.f32 1.0, %v4846_v29  ;;  %v4893_v35 = vsub.f32 %v1699_v42, %v1731_v60  ;;  %v1175_v43 = vand.u32 2147483647, %v4829_v61  ;;  %v4897_v52 = vmul.f32 %v688_v53, %v4676_v33 }
 0x198   :  { %995 = vadd.xlane.f32.xlu1 %v941_v31  ;;  %1081 = vadd.xlane.f32.xlu0 %v1032_v46  ;;  %3790 = vpow2.f32 %v1863_v54  ;;  %v1321_v46 = vadd.f32 1.0, %v4860_v36  ;;  %v2899_v31 = vmax.f32 %v4725_v22, 0.0  ;;  %v4900_v56 = vmul.f32 %v720_v21, %v4676_v33 }
 0x199   :  { %v4903_v22 = vsub.f32 %v1113_v6, %v4705_v51  ;;  %v4905_v13 = vsub.f32 %v1697_v23, %v1729_v40  ;;  %v2901_v1 = vmax.f32 %v4727_v18, 0.0  ;;  %v2933_v37 = vmul.f32 0.0, %v4727_v18 }
 0x19a   :  { %v4881_v24 = vpop.eup %3782  ;;  %7939 = vst [vmem:[#allocation2_spill] sm:$0xff] %v4900_v56  ;;  %3792 = vlog2.f32 %v1939_v45  ;;  %v4913_v50 = vsub.f32 %v2316_v49, %v4719_v5  ;;  %v1942_v59 = vmul.f32 -0.5, %v4846_v29  ;;  %v4920_v18 = vsub.f32 %v2899_v31, %v2931_v4  ;;  %v4938_v31 = vpop.f32.mrb[28].mxu0 }
 0x19b   :  { %v4891_v34 = vpop.eup %3784  ;;  %v1921_v3 = vadd.f32 1.0, %v4881_v24  ;;  %3794 = vlog2.f32 %v1321_v46  ;;  %v1732_v9 = vmul.f32 0.0, %v4749_v28  ;;  %v1207_v53 = vsub.f32 0.0, %v1175_v43  ;;  %7940 = vst [vmem:[#allocation3_spill] sm:$0xff] %v4938_v31 }
 0x19c   :  { %799 = vadd.xlane.f32.xlu1 %v747_v48  ;;  %899 = vadd.xlane.f32.xlu0 %v845_v10  ;;  %v958_v48 = vpop.xlane.xlu1 %957  ;;  %v4886_v10 = vpop.xlane.xlu0 %951  ;;  %v2524_v16 = vadd.f32 1.0, %v4891_v34  ;;  %v4926_v21 = vsub.f32 %v2901_v1, %v2933_v37  ;;  %v1111_v54 = vmax.f32 %v4829_v61, 0.0  ;;  %v1945_v23 = vand.u32 2147483647, %v4846_v29 }
 0x19d   :  { %v2378_v33 = vand.u32 2147483647, %v4886_v10  ;;  %v2381_v5 = vand.u32 2147483647, %v958_v48  ;;  %v2317_v42 = vmax.f32 %v958_v48, 0.0  ;;  %v1324_v40 = vmul.f32 -0.5, %v4860_v36 }
 0x19e   :  { %v4916_v51 = vpop.eup %3786  ;;  %3796 = vlog2.f32 %v1921_v3  ;;  %v1943_v45 = vadd.f32 1.0, %v1942_v59  ;;  %v1327_v49 = vand.u32 2147483647, %v4860_v36  ;;  %v4945_v37 = vpop.f32.mrb[29].mxu0  ;;  %v4948_v3 = vsub.f32 %v1111_v54, %v4829_v61 }
 0x19f   :  { %v2410_v60 = vsub.f32 0.0, %v2378_v33  ;;  %3798 = vlog2.f32 %v2524_v16  ;;  %v2413_v43 = vsub.f32 0.0, %v2381_v5  ;;  %7941 = vst [vmem:[#allocation4_spill] sm:$0xff] %v4945_v37  ;;  %v4950_v33 = vsub.f32 %v2317_v42, %v958_v48 }
 0x1a0   :  { %991 = vadd.xlane.f32.xlu1 %v4770_v44  ;;  %1091 = vadd.xlane.f32.xlu0 %v4779_v57  ;;  %v4922_v44 = vpop.eup %3788  ;;  %v1700_v57 = vmax.f32 %v4749_v28, 0.0  ;;  %v4929_v6 = vpop.xlane.xlu1 %857  ;;  %v3123_v28 = vadd.f32 1.0, %v4916_v51  ;;  %v2314_v59 = vmax.f32 %v4886_v10, 0.0  ;;  %vm4955_vm0 = vcmp.lt.f32.partialorder %v1945_v23, 0.0004427343 }
 0x1a1   :  { %v3141_v46 = vadd.f32 1.0, %v4922_v44  ;;  %v1794_v1 = vand.u32 2147483647, %v4929_v6  ;;  %v2442_v16 = vmul.f32 1.442695, %v2410_v60  ;;  %v4960_v61 = vpop.xlane.xlu0 %765  ;;  %v4963_v48 = vmul.f32 %v4846_v29, %v1943_v45 }
 0x1a2   :  { %v4940_v4 = vpop.eup %3790  ;;  %3800 = vlog2.f32 %v3123_v28  ;;  %vm4965_vm1 = vcmp.lt.f32.partialorder %v1327_v49, 0.0004427343  ;;  %v2527_v42 = vmul.f32 -0.5, %v4891_v34  ;;  %v2448_v60 = vmul.f32 1.442695, %v2413_v43 }
 0x1a3   :  { %v1826_v5 = vsub.f32 0.0, %v1794_v1  ;;  %3802 = vlog2.f32 %v3141_v46  ;;  %v1927_v28 = vand.u32 2147483647, %v4881_v24  ;;  %v2530_v1 = vand.u32 2147483647, %v4891_v34 }
 0x1a4   :  { %805 = vadd.xlane.f32.xlu1 %v4761_v11  ;;  %895 = vadd.xlane.f32.xlu0 %v4773_v47  ;;  %v4942_v11 = vsub.f32 %v1700_v57, %v1732_v9  ;;  %v1239_v47 = vmul.f32 1.442695, %v1207_v53  ;;  %v1325_v9 = vadd.f32 1.0, %v1324_v40  ;;  %v1924_v53 = vmul.f32 -0.5, %v4881_v24 }
 0x1a5   :  { %v1859_v23 = vmul.f32 1.442695, %v1826_v5  ;;  %v1178_v29 = vand.u32 2147483647, %v4960_v61  ;;  %v3126_v49 = vmul.f32 -0.5, %v4916_v51  ;;  %v3144_v46 = vmul.f32 -0.5, %v4922_v44  ;;  %v5013_v57 = vpop.xlane.xlu0 %1053 }
 0x1a6   :  { %3804 = vpow2.f32 %v1239_v47  ;;  %v1925_v45 = vadd.f32 1.0, %v1924_v53  ;;  %v3129_v43 = vand.u32 2147483647, %v4916_v51  ;;  %v1951_v5 = vmul.f32 -0.5, %v4940_v4 }
 0x1a7   :  { %3806 = vpow2.f32 %v2442_v16  ;;  %v4980_v16 = vpop.xlane.xlu1 %953  ;;  %v1326_v56 = vmul.f32 %v4860_v36, %v1325_v9  ;;  %vm4984_vm3 = vcmp.lt.f32.partialorder %v1927_v28, 0.0004427343  ;;  %vm4988_vm4 = vcmp.lt.f32.partialorder %v2530_v1, 0.0004427343 }
 0x1a8   :  { %997 = vadd.xlane.f32.xlu1 %v4791_v14  ;;  %1087 = vadd.xlane.f32.xlu0 %v4794_v38  ;;  %v1948_v14 = vadd.f32 1.0, %v4940_v4  ;;  %v3793_v38 = vpop.eup %3792  ;;  %3808 = vpow2.f32 %v1859_v23  ;;  %v2379_v36 = vand.u32 2147483647, %v4980_v16  ;;  %v1926_v28 = vmul.f32 %v4881_v24, %v1925_v45  ;;  %v5015_v24 = vpop.f32.mrb[30].mxu0 }
 0x1a9   :  { %v3795_v40 = vpop.eup %3794  ;;  %v1941_v47 = vmul.f32 0.6931472, %v3793_v38  ;;  %vm5002_vm5 = vcmp.lt.f32.partialorder %v3129_v43, 0.0004427343  ;;  %v1954_v45 = vand.u32 2147483647, %v4940_v4 }
 0x1aa   :  { %3810 = vlog2.f32 %v1948_v14  ;;  %v3797_v37 = vpop.eup %3796  ;;  %v1323_v31 = vmul.f32 0.6931472, %v3795_v40  ;;  %v1210_v14 = vsub.f32 0.0, %v1178_v29  ;;  %v3145_v40 = vadd.f32 1.0, %v3144_v46 }
 0x1ab   :  { %3812 = vpow2.f32 %v2448_v60  ;;  %v3799_v53 = vpop.eup %3798  ;;  %v4995_v60 = vsub.f32 %v2314_v59, %v4886_v10  ;;  %v1947_v9 = vsel %vm4955_vm0, %v4963_v48, %v1941_v47  ;;  %v1698_v47 = vmax.f32 %v4929_v6, 0.0 }
 0x1ac   :  { %801 = vadd.xlane.f32.xlu1 %v4797_v55  ;;  %901 = vadd.xlane.f32.xlu0 %v4800_v15  ;;  %v2528_v55 = vadd.f32 1.0, %v2527_v42  ;;  %v3147_v15 = vand.u32 2147483647, %v4922_v44  ;;  %v3127_v42 = vadd.f32 1.0, %v3126_v49  ;;  %v3801_v29 = vpop.eup %3800  ;;  %v1923_v49 = vmul.f32 0.6931472, %v3797_v37 }
 0x1ad   :  { %v2526_v10 = vmul.f32 0.6931472, %v3799_v53  ;;  %v3803_v48 = vpop.eup %3802  ;;  %v1730_v54 = vmul.f32 0.0, %v4929_v6  ;;  %v3146_v43 = vmul.f32 %v4922_v44, %v3145_v40  ;;  %v3125_v53 = vmul.f32 0.6931472, %v3801_v29 }
 0x1ae   :  { %v2529_v59 = vmul.f32 %v4891_v34, %v2528_v55  ;;  %vm5009_vm6 = vcmp.lt.f32.partialorder %v3147_v15, 0.0004427343  ;;  %v3128_v37 = vmul.f32 %v4916_v51, %v3127_v42  ;;  %v2998_v42 = vand.u32 2147483647, %v5013_v57 }
 0x1af   :  { %vm5045_vm7 = vcmp.lt.f32.partialorder %v1954_v45, 0.0004427343  ;;  %v2315_v29 = vmax.f32 %v4980_v16, 0.0 }
 0x1b0   :  { %993 = vadd.xlane.f32.xlu1 %v4809_v8  ;;  %1093 = vadd.xlane.f32.xlu0 %v4812_v58  ;;  %v1952_v8 = vadd.f32 1.0, %v1951_v5  ;;  %v1329_v58 = vsel %vm4965_vm1, %v1326_v56, %v1323_v31  ;;  %v1245_v56 = vmul.f32 1.442695, %v1210_v14  ;;  %v5022_v34 = vpop.eup %3804  ;;  %v2211_v31 = vadd.f32 %v1947_v9, %v4893_v35 }
 0x1b1   :  { %v2411_v5 = vsub.f32 0.0, %v2379_v36  ;;  %v5027_v55 = vpop.eup %3806  ;;  %v1593_v15 = vadd.f32 %v1329_v58, %v4903_v22  ;;  %v1929_v35 = vsel %vm4984_vm3, %v1926_v28, %v1923_v49  ;;  %v2532_v51 = vsel %vm4988_vm4, %v2529_v59, %v2526_v10  ;;  %v5043_v22 = vpop.f32.mrb[28].mxu1 }
 0x1b2   :  { %v5031_v6 = vmul.f32 %v4940_v4, %v1952_v8  ;;  %v5036_v14 = vpop.eup %3808  ;;  %v3143_v4 = vmul.f32 0.6931472, %v3803_v48  ;;  %v5049_v9 = vsub.f32 %v1698_v47, %v1730_v54  ;;  %3814 = vpow2.f32 %v1245_v56  ;;  %v5054_v23 = vpop.f32.mrb[29].mxu1 }
 0x1b3   :  { %v2444_v44 = vmul.f32 1.442695, %v2411_v5  ;;  %v1930_v8 = vadd.f32 1.0, %v5036_v14  ;;  %v5059_v28 = vsel %vm1623_vm2, %v2211_v31, 0.0  ;;  %v3030_v58 = vsub.f32 0.0, %v2998_v42  ;;  %v5062_v49 = vpop.xlane.xlu1 %771  ;;  %v5064_v10 = vpop.xlane.xlu0 %761 }
 0x1b4   :  { %811 = vadd.xlane.f32.xlu1 %v4844_v62  ;;  %897 = vadd.xlane.f32.xlu0 %v4824_v17  ;;  %v1114_v62 = vmax.f32 %v4960_v61, 0.0  ;;  %v5034_v17 = vpop.f32.mrb[31].mxu0  ;;  %v3811_v40 = vpop.eup %3810  ;;  %v2209_v59 = vadd.f32 %v1929_v35, %v4905_v13  ;;  %v5070_v48 = vsel %vm1623_vm2, %v1593_v15, 0.0  ;;  %v3131_v45 = vsel %vm5002_vm5, %v3128_v37, %v3125_v53 }
 0x1b5   :  { %v5056_v38 = vpop.eup %3812  ;;  %3816 = vpow2.f32 %v2444_v44  ;;  %v1303_v47 = vadd.f32 1.0, %v5022_v34  ;;  %v3149_v56 = vsel %vm5009_vm6, %v3146_v43, %v3143_v4  ;;  %v1950_v13 = vmul.f32 0.6931472, %v3811_v40  ;;  %v5084_v5 = vpop.f32.mrb[30].mxu1 }
 0x1b6   :  { %3818 = vlog2.f32 %v1930_v8  ;;  %v5076_v54 = vsub.f32 %v1114_v62, %v4960_v61  ;;  %v1181_v31 = vand.u32 2147483647, %v5062_v49  ;;  %v1933_v1 = vmul.f32 -0.5, %v5036_v14 }
 0x1b7   :  { %v5088_v37 = vsub.f32 %v2315_v29, %v4980_v16  ;;  %v3065_v61 = vmul.f32 1.442695, %v3030_v58  ;;  %v1176_v46 = vand.u32 2147483647, %v5064_v10  ;;  %v5092_v43 = vsel %vm1623_vm2, %v2209_v59, 0.0  ;;  %v5102_v35 = vpop.xlane.xlu0 %1049  ;;  %v5106_v40 = vpop.xlane.xlu1 %963 }
 0x1b8   :  { %1003 = vadd.xlane.f32.xlu1 %v4874_v7  ;;  %1089 = vadd.xlane.f32.xlu0 %v4827_v19  ;;  %v2796_v7 = vadd.f32 %v2532_v51, %v4913_v50  ;;  %v2506_v19 = vadd.f32 1.0, %v5027_v55  ;;  %v2533_v50 = vadd.f32 1.0, %v5056_v38  ;;  %v3413_v53 = vadd.f32 %v3149_v56, %v4926_v21 }
 0x1b9   :  { %v1306_v16 = vmul.f32 -0.5, %v5022_v34  ;;  %v1208_v62 = vsub.f32 0.0, %v1176_v46  ;;  %v1309_v51 = vand.u32 2147483647, %v5022_v34  ;;  %v2902_v44 = vmax.f32 %v5013_v57, 0.0 }
 0x1ba   :  { %v5095_v15 = vsel %vm1623_vm2, %v2796_v7, 0.0  ;;  %3820 = vlog2.f32 %v2506_v19  ;;  %v1213_v42 = vsub.f32 0.0, %v1181_v31  ;;  %v1934_v21 = vadd.f32 1.0, %v1933_v1 }
 0x1bb   :  { %3822 = vlog2.f32 %v1303_v47  ;;  %v1241_v4 = vmul.f32 1.442695, %v1208_v62  ;;  %v2536_v58 = vmul.f32 -0.5, %v5056_v38  ;;  %v1936_v59 = vand.u32 2147483647, %v5036_v14 }
 0x1bc   :  { %807 = vadd.xlane.f32.xlu1 %v4835_v41  ;;  %907 = vadd.xlane.f32.xlu0 %v4832_v63  ;;  %v3411_v41 = vadd.f32 %v3131_v45, %v4920_v18  ;;  %v5098_v63 = vpop.f32.mrb[31].mxu1  ;;  %3824 = vlog2.f32 %v2533_v50  ;;  %v1956_v18 = vsel %vm5045_vm7, %v5031_v6, %v1950_v13  ;;  %v5113_v8 = vpop.eup %3814  ;;  %v1307_v6 = vadd.f32 1.0, %v1306_v16 }
 0x1bd   :  { %3826 = vpow2.f32 %v3065_v61  ;;  %v2384_v36 = vand.u32 2147483647, %v5106_v40  ;;  %v2212_v45 = vadd.f32 %v1956_v18, %v4942_v11  ;;  %v2509_v47 = vmul.f32 -0.5, %v5027_v55  ;;  %v5135_v11 = vpop.xlane.xlu1 %767 }
 0x1be   :  { %v5116_v29 = vsel %vm1623_vm2, %v3411_v41, 0.0  ;;  %3828 = vpow2.f32 %v1241_v4  ;;  %v1251_v13 = vmul.f32 1.442695, %v1213_v42  ;;  %v2539_v50 = vand.u32 2147483647, %v5056_v38 }
 0x1bf   :  { %v5121_v7 = vpop.eup %3816  ;;  %v1935_v1 = vmul.f32 %v5036_v14, %v1934_v21  ;;  %v2537_v46 = vadd.f32 1.0, %v2536_v58  ;;  %v2512_v41 = vand.u32 2147483647, %v5027_v55  ;;  %vm1937_vm8 = vcmp.lt.f32.partialorder %v1936_v59, 0.0004427343 }
 0x1c0   :  { %999 = vadd.xlane.f32.xlu1 %v4865_v39  ;;  %1099 = vadd.xlane.f32.xlu0 %v4858_v12  ;;  %v2996_v39 = vand.u32 2147483647, %v5102_v35  ;;  %v5124_v12 = vsel %vm1623_vm2, %v3413_v53, 0.0  ;;  %v3819_v19 = vpop.eup %3818  ;;  %v2515_v56 = vadd.f32 1.0, %v5121_v7  ;;  %v1330_v16 = vadd.f32 1.0, %v5113_v8 }
 0x1c1   :  { %v1932_v31 = vmul.f32 0.6931472, %v3819_v19  ;;  %v2416_v62 = vsub.f32 0.0, %v2384_v36  ;;  %vm5138_vm9 = vcmp.lt.f32.partialorder %v1309_v51, 0.0004427343  ;;  %v2510_v18 = vadd.f32 1.0, %v2509_v47 }
 0x1c2   :  { %v3028_v61 = vsub.f32 0.0, %v2996_v39  ;;  %3830 = vlog2.f32 %v2515_v56  ;;  %v2934_v21 = vmul.f32 0.0, %v5013_v57  ;;  %v5147_v58 = vmul.f32 %v5022_v34, %v1307_v6 }
 0x1c3   :  { %v1938_v53 = vsel %vm1937_vm8, %v1935_v1, %v1932_v31  ;;  %3832 = vpow2.f32 %v1251_v13  ;;  %v2518_v59 = vmul.f32 -0.5, %v5121_v7  ;;  %v1179_v51 = vand.u32 2147483647, %v5135_v11 }
 0x1c4   :  { %813 = vadd.xlane.f32.xlu1 %v4841_v26  ;;  %903 = vadd.xlane.f32.xlu0 %v4838_v0  ;;  %v3061_v26 = vmul.f32 1.442695, %v3028_v61  ;;  %v3821_v42 = vpop.eup %3820  ;;  %v2210_v14 = vadd.f32 %v1938_v53, %v5049_v9  ;;  %v5152_v36 = vsel %vm1623_vm2, %v2212_v45, 0.0  ;;  %vm5154_vm10 = vcmp.lt.f32.partialorder %v2539_v50, 0.0004427343  ;;  %v5180_v61 = vpop.xlane.xlu0 %867 }
 0x1c5   :  { %v3823_v4 = vpop.eup %3822  ;;  %v2508_v34 = vmul.f32 0.6931472, %v3821_v42  ;;  %v2454_v47 = vmul.f32 1.442695, %v2416_v62  ;;  %v2538_v56 = vmul.f32 %v5056_v38, %v2537_v46  ;;  %v2511_v45 = vmul.f32 %v5027_v55, %v2510_v18  ;;  %v5194_v42 = vpop.xlane.xlu1 %959 }
 0x1c6   :  { %3834 = vpow2.f32 %v3061_v26  ;;  %v3825_v39 = vpop.eup %3824  ;;  %vm5165_vm11 = vcmp.lt.f32.partialorder %v2512_v41, 0.0004427343  ;;  %v5171_v50 = vsub.f32 %v2902_v44, %v2934_v21  ;;  %v2519_v38 = vadd.f32 1.0, %v2518_v59 }
 0x1c7   :  { %v5160_v19 = vpop.eup %3826  ;;  %3836 = vlog2.f32 %v1330_v16  ;;  %v1211_v55 = vsub.f32 0.0, %v1179_v51  ;;  %v2535_v46 = vmul.f32 0.6931472, %v3825_v39  ;;  %v2521_v41 = vand.u32 2147483647, %v5121_v7 }
 0x1c8   :  { %1005 = vadd.xlane.f32.xlu1 %v4879_v30  ;;  %1095 = vadd.xlane.f32.xlu0 %v4868_v20  ;;  %v2242_v30 = vsel %vm1623_vm2, %v2210_v14, 0.0  ;;  %v1117_v20 = vmax.f32 %v5062_v49, 0.0  ;;  %v5175_v31 = vpop.eup %3828  ;;  %v3150_v57 = vadd.f32 1.0, %v5160_v19  ;;  %3838 = vpow2.f32 %v2454_v47 }
 0x1c9   :  { %v2243_v6 = vadd.f32 %v2242_v30, %v5092_v43  ;;  %v1305_v43 = vmul.f32 0.6931472, %v3823_v4  ;;  %v1312_v44 = vadd.f32 1.0, %v5175_v31  ;;  %v1333_v16 = vmul.f32 -0.5, %v5113_v8 }
 0x1ca   :  { %v1336_v62 = vand.u32 2147483647, %v5113_v8  ;;  %v1799_v26 = vand.u32 2147483647, %v5180_v61  ;;  %v2520_v14 = vmul.f32 %v5121_v7, %v2519_v38  ;;  %v1247_v21 = vmul.f32 1.442695, %v1211_v55 }
 0x1cb   :  { %v5178_v1 = vadd.f32 %v5059_v28, %v2243_v6  ;;  %v1112_v28 = vmax.f32 %v5064_v10, 0.0  ;;  %3840 = vlog2.f32 %v1312_v44  ;;  %v2541_v59 = vsel %vm5154_vm10, %v2538_v56, %v2535_v46  ;;  %v7964_v46 = vld [vmem:[#allocation2_spill] sm:$0xff] }
 0x1cc   :  { %809 = vadd.xlane.f32.xlu1 %v4852_v2  ;;  %909 = vadd.xlane.f32.xlu0 %v4849_v32  ;;  %v2514_v32 = vsel %vm5165_vm11, %v2511_v45, %v2508_v34  ;;  %v5188_v2 = vsub.f32 %v1117_v20, %v5062_v49  ;;  %v3831_v53 = vpop.eup %3830  ;;  %v1311_v49 = vsel %vm5138_vm9, %v5147_v58, %v1305_v43  ;;  %vm2522_vm12 = vcmp.lt.f32.partialorder %v2521_v41, 0.0004427343 }
 0x1cd   :  { %v2517_v18 = vmul.f32 0.6931472, %v3831_v53  ;;  %v5202_v4 = vpop.eup %3832  ;;  %v2794_v51 = vadd.f32 %v2514_v32, %v4995_v60  ;;  %3842 = vlog2.f32 %v3150_v57  ;;  %v1315_v39 = vmul.f32 -0.5, %v5175_v31 }
 0x1ce   :  { %v1831_v0 = vsub.f32 0.0, %v1799_v26  ;;  %v2382_v58 = vand.u32 2147483647, %v5194_v42  ;;  %v1334_v30 = vadd.f32 1.0, %v1333_v16  ;;  %vm5211_vm13 = vcmp.lt.f32.partialorder %v1336_v62, 0.0004427343  ;;  %v5236_v26 = vpop.xlane.xlu0 %1059 }
 0x1cf   :  { %v1144_v20 = vsub.f32 %v1112_v28, %v5064_v10  ;;  %v1591_v34 = vadd.f32 %v1311_v49, %v4948_v3  ;;  %v2797_v6 = vadd.f32 %v2541_v59, %v4950_v33  ;;  %3844 = vpow2.f32 %v1247_v21 }
 0x1d0   :  { %1001 = vadd.xlane.f32.xlu1 %v4897_v52  ;;  %1101 = vadd.xlane.f32.xlu0 %v4889_v25  ;;  %v5207_v52 = vpop.eup %3834  ;;  %v2523_v25 = vsel %vm2522_vm12, %v2520_v14, %v2517_v18  ;;  %v2826_v56 = vsel %vm1623_vm2, %v2794_v51, 0.0  ;;  %v1357_v13 = vadd.f32 1.0, %v5202_v4  ;;  %v2414_v43 = vsub.f32 0.0, %v2382_v58  ;;  %v5241_v14 = vpop.xlane.xlu1 %773 }
 0x1d1   :  { %v2795_v9 = vadd.f32 %v2523_v25, %v5088_v37  ;;  %v3837_v60 = vpop.eup %3836  ;;  %v3132_v47 = vadd.f32 1.0, %v5207_v52  ;;  %v1316_v38 = vadd.f32 1.0, %v1315_v39  ;;  %v1869_v10 = vmul.f32 1.442695, %v1831_v0 }
 0x1d2   :  { %v1335_v55 = vmul.f32 %v5113_v8, %v1334_v30  ;;  %v1318_v3 = vand.u32 2147483647, %v5175_v31  ;;  %v2450_v33 = vmul.f32 1.442695, %v2414_v43  ;;  %v5227_v41 = vpop.eup %3838  ;;  %v3153_v44 = vmul.f32 -0.5, %v5160_v19 }
 0x1d3   :  { %v2827_v45 = vsel %vm1623_vm2, %v2795_v9, 0.0  ;;  %3846 = vlog2.f32 %v3132_v47  ;;  %v2320_v32 = vmax.f32 %v5106_v40, 0.0  ;;  %v2900_v28 = vmax.f32 %v5102_v35, 0.0 }
 0x1d4   :  { %905 = vadd.xlane.f32.xlu0 %v4855_v27  ;;  %v2828_v37 = vadd.f32 %v2827_v45, %v2826_v56  ;;  %v1332_v27 = vmul.f32 0.6931472, %v3837_v60  ;;  %v1624_v16 = vsel %vm1623_vm2, %v1591_v34, 0.0  ;;  %v2831_v8 = vsel %vm1623_vm2, %v2797_v6, 0.0 }
 0x1d5   :  { %v3841_v53 = vpop.eup %3840  ;;  %3848 = vlog2.f32 %v1357_v13  ;;  %v3135_v62 = vmul.f32 -0.5, %v5207_v52  ;;  %v1317_v18 = vmul.f32 %v5175_v31, %v1316_v38  ;;  %vm1319_vm14 = vcmp.lt.f32.partialorder %v1318_v3, 0.0004427343 }
 0x1d6   :  { %v2830_v57 = vadd.f32 %v5095_v15, %v2828_v37  ;;  %v1314_v49 = vmul.f32 0.6931472, %v3841_v53  ;;  %3850 = vpow2.f32 %v1869_v10  ;;  %v1338_v59 = vsel %vm5211_vm13, %v1335_v55, %v1332_v27 }
 0x1d7   :  { %v3843_v21 = vpop.eup %3842  ;;  %v2560_v51 = vadd.f32 1.0, %v5227_v41  ;;  %3852 = vpow2.f32 %v2450_v33  ;;  %v3154_v25 = vadd.f32 1.0, %v3153_v44  ;;  %v2932_v0 = vmul.f32 0.0, %v5102_v35  ;;  %v5264_v33 = vpop.xlane.xlu0 %863 }
 0x1d8   :  { %1097 = vadd.xlane.f32.xlu0 %v7964_v46  ;;  %v5239_v15 = vadd.f32 %v2831_v8, %v2830_v57  ;;  %v1320_v39 = vsel %vm1319_vm14, %v1317_v18, %v1314_v49  ;;  %v3001_v58 = vand.u32 2147483647, %v5236_v26  ;;  %v3136_v30 = vadd.f32 1.0, %v3135_v62  ;;  %v5280_v18 = vpop.xlane.xlu1 %965 }
 0x1d9   :  { %v1592_v31 = vadd.f32 %v1320_v39, %v1144_v20  ;;  %v1115_v9 = vmax.f32 %v5135_v11, 0.0  ;;  %v1182_v60 = vand.u32 2147483647, %v5241_v14  ;;  %v5250_v34 = vpop.eup %3844  ;;  %v1594_v7 = vadd.f32 %v1338_v59, %v5076_v54 }
 0x1da   :  { %v3156_v6 = vand.u32 2147483647, %v5160_v19  ;;  %v1360_v47 = vmul.f32 -0.5, %v5202_v4  ;;  %v3138_v56 = vand.u32 2147483647, %v5207_v52  ;;  %3854 = vlog2.f32 %v2560_v51 }
 0x1db   :  { %v3152_v45 = vmul.f32 0.6931472, %v3843_v21  ;;  %v1625_v35 = vsel %vm1623_vm2, %v1592_v31, 0.0  ;;  %v5259_v20 = vadd.f32 %v5152_v36, %v5178_v1  ;;  %v3155_v43 = vmul.f32 %v5160_v19, %v3154_v25 }
 0x1dc   :  { %v1626_v37 = vadd.f32 %v1625_v35, %v1624_v16  ;;  %v2964_v38 = vsub.f32 %v2900_v28, %v2932_v0  ;;  %v3033_v54 = vsub.f32 0.0, %v3001_v58  ;;  %v3137_v27 = vmul.f32 %v5207_v52, %v3136_v30 }
 0x1dd   :  { %v3847_v13 = vpop.eup %3846  ;;  %v1339_v55 = vadd.f32 1.0, %v5250_v34  ;;  %v1214_v3 = vsub.f32 0.0, %v1182_v60  ;;  %vm5266_vm15 = vcmp.lt.f32.partialorder %v3156_v6, 0.0004427343  ;;  %v1363_v36 = vand.u32 2147483647, %v5202_v4  ;;  %v5296_v6 = vpop.xlane.xlu0 %1055 }
 0x1de   :  { %v3134_v10 = vmul.f32 0.6931472, %v3847_v13  ;;  %v1628_v1 = vadd.f32 %v5070_v48, %v1626_v37  ;;  %vm3139_vm0 = vcmp.lt.f32.partialorder %v3138_v56, 0.0004427343  ;;  %v1629_v57 = vsel %vm1623_vm2, %v1594_v7, 0.0 }
 0x1df   :  { %v3849_v19 = vpop.eup %3848  ;;  %v3158_v52 = vsel %vm5266_vm15, %v3155_v43, %v3152_v45  ;;  %v1361_v44 = vadd.f32 1.0, %v1360_v47  ;;  %v3071_v62 = vmul.f32 1.442695, %v3033_v54  ;;  %v1797_v49 = vand.u32 2147483647, %v5264_v33 }
 0x1e0   :  { %v3140_v28 = vsel %vm3139_vm0, %v3137_v27, %v3134_v10  ;;  %v5275_v53 = vpop.eup %3850  ;;  %v5277_v8 = vadd.f32 %v1629_v57, %v1628_v1  ;;  %v2563_v21 = vmul.f32 -0.5, %v5227_v41  ;;  %3856 = vlog2.f32 %v1339_v55 }
 0x1e1   :  { %v3412_v16 = vadd.f32 %v3140_v28, %v2964_v38  ;;  %v5282_v48 = vpop.eup %3852  ;;  %v1703_v59 = vmax.f32 %v5180_v61, 0.0  ;;  %v1253_v51 = vmul.f32 1.442695, %v1214_v3  ;;  %v3414_v25 = vadd.f32 %v3158_v52, %v5171_v50  ;;  %v5306_v38 = vpop.xlane.xlu1 %769 }
 0x1e2   :  { %v1359_v39 = vmul.f32 0.6931472, %v3849_v19  ;;  %vm5287_vm1 = vcmp.lt.f32.partialorder %v1363_v36, 0.0004427343  ;;  %v1362_v31 = vmul.f32 %v5202_v4, %v1361_v44  ;;  %v1735_v60 = vmul.f32 0.0, %v5180_v61  ;;  %v5319_v19 = vpop.xlane.xlu0 %869 }
 0x1e3   :  { %v3444_v58 = vsel %vm1623_vm2, %v3412_v16, 0.0  ;;  %v1975_v7 = vadd.f32 1.0, %v5275_v53  ;;  %v2542_v47 = vadd.f32 1.0, %v5282_v48  ;;  %3858 = vpow2.f32 %v3071_v62 }
 0x1e4   :  { %v3445_v30 = vadd.f32 %v3444_v58, %v5116_v29  ;;  %v1829_v50 = vsub.f32 0.0, %v1797_v49  ;;  %v2385_v56 = vand.u32 2147483647, %v5280_v18  ;;  %v3855_v45 = vpop.eup %3854  ;;  %v2564_v35 = vadd.f32 1.0, %v2563_v21 }
 0x1e5   :  { %v2566_v13 = vand.u32 2147483647, %v5227_v41  ;;  %3860 = vpow2.f32 %v1253_v51  ;;  %v3448_v29 = vsel %vm1623_vm2, %v3414_v25, 0.0  ;;  %v1365_v61 = vsel %vm5287_vm1, %v1362_v31, %v1359_v39 }
 0x1e6   :  { %v3447_v4 = vadd.f32 %v5124_v12, %v3445_v30  ;;  %v1342_v43 = vmul.f32 -0.5, %v5250_v34  ;;  %v1865_v37 = vmul.f32 1.442695, %v1829_v50  ;;  %3862 = vlog2.f32 %v1975_v7 }
 0x1e7   :  { %v2417_v54 = vsub.f32 0.0, %v2385_v56  ;;  %v2999_v27 = vand.u32 2147483647, %v5296_v6  ;;  %v2352_v12 = vsub.f32 %v2320_v32, %v5106_v40  ;;  %v2562_v55 = vmul.f32 0.6931472, %v3855_v45 }
 0x1e8   :  { %v5308_v10 = vadd.f32 %v3448_v29, %v3447_v4  ;;  %v1147_v3 = vsub.f32 %v1115_v9, %v5135_v11  ;;  %3864 = vlog2.f32 %v2542_v47  ;;  %v2318_v46 = vmax.f32 %v5194_v42, 0.0  ;;  %v5353_v47 = vpop.xlane.xlu1 %961 }
 0x1e9   :  { %3866 = vpow2.f32 %v1865_v37  ;;  %v3031_v36 = vsub.f32 0.0, %v2999_v27  ;;  %v1180_v1 = vand.u32 2147483647, %v5306_v38  ;;  %v1597_v57 = vadd.f32 %v1365_v61, %v5188_v2 }
 0x1ea   :  { %v2565_v52 = vmul.f32 %v5227_v41, %v2564_v35  ;;  %v1343_v44 = vadd.f32 1.0, %v1342_v43  ;;  %v1345_v40 = vand.u32 2147483647, %v5250_v34  ;;  %v3857_v32 = vpop.eup %3856  ;;  %vm5324_vm3 = vcmp.lt.f32.partialorder %v2566_v13, 0.0004427343 }
 0x1eb   :  { %v5328_v11 = vsub.f32 %v1703_v59, %v1735_v60  ;;  %v2456_v9 = vmul.f32 1.442695, %v2417_v54  ;;  %v1212_v16 = vsub.f32 0.0, %v1180_v1  ;;  %v2905_v49 = vmax.f32 %v5236_v26, 0.0 }
 0x1ec   :  { %v2568_v62 = vsel %vm5324_vm3, %v2565_v52, %v2562_v55  ;;  %v2937_v2 = vmul.f32 0.0, %v5236_v26  ;;  %v1800_v41 = vand.u32 2147483647, %v5319_v19  ;;  %v1978_v21 = vmul.f32 -0.5, %v5275_v53 }
 0x1ed   :  { %v5337_v51 = vsub.f32 %v2318_v46, %v5194_v42  ;;  %v1118_v25 = vmax.f32 %v5241_v14, 0.0  ;;  %v3067_v59 = vmul.f32 1.442695, %v3031_v36  ;;  %v5340_v39 = vpop.eup %3858  ;;  %v5343_v0 = vsel %vm1623_vm2, %v1597_v57, 0.0 }
 0x1ee   :  { %v1341_v58 = vmul.f32 0.6931472, %v3857_v32  ;;  %v1344_v31 = vmul.f32 %v5250_v34, %v1343_v44  ;;  %vm5346_vm4 = vcmp.lt.f32.partialorder %v1345_v40, 0.0004427343  ;;  %v2800_v60 = vadd.f32 %v2568_v62, %v2352_v12  ;;  %v5378_v32 = vpop.xlane.xlu0 %1061 }
 0x1ef   :  { %v5350_v30 = vpop.eup %3860  ;;  %v2545_v42 = vmul.f32 -0.5, %v5282_v48  ;;  %3868 = vpow2.f32 %v2456_v9  ;;  %v1249_v7 = vmul.f32 1.442695, %v1212_v16  ;;  %v5355_v50 = vsub.f32 %v2905_v49, %v2937_v2 }
 0x1f0   :  { %v1701_v56 = vmax.f32 %v5264_v33, 0.0  ;;  %v1733_v45 = vmul.f32 0.0, %v5264_v33  ;;  %v1832_v34 = vsub.f32 0.0, %v1800_v41  ;;  %v3863_v35 = vpop.eup %3862  ;;  %v1979_v13 = vadd.f32 1.0, %v1978_v21 }
 0x1f1   :  { %v3177_v4 = vadd.f32 1.0, %v5340_v39  ;;  %v5361_v29 = vsub.f32 %v1118_v25, %v5241_v14  ;;  %3870 = vpow2.f32 %v3067_v59  ;;  %v1347_v43 = vsel %vm5346_vm4, %v1344_v31, %v1341_v58 }
 0x1f2   :  { %v3865_v61 = vpop.eup %3864  ;;  %v1366_v37 = vadd.f32 1.0, %v5350_v30  ;;  %3872 = vpow2.f32 %v1249_v7  ;;  %v2383_v54 = vand.u32 2147483647, %v5353_v47  ;;  %v5370_v33 = vsel %vm1623_vm2, %v2800_v60, 0.0 }
 0x1f3   :  { %v5367_v27 = vpop.eup %3866  ;;  %v1981_v12 = vand.u32 2147483647, %v5275_v53  ;;  %v2546_v55 = vadd.f32 1.0, %v2545_v42  ;;  %v2548_v14 = vand.u32 2147483647, %v5282_v48  ;;  %v5374_v36 = vsub.f32 %v1701_v56, %v1733_v45 }
 0x1f4   :  { %v1977_v46 = vmul.f32 0.6931472, %v3863_v35  ;;  %v1871_v1 = vmul.f32 1.442695, %v1832_v34  ;;  %v2415_v57 = vsub.f32 0.0, %v2383_v54  ;;  %v1595_v52 = vadd.f32 %v1347_v43, %v1147_v3 }
 0x1f5   :  { %v1980_v44 = vmul.f32 %v5275_v53, %v1979_v13  ;;  %3874 = vlog2.f32 %v3177_v4  ;;  %v2321_v40 = vmax.f32 %v5280_v18, 0.0  ;;  %v2544_v28 = vmul.f32 0.6931472, %v3865_v61 }
 0x1f6   :  { %v3180_v9 = vmul.f32 -0.5, %v5340_v39  ;;  %3876 = vlog2.f32 %v1366_v37  ;;  %v1957_v16 = vadd.f32 1.0, %v5367_v27  ;;  %vm5382_vm5 = vcmp.lt.f32.partialorder %v1981_v12, 0.0004427343 }
 0x1f7   :  { %v2547_v49 = vmul.f32 %v5282_v48, %v2546_v55  ;;  %v2903_v3 = vmax.f32 %v5296_v6, 0.0  ;;  %v2452_v53 = vmul.f32 1.442695, %v2415_v57  ;;  %v1983_v2 = vsel %vm5382_vm5, %v1980_v44, %v1977_v46 }
 0x1f8   :  { %v2935_v41 = vmul.f32 0.0, %v5296_v6  ;;  %3878 = vpow2.f32 %v1871_v1  ;;  %v3002_v21 = vand.u32 2147483647, %v5378_v32  ;;  %v1631_v59 = vsel %vm1623_vm2, %v1595_v52, 0.0 }
 0x1f9   :  { %v5392_v25 = vpop.eup %3868  ;;  %vm5395_vm6 = vcmp.lt.f32.partialorder %v2548_v14, 0.0004427343  ;;  %v5400_v48 = vsub.f32 %v2321_v40, %v5280_v18  ;;  %v1116_v31 = vmax.f32 %v5306_v38, 0.0  ;;  %v3181_v6 = vadd.f32 1.0, %v3180_v9  ;;  %v5411_v18 = vpop.xlane.xlu1 %779 }
 0x1fa   :  { %v2550_v26 = vsel %vm5395_vm6, %v2547_v49, %v2544_v28  ;;  %v3183_v60 = vand.u32 2147483647, %v5340_v39  ;;  %3880 = vlog2.f32 %v1957_v16  ;;  %v2215_v7 = vadd.f32 %v1983_v2, %v5328_v11  ;;  %v5444_v40 = vpop.xlane.xlu0 %865 }
 0x1fb   :  { %v5406_v42 = vpop.eup %3870  ;;  %v1369_v56 = vmul.f32 -0.5, %v5350_v30  ;;  %v1372_v45 = vand.u32 2147483647, %v5350_v30  ;;  %3882 = vpow2.f32 %v2452_v53  ;;  %v5416_v35 = vadd.f32 %v1631_v59, %v5277_v8 }
 0x1fc   :  { %v5413_v34 = vpop.eup %3872  ;;  %v2569_v13 = vadd.f32 1.0, %v5392_v25  ;;  %v5419_v4 = vsub.f32 %v2903_v3, %v2935_v41  ;;  %v3034_v61 = vsub.f32 0.0, %v3002_v21  ;;  %v2798_v43 = vadd.f32 %v2550_v26, %v5337_v51 }
 0x1fd   :  { %v5423_v11 = vsub.f32 %v1116_v31, %v5306_v38  ;;  %v1704_v37 = vmax.f32 %v5319_v19, 0.0  ;;  %v1736_v54 = vmul.f32 0.0, %v5319_v19  ;;  %v3182_v12 = vmul.f32 %v5340_v39, %v3181_v6 }
 0x1fe   :  { %vm5428_vm7 = vcmp.lt.f32.partialorder %v3183_v60, 0.0004427343  ;;  %v3159_v8 = vadd.f32 1.0, %v5406_v42  ;;  %v1185_v14 = vand.u32 2147483647, %v5411_v18  ;;  %v5435_v51 = vsel %vm1623_vm2, %v2215_v7, 0.0 }
 0x1ff   :  { %v3875_v46 = vpop.eup %3874  ;;  %v1370_v38 = vadd.f32 1.0, %v1369_v56  ;;  %vm5437_vm8 = vcmp.lt.f32.partialorder %v1372_v45, 0.0004427343  ;;  %v1348_v19 = vadd.f32 1.0, %v5413_v34  ;;  %3884 = vlog2.f32 %v2569_v13  ;;  %v5471_v13 = vpop.xlane.xlu1 %971 }
 0x200   :  { %v3877_v39 = vpop.eup %3876  ;;  %v2319_v57 = vmax.f32 %v5353_v47, 0.0  ;;  %v2906_v52 = vmax.f32 %v5378_v32, 0.0  ;;  %v3073_v44 = vmul.f32 1.442695, %v3034_v61  ;;  %v2833_v28 = vsel %vm1623_vm2, %v2798_v43, 0.0 }
 0x201   :  { %v1960_v9 = vmul.f32 -0.5, %v5367_v27  ;;  %v1963_v16 = vand.u32 2147483647, %v5367_v27  ;;  %v2938_v62 = vmul.f32 0.0, %v5378_v32  ;;  %v3179_v3 = vmul.f32 0.6931472, %v3875_v46 }
 0x202   :  { %v5450_v49 = vpop.eup %3878  ;;  %v2572_v53 = vmul.f32 -0.5, %v5392_v25  ;;  %3886 = vlog2.f32 %v3159_v8  ;;  %v1217_v2 = vsub.f32 0.0, %v1185_v14  ;;  %v1368_v41 = vmul.f32 0.6931472, %v3877_v39  ;;  %v5481_v14 = vpop.xlane.xlu0 %1057 }
 0x203   :  { %3888 = vlog2.f32 %v1348_v19  ;;  %v5453_v21 = vsub.f32 %v1704_v37, %v1736_v54  ;;  %v1798_v59 = vand.u32 2147483647, %v5444_v40  ;;  %v5457_v31 = vadd.f32 %v2833_v28, %v5239_v15 }
 0x204   :  { %v3881_v58 = vpop.eup %3880  ;;  %v1371_v26 = vmul.f32 %v5350_v30, %v1370_v38  ;;  %v5461_v32 = vsub.f32 %v2319_v57, %v5353_v47  ;;  %3890 = vpow2.f32 %v3073_v44  ;;  %v1961_v60 = vadd.f32 1.0, %v1960_v9 }
 0x205   :  { %v5463_v6 = vpop.eup %3882  ;;  %vm5465_vm9 = vcmp.lt.f32.partialorder %v1963_v16, 0.0004427343  ;;  %v2575_v56 = vand.u32 2147483647, %v5392_v25  ;;  %v1984_v45 = vadd.f32 1.0, %v5450_v49  ;;  %v3185_v15 = vsel %vm5428_vm7, %v3182_v12, %v3179_v3 }
 0x206   :  { %v2573_v30 = vadd.f32 1.0, %v2572_v53  ;;  %v5475_v47 = vsub.f32 %v2906_v52, %v2938_v62  ;;  %v1259_v61 = vmul.f32 1.442695, %v1217_v2  ;;  %v1374_v43 = vsel %vm5437_vm8, %v1371_v26, %v1368_v41  ;;  %v5509_v26 = vpop.xlane.xlu1 %775 }
 0x207   :  { %v3162_v37 = vmul.f32 -0.5, %v5406_v42  ;;  %v3165_v54 = vand.u32 2147483647, %v5406_v42  ;;  %v1830_v8 = vsub.f32 0.0, %v1798_v59  ;;  %v1959_v46 = vmul.f32 0.6931472, %v3881_v58 }
 0x208   :  { %v2551_v38 = vadd.f32 1.0, %v5463_v6  ;;  %v1121_v55 = vmax.f32 %v5411_v18, 0.0  ;;  %v2388_v12 = vand.u32 2147483647, %v5471_v13  ;;  %v3417_v19 = vadd.f32 %v3185_v15, %v5355_v50 }
 0x209   :  { %v1962_v39 = vmul.f32 %v5367_v27, %v1961_v60  ;;  %vm5488_vm10 = vcmp.lt.f32.partialorder %v2575_v56, 0.0004427343  ;;  %3892 = vlog2.f32 %v1984_v45  ;;  %v3885_v57 = vpop.eup %3884  ;;  %v1598_v52 = vadd.f32 %v1374_v43, %v5361_v29 }
 0x20a   :  { %v1351_v44 = vmul.f32 -0.5, %v5413_v34  ;;  %3894 = vpow2.f32 %v1259_v61  ;;  %v3000_v28 = vand.u32 2147483647, %v5481_v14  ;;  %v2574_v9 = vmul.f32 %v5392_v25, %v2573_v30 }
 0x20b   :  { %v3163_v16 = vadd.f32 1.0, %v3162_v37  ;;  %v1867_v62 = vmul.f32 1.442695, %v1830_v8  ;;  %v2420_v50 = vsub.f32 0.0, %v2388_v12  ;;  %v1965_v27 = vsel %vm5465_vm9, %v1962_v39, %v1959_v46 }
 0x20c   :  { %v3887_v3 = vpop.eup %3886  ;;  %vm5498_vm11 = vcmp.lt.f32.partialorder %v3165_v54, 0.0004427343  ;;  %3896 = vlog2.f32 %v2551_v38  ;;  %v5503_v29 = vsub.f32 %v1121_v55, %v5411_v18  ;;  %v5506_v41 = vsel %vm1623_vm2, %v3417_v19, 0.0 }
 0x20d   :  { %v3889_v2 = vpop.eup %3888  ;;  %v2571_v25 = vmul.f32 0.6931472, %v3885_v57  ;;  %v1354_v59 = vand.u32 2147483647, %v5413_v34  ;;  %v3032_v58 = vsub.f32 0.0, %v3000_v28  ;;  %v5514_v7 = vsel %vm1623_vm2, %v1598_v52, 0.0 }
 0x20e   :  { %v5511_v60 = vpop.eup %3890  ;;  %v1352_v56 = vadd.f32 1.0, %v1351_v44  ;;  %v1987_v45 = vmul.f32 -0.5, %v5450_v49  ;;  %v1702_v18 = vmax.f32 %v5444_v40, 0.0  ;;  %v2213_v15 = vadd.f32 %v1965_v27, %v5374_v36 }
 0x20f   :  { %v1990_v30 = vand.u32 2147483647, %v5450_v49  ;;  %3898 = vpow2.f32 %v1867_v62  ;;  %v2462_v61 = vmul.f32 1.442695, %v2420_v50  ;;  %v3161_v43 = vmul.f32 0.6931472, %v3887_v3  ;;  %v5545_v50 = vpop.xlane.xlu1 %967 }
 0x210   :  { %v3164_v37 = vmul.f32 %v5406_v42, %v3163_v16  ;;  %v3069_v54 = vmul.f32 1.442695, %v3032_v58  ;;  %v1183_v8 = vand.u32 2147483647, %v5509_v26  ;;  %v2577_v46 = vsel %vm5488_vm10, %v2574_v9, %v2571_v25  ;;  %v5531_v42 = vpop.xlane.xlu0 %875 }
 0x211   :  { %v1350_v38 = vmul.f32 0.6931472, %v3889_v2  ;;  %v2554_v55 = vmul.f32 -0.5, %v5463_v6  ;;  %v3186_v12 = vadd.f32 1.0, %v5511_v60  ;;  %vm5526_vm12 = vcmp.lt.f32.partialorder %v1354_v59, 0.0004427343 }
 0x212   :  { %v1988_v19 = vadd.f32 1.0, %v1987_v45  ;;  %v1734_v39 = vmul.f32 0.0, %v5444_v40  ;;  %v1215_v57 = vsub.f32 0.0, %v1183_v8  ;;  %v2248_v44 = vsel %vm1623_vm2, %v2213_v15, 0.0 }
 0x213   :  { %v3893_v52 = vpop.eup %3892  ;;  %v1353_v1 = vmul.f32 %v5413_v34, %v1352_v56  ;;  %vm5535_vm13 = vcmp.lt.f32.partialorder %v1990_v30, 0.0004427343  ;;  %3900 = vpow2.f32 %v2462_v61  ;;  %v2801_v16 = vadd.f32 %v2577_v46, %v5400_v48 }
 0x214   :  { %v5539_v9 = vpop.eup %3894  ;;  %v3167_v40 = vsel %vm5498_vm11, %v3164_v37, %v3161_v43  ;;  %v2557_v62 = vand.u32 2147483647, %v5463_v6  ;;  %3902 = vpow2.f32 %v3069_v54  ;;  %v2555_v3 = vadd.f32 1.0, %v2554_v55 }
 0x215   :  { %v1356_v34 = vsel %vm5526_vm12, %v1353_v1, %v1350_v38  ;;  %3904 = vlog2.f32 %v3186_v12  ;;  %v1803_v27 = vand.u32 2147483647, %v5531_v42  ;;  %v5551_v25 = vadd.f32 %v2248_v44, %v5259_v20  ;;  %v5575_v38 = vpop.xlane.xlu0 %1067 }
 0x216   :  { %v3897_v2 = vpop.eup %3896  ;;  %v1989_v48 = vmul.f32 %v5450_v49, %v1988_v19  ;;  %v5554_v53 = vsub.f32 %v1702_v18, %v1734_v39  ;;  %v1255_v59 = vmul.f32 1.442695, %v1215_v57  ;;  %v3415_v58 = vadd.f32 %v3167_v40, %v5419_v4 }
 0x217   :  { %v1986_v56 = vmul.f32 0.6931472, %v3893_v52  ;;  %v1393_v45 = vadd.f32 1.0, %v5539_v9  ;;  %v2386_v15 = vand.u32 2147483647, %v5545_v50  ;;  %v1596_v30 = vadd.f32 %v1356_v34, %v5423_v11 }
 0x218   :  { %vm5560_vm14 = vcmp.lt.f32.partialorder %v2557_v62, 0.0004427343  ;;  %v3189_v20 = vmul.f32 -0.5, %v5511_v60  ;;  %v2324_v49 = vmax.f32 %v5471_v13, 0.0  ;;  %v5569_v43 = vsel %vm1623_vm2, %v2801_v16, 0.0 }
 0x219   :  { %v5566_v18 = vpop.eup %3898  ;;  %v2553_v4 = vmul.f32 0.6931472, %v3897_v2  ;;  %v2556_v37 = vmul.f32 %v5463_v6, %v2555_v3  ;;  %v1835_v54 = vsub.f32 0.0, %v1803_v27  ;;  %v3192_v8 = vand.u32 2147483647, %v5511_v60  ;;  %v5606_v3 = vld [vmem:[%s7935_s0 + $0xf0] sm:$0xff] }
 0x21a   :  { %v2904_v11 = vmax.f32 %v5481_v14, 0.0  ;;  %v2936_v46 = vmul.f32 0.0, %v5481_v14  ;;  %3906 = vpow2.f32 %v1255_v59  ;;  %v3450_v55 = vsel %vm1623_vm2, %v3415_v58, 0.0 }
 0x21b   :  { %v1992_v12 = vsel %vm5535_vm13, %v1989_v48, %v1986_v56  ;;  %3908 = vlog2.f32 %v1393_v45  ;;  %v2418_v36 = vsub.f32 0.0, %v2386_v15  ;;  %v1633_v19 = vsel %vm1623_vm2, %v1596_v30, 0.0 }
 0x21c   :  { %v3190_v6 = vadd.f32 1.0, %v3189_v20  ;;  %v1966_v39 = vadd.f32 1.0, %v5566_v18  ;;  %v5583_v57 = vsub.f32 %v2324_v49, %v5471_v13  ;;  %v2559_v14 = vsel %vm5560_vm14, %v2556_v37, %v2553_v4  ;;  %v7995_v49 = vld [vmem:[#allocation3_spill] sm:$0xff] }
 0x21d   :  { %v5585_v52 = vpop.eup %3900  ;;  %v1119_v44 = vmax.f32 %v5509_v26, 0.0  ;;  %v1877_v1 = vmul.f32 1.442695, %v1835_v54  ;;  %v3005_v28 = vand.u32 2147483647, %v5575_v38  ;;  %v5594_v40 = vadd.f32 %v3450_v55, %v5308_v10 }
 0x21e   :  { %v5591_v16 = vpop.eup %3902  ;;  %v2216_v62 = vadd.f32 %v1992_v12, %v5453_v21  ;;  %vm5597_vm15 = vcmp.lt.f32.partialorder %v3192_v8, 0.0004427343  ;;  %v5601_v34 = vsub.f32 %v2904_v11, %v2936_v46  ;;  %v1634_v2 = vadd.f32 %v1633_v19, %v5416_v35  ;;  %v5614_v21 = vld [vmem:[%s7934_s1 + $0xf0] sm:$0xff]  ;;  %v5640_v8 = vld [vmem:[%s7934_s1 + $0xe0] sm:$0xff] }
 0x21f   :  { %v3905_v27 = vpop.eup %3904  ;;  %v1396_v48 = vmul.f32 -0.5, %v5539_v9  ;;  %v1399_v10 = vand.u32 2147483647, %v5539_v9  ;;  %v2458_v59 = vmul.f32 1.442695, %v2418_v36  ;;  %v2799_v58 = vadd.f32 %v2559_v14, %v5461_v32 }
 0x220   :  { %v3191_v56 = vmul.f32 %v5511_v60, %v3190_v6  ;;  %3910 = vlog2.f32 %v1966_v39  ;;  %v2596_v45 = vadd.f32 1.0, %v5585_v52  ;;  %v3168_v15 = vadd.f32 1.0, %v5591_v16  ;;  %v5630_v60 = vpop.xlane.xlu1 %781 }
 0x221   :  { %v5621_v35 = vsub.f32 %v1119_v44, %v5509_v26  ;;  %3912 = vpow2.f32 %v1877_v1  ;;  %v3037_v30 = vsub.f32 0.0, %v3005_v28  ;;  %v5624_v61 = vsel %vm1623_vm2, %v2216_v62, 0.0  ;;  %v7998_v1 = vld [vmem:[#allocation4_spill] sm:$0xff] }
 0x222   :  { %v3188_v20 = vmul.f32 0.6931472, %v3905_v27  ;;  %v757_v4 = vmul.f32 %v7995_v49, %v5606_v3  ;;  %v853_v32 = vmul.f32 %v7995_v49, %v5614_v21  ;;  %v1397_v37 = vadd.f32 1.0, %v1396_v48 }
 0x223   :  { %vm5632_vm0 = vcmp.lt.f32.partialorder %v1399_v10, 0.0004427343  ;;  %v1636_v26 = vadd.f32 %v5343_v0, %v1634_v2  ;;  %3914 = vpow2.f32 %v2458_v59  ;;  %v2835_v46 = vsel %vm1623_vm2, %v2799_v58, 0.0  ;;  %v5665_v58 = vpop.xlane.xlu0 %871 }
 0x224   :  { %v5642_v11 = vpop.eup %3906  ;;  %3916 = vlog2.f32 %v2596_v45  ;;  %v1707_v55 = vmax.f32 %v5531_v42, 0.0  ;;  %v1739_v12 = vmul.f32 0.0, %v5531_v42  ;;  %819 = vadd.xlane.f32.xlu1 %v757_v4  ;;  %915 = vadd.xlane.f32.xlu0 %v853_v32  ;;  %v2322_v0 = vmax.f32 %v5545_v50, 0.0 }
 0x225   :  { %v3909_v36 = vpop.eup %3908  ;;  %3918 = vlog2.f32 %v3168_v15  ;;  %v3079_v19 = vmul.f32 1.442695, %v3037_v30  ;;  %v1186_v6 = vand.u32 2147483647, %v5630_v60  ;;  %v3194_v39 = vsel %vm5597_vm15, %v3191_v56, %v3188_v20 }
 0x226   :  { %v1969_v14 = vmul.f32 -0.5, %v5566_v18  ;;  %v2599_v44 = vmul.f32 -0.5, %v5585_v52  ;;  %v851_v28 = vmul.f32 %v5640_v8, %v7998_v1  ;;  %v2836_v42 = vadd.f32 %v2835_v46, %v5457_v31 }
 0x227   :  { %v1398_v62 = vmul.f32 %v5539_v9, %v1397_v37  ;;  %v1375_v27 = vadd.f32 1.0, %v5642_v11  ;;  %v5659_v2 = vadd.f32 %v5514_v7, %v1636_v26  ;;  %v1395_v48 = vmul.f32 0.6931472, %v3909_v36 }
 0x228   :  { %v1972_v13 = vand.u32 2147483647, %v5566_v18  ;;  %v2602_v10 = vand.u32 2147483647, %v5585_v52  ;;  %v5663_v59 = vsub.f32 %v1707_v55, %v1739_v12  ;;  %911 = vadd.xlane.f32.xlu0 %v851_v28  ;;  %v3418_v56 = vadd.f32 %v3194_v39, %v5475_v47 }
 0x229   :  { %v3171_v31 = vmul.f32 -0.5, %v5591_v16  ;;  %3920 = vpow2.f32 %v3079_v19  ;;  %v1218_v9 = vsub.f32 0.0, %v1186_v6  ;;  %v1970_v15 = vadd.f32 1.0, %v1969_v14 }
 0x22a   :  { %v3911_v45 = vpop.eup %3910  ;;  %v2600_v7 = vadd.f32 1.0, %v2599_v44  ;;  %v5670_v30 = vsub.f32 %v2322_v0, %v5545_v50  ;;  %v2909_v20 = vmax.f32 %v5575_v38, 0.0  ;;  %3922 = vlog2.f32 %v1375_v27 }
 0x22b   :  { %v5673_v49 = vpop.eup %3912  ;;  %v2838_v4 = vadd.f32 %v5370_v33, %v2836_v42  ;;  %v2941_v32 = vmul.f32 0.0, %v5575_v38  ;;  %v1801_v47 = vand.u32 2147483647, %v5665_v58  ;;  %v1401_v37 = vsel %vm5632_vm0, %v1398_v62, %v1395_v48 }
 0x22c   :  { %vm5680_vm1 = vcmp.lt.f32.partialorder %v1972_v13, 0.0004427343  ;;  %v3174_v50 = vand.u32 2147483647, %v5591_v16  ;;  %v1378_v46 = vmul.f32 -0.5, %v5642_v11  ;;  %v5689_v12 = vsel %vm1623_vm2, %v3418_v56, 0.0 }
 0x22d   :  { %v5686_v55 = vpop.eup %3914  ;;  %vm5691_vm3 = vcmp.lt.f32.partialorder %v2602_v10, 0.0004427343  ;;  %v3172_v38 = vadd.f32 1.0, %v3171_v31  ;;  %v1261_v54 = vmul.f32 1.442695, %v1218_v9  ;;  %v1971_v19 = vmul.f32 %v5566_v18, %v1970_v15 }
 0x22e   :  { %v3917_v36 = vpop.eup %3916  ;;  %v1968_v0 = vmul.f32 0.6931472, %v3911_v45  ;;  %v2601_v6 = vmul.f32 %v5585_v52, %v2600_v7  ;;  %v2011_v39 = vadd.f32 1.0, %v5673_v49  ;;  %v1601_v44 = vadd.f32 %v1401_v37, %v5503_v29  ;;  %v691_v52 = vld [vmem:[%s7935_s0 + $0xe0] sm:$0xff]  ;;  %v5719_v45 = vpop.xlane.xlu1 %973  ;;  %v5738_v37 = vld [vmem:[%s7934_s1 + $0xf8] sm:$0xff] }
 0x22f   :  { %v3919_v14 = vpop.eup %3918  ;;  %v1381_v28 = vand.u32 2147483647, %v5642_v11  ;;  %v5701_v42 = vadd.f32 %v5569_v43, %v2838_v4  ;;  %v1833_v62 = vsub.f32 0.0, %v1801_v47  ;;  %vm5703_vm4 = vcmp.lt.f32.partialorder %v3174_v50, 0.0004427343 }
 0x230   :  { %v1379_v48 = vadd.f32 1.0, %v1378_v46  ;;  %v2578_v18 = vadd.f32 1.0, %v5686_v55  ;;  %v5708_v13 = vsub.f32 %v2909_v20, %v2941_v32  ;;  %v2598_v29 = vmul.f32 0.6931472, %v3917_v36  ;;  %v5731_v32 = vpop.xlane.xlu0 %1063 }
 0x231   :  { %v3173_v10 = vmul.f32 %v5591_v16, %v3172_v38  ;;  %v1122_v43 = vmax.f32 %v5630_v60, 0.0  ;;  %3924 = vpow2.f32 %v1261_v54  ;;  %v1974_v56 = vsel %vm5680_vm1, %v1971_v19, %v1968_v0  ;;  %v5765_v19 = vld [vmem:[%s7935_s0 + $0xe8] sm:$0xff] }
 0x232   :  { %v3170_v31 = vmul.f32 0.6931472, %v3919_v14  ;;  %3926 = vlog2.f32 %v2011_v39  ;;  %v949_v9 = vmul.f32 %v5043_v22, %v5606_v3  ;;  %v5724_v7 = vsel %vm1623_vm2, %v1601_v44, 0.0  ;;  %v724_v44 = vld [vmem:[%s7934_s1 + $0xe8] sm:$0xff] }
 0x233   :  { %v5721_v15 = vpop.eup %3920  ;;  %vm5726_vm5 = vcmp.lt.f32.partialorder %v1381_v28, 0.0004427343  ;;  %v755_v20 = vmul.f32 %v691_v52, %v7998_v1  ;;  %v1873_v4 = vmul.f32 1.442695, %v1833_v62  ;;  %v1380_v47 = vmul.f32 %v5642_v11, %v1379_v48 }
 0x234   :  { %3928 = vlog2.f32 %v2578_v18  ;;  %v1705_v3 = vmax.f32 %v5665_v58, 0.0  ;;  %v1043_v26 = vmul.f32 %v5640_v8, %v5054_v23  ;;  %1011 = vadd.xlane.f32.xlu1 %v949_v9  ;;  %v3923_v50 = vpop.eup %3922  ;;  %v2214_v1 = vadd.f32 %v1974_v56, %v5554_v53  ;;  %v5756_v8 = vld [vmem:[%s7935_s0 + $0xf8] sm:$0xff] }
 0x235   :  { %v2604_v46 = vsel %vm5691_vm3, %v2601_v6, %v2598_v29  ;;  %v1737_v11 = vmul.f32 0.0, %v5665_v58  ;;  %v2389_v38 = vand.u32 2147483647, %v5719_v45  ;;  %v3176_v54 = vsel %vm5703_vm4, %v3173_v10, %v3170_v31 }
 0x236   :  { %v3213_v36 = vadd.f32 1.0, %v5721_v15  ;;  %v5751_v0 = vsub.f32 %v1122_v43, %v5630_v60  ;;  %v3003_v53 = vand.u32 2147483647, %v5731_v32  ;;  %1103 = vadd.xlane.f32.xlu0 %v1043_v26  ;;  %v2014_v58 = vmul.f32 -0.5, %v5673_v49  ;;  %v5780_v43 = vpop.xlane.xlu1 %777  ;;  %v5797_v26 = vpop.xlane.xlu0 %877 }
 0x237   :  { %3930 = vpow2.f32 %v1873_v4  ;;  %v854_v33 = vmul.f32 %v5015_v24, %v5738_v37  ;;  %v2421_v60 = vsub.f32 0.0, %v2389_v38  ;;  %v2804_v6 = vadd.f32 %v2604_v46, %v5583_v57 }
 0x238   :  { %v1377_v39 = vmul.f32 0.6931472, %v3923_v50  ;;  %v2017_v14 = vand.u32 2147483647, %v5673_v49  ;;  %v3035_v28 = vsub.f32 0.0, %v3003_v53  ;;  %815 = vadd.xlane.f32.xlu1 %v755_v20  ;;  %v2250_v62 = vsel %vm1623_vm2, %v2214_v1, 0.0 }
 0x239   :  { %v3416_v27 = vadd.f32 %v3176_v54, %v5601_v34  ;;  %v2581_v48 = vmul.f32 -0.5, %v5686_v55  ;;  %v758_v18 = vmul.f32 %v5015_v24, %v5756_v8  ;;  %3932 = vlog2.f32 %v3213_v36 }
 0x23a   :  { %v5777_v57 = vsub.f32 %v1705_v3, %v1737_v11  ;;  %v947_v29 = vmul.f32 %v691_v52, %v5054_v23  ;;  %v2464_v10 = vmul.f32 1.442695, %v2421_v60  ;;  %917 = vadd.xlane.f32.xlu0 %v854_v33  ;;  %v2015_v31 = vadd.f32 1.0, %v2014_v58 }
 0x23b   :  { %v5782_v56 = vpop.eup %3924  ;;  %v756_v34 = vmul.f32 %v5765_v19, %v5034_v17  ;;  %v852_v9 = vmul.f32 %v724_v44, %v5034_v17  ;;  %v3075_v20 = vmul.f32 1.442695, %v3035_v28  ;;  %v2251_v24 = vadd.f32 %v2250_v62, %v5551_v25 }
 0x23c   :  { %v3927_v4 = vpop.eup %3926  ;;  %v5789_v3 = vsel %vm1623_vm2, %v2804_v6, 0.0  ;;  %v1383_v23 = vsel %vm5726_vm5, %v1380_v47, %v1377_v39  ;;  %vm5793_vm6 = vcmp.lt.f32.partialorder %v2017_v14, 0.0004427343  ;;  %1007 = vadd.xlane.f32.xlu1 %v947_v29  ;;  %v3452_v50 = vsel %vm1623_vm2, %v3416_v27, 0.0  ;;  %v5810_v6 = vpop.xlane.xlu1 %969 }
 0x23d   :  { %v2582_v17 = vadd.f32 1.0, %v2581_v48  ;;  %v2584_v1 = vand.u32 2147483647, %v5686_v55  ;;  %v1184_v25 = vand.u32 2147483647, %v5780_v43  ;;  %v3216_v11 = vmul.f32 -0.5, %v5721_v15  ;;  %v5824_v27 = vpop.xlane.xlu0 %1069 }
 0x23e   :  { %v3929_v46 = vpop.eup %3928  ;;  %v3219_v16 = vand.u32 2147483647, %v5721_v15  ;;  %v1402_v47 = vadd.f32 1.0, %v5782_v56  ;;  %3934 = vpow2.f32 %v2464_v10  ;;  %913 = vadd.xlane.f32.xlu0 %v852_v9  ;;  %v1599_v38 = vadd.f32 %v1383_v23, %v5621_v35 }
 0x23f   :  { %v2013_v54 = vmul.f32 0.6931472, %v3927_v4  ;;  %v2016_v36 = vmul.f32 %v5673_v49, %v2015_v31  ;;  %3936 = vpow2.f32 %v3075_v20  ;;  %v2253_v53 = vadd.f32 %v5435_v51, %v2251_v24 }
 0x240   :  { %v1044_v58 = vmul.f32 %v724_v44, %v5098_v63  ;;  %v1216_v33 = vsub.f32 0.0, %v1184_v25  ;;  %v1804_v60 = vand.u32 2147483647, %v5797_v26  ;;  %821 = vadd.xlane.f32.xlu1 %v758_v18  ;;  %v3453_v14 = vadd.f32 %v3452_v50, %v5594_v40 }
 0x241   :  { %v5812_v39 = vpop.eup %3930  ;;  %v2580_v28 = vmul.f32 0.6931472, %v3929_v46  ;;  %v2583_v35 = vmul.f32 %v5686_v55, %v2582_v17  ;;  %vm5816_vm7 = vcmp.lt.f32.partialorder %v2584_v1, 0.0004427343  ;;  %v3217_v51 = vadd.f32 1.0, %v3216_v11 }
 0x242   :  { %vm5820_vm8 = vcmp.lt.f32.partialorder %v3219_v16, 0.0004427343  ;;  %3938 = vlog2.f32 %v1402_v47  ;;  %v1257_v62 = vmul.f32 1.442695, %v1216_v33  ;;  %1105 = vadd.xlane.f32.xlu0 %v1044_v58  ;;  %v1639_v48 = vsel %vm1623_vm2, %v1599_v38, 0.0 }
 0x243   :  { %v2019_v40 = vsel %vm5793_vm6, %v2016_v36, %v2013_v54  ;;  %v1045_v55 = vmul.f32 %v5043_v22, %v5614_v21  ;;  %v2387_v18 = vand.u32 2147483647, %v5810_v6  ;;  %v3933_v29 = vpop.eup %3932  ;;  %v1993_v10 = vadd.f32 1.0, %v5812_v39  ;;  %v5870_v54 = vpop.xlane.xlu1 %787 }
 0x244   :  { %v2325_v31 = vmax.f32 %v5719_v45, 0.0  ;;  %3940 = vpow2.f32 %v1257_v62  ;;  %v1836_v9 = vsub.f32 0.0, %v1804_v60  ;;  %817 = vadd.xlane.f32.xlu1 %v756_v34  ;;  %v2586_v20 = vsel %vm5816_vm7, %v2583_v35, %v2580_v28 }
 0x245   :  { %v3455_v4 = vadd.f32 %v5506_v41, %v3453_v14  ;;  %v2907_v24 = vmax.f32 %v5731_v32, 0.0  ;;  %v3006_v23 = vand.u32 2147483647, %v5824_v27  ;;  %v2219_v22 = vadd.f32 %v2019_v40, %v5663_v59 }
 0x246   :  { %v2939_v21 = vmul.f32 0.0, %v5731_v32  ;;  %v948_v52 = vmul.f32 %v5765_v19, %v5098_v63  ;;  %v2419_v50 = vsub.f32 0.0, %v2387_v18  ;;  %1107 = vadd.xlane.f32.xlu0 %v1045_v55  ;;  %v3215_v17 = vmul.f32 0.6931472, %v3933_v29 }
 0x247   :  { %v1405_v34 = vmul.f32 -0.5, %v5782_v56  ;;  %v1408_v1 = vand.u32 2147483647, %v5782_v56  ;;  %v5846_v41 = vadd.f32 %v5624_v61, %v2253_v53  ;;  %v2802_v46 = vadd.f32 %v2586_v20, %v5670_v30 }
 0x248   :  { %v5848_v25 = vpop.eup %3934  ;;  %v3218_v59 = vmul.f32 %v5721_v15, %v3217_v51  ;;  %3942 = vlog2.f32 %v1993_v10  ;;  %v1879_v32 = vmul.f32 1.442695, %v1836_v9  ;;  %1009 = vadd.xlane.f32.xlu1 %v948_v52  ;;  %v5855_v19 = vadd.f32 %v1639_v48, %v5659_v2  ;;  %v5872_v2 = vpop.xlane.xlu0 %873 }
 0x249   :  { %v5852_v63 = vpop.eup %3936  ;;  %v5858_v11 = vsub.f32 %v2325_v31, %v5719_v45  ;;  %v950_v61 = vmul.f32 %v5084_v5, %v5756_v8  ;;  %v3038_v16 = vsub.f32 0.0, %v3006_v23  ;;  %v5863_v47 = vsel %vm1623_vm2, %v2219_v22, 0.0 }
 0x24a   :  { %v5866_v30 = vadd.f32 %v5689_v12, %v3455_v4  ;;  %v5868_v15 = vsub.f32 %v2907_v24, %v2939_v21  ;;  %v2460_v38 = vmul.f32 1.442695, %v2419_v50  ;;  %v3221_v45 = vsel %vm5820_vm8, %v3218_v59, %v3215_v17  ;;  %v5911_v4 = vpop.xlane.xlu1 %979 }
 0x24b   :  { %v1406_v36 = vadd.f32 1.0, %v1405_v34  ;;  %vm5876_vm9 = vcmp.lt.f32.partialorder %v1408_v1, 0.0004427343  ;;  %v2605_v53 = vadd.f32 1.0, %v5848_v25  ;;  %v2841_v12 = vsel %vm1623_vm2, %v2802_v46, 0.0 }
 0x24c   :  { %v3939_v58 = vpop.eup %3938  ;;  %v3195_v33 = vadd.f32 1.0, %v5852_v63  ;;  %v1120_v60 = vmax.f32 %v5780_v43, 0.0  ;;  %3944 = vpow2.f32 %v1879_v32  ;;  %1013 = vadd.xlane.f32.xlu1 %v950_v61  ;;  %v1046_v14 = vmul.f32 %v5084_v5, %v5738_v37  ;;  %v5923_v59 = vpop.xlane.xlu0 %1065 }
 0x24d   :  { %v3081_v28 = vmul.f32 1.442695, %v3038_v16  ;;  %v1189_v35 = vand.u32 2147483647, %v5870_v54  ;;  %v1802_v49 = vand.u32 2147483647, %v5872_v2  ;;  %v3421_v44 = vadd.f32 %v3221_v45, %v5708_v13 }
 0x24e   :  { %v5888_v51 = vpop.eup %3940  ;;  %v1996_v62 = vmul.f32 -0.5, %v5812_v39  ;;  %v1999_v48 = vand.u32 2147483647, %v5812_v39  ;;  %3946 = vpow2.f32 %v2460_v38  ;;  %v5894_v40 = vadd.f32 %v2841_v12, %v5701_v42 }
 0x24f   :  { %v1404_v55 = vmul.f32 0.6931472, %v3939_v58  ;;  %v1407_v5 = vmul.f32 %v5782_v56, %v1406_v36  ;;  %3948 = vlog2.f32 %v2605_v53  ;;  %v1708_v37 = vmax.f32 %v5797_v26, 0.0 }
 0x250   :  { %3950 = vlog2.f32 %v3195_v33  ;;  %v1740_v18 = vmul.f32 0.0, %v5797_v26  ;;  %v1834_v29 = vsub.f32 0.0, %v1802_v49  ;;  %1109 = vadd.xlane.f32.xlu1 %v1046_v14  ;;  %v5900_v13 = vsub.f32 %v1120_v60, %v5780_v43 }
 0x251   :  { %v1384_v10 = vadd.f32 1.0, %v5888_v51  ;;  %3952 = vpow2.f32 %v3081_v28  ;;  %v1221_v31 = vsub.f32 0.0, %v1189_v35  ;;  %v5904_v9 = vsel %vm1623_vm2, %v3421_v44, 0.0 }
 0x252   :  { %v3943_v42 = vpop.eup %3942  ;;  %v1997_v56 = vadd.f32 1.0, %v1996_v62  ;;  %vm5906_vm10 = vcmp.lt.f32.partialorder %v1999_v48, 0.0004427343  ;;  %v2323_v26 = vmax.f32 %v5810_v6, 0.0  ;;  %v1410_v43 = vsel %vm5876_vm9, %v1407_v5, %v1404_v55  ;;  %v5958_v62 = vpop.xlane.xlu1 %783 }
 0x253   :  { %v2608_v24 = vmul.f32 -0.5, %v5848_v25  ;;  %v3198_v23 = vmul.f32 -0.5, %v5852_v63  ;;  %v1875_v22 = vmul.f32 1.442695, %v1834_v29  ;;  %v5917_v21 = vsub.f32 %v1708_v37, %v1740_v18 }
 0x254   :  { %v2910_v52 = vmax.f32 %v5824_v27, 0.0  ;;  %v2942_v50 = vmul.f32 0.0, %v5824_v27  ;;  %v1125_v17 = vmax.f32 %v5870_v54, 0.0  ;;  %v1995_v34 = vmul.f32 0.6931472, %v3943_v42 }
 0x255   :  { %3954 = vlog2.f32 %v1384_v10  ;;  %v1267_v1 = vmul.f32 1.442695, %v1221_v31  ;;  %v2392_v46 = vand.u32 2147483647, %v5911_v4  ;;  %v1602_v61 = vadd.f32 %v1410_v43, %v5751_v0 }
 0x256   :  { %v5925_v32 = vpop.eup %3944  ;;  %v2611_v16 = vand.u32 2147483647, %v5848_v25  ;;  %v3201_v38 = vand.u32 2147483647, %v5852_v63  ;;  %3956 = vpow2.f32 %v1875_v22  ;;  %v1998_v27 = vmul.f32 %v5812_v39, %v1997_v56 }
 0x257   :  { %v2609_v45 = vadd.f32 1.0, %v2608_v24  ;;  %v3199_v36 = vadd.f32 1.0, %v3198_v23  ;;  %v5932_v8 = vsub.f32 %v2323_v26, %v5810_v6  ;;  %v5936_v58 = vsub.f32 %v2910_v52, %v2942_v50 }
 0x258   :  { %v5934_v53 = vpop.eup %3946  ;;  %v5939_v12 = vsub.f32 %v1125_v17, %v5870_v54  ;;  %v1706_v0 = vmax.f32 %v5872_v2, 0.0  ;;  %v3004_v33 = vand.u32 2147483647, %v5923_v59  ;;  %v2001_v39 = vsel %vm5906_vm10, %v1998_v27, %v1995_v34 }
 0x259   :  { %v3949_v60 = vpop.eup %3948  ;;  %v2020_v14 = vadd.f32 1.0, %v5925_v32  ;;  %3958 = vpow2.f32 %v1267_v1  ;;  %v2424_v6 = vsub.f32 0.0, %v2392_v46  ;;  %v5947_v35 = vsel %vm1623_vm2, %v1602_v61, 0.0 }
 0x25a   :  { %v3951_v28 = vpop.eup %3950  ;;  %vm5949_vm11 = vcmp.lt.f32.partialorder %v2611_v16, 0.0004427343  ;;  %vm5953_vm12 = vcmp.lt.f32.partialorder %v3201_v38, 0.0004427343  ;;  %v1738_v44 = vmul.f32 0.0, %v5872_v2  ;;  %v2610_v55 = vmul.f32 %v5848_v25, %v2609_v45 }
 0x25b   :  { %v5960_v48 = vpop.eup %3952  ;;  %v3200_v5 = vmul.f32 %v5852_v63, %v3199_v36  ;;  %v2587_v37 = vadd.f32 1.0, %v5934_v53  ;;  %v2328_v18 = vmax.f32 %v5911_v4, 0.0  ;;  %v2217_v29 = vadd.f32 %v2001_v39, %v5777_v57 }
 0x25c   :  { %v1387_v10 = vmul.f32 -0.5, %v5888_v51  ;;  %v2908_v31 = vmax.f32 %v5923_v59, 0.0  ;;  %v3036_v42 = vsub.f32 0.0, %v3004_v33  ;;  %v3197_v2 = vmul.f32 0.6931472, %v3951_v28  ;;  %v5998_v33 = vpop.xlane.xlu0 %883 }
 0x25d   :  { %3960 = vlog2.f32 %v2020_v14  ;;  %v2470_v56 = vmul.f32 1.442695, %v2424_v6  ;;  %v1187_v20 = vand.u32 2147483647, %v5958_v62  ;;  %v2607_v26 = vmul.f32 0.6931472, %v3949_v60 }
 0x25e   :  { %v3222_v25 = vadd.f32 1.0, %v5960_v48  ;;  %v5971_v63 = vsub.f32 %v1706_v0, %v1738_v44  ;;  %v3077_v43 = vmul.f32 1.442695, %v3036_v42  ;;  %v1390_v23 = vand.u32 2147483647, %v5888_v51 }
 0x25f   :  { %v3955_v24 = vpop.eup %3954  ;;  %3962 = vlog2.f32 %v2587_v37  ;;  %v2940_v57 = vmul.f32 0.0, %v5923_v59  ;;  %v1219_v22 = vsub.f32 0.0, %v1187_v20  ;;  %v2256_v50 = vsel %vm1623_vm2, %v2217_v29, 0.0 }
 0x260   :  { %v5975_v52 = vpop.eup %3956  ;;  %v1388_v17 = vadd.f32 1.0, %v1387_v10  ;;  %v5979_v34 = vsub.f32 %v2328_v18, %v5911_v4  ;;  %3964 = vpow2.f32 %v3077_v43  ;;  %v3203_v1 = vsel %vm5953_vm12, %v3200_v5, %v3197_v2  ;;  %v6011_v5 = vpop.xlane.xlu1 %975 }
 0x261   :  { %v2023_v46 = vmul.f32 -0.5, %v5925_v32  ;;  %3966 = vpow2.f32 %v2470_v56  ;;  %v1263_v61 = vmul.f32 1.442695, %v1219_v22  ;;  %v2613_v59 = vsel %vm5949_vm11, %v2610_v55, %v2607_v26 }
 0x262   :  { %v1386_v16 = vmul.f32 0.6931472, %v3955_v24  ;;  %v2590_v38 = vmul.f32 -0.5, %v5934_v53  ;;  %3968 = vlog2.f32 %v3222_v25  ;;  %v5990_v4 = vadd.f32 %v2256_v50, %v5846_v41 }
 0x263   :  { %v5987_v27 = vpop.eup %3958  ;;  %vm5992_vm13 = vcmp.lt.f32.partialorder %v1390_v23, 0.0004427343  ;;  %v2026_v36 = vand.u32 2147483647, %v5925_v32  ;;  %v2002_v0 = vadd.f32 1.0, %v5975_v52  ;;  %v3419_v60 = vadd.f32 %v3203_v1, %v5868_v15  ;;  %v6044_v1 = vpop.xlane.xlu0 %1075 }
 0x264   :  { %v1389_v39 = vmul.f32 %v5888_v51, %v1388_v17  ;;  %v3225_v14 = vmul.f32 -0.5, %v5960_v48  ;;  %3970 = vpow2.f32 %v1263_v61  ;;  %v2805_v41 = vadd.f32 %v2613_v59, %v5858_v11 }
 0x265   :  { %v2024_v6 = vadd.f32 1.0, %v2023_v46  ;;  %v2593_v28 = vand.u32 2147483647, %v5934_v53  ;;  %v6005_v49 = vsub.f32 %v2908_v31, %v2940_v57  ;;  %v2591_v44 = vadd.f32 1.0, %v2590_v38 }
 0x266   :  { %v1392_v54 = vsel %vm5992_vm13, %v1389_v39, %v1386_v16  ;;  %v1429_v55 = vadd.f32 1.0, %v5987_v27  ;;  %v1807_v15 = vand.u32 2147483647, %v5998_v33  ;;  %vm6013_vm14 = vcmp.lt.f32.partialorder %v2026_v36, 0.0004427343  ;;  %v6050_v36 = vpop.xlane.xlu1 %789 }
 0x267   :  { %v3961_v51 = vpop.eup %3960  ;;  %v3228_v11 = vand.u32 2147483647, %v5960_v48  ;;  %v1432_v18 = vmul.f32 -0.5, %v5987_v27  ;;  %3972 = vlog2.f32 %v2002_v0  ;;  %v3458_v29 = vsel %vm1623_vm2, %v3419_v60, 0.0 }
 0x268   :  { %v3226_v10 = vadd.f32 1.0, %v3225_v14  ;;  %v1123_v31 = vmax.f32 %v5958_v62, 0.0  ;;  %v1839_v42 = vsub.f32 0.0, %v1807_v15  ;;  %v6022_v56 = vsel %vm1623_vm2, %v2805_v41, 0.0 }
 0x269   :  { %v3963_v2 = vpop.eup %3962  ;;  %v1600_v20 = vadd.f32 %v1392_v54, %v5900_v13  ;;  %v2025_v26 = vmul.f32 %v5925_v32, %v2024_v6  ;;  %v2390_v25 = vand.u32 2147483647, %v6011_v5  ;;  %v2022_v24 = vmul.f32 0.6931472, %v3961_v51 }
 0x26a   :  { %v6027_v43 = vpop.eup %3964  ;;  %v2592_v23 = vmul.f32 %v5934_v53, %v2591_v44  ;;  %vm6030_vm15 = vcmp.lt.f32.partialorder %v2593_v28, 0.0004427343  ;;  %3974 = vlog2.f32 %v1429_v55  ;;  %v6037_v50 = vadd.f32 %v3458_v29, %v5866_v30 }
 0x26b   :  { %v6034_v22 = vpop.eup %3966  ;;  %vm6039_vm0 = vcmp.lt.f32.partialorder %v3228_v11, 0.0004427343  ;;  %v1433_v32 = vadd.f32 1.0, %v1432_v18  ;;  %v3204_v17 = vadd.f32 1.0, %v6027_v43  ;;  %v2589_v46 = vmul.f32 0.6931472, %v3963_v2  ;;  %v6072_v18 = vpop.xlane.xlu0 %879 }
 0x26c   :  { %v3969_v53 = vpop.eup %3968  ;;  %v3227_v61 = vmul.f32 %v5960_v48, %v3226_v10  ;;  %v1885_v59 = vmul.f32 1.442695, %v1839_v42  ;;  %v2422_v16 = vsub.f32 0.0, %v2390_v25  ;;  %v1641_v38 = vsel %vm1623_vm2, %v1600_v20, 0.0  ;;  %v6087_v2 = vpop.xlane.xlu1 %981 }
 0x26d   :  { %v1435_v30 = vand.u32 2147483647, %v5987_v27  ;;  %v2005_v45 = vmul.f32 -0.5, %v5975_v52  ;;  %3976 = vlog2.f32 %v3204_v17  ;;  %v2028_v60 = vsel %vm6013_vm14, %v2025_v26, %v2022_v24 }
 0x26e   :  { %v6052_v0 = vpop.eup %3970  ;;  %v2008_v39 = vand.u32 2147483647, %v5975_v52  ;;  %v2632_v48 = vadd.f32 1.0, %v6034_v22  ;;  %v6059_v14 = vsub.f32 %v1123_v31, %v5958_v62  ;;  %v3224_v41 = vmul.f32 0.6931472, %v3969_v53 }
 0x26f   :  { %v6062_v6 = vmul.f32 %v5987_v27, %v1433_v32  ;;  %v1711_v28 = vmax.f32 %v5998_v33, 0.0  ;;  %v2466_v54 = vmul.f32 1.442695, %v2422_v16  ;;  %v1642_v44 = vadd.f32 %v1641_v38, %v5855_v19 }
 0x270   :  { %v2595_v55 = vsel %vm6030_vm15, %v2592_v23, %v2589_v46  ;;  %v1743_v15 = vmul.f32 0.0, %v5998_v33  ;;  %3978 = vpow2.f32 %v1885_v59  ;;  %v2220_v37 = vadd.f32 %v2028_v60, %v5917_v21 }
 0x271   :  { %v3973_v51 = vpop.eup %3972  ;;  %v2006_v62 = vadd.f32 1.0, %v2005_v45  ;;  %v1411_v11 = vadd.f32 1.0, %v6052_v0  ;;  %v3009_v27 = vand.u32 2147483647, %v6044_v1  ;;  %vm6074_vm1 = vcmp.lt.f32.partialorder %v1435_v30, 0.0004427343 }
 0x272   :  { %vm6078_vm3 = vcmp.lt.f32.partialorder %v2008_v39, 0.0004427343  ;;  %3980 = vlog2.f32 %v2632_v48  ;;  %v2635_v33 = vmul.f32 -0.5, %v6034_v22  ;;  %v1190_v21 = vand.u32 2147483647, %v6050_v36 }
 0x273   :  { %v2803_v10 = vadd.f32 %v2595_v55, %v5932_v8  ;;  %v3230_v31 = vsel %vm6039_vm0, %v3227_v61, %v3224_v41  ;;  %3982 = vpow2.f32 %v2466_v54  ;;  %v3041_v42 = vsub.f32 0.0, %v3009_v27 }
 0x274   :  { %v3975_v20 = vpop.eup %3974  ;;  %v2004_v26 = vmul.f32 0.6931472, %v3973_v51  ;;  %v3207_v25 = vmul.f32 -0.5, %v6027_v43  ;;  %v1222_v24 = vsub.f32 0.0, %v1190_v21  ;;  %v1805_v23 = vand.u32 2147483647, %v6072_v18 }
 0x275   :  { %v1644_v57 = vadd.f32 %v5724_v7, %v1642_v44  ;;  %v2638_v32 = vand.u32 2147483647, %v6034_v22  ;;  %3984 = vlog2.f32 %v1411_v11  ;;  %v6093_v8 = vsub.f32 %v1711_v28, %v1743_v15  ;;  %v6112_v15 = vpop.xlane.xlu0 %1071 }
 0x276   :  { %v2007_v13 = vmul.f32 %v5975_v52, %v2006_v62  ;;  %v3087_v17 = vmul.f32 1.442695, %v3041_v42  ;;  %v1837_v53 = vsub.f32 0.0, %v1805_v23  ;;  %v2393_v46 = vand.u32 2147483647, %v6087_v2 }
 0x277   :  { %v3977_v61 = vpop.eup %3976  ;;  %v2843_v59 = vsel %vm1623_vm2, %v2803_v10, 0.0  ;;  %v3422_v16 = vadd.f32 %v3230_v31, %v5936_v58  ;;  %v1431_v38 = vmul.f32 0.6931472, %v3975_v20  ;;  %v1269_v30 = vmul.f32 1.442695, %v1222_v24  ;;  %v6143_v31 = vpop.xlane.xlu1 %785 }
 0x278   :  { %v2010_v7 = vsel %vm6078_vm3, %v2007_v13, %v2004_v26  ;;  %v2636_v45 = vadd.f32 1.0, %v2635_v33  ;;  %v3208_v60 = vadd.f32 1.0, %v3207_v25  ;;  %v2326_v39 = vmax.f32 %v6011_v5, 0.0 }
 0x279   :  { %v6103_v52 = vsel %vm1623_vm2, %v2220_v37, 0.0  ;;  %v3210_v48 = vand.u32 2147483647, %v6027_v43  ;;  %v6107_v41 = vadd.f32 %v5947_v35, %v1644_v57  ;;  %v1881_v28 = vmul.f32 1.442695, %v1837_v53 }
 0x27a   :  { %v6109_v54 = vpop.eup %3978  ;;  %v2844_v58 = vadd.f32 %v2843_v59, %v5894_v40  ;;  %v3206_v44 = vmul.f32 0.6931472, %v3977_v61  ;;  %3986 = vpow2.f32 %v3087_v17  ;;  %v2425_v55 = vsub.f32 0.0, %v2393_v46 }
 0x27b   :  { %v1437_v51 = vsel %vm6074_vm1, %v6062_v6, %v1431_v38  ;;  %v2218_v37 = vadd.f32 %v2010_v7, %v5971_v63  ;;  %vm6118_vm4 = vcmp.lt.f32.partialorder %v2638_v32, 0.0004427343  ;;  %v1414_v35 = vmul.f32 -0.5, %v6052_v0 }
 0x27c   :  { %3988 = vpow2.f32 %v1269_v30  ;;  %v3981_v11 = vpop.eup %3980  ;;  %v6124_v40 = vsel %vm1623_vm2, %v3422_v16, 0.0  ;;  %v2637_v27 = vmul.f32 %v6034_v22, %v2636_v45  ;;  %v3209_v19 = vmul.f32 %v6027_v43, %v3208_v60 }
 0x27d   :  { %v6129_v29 = vsub.f32 %v2326_v39, %v6011_v5  ;;  %v6131_v6 = vpop.eup %3982  ;;  %vm6133_vm5 = vcmp.lt.f32.partialorder %v3210_v48, 0.0004427343  ;;  %v2047_v33 = vadd.f32 1.0, %v6109_v54  ;;  %3990 = vpow2.f32 %v1881_v28 }
 0x27e   :  { %v3007_v21 = vand.u32 2147483647, %v6112_v15  ;;  %v2846_v10 = vadd.f32 %v5789_v3, %v2844_v58  ;;  %v1605_v22 = vadd.f32 %v1437_v51, %v5939_v12  ;;  %v3212_v43 = vsel %vm6133_vm5, %v3209_v19, %v3206_v44  ;;  %v6183_v44 = vpop.xlane.xlu0 %885 }
 0x27f   :  { %v2472_v5 = vmul.f32 1.442695, %v2425_v55  ;;  %v3985_v42 = vpop.eup %3984  ;;  %v2258_v20 = vsel %vm1623_vm2, %v2218_v37, 0.0  ;;  %v1415_v26 = vadd.f32 1.0, %v1414_v35  ;;  %v1417_v25 = vand.u32 2147483647, %v6052_v0 }
 0x280   :  { %v3039_v24 = vsub.f32 0.0, %v3007_v21  ;;  %v2634_v23 = vmul.f32 0.6931472, %v3981_v11  ;;  %v2614_v57 = vadd.f32 1.0, %v6131_v6  ;;  %v2913_v3 = vmax.f32 %v6044_v1, 0.0 }
 0x281   :  { %v2945_v12 = vmul.f32 0.0, %v6044_v1  ;;  %v3420_v32 = vadd.f32 %v3212_v43, %v6005_v49  ;;  %3992 = vlog2.f32 %v2047_v33  ;;  %v1188_v17 = vand.u32 2147483647, %v6143_v31 }
 0x282   :  { %v3083_v13 = vmul.f32 1.442695, %v3039_v24  ;;  %v2259_v53 = vadd.f32 %v2258_v20, %v5990_v4  ;;  %v1413_v46 = vmul.f32 0.6931472, %v3985_v42  ;;  %v1126_v61 = vmax.f32 %v6050_v36, 0.0 }
 0x283   :  { %3994 = vpow2.f32 %v2472_v5  ;;  %v6155_v59 = vsel %vm1623_vm2, %v1605_v22, 0.0  ;;  %v1416_v16 = vmul.f32 %v6052_v0, %v1415_v26  ;;  %vm6158_vm6 = vcmp.lt.f32.partialorder %v1417_v25, 0.0004427343  ;;  %v6202_v22 = vpop.xlane.xlu1 %977 }
 0x284   :  { %v6163_v49 = vadd.f32 %v6022_v56, %v2846_v10  ;;  %v6165_v1 = vpop.eup %3986  ;;  %v2640_v4 = vsel %vm6118_vm4, %v2637_v27, %v2634_v23  ;;  %3996 = vlog2.f32 %v2614_v57  ;;  %v1709_v30 = vmax.f32 %v6072_v18, 0.0 }
 0x285   :  { %v1741_v7 = vmul.f32 0.0, %v6072_v18  ;;  %v3460_v0 = vsel %vm1623_vm2, %v3420_v32, 0.0  ;;  %v2050_v60 = vmul.f32 -0.5, %v6109_v54  ;;  %3998 = vpow2.f32 %v3083_v13  ;;  %v6229_v32 = vpop.xlane.xlu0 %1077 }
 0x286   :  { %v6171_v45 = vpop.eup %3988  ;;  %v1220_v39 = vsub.f32 0.0, %v1188_v17  ;;  %v2261_v56 = vadd.f32 %v5863_v47, %v2259_v53  ;;  %v1419_v48 = vsel %vm6158_vm6, %v1416_v16, %v1413_v46  ;;  %v6178_v28 = vsub.f32 %v2913_v3, %v2945_v12 }
 0x287   :  { %v6181_v58 = vsub.f32 %v1126_v61, %v6050_v36  ;;  %v6185_v18 = vpop.eup %3990  ;;  %v2808_v55 = vadd.f32 %v2640_v4, %v5979_v34  ;;  %v2617_v51 = vmul.f32 -0.5, %v6131_v6  ;;  %v3249_v37 = vadd.f32 1.0, %v6165_v1 }
 0x288   :  { %v2329_v47 = vmax.f32 %v6087_v2, 0.0  ;;  %v3461_v62 = vadd.f32 %v3460_v0, %v6037_v50  ;;  %v2053_v35 = vand.u32 2147483647, %v6109_v54  ;;  %v1438_v11 = vadd.f32 1.0, %v6171_v45 }
 0x289   :  { %v6194_v36 = vsub.f32 %v1709_v30, %v1741_v7  ;;  %v1603_v27 = vadd.f32 %v1419_v48, %v6059_v14  ;;  %v2051_v19 = vadd.f32 1.0, %v2050_v60  ;;  %v1265_v63 = vmul.f32 1.442695, %v1220_v39 }
 0x28a   :  { %v1808_v34 = vand.u32 2147483647, %v6183_v44  ;;  %v2620_v33 = vand.u32 2147483647, %v6131_v6  ;;  %v2029_v21 = vadd.f32 1.0, %v6185_v18  ;;  %v2911_v10 = vmax.f32 %v6112_v15, 0.0 }
 0x28b   :  { %v2943_v50 = vmul.f32 0.0, %v6112_v15  ;;  %v3993_v43 = vpop.eup %3992  ;;  %v6205_v5 = vsel %vm1623_vm2, %v2808_v55, 0.0  ;;  %v2618_v42 = vadd.f32 1.0, %v2617_v51  ;;  %4000 = vlog2.f32 %v3249_v37 }
 0x28c   :  { %v6208_v14 = vadd.f32 %v6103_v52, %v2261_v56  ;;  %v3463_v26 = vadd.f32 %v5904_v9, %v3461_v62  ;;  %vm6213_vm7 = vcmp.lt.f32.partialorder %v2053_v35, 0.0004427343  ;;  %4002 = vlog2.f32 %v1438_v11  ;;  %v6248_v56 = vpop.xlane.xlu1 %795 }
 0x28d   :  { %v6210_v20 = vpop.eup %3994  ;;  %v6218_v15 = vsub.f32 %v2329_v47, %v6087_v2  ;;  %v1647_v24 = vsel %vm1623_vm2, %v1603_v27, 0.0  ;;  %4004 = vpow2.f32 %v1265_v63  ;;  %v1840_v23 = vsub.f32 0.0, %v1808_v34 }
 0x28e   :  { %v2391_v57 = vand.u32 2147483647, %v6202_v22  ;;  %v3997_v52 = vpop.eup %3996  ;;  %v2052_v3 = vmul.f32 %v6109_v54, %v2051_v19  ;;  %vm6223_vm8 = vcmp.lt.f32.partialorder %v2620_v33, 0.0004427343  ;;  %4006 = vlog2.f32 %v2029_v21 }
 0x28f   :  { %v6227_v9 = vsub.f32 %v2911_v10, %v2943_v50  ;;  %v6231_v2 = vpop.eup %3998  ;;  %v2049_v13 = vmul.f32 0.6931472, %v3993_v43  ;;  %v2619_v17 = vmul.f32 %v6131_v6, %v2618_v42  ;;  %v2641_v53 = vadd.f32 1.0, %v6210_v20 }
 0x290   :  { %v1124_v46 = vmax.f32 %v6143_v31, 0.0  ;;  %v6237_v54 = vadd.f32 %v1647_v24, %v6107_v41  ;;  %v3252_v61 = vmul.f32 -0.5, %v6165_v1  ;;  %v1712_v16 = vmax.f32 %v6183_v44, 0.0 }
 0x291   :  { %v2423_v38 = vsub.f32 0.0, %v2391_v57  ;;  %v2616_v4 = vmul.f32 0.6931472, %v3997_v52  ;;  %v6242_v30 = vadd.f32 %v6124_v40, %v3463_v26  ;;  %v1887_v7 = vmul.f32 1.442695, %v1840_v23 }
 0x292   :  { %v3010_v0 = vand.u32 2147483647, %v6229_v32  ;;  %v1441_v6 = vmul.f32 -0.5, %v6171_v45  ;;  %v3231_v60 = vadd.f32 1.0, %v6231_v2  ;;  %v1744_v39 = vmul.f32 0.0, %v6183_v44 }
 0x293   :  { %v2468_v41 = vmul.f32 1.442695, %v2423_v38  ;;  %v2055_v48 = vsel %vm6213_vm7, %v2052_v3, %v2049_v13  ;;  %v3255_v55 = vand.u32 2147483647, %v6165_v1  ;;  %4008 = vlog2.f32 %v2641_v53  ;;  %v6279_v3 = vpop.xlane.xlu0 %881 }
 0x294   :  { %v3042_v40 = vsub.f32 0.0, %v3010_v0  ;;  %v3253_v51 = vadd.f32 1.0, %v3252_v61  ;;  %v1444_v37 = vand.u32 2147483647, %v6171_v45  ;;  %v2032_v47 = vmul.f32 -0.5, %v6185_v18  ;;  %v6291_v61 = vpop.xlane.xlu1 %987 }
 0x295   :  { %4010 = vpow2.f32 %v2468_v41  ;;  %v4001_v62 = vpop.eup %4000  ;;  %v2622_v44 = vsel %vm6223_vm8, %v2619_v17, %v2616_v4  ;;  %v2644_v35 = vmul.f32 -0.5, %v6210_v20  ;;  %v1193_v11 = vand.u32 2147483647, %v6248_v56 }
 0x296   :  { %4012 = vpow2.f32 %v1887_v7  ;;  %v4003_v27 = vpop.eup %4002  ;;  %v2223_v19 = vadd.f32 %v2055_v48, %v6093_v8  ;;  %v1442_v63 = vadd.f32 1.0, %v1441_v6  ;;  %v6261_v34 = vsub.f32 %v1124_v46, %v6143_v31 }
 0x297   :  { %4014 = vlog2.f32 %v3231_v60  ;;  %v6263_v33 = vpop.eup %4004  ;;  %vm6265_vm9 = vcmp.lt.f32.partialorder %v3255_v55, 0.0004427343  ;;  %v2035_v10 = vand.u32 2147483647, %v6185_v18  ;;  %v6270_v50 = vsub.f32 %v1712_v16, %v1744_v39 }
 0x298   :  { %v3089_v43 = vmul.f32 1.442695, %v3042_v40  ;;  %v4007_v42 = vpop.eup %4006  ;;  %v2806_v26 = vadd.f32 %v2622_v44, %v6129_v29  ;;  %v3254_v8 = vmul.f32 %v6165_v1, %v3253_v51  ;;  %vm6274_vm10 = vcmp.lt.f32.partialorder %v1444_v37, 0.0004427343 }
 0x299   :  { %v2033_v31 = vadd.f32 1.0, %v2032_v47  ;;  %v3251_v24 = vmul.f32 0.6931472, %v4001_v62  ;;  %v2645_v23 = vadd.f32 1.0, %v2644_v35  ;;  %v2647_v57 = vand.u32 2147483647, %v6210_v20 }
 0x29a   :  { %v1225_v52 = vsub.f32 0.0, %v1193_v11  ;;  %v6282_v12 = vsel %vm1623_vm2, %v2223_v19, 0.0  ;;  %v1440_v13 = vmul.f32 0.6931472, %v4003_v27  ;;  %v1443_v29 = vmul.f32 %v6171_v45, %v1442_v63 }
 0x29b   :  { %v1420_v1 = vadd.f32 1.0, %v6263_v33  ;;  %v2031_v17 = vmul.f32 0.6931472, %v4007_v42  ;;  %vm6286_vm11 = vcmp.lt.f32.partialorder %v2035_v10, 0.0004427343  ;;  %v3234_v46 = vmul.f32 -0.5, %v6231_v2  ;;  %v6323_v10 = vpop.xlane.xlu0 %1073 }
 0x29c   :  { %4016 = vpow2.f32 %v3089_v43  ;;  %v2849_v16 = vsel %vm1623_vm2, %v2806_v26, 0.0  ;;  %v2034_v38 = vmul.f32 %v6185_v18, %v2033_v31  ;;  %v2327_v4 = vmax.f32 %v6202_v22, 0.0 }
 0x29d   :  { %v1806_v45 = vand.u32 2147483647, %v6279_v3  ;;  %v4009_v7 = vpop.eup %4008  ;;  %v3257_v0 = vsel %vm6265_vm9, %v3254_v8, %v3251_v24  ;;  %v2646_v6 = vmul.f32 %v6210_v20, %v2645_v23  ;;  %vm6300_vm12 = vcmp.lt.f32.partialorder %v2647_v57, 0.0004427343 }
 0x29e   :  { %v2914_v39 = vmax.f32 %v6229_v32, 0.0  ;;  %v1275_v41 = vmul.f32 1.442695, %v1225_v52  ;;  %v1446_v18 = vsel %vm6274_vm10, %v1443_v29, %v1440_v13  ;;  %4018 = vlog2.f32 %v1420_v1  ;;  %v6348_v13 = vpop.xlane.xlu1 %791 }
 0x29f   :  { %v6305_v48 = vpop.eup %4010  ;;  %v1838_v55 = vsub.f32 0.0, %v1806_v45  ;;  %v2396_v40 = vand.u32 2147483647, %v6291_v61  ;;  %v6313_v20 = vadd.f32 %v2849_v16, %v6163_v49  ;;  %v2037_v37 = vsel %vm6286_vm11, %v2034_v38, %v2031_v17 }
 0x2a0   :  { %v6310_v51 = vpop.eup %4012  ;;  %v3235_v47 = vadd.f32 1.0, %v3234_v46  ;;  %v3237_v62 = vand.u32 2147483647, %v6231_v2  ;;  %v2623_v35 = vadd.f32 1.0, %v6305_v48  ;;  %v2946_v11 = vmul.f32 0.0, %v6229_v32 }
 0x2a1   :  { %v4015_v44 = vpop.eup %4014  ;;  %v1883_v27 = vmul.f32 1.442695, %v1838_v55  ;;  %v2428_v19 = vsub.f32 0.0, %v2396_v40  ;;  %v3425_v63 = vadd.f32 %v3257_v0, %v6178_v28  ;;  %v1606_v21 = vadd.f32 %v1446_v18, %v6181_v58 }
 0x2a2   :  { %v1129_v49 = vmax.f32 %v6248_v56, 0.0  ;;  %4020 = vpow2.f32 %v1275_v41  ;;  %v2221_v43 = vadd.f32 %v2037_v37, %v6194_v36  ;;  %v2643_v42 = vmul.f32 0.6931472, %v4009_v7  ;;  %v6365_v7 = vpop.xlane.xlu0 %891 }
 0x2a3   :  { %v2056_v26 = vadd.f32 1.0, %v6310_v51  ;;  %4022 = vpow2.f32 %v1883_v27  ;;  %v3233_v8 = vmul.f32 0.6931472, %v4015_v44  ;;  %v1423_v32 = vmul.f32 -0.5, %v6263_v33 }
 0x2a4   :  { %v6329_v25 = vsub.f32 %v2327_v4, %v6202_v22  ;;  %v2478_v28 = vmul.f32 1.442695, %v2428_v19  ;;  %vm6331_vm13 = vcmp.lt.f32.partialorder %v3237_v62, 0.0004427343  ;;  %v1426_v31 = vand.u32 2147483647, %v6263_v33 }
 0x2a5   :  { %4024 = vlog2.f32 %v2623_v35  ;;  %v3008_v36 = vand.u32 2147483647, %v6323_v10  ;;  %v6340_v23 = vsel %vm1623_vm2, %v3425_v63, 0.0  ;;  %v3236_v57 = vmul.f32 %v6231_v2, %v3235_v47 }
 0x2a6   :  { %v6337_v24 = vpop.eup %4016  ;;  %v6343_v52 = vsub.f32 %v2914_v39, %v2946_v11  ;;  %v6346_v22 = vsub.f32 %v1129_v49, %v6248_v56  ;;  %v6351_v29 = vsel %vm1623_vm2, %v1606_v21, 0.0  ;;  %v2264_v1 = vsel %vm1623_vm2, %v2221_v43, 0.0 }
 0x2a7   :  { %v2649_v17 = vsel %vm6300_vm12, %v2646_v6, %v2643_v42  ;;  %4026 = vlog2.f32 %v2056_v26  ;;  %v3239_v53 = vsel %vm6331_vm13, %v3236_v57, %v3233_v8  ;;  %v1424_v2 = vadd.f32 1.0, %v1423_v32 }
 0x2a8   :  { %4028 = vpow2.f32 %v2478_v28  ;;  %v3040_v46 = vsub.f32 0.0, %v3008_v36  ;;  %v4019_v16 = vpop.eup %4018  ;;  %vm6358_vm14 = vcmp.lt.f32.partialorder %v1426_v31, 0.0004427343  ;;  %v2059_v38 = vmul.f32 -0.5, %v6310_v51 }
 0x2a9   :  { %v3258_v4 = vadd.f32 1.0, %v6337_v24  ;;  %v1191_v45 = vand.u32 2147483647, %v6348_v13  ;;  %v6368_v0 = vadd.f32 %v2264_v1, %v6208_v14  ;;  %v2809_v6 = vadd.f32 %v2649_v17, %v6218_v15 }
 0x2aa   :  { %v1710_v60 = vmax.f32 %v6279_v3, 0.0  ;;  %v3085_v39 = vmul.f32 1.442695, %v3040_v46  ;;  %v3423_v41 = vadd.f32 %v3239_v53, %v6227_v9  ;;  %v2062_v18 = vand.u32 2147483647, %v6310_v51  ;;  %v6408_v46 = vpop.xlane.xlu1 %983 }
 0x2ab   :  { %v1742_v55 = vmul.f32 0.0, %v6279_v3  ;;  %v1223_v40 = vsub.f32 0.0, %v1191_v45  ;;  %v1422_v47 = vmul.f32 0.6931472, %v4019_v16  ;;  %v2626_v62 = vmul.f32 -0.5, %v6305_v48 }
 0x2ac   :  { %v6375_v37 = vpop.eup %4020  ;;  %4030 = vpow2.f32 %v3085_v39  ;;  %v1811_v14 = vand.u32 2147483647, %v6365_v7  ;;  %v2060_v15 = vadd.f32 1.0, %v2059_v38  ;;  %v2332_v35 = vmax.f32 %v6291_v61, 0.0 }
 0x2ad   :  { %v6379_v44 = vpop.eup %4022  ;;  %4032 = vlog2.f32 %v3258_v4  ;;  %v1271_v9 = vmul.f32 1.442695, %v1223_v40  ;;  %v6383_v11 = vsel %vm1623_vm2, %v2809_v6, 0.0  ;;  %v1425_v3 = vmul.f32 %v6263_v33, %v1424_v2 }
 0x2ae   :  { %v2629_v27 = vand.u32 2147483647, %v6305_v48  ;;  %v2038_v19 = vadd.f32 1.0, %v6379_v44  ;;  %v3466_v21 = vsel %vm1623_vm2, %v3423_v41, 0.0  ;;  %vm6389_vm15 = vcmp.lt.f32.partialorder %v2062_v18, 0.0004427343 }
 0x2af   :  { %v4025_v63 = vpop.eup %4024  ;;  %v1465_v43 = vadd.f32 1.0, %v6375_v37  ;;  %4034 = vpow2.f32 %v1271_v9  ;;  %v1843_v42 = vsub.f32 0.0, %v1811_v14  ;;  %v1428_v26 = vsel %vm6358_vm14, %v1425_v3, %v1422_v47 }
 0x2b0   :  { %v2627_v8 = vadd.f32 1.0, %v2626_v62  ;;  %v3261_v33 = vmul.f32 -0.5, %v6337_v24  ;;  %4036 = vlog2.f32 %v2038_v19  ;;  %v2061_v28 = vmul.f32 %v6310_v51, %v2060_v15 }
 0x2b1   :  { %v4027_v32 = vpop.eup %4026  ;;  %v3264_v58 = vand.u32 2147483647, %v6337_v24  ;;  %v6399_v31 = vsub.f32 %v1710_v60, %v1742_v55  ;;  %v6402_v36 = vsub.f32 %v2332_v35, %v6291_v61  ;;  %v2625_v1 = vmul.f32 0.6931472, %v4025_v63 }
 0x2b2   :  { %v6404_v57 = vpop.eup %4028  ;;  %v2912_v17 = vmax.f32 %v6323_v10, 0.0  ;;  %v2944_v53 = vmul.f32 0.0, %v6323_v10  ;;  %v1893_v2 = vmul.f32 1.442695, %v1843_v42  ;;  %v6411_v16 = vadd.f32 %v3466_v21, %v6242_v30  ;;  %v6420_v10 = vpop.xlane.xlu0 %1083 }
 0x2b3   :  { %v1604_v51 = vadd.f32 %v1428_v26, %v6261_v34  ;;  %vm6414_vm0 = vcmp.lt.f32.partialorder %v2629_v27, 0.0004427343  ;;  %4038 = vlog2.f32 %v1465_v43  ;;  %v2058_v61 = vmul.f32 0.6931472, %v4027_v32  ;;  %v6449_v43 = vpop.xlane.xlu1 %797 }
 0x2b4   :  { %v2628_v38 = vmul.f32 %v6305_v48, %v2627_v8  ;;  %v3262_v4 = vadd.f32 1.0, %v3261_v33  ;;  %v1468_v45 = vmul.f32 -0.5, %v6375_v37  ;;  %v2041_v6 = vmul.f32 -0.5, %v6379_v44 }
 0x2b5   :  { %v2668_v30 = vadd.f32 1.0, %v6404_v57  ;;  %v1127_v60 = vmax.f32 %v6348_v13, 0.0  ;;  %v2394_v34 = vand.u32 2147483647, %v6408_v46  ;;  %vm6430_vm1 = vcmp.lt.f32.partialorder %v3264_v58, 0.0004427343 }
 0x2b6   :  { %v6426_v39 = vpop.eup %4030  ;;  %v2631_v41 = vsel %vm6414_vm0, %v2628_v38, %v2625_v1  ;;  %v6434_v18 = vsub.f32 %v2912_v17, %v2944_v53  ;;  %4040 = vpow2.f32 %v1893_v2  ;;  %v1649_v40 = vsel %vm1623_vm2, %v1604_v51, 0.0  ;;  %v6465_v51 = vpop.xlane.xlu0 %887 }
 0x2b7   :  { %v4033_v55 = vpop.eup %4032  ;;  %v1471_v47 = vand.u32 2147483647, %v6375_v37  ;;  %v3240_v62 = vadd.f32 1.0, %v6426_v39  ;;  %v3013_v14 = vand.u32 2147483647, %v6420_v10  ;;  %v2064_v15 = vsel %vm6389_vm15, %v2061_v28, %v2058_v61 }
 0x2b8   :  { %v3263_v35 = vmul.f32 %v6337_v24, %v3262_v4  ;;  %v1469_v9 = vadd.f32 1.0, %v1468_v45  ;;  %v2426_v3 = vsub.f32 0.0, %v2394_v34  ;;  %v2807_v19 = vadd.f32 %v2631_v41, %v6329_v25 }
 0x2b9   :  { %v6443_v27 = vpop.eup %4034  ;;  %v2042_v63 = vadd.f32 1.0, %v2041_v6  ;;  %4042 = vlog2.f32 %v2668_v30  ;;  %v6447_v21 = vsub.f32 %v1127_v60, %v6348_v13  ;;  %v1650_v26 = vadd.f32 %v1649_v40, %v6237_v54 }
 0x2ba   :  { %v4037_v42 = vpop.eup %4036  ;;  %v3260_v49 = vmul.f32 0.6931472, %v4033_v55  ;;  %v2044_v8 = vand.u32 2147483647, %v6379_v44  ;;  %v2474_v24 = vmul.f32 1.442695, %v2426_v3  ;;  %v2224_v33 = vadd.f32 %v2064_v15, %v6270_v50 }
 0x2bb   :  { %vm6454_vm3 = vcmp.lt.f32.partialorder %v1471_v47, 0.0004427343  ;;  %v2040_v25 = vmul.f32 0.6931472, %v4037_v42  ;;  %4044 = vlog2.f32 %v3240_v62  ;;  %v3045_v28 = vsub.f32 0.0, %v3013_v14 }
 0x2bc   :  { %v1470_v13 = vmul.f32 %v6375_v37, %v1469_v9  ;;  %v2671_v58 = vmul.f32 -0.5, %v6404_v57  ;;  %v1715_v1 = vmax.f32 %v6365_v7, 0.0  ;;  %v1194_v54 = vand.u32 2147483647, %v6449_v43  ;;  %v6499_v9 = vpop.xlane.xlu1 %989 }
 0x2bd   :  { %v4039_v17 = vpop.eup %4038  ;;  %v2851_v53 = vsel %vm1623_vm2, %v2807_v19, 0.0  ;;  %v2043_v50 = vmul.f32 %v6379_v44, %v2042_v63  ;;  %v1447_v2 = vadd.f32 1.0, %v6443_v27  ;;  %4046 = vpow2.f32 %v2474_v24 }
 0x2be   :  { %v1652_v56 = vadd.f32 %v6155_v59, %v1650_v26  ;;  %v3266_v37 = vsel %vm6430_vm1, %v3263_v35, %v3260_v49  ;;  %vm6470_vm4 = vcmp.lt.f32.partialorder %v2044_v8, 0.0004427343  ;;  %v1747_v38 = vmul.f32 0.0, %v6365_v7 }
 0x2bf   :  { %v2046_v4 = vsel %vm6470_vm4, %v2043_v50, %v2040_v25  ;;  %v2674_v44 = vand.u32 2147483647, %v6404_v57  ;;  %v2330_v45 = vmax.f32 %v6408_v46, 0.0  ;;  %v3095_v6 = vmul.f32 1.442695, %v3045_v28 }
 0x2c0   :  { %v6479_v30 = vpop.eup %4040  ;;  %v2852_v59 = vadd.f32 %v2851_v53, %v6313_v20  ;;  %v1467_v60 = vmul.f32 0.6931472, %v4039_v17  ;;  %v1226_v34 = vsub.f32 0.0, %v1194_v54  ;;  %v1809_v41 = vand.u32 2147483647, %v6465_v51 }
 0x2c1   :  { %v3426_v48 = vadd.f32 %v3266_v37, %v6343_v52  ;;  %v2672_v55 = vadd.f32 1.0, %v2671_v58  ;;  %v3243_v7 = vmul.f32 -0.5, %v6426_v39  ;;  %4048 = vlog2.f32 %v1447_v2  ;;  %v6519_v58 = vpop.xlane.xlu0 %1079 }
 0x2c2   :  { %v6486_v40 = vsel %vm1623_vm2, %v2224_v33, 0.0  ;;  %v2222_v47 = vadd.f32 %v2046_v4, %v6399_v31  ;;  %v6490_v62 = vadd.f32 %v6351_v29, %v1652_v56  ;;  %v1841_v14 = vsub.f32 0.0, %v1809_v41 }
 0x2c3   :  { %v4043_v20 = vpop.eup %4042  ;;  %vm6492_vm5 = vcmp.lt.f32.partialorder %v2674_v44, 0.0004427343  ;;  %v6496_v35 = vsub.f32 %v1715_v1, %v1747_v38  ;;  %v2083_v52 = vadd.f32 1.0, %v6479_v30  ;;  %4050 = vpow2.f32 %v3095_v6 }
 0x2c4   :  { %v2854_v3 = vadd.f32 %v6205_v5, %v2852_v59  ;;  %v1473_v31 = vsel %vm6454_vm3, %v1470_v13, %v1467_v60  ;;  %v6505_v29 = vsub.f32 %v2330_v45, %v6408_v46  ;;  %v1277_v19 = vmul.f32 1.442695, %v1226_v34 }
 0x2c5   :  { %v4045_v63 = vpop.eup %4044  ;;  %v6508_v42 = vsel %vm1623_vm2, %v3426_v48, 0.0  ;;  %v2673_v26 = vmul.f32 %v6404_v57, %v2672_v55  ;;  %v3244_v49 = vadd.f32 1.0, %v3243_v7  ;;  %v1889_v8 = vmul.f32 1.442695, %v1841_v14  ;;  %v6549_v48 = vpop.xlane.xlu1 %793 }
 0x2c6   :  { %v2266_v24 = vsel %vm1623_vm2, %v2222_v47, 0.0  ;;  %v2670_v33 = vmul.f32 0.6931472, %v4043_v20  ;;  %v2917_v5 = vmax.f32 %v6420_v10, 0.0  ;;  %v2397_v32 = vand.u32 2147483647, %v6499_v9 }
 0x2c7   :  { %v6514_v25 = vpop.eup %4046  ;;  %v1609_v46 = vadd.f32 %v1473_v31, %v6346_v22  ;;  %v3246_v28 = vand.u32 2147483647, %v6426_v39  ;;  %4052 = vlog2.f32 %v2083_v52  ;;  %v2949_v13 = vmul.f32 0.0, %v6420_v10  ;;  %v6565_v31 = vpop.xlane.xlu0 %893 }
 0x2c8   :  { %v3242_v57 = vmul.f32 0.6931472, %v4045_v63  ;;  %v1450_v1 = vmul.f32 -0.5, %v6443_v27  ;;  %v6523_v54 = vadd.f32 %v6383_v11, %v2854_v3  ;;  %4054 = vpow2.f32 %v1277_v19 }
 0x2c9   :  { %v2267_v17 = vadd.f32 %v2266_v24, %v6368_v0  ;;  %v3245_v53 = vmul.f32 %v6426_v39, %v3244_v49  ;;  %v2086_v22 = vmul.f32 -0.5, %v6479_v30  ;;  %4056 = vpow2.f32 %v1889_v8 }
 0x2ca   :  { %v2676_v50 = vsel %vm6492_vm5, %v2673_v26, %v2670_v33  ;;  %v2650_v10 = vadd.f32 1.0, %v6514_v25  ;;  %v2429_v2 = vsub.f32 0.0, %v2397_v32  ;;  %v3011_v56 = vand.u32 2147483647, %v6519_v58 }
 0x2cb   :  { %v4049_v37 = vpop.eup %4048  ;;  %vm6532_vm6 = vcmp.lt.f32.partialorder %v3246_v28, 0.0004427343  ;;  %v1453_v0 = vand.u32 2147483647, %v6443_v27  ;;  %v6537_v61 = vsub.f32 %v2917_v5, %v2949_v13  ;;  %v1130_v39 = vmax.f32 %v6449_v43, 0.0  ;;  %v6590_v28 = vpop.xlane.xlu1 %985 }
 0x2cc   :  { %v3248_v38 = vsel %vm6532_vm6, %v3245_v53, %v3242_v57  ;;  %v1451_v4 = vadd.f32 1.0, %v1450_v1  ;;  %v2089_v44 = vand.u32 2147483647, %v6479_v30  ;;  %v1713_v45 = vmax.f32 %v6465_v51, 0.0 }
 0x2cd   :  { %v6544_v6 = vpop.eup %4050  ;;  %v2269_v59 = vadd.f32 %v6282_v12, %v2267_v17  ;;  %v2812_v60 = vadd.f32 %v2676_v50, %v6402_v36  ;;  %v2087_v34 = vadd.f32 1.0, %v2086_v22  ;;  %v1745_v41 = vmul.f32 0.0, %v6465_v51 }
 0x2ce   :  { %v1449_v55 = vmul.f32 0.6931472, %v4049_v37  ;;  %4058 = vlog2.f32 %v2650_v10  ;;  %v2480_v7 = vmul.f32 1.442695, %v2429_v2  ;;  %v3043_v47 = vsub.f32 0.0, %v3011_v56 }
 0x2cf   :  { %v6552_v14 = vsel %vm1623_vm2, %v1609_v46, 0.0  ;;  %v3424_v20 = vadd.f32 %v3248_v38, %v6434_v18  ;;  %vm6555_vm7 = vcmp.lt.f32.partialorder %v1453_v0, 0.0004427343  ;;  %v6560_v12 = vsub.f32 %v1130_v39, %v6449_v43 }
 0x2d0   :  { %v1452_v36 = vmul.f32 %v6443_v27, %v1451_v4  ;;  %v3285_v51 = vadd.f32 1.0, %v6544_v6  ;;  %v3091_v52 = vmul.f32 1.442695, %v3043_v47  ;;  %v1192_v3 = vand.u32 2147483647, %v6549_v48 }
 0x2d1   :  { %v4053_v19 = vpop.eup %4052  ;;  %v6568_v63 = vsel %vm1623_vm2, %v2812_v60, 0.0  ;;  %v2088_v18 = vmul.f32 %v6479_v30, %v2087_v34  ;;  %vm6571_vm8 = vcmp.lt.f32.partialorder %v2089_v44, 0.0004427343  ;;  %v6575_v43 = vsub.f32 %v1713_v45, %v1745_v41 }
 0x2d2   :  { %v2333_v27 = vmax.f32 %v6499_v9, 0.0  ;;  %v6578_v49 = vpop.eup %4054  ;;  %v1455_v8 = vsel %vm6555_vm7, %v1452_v36, %v1449_v55  ;;  %v2653_v24 = vmul.f32 -0.5, %v6514_v25  ;;  %v6584_v33 = vadd.f32 %v6486_v40, %v2269_v59  ;;  %v6609_v59 = vpop.xlane.xlu0 %1085 }
 0x2d3   :  { %4060 = vpow2.f32 %v2480_v7  ;;  %v6586_v30 = vpop.eup %4056  ;;  %v3468_v5 = vsel %vm1623_vm2, %v3424_v20, 0.0  ;;  %v1224_v32 = vsub.f32 0.0, %v1192_v3  ;;  %v1812_v46 = vand.u32 2147483647, %v6565_v31  ;;  %v6620_v20 = vpop.xlane.xlu1 %803 }
 0x2d4   :  { %4062 = vpow2.f32 %v3091_v52  ;;  %v3288_v13 = vmul.f32 -0.5, %v6544_v6  ;;  %v2915_v57 = vmax.f32 %v6519_v58, 0.0  ;;  %v2947_v1 = vmul.f32 0.0, %v6519_v58 }
 0x2d5   :  { %4064 = vlog2.f32 %v3285_v51  ;;  %v1607_v40 = vadd.f32 %v1455_v8, %v6447_v21  ;;  %v1474_v17 = vadd.f32 1.0, %v6578_v49  ;;  %v1273_v53 = vmul.f32 1.442695, %v1224_v32 }
 0x2d6   :  { %v1844_v22 = vsub.f32 0.0, %v1812_v46  ;;  %v3469_v50 = vadd.f32 %v3468_v5, %v6411_v16  ;;  %v2085_v10 = vmul.f32 0.6931472, %v4053_v19  ;;  %v2065_v2 = vadd.f32 1.0, %v6586_v30 }
 0x2d7   :  { %v2395_v56 = vand.u32 2147483647, %v6590_v28  ;;  %v2654_v37 = vadd.f32 1.0, %v2653_v24  ;;  %v2656_v11 = vand.u32 2147483647, %v6514_v25  ;;  %v6602_v0 = vsub.f32 %v2333_v27, %v6499_v9 }
 0x2d8   :  { %4066 = vpow2.f32 %v1273_v53  ;;  %v4059_v58 = vpop.eup %4058  ;;  %v3289_v21 = vadd.f32 1.0, %v3288_v13  ;;  %v6604_v39 = vsub.f32 %v2915_v57, %v2947_v1  ;;  %v1128_v38 = vmax.f32 %v6549_v48, 0.0  ;;  %v6652_v57 = vpop.xlane.xlu0 %889 }
 0x2d9   :  { %v1895_v4 = vmul.f32 1.442695, %v1844_v22  ;;  %v1655_v16 = vsel %vm1623_vm2, %v1607_v40, 0.0  ;;  %4068 = vlog2.f32 %v1474_v17  ;;  %v1477_v44 = vmul.f32 -0.5, %v6578_v49 }
 0x2da   :  { %v2427_v45 = vsub.f32 0.0, %v2395_v56  ;;  %v3471_v60 = vadd.f32 %v6340_v23, %v3469_v50  ;;  %v2091_v9 = vsel %vm6571_vm8, %v2088_v18, %v2085_v10  ;;  %v3291_v34 = vand.u32 2147483647, %v6544_v6 }
 0x2db   :  { %4070 = vlog2.f32 %v2065_v2  ;;  %v2652_v41 = vmul.f32 0.6931472, %v4059_v58  ;;  %v2655_v55 = vmul.f32 %v6514_v25, %v2654_v37  ;;  %vm6616_vm9 = vcmp.lt.f32.partialorder %v2656_v11, 0.0004427343 }
 0x2dc   :  { %v2476_v47 = vmul.f32 1.442695, %v2427_v45  ;;  %v6625_v23 = vadd.f32 %v1655_v16, %v6490_v62  ;;  %v3290_v36 = vmul.f32 %v6544_v6, %v3289_v21  ;;  %4072 = vpow2.f32 %v1895_v4 }
 0x2dd   :  { %v6622_v15 = vpop.eup %4060  ;;  %v3014_v51 = vand.u32 2147483647, %v6609_v59  ;;  %v2227_v25 = vadd.f32 %v2091_v9, %v6496_v35  ;;  %v1478_v3 = vadd.f32 1.0, %v1477_v44  ;;  %v1480_v19 = vand.u32 2147483647, %v6578_v49 }
 0x2de   :  { %v6629_v52 = vpop.eup %4062  ;;  %4074 = vpow2.f32 %v2476_v47  ;;  %vm6633_vm10 = vcmp.lt.f32.partialorder %v3291_v34, 0.0004427343  ;;  %v2068_v62 = vmul.f32 -0.5, %v6586_v30  ;;  %v6639_v6 = vadd.f32 %v6508_v42, %v3471_v60 }
 0x2df   :  { %v4065_v18 = vpop.eup %4064  ;;  %v1197_v27 = vand.u32 2147483647, %v6620_v20  ;;  %v2658_v8 = vsel %vm6616_vm9, %v2655_v55, %v2652_v41  ;;  %v2677_v35 = vadd.f32 1.0, %v6622_v15  ;;  %v6646_v24 = vsub.f32 %v1128_v38, %v6549_v48 }
 0x2e0   :  { %v3046_v5 = vsub.f32 0.0, %v3014_v51  ;;  %v2071_v32 = vand.u32 2147483647, %v6586_v30  ;;  %v3267_v46 = vadd.f32 1.0, %v6629_v52  ;;  %v1716_v13 = vmax.f32 %v6565_v31, 0.0 }
 0x2e1   :  { %v1748_v42 = vmul.f32 0.0, %v6565_v31  ;;  %v6657_v40 = vsel %vm1623_vm2, %v2227_v25, 0.0  ;;  %v3287_v17 = vmul.f32 0.6931472, %v4065_v18  ;;  %v1479_v48 = vmul.f32 %v6578_v49, %v1478_v3 }
 0x2e2   :  { %v6654_v1 = vpop.eup %4066  ;;  %vm6660_vm11 = vcmp.lt.f32.partialorder %v1480_v19, 0.0004427343  ;;  %v2810_v22 = vadd.f32 %v2658_v8, %v6505_v29  ;;  %v2069_v50 = vadd.f32 1.0, %v2068_v62  ;;  %v1229_v31 = vsub.f32 0.0, %v1197_v27 }
 0x2e3   :  { %v1456_v10 = vadd.f32 1.0, %v6654_v1  ;;  %v4069_v2 = vpop.eup %4068  ;;  %4076 = vlog2.f32 %v2677_v35  ;;  %v2331_v56 = vmax.f32 %v6590_v28, 0.0  ;;  %v3097_v37 = vmul.f32 1.442695, %v3046_v5 }
 0x2e4   :  { %v1810_v11 = vand.u32 2147483647, %v6652_v57  ;;  %vm6668_vm12 = vcmp.lt.f32.partialorder %v2071_v32, 0.0004427343  ;;  %v2680_v21 = vmul.f32 -0.5, %v6622_v15  ;;  %4078 = vlog2.f32 %v3267_v46 }
 0x2e5   :  { %v4071_v58 = vpop.eup %4070  ;;  %v6673_v29 = vsub.f32 %v1716_v13, %v1748_v42  ;;  %v3293_v38 = vsel %vm6633_vm10, %v3290_v36, %v3287_v17  ;;  %4080 = vlog2.f32 %v1456_v10  ;;  %v2918_v4 = vmax.f32 %v6609_v59, 0.0  ;;  %v6688_v36 = vpop.xlane.xlu1 %995 }
 0x2e6   :  { %v2950_v16 = vmul.f32 0.0, %v6609_v59  ;;  %v6679_v44 = vpop.eup %4072  ;;  %v2857_v45 = vsel %vm1623_vm2, %v2810_v22, 0.0  ;;  %v1476_v60 = vmul.f32 0.6931472, %v4069_v2  ;;  %v1283_v9 = vmul.f32 1.442695, %v1229_v31 }
 0x2e7   :  { %v1842_v34 = vsub.f32 0.0, %v1810_v11  ;;  %v2067_v55 = vmul.f32 0.6931472, %v4071_v58  ;;  %v2070_v7 = vmul.f32 %v6586_v30, %v2069_v50  ;;  %v6686_v47 = vsub.f32 %v2331_v56, %v6590_v28  ;;  %v6699_v28 = vpop.xlane.xlu0 %1081 }
 0x2e8   :  { %v6682_v41 = vpop.eup %4074  ;;  %4082 = vpow2.f32 %v3097_v37  ;;  %v3429_v59 = vadd.f32 %v3293_v38, %v6537_v61  ;;  %v2681_v51 = vadd.f32 1.0, %v2680_v21  ;;  %v2683_v25 = vand.u32 2147483647, %v6622_v15 }
 0x2e9   :  { %v2659_v3 = vadd.f32 1.0, %v6682_v41  ;;  %v6694_v19 = vadd.f32 %v2857_v45, %v6523_v54  ;;  %v3270_v18 = vmul.f32 -0.5, %v6629_v52  ;;  %v6697_v26 = vsub.f32 %v2918_v4, %v2950_v16  ;;  %v6719_v22 = vpop.xlane.xlu1 %799 }
 0x2ea   :  { %v1891_v30 = vmul.f32 1.442695, %v1842_v34  ;;  %v1482_v62 = vsel %vm6660_vm11, %v1479_v48, %v1476_v60  ;;  %v3273_v61 = vand.u32 2147483647, %v6629_v52  ;;  %v2092_v27 = vadd.f32 1.0, %v6679_v44 }
 0x2eb   :  { %4084 = vpow2.f32 %v1283_v9  ;;  %v2073_v8 = vsel %vm6668_vm12, %v2070_v7, %v2067_v55  ;;  %v1459_v54 = vmul.f32 -0.5, %v6654_v1  ;;  %v2400_v35 = vand.u32 2147483647, %v6688_v36 }
 0x2ec   :  { %4086 = vpow2.f32 %v1891_v30  ;;  %v6710_v5 = vsel %vm1623_vm2, %v3429_v59, 0.0  ;;  %vm6712_vm13 = vcmp.lt.f32.partialorder %v2683_v25, 0.0004427343  ;;  %v3012_v46 = vand.u32 2147483647, %v6699_v28 }
 0x2ed   :  { %4088 = vlog2.f32 %v2659_v3  ;;  %v4077_v13 = vpop.eup %4076  ;;  %v1610_v42 = vadd.f32 %v1482_v62, %v6560_v12  ;;  %v3271_v17 = vadd.f32 1.0, %v3270_v18  ;;  %v1133_v48 = vmax.f32 %v6620_v20, 0.0  ;;  %v6774_v31 = vpop.xlane.xlu1 %991 }
 0x2ee   :  { %v2432_v53 = vsub.f32 0.0, %v2400_v35  ;;  %v4079_v50 = vpop.eup %4078  ;;  %v2225_v10 = vadd.f32 %v2073_v8, %v6575_v43  ;;  %vm6722_vm14 = vcmp.lt.f32.partialorder %v3273_v61, 0.0004427343  ;;  %4090 = vlog2.f32 %v2092_v27 }
 0x2ef   :  { %v1714_v2 = vmax.f32 %v6652_v57, 0.0  ;;  %v4081_v56 = vpop.eup %4080  ;;  %v1460_v37 = vadd.f32 1.0, %v1459_v54  ;;  %v1462_v12 = vand.u32 2147483647, %v6654_v1  ;;  %v1746_v11 = vmul.f32 0.0, %v6652_v57 }
 0x2f0   :  { %v3044_v58 = vsub.f32 0.0, %v3012_v46  ;;  %v2679_v49 = vmul.f32 0.6931472, %v4077_v13  ;;  %v2682_v21 = vmul.f32 %v6622_v15, %v2681_v51  ;;  %v2095_v38 = vmul.f32 -0.5, %v6679_v44 }
 0x2f1   :  { %v1195_v43 = vand.u32 2147483647, %v6719_v22  ;;  %v6735_v16 = vsel %vm1623_vm2, %v1610_v42, 0.0  ;;  %v3269_v45 = vmul.f32 0.6931472, %v4079_v50  ;;  %v6738_v60 = vsub.f32 %v1133_v48, %v6620_v20 }
 0x2f2   :  { %v6732_v4 = vpop.eup %4082  ;;  %v2486_v9 = vmul.f32 1.442695, %v2432_v53  ;;  %v2272_v57 = vsel %vm1623_vm2, %v2225_v10, 0.0  ;;  %v3272_v34 = vmul.f32 %v6629_v52, %v3271_v17  ;;  %v1458_v55 = vmul.f32 0.6931472, %v4081_v56  ;;  %v6769_v17 = vpop.xlane.xlu0 %899 }
 0x2f3   :  { %v2662_v15 = vmul.f32 -0.5, %v6682_v41  ;;  %v1461_v7 = vmul.f32 %v6654_v1, %v1460_v37  ;;  %vm6744_vm15 = vcmp.lt.f32.partialorder %v1462_v12, 0.0004427343  ;;  %v6748_v51 = vsub.f32 %v1714_v2, %v1746_v11 }
 0x2f4   :  { %v3093_v25 = vmul.f32 1.442695, %v3044_v58  ;;  %v2685_v20 = vsel %vm6712_vm13, %v2682_v21, %v2679_v49  ;;  %v2096_v18 = vadd.f32 1.0, %v2095_v38  ;;  %v3294_v52 = vadd.f32 1.0, %v6732_v4 }
 0x2f5   :  { %v6750_v3 = vpop.eup %4084  ;;  %v1227_v30 = vsub.f32 0.0, %v1195_v43  ;;  %v6758_v1 = vadd.f32 %v2272_v57, %v6584_v33  ;;  %v3275_v61 = vsel %vm6722_vm14, %v3272_v34, %v3269_v45  ;;  %v2098_v27 = vand.u32 2147483647, %v6679_v44 }
 0x2f6   :  { %v6755_v62 = vpop.eup %4086  ;;  %4092 = vpow2.f32 %v2486_v9  ;;  %v1464_v54 = vsel %vm6744_vm15, %v1461_v7, %v1458_v55  ;;  %v2663_v35 = vadd.f32 1.0, %v2662_v15  ;;  %v2665_v32 = vand.u32 2147483647, %v6682_v41 }
 0x2f7   :  { %v4089_v8 = vpop.eup %4088  ;;  %4094 = vpow2.f32 %v3093_v25  ;;  %v2813_v46 = vadd.f32 %v2685_v20, %v6602_v0  ;;  %v1501_v13 = vadd.f32 1.0, %v6750_v3  ;;  %v2336_v33 = vmax.f32 %v6688_v36, 0.0 }
 0x2f8   :  { %v1279_v42 = vmul.f32 1.442695, %v1227_v30  ;;  %v4091_v48 = vpop.eup %4090  ;;  %v3427_v53 = vadd.f32 %v3275_v61, %v6604_v39  ;;  %v2097_v50 = vmul.f32 %v6679_v44, %v2096_v18  ;;  %4096 = vlog2.f32 %v3294_v52  ;;  %v6809_v18 = vpop.xlane.xlu0 %1091 }
 0x2f9   :  { %v2074_v10 = vadd.f32 1.0, %v6755_v62  ;;  %v1608_v2 = vadd.f32 %v1464_v54, %v6646_v24  ;;  %v2661_v0 = vmul.f32 0.6931472, %v4089_v8  ;;  %v3297_v56 = vmul.f32 -0.5, %v6732_v4 }
 0x2fa   :  { %4098 = vpow2.f32 %v1279_v42  ;;  %v2664_v37 = vmul.f32 %v6682_v41, %v2663_v35  ;;  %vm6779_vm0 = vcmp.lt.f32.partialorder %v2665_v32, 0.0004427343  ;;  %v2916_v39 = vmax.f32 %v6699_v28, 0.0 }
 0x2fb   :  { %v1815_v44 = vand.u32 2147483647, %v6769_v17  ;;  %v2094_v11 = vmul.f32 0.6931472, %v4091_v48  ;;  %4100 = vlog2.f32 %v1501_v13  ;;  %v2948_v58 = vmul.f32 0.0, %v6699_v28 }
 0x2fc   :  { %v2398_v24 = vand.u32 2147483647, %v6774_v31  ;;  %v3474_v49 = vsel %vm1623_vm2, %v3427_v53, 0.0  ;;  %v3300_v21 = vand.u32 2147483647, %v6732_v4  ;;  %4102 = vlog2.f32 %v2074_v10  ;;  %v6842_v10 = vpop.xlane.xlu1 %805  ;;  %v6845_v12 = vpop.xlane.xlu0 %895 }
 0x2fd   :  { %v1847_v41 = vsub.f32 0.0, %v1815_v44  ;;  %v1657_v38 = vsel %vm1623_vm2, %v1608_v2, 0.0  ;;  %v2667_v43 = vsel %vm6779_vm0, %v2664_v37, %v2661_v0  ;;  %v3298_v45 = vadd.f32 1.0, %v3297_v56 }
 0x2fe   :  { %v1504_v9 = vmul.f32 -0.5, %v6750_v3  ;;  %v6794_v57 = vsel %vm1623_vm2, %v2813_v46, 0.0  ;;  %vm6796_vm1 = vcmp.lt.f32.partialorder %v2098_v27, 0.0004427343  ;;  %v6801_v34 = vsub.f32 %v2336_v33, %v6688_v36 }
 0x2ff   :  { %v1131_v55 = vmax.f32 %v6719_v22, 0.0  ;;  %v2100_v7 = vsel %vm6796_vm1, %v2097_v50, %v2094_v11  ;;  %v1507_v59 = vand.u32 2147483647, %v6750_v3  ;;  %v1901_v25 = vmul.f32 1.442695, %v1847_v41 }
 0x300   :  { %v6804_v15 = vpop.eup %4092  ;;  %v2430_v20 = vsub.f32 0.0, %v2398_v24  ;;  %v6814_v30 = vadd.f32 %v3474_v49, %v6639_v6  ;;  %v1658_v36 = vadd.f32 %v1657_v38, %v6625_v23  ;;  %v2811_v61 = vadd.f32 %v2667_v43, %v6686_v47 }
 0x301   :  { %v6811_v52 = vpop.eup %4094  ;;  %v6818_v27 = vsub.f32 %v2916_v39, %v2948_v58  ;;  %v3299_v8 = vmul.f32 %v6732_v4, %v3298_v45  ;;  %vm6821_vm3 = vcmp.lt.f32.partialorder %v3300_v21, 0.0004427343  ;;  %v1505_v35 = vadd.f32 1.0, %v1504_v9 }
 0x302   :  { %v3276_v32 = vadd.f32 1.0, %v6811_v52  ;;  %v4097_v46 = vpop.eup %4096  ;;  %v2228_v13 = vadd.f32 %v2100_v7, %v6673_v29  ;;  %v2077_v6 = vmul.f32 -0.5, %v6755_v62  ;;  %v2482_v33 = vmul.f32 1.442695, %v2430_v20 }
 0x303   :  { %v3017_v23 = vand.u32 2147483647, %v6809_v18  ;;  %vm6831_vm4 = vcmp.lt.f32.partialorder %v1507_v59, 0.0004427343  ;;  %v2704_v4 = vadd.f32 1.0, %v6804_v15  ;;  %v6837_v48 = vsub.f32 %v1131_v55, %v6719_v22 }
 0x304   :  { %v6829_v47 = vpop.eup %4098  ;;  %4104 = vpow2.f32 %v1901_v25  ;;  %v1660_v53 = vadd.f32 %v6552_v14, %v1658_v36  ;;  %v2859_v29 = vsel %vm1623_vm2, %v2811_v61, 0.0  ;;  %v2080_v50 = vand.u32 2147483647, %v6755_v62  ;;  %v6874_v36 = vpop.xlane.xlu1 %997 }
 0x305   :  { %4106 = vlog2.f32 %v3276_v32  ;;  %v4101_v2 = vpop.eup %4100  ;;  %v3296_v0 = vmul.f32 0.6931472, %v4097_v46  ;;  %v1483_v56 = vadd.f32 1.0, %v6829_v47  ;;  %v3049_v37 = vsub.f32 0.0, %v3017_v23 }
 0x306   :  { %4108 = vpow2.f32 %v2482_v33  ;;  %v4103_v22 = vpop.eup %4102  ;;  %v6848_v39 = vsel %vm1623_vm2, %v2228_v13, 0.0  ;;  %v2078_v14 = vadd.f32 1.0, %v2077_v6  ;;  %v1719_v44 = vmax.f32 %v6769_v17, 0.0 }
 0x307   :  { %v1751_v11 = vmul.f32 0.0, %v6769_v17  ;;  %v2860_v58 = vadd.f32 %v2859_v29, %v6694_v19  ;;  %4110 = vlog2.f32 %v2704_v4  ;;  %v2334_v24 = vmax.f32 %v6774_v31, 0.0 }
 0x308   :  { %v1198_v49 = vand.u32 2147483647, %v6842_v10  ;;  %v1503_v21 = vmul.f32 0.6931472, %v4101_v2  ;;  %v1506_v41 = vmul.f32 %v6750_v3, %v1505_v35  ;;  %vm6856_vm5 = vcmp.lt.f32.partialorder %v2080_v50, 0.0004427343 }
 0x309   :  { %v1813_v43 = vand.u32 2147483647, %v6845_v12  ;;  %v3302_v45 = vsel %vm6821_vm3, %v3299_v8, %v3296_v0  ;;  %v2076_v17 = vmul.f32 0.6931472, %v4103_v22  ;;  %4112 = vlog2.f32 %v1483_v56 }
 0x30a   :  { %v3103_v19 = vmul.f32 1.442695, %v3049_v37  ;;  %v2707_v9 = vmul.f32 -0.5, %v6804_v15  ;;  %v6865_v28 = vadd.f32 %v6735_v16, %v1660_v53  ;;  %v1230_v55 = vsub.f32 0.0, %v1198_v49  ;;  %v6895_v53 = vpop.xlane.xlu0 %1087 }
 0x30b   :  { %v1845_v7 = vsub.f32 0.0, %v1813_v43  ;;  %v2862_v3 = vadd.f32 %v6568_v63, %v2860_v58  ;;  %v2079_v59 = vmul.f32 %v6755_v62, %v2078_v14  ;;  %v6869_v25 = vsub.f32 %v1719_v44, %v1751_v11 }
 0x30c   :  { %v6872_v20 = vsub.f32 %v2334_v24, %v6774_v31  ;;  %v3430_v61 = vadd.f32 %v3302_v45, %v6697_v26  ;;  %v1509_v8 = vsel %vm6831_vm4, %v1506_v41, %v1503_v21  ;;  %v3279_v16 = vmul.f32 -0.5, %v6811_v52 }
 0x30d   :  { %v1897_v54 = vmul.f32 1.442695, %v1845_v7  ;;  %v2082_v63 = vsel %vm6856_vm5, %v2079_v59, %v2076_v17  ;;  %v2710_v62 = vand.u32 2147483647, %v6804_v15  ;;  %v2921_v31 = vmax.f32 %v6809_v18, 0.0 }
 0x30e   :  { %v6880_v35 = vpop.eup %4104  ;;  %4114 = vpow2.f32 %v3103_v19  ;;  %v2708_v46 = vadd.f32 1.0, %v2707_v9  ;;  %v2953_v26 = vmul.f32 0.0, %v6809_v18  ;;  %v1285_v13 = vmul.f32 1.442695, %v1230_v55 }
 0x30f   :  { %v4107_v32 = vpop.eup %4106  ;;  %v2401_v6 = vand.u32 2147483647, %v6874_v36  ;;  %v1613_v23 = vadd.f32 %v1509_v8, %v6738_v60  ;;  %v3282_v42 = vand.u32 2147483647, %v6811_v52  ;;  %v6893_v4 = vadd.f32 %v6794_v57, %v2862_v3 }
 0x310   :  { %v6888_v33 = vpop.eup %4108  ;;  %4116 = vpow2.f32 %v1897_v54  ;;  %v6898_v29 = vsel %vm1623_vm2, %v3430_v61, 0.0  ;;  %v2226_v18 = vadd.f32 %v2082_v63, %v6748_v51  ;;  %v3280_v50 = vadd.f32 1.0, %v3279_v16 }
 0x311   :  { %v1486_v2 = vmul.f32 -0.5, %v6829_v47  ;;  %v4111_v0 = vpop.eup %4110  ;;  %vm6902_vm6 = vcmp.lt.f32.partialorder %v2710_v62, 0.0004427343  ;;  %v1489_v60 = vand.u32 2147483647, %v6829_v47  ;;  %v2119_v57 = vadd.f32 1.0, %v6880_v35 }
 0x312   :  { %v2433_v37 = vsub.f32 0.0, %v2401_v6  ;;  %v3278_v22 = vmul.f32 0.6931472, %v4107_v32  ;;  %v2686_v14 = vadd.f32 1.0, %v6888_v33  ;;  %4118 = vpow2.f32 %v1285_v13 }
 0x313   :  { %v3015_v44 = vand.u32 2147483647, %v6895_v53  ;;  %v4113_v51 = vpop.eup %4112  ;;  %v6911_v11 = vsel %vm1623_vm2, %v1613_v23, 0.0  ;;  %v2709_v58 = vmul.f32 %v6804_v15, %v2708_v46  ;;  %vm6914_vm7 = vcmp.lt.f32.partialorder %v3282_v42, 0.0004427343  ;;  %v6926_v15 = vpop.xlane.xlu1 %801 }
 0x314   :  { %v6918_v49 = vsub.f32 %v2921_v31, %v2953_v26  ;;  %v2274_v21 = vsel %vm1623_vm2, %v2226_v18, 0.0  ;;  %v2706_v41 = vmul.f32 0.6931472, %v4111_v0  ;;  %v3281_v38 = vmul.f32 %v6811_v52, %v3280_v50 }
 0x315   :  { %v1487_v43 = vadd.f32 1.0, %v1486_v2  ;;  %vm6922_vm8 = vcmp.lt.f32.partialorder %v1489_v60, 0.0004427343  ;;  %4120 = vlog2.f32 %v2119_v57  ;;  %v2488_v17 = vmul.f32 1.442695, %v2433_v37  ;;  %v6964_v60 = vpop.xlane.xlu0 %901 }
 0x316   :  { %v3047_v19 = vsub.f32 0.0, %v3015_v44  ;;  %v3284_v9 = vsel %vm6914_vm7, %v3281_v38, %v3278_v22  ;;  %v1485_v55 = vmul.f32 0.6931472, %v4113_v51  ;;  %4122 = vlog2.f32 %v2686_v14 }
 0x317   :  { %v1134_v7 = vmax.f32 %v6842_v10, 0.0  ;;  %v2275_v52 = vadd.f32 %v2274_v21, %v6758_v1  ;;  %v1717_v59 = vmax.f32 %v6845_v12, 0.0  ;;  %v1749_v61 = vmul.f32 0.0, %v6845_v12  ;;  %v6973_v57 = vpop.xlane.xlu1 %993 }
 0x318   :  { %v6931_v3 = vpop.eup %4114  ;;  %v2337_v8 = vmax.f32 %v6874_v36, 0.0  ;;  %v2712_v16 = vsel %vm6902_vm6, %v2709_v58, %v2706_v41  ;;  %v1488_v54 = vmul.f32 %v6829_v47, %v1487_v43  ;;  %v2122_v63 = vmul.f32 -0.5, %v6880_v35 }
 0x319   :  { %v1196_v62 = vand.u32 2147483647, %v6926_v15  ;;  %v3428_v32 = vadd.f32 %v3284_v9, %v6818_v27  ;;  %v2125_v1 = vand.u32 2147483647, %v6880_v35  ;;  %4124 = vpow2.f32 %v2488_v17 }
 0x31a   :  { %v6942_v31 = vpop.eup %4116  ;;  %v3099_v46 = vmul.f32 1.442695, %v3047_v19  ;;  %v1491_v12 = vsel %vm6922_vm8, %v1488_v54, %v1485_v55  ;;  %v2689_v26 = vmul.f32 -0.5, %v6888_v33  ;;  %v3321_v13 = vadd.f32 1.0, %v6931_v3 }
 0x31b   :  { %v6951_v47 = vsub.f32 %v1134_v7, %v6842_v10  ;;  %v2277_v6 = vadd.f32 %v6657_v40, %v2275_v52  ;;  %v2816_v23 = vadd.f32 %v2712_v16, %v6801_v34  ;;  %v6955_v42 = vsub.f32 %v1717_v59, %v1749_v61 }
 0x31c   :  { %v6958_v27 = vsub.f32 %v2337_v8, %v6874_v36  ;;  %v6960_v18 = vpop.eup %4118  ;;  %v2123_v50 = vadd.f32 1.0, %v2122_v63  ;;  %v2101_v2 = vadd.f32 1.0, %v6942_v31  ;;  %v2919_v0 = vmax.f32 %v6895_v53, 0.0 }
 0x31d   :  { %v1228_v56 = vsub.f32 0.0, %v1196_v62  ;;  %v3476_v10 = vsel %vm1623_vm2, %v3428_v32, 0.0  ;;  %v1611_v40 = vadd.f32 %v1491_v12, %v6837_v48  ;;  %vm6968_vm9 = vcmp.lt.f32.partialorder %v2125_v1, 0.0004427343 }
 0x31e   :  { %v2692_v36 = vand.u32 2147483647, %v6888_v33  ;;  %4126 = vpow2.f32 %v3099_v46  ;;  %v2690_v37 = vadd.f32 1.0, %v2689_v26  ;;  %v2951_v22 = vmul.f32 0.0, %v6895_v53 }
 0x31f   :  { %4128 = vlog2.f32 %v3321_v13  ;;  %v1281_v14 = vmul.f32 1.442695, %v1228_v56  ;;  %v4121_v44 = vpop.eup %4120  ;;  %v6977_v51 = vsel %vm1623_vm2, %v2816_v23, 0.0  ;;  %v1510_v48 = vadd.f32 1.0, %v6960_v18 }
 0x320   :  { %v6981_v58 = vadd.f32 %v6848_v39, %v2277_v6  ;;  %v1816_v24 = vand.u32 2147483647, %v6964_v60  ;;  %v4123_v21 = vpop.eup %4122  ;;  %v3477_v41 = vadd.f32 %v3476_v10, %v6814_v30  ;;  %v2124_v38 = vmul.f32 %v6880_v35, %v2123_v50  ;;  %v6996_v30 = vpop.xlane.xlu0 %1093 }
 0x321   :  { %4130 = vlog2.f32 %v2101_v2  ;;  %v2399_v53 = vand.u32 2147483647, %v6973_v57  ;;  %v1663_v43 = vsel %vm1623_vm2, %v1611_v40, 0.0  ;;  %v3324_v45 = vmul.f32 -0.5, %v6931_v3  ;;  %v7029_v10 = vpop.xlane.xlu1 %811 }
 0x322   :  { %4132 = vpow2.f32 %v1281_v14  ;;  %v1848_v17 = vsub.f32 0.0, %v1816_v24  ;;  %v2121_v19 = vmul.f32 0.6931472, %v4121_v44  ;;  %v2691_v39 = vmul.f32 %v6888_v33, %v2690_v37 }
 0x323   :  { %vm6990_vm10 = vcmp.lt.f32.partialorder %v2692_v36, 0.0004427343  ;;  %v6994_v55 = vsub.f32 %v2919_v0, %v2951_v22  ;;  %v6998_v35 = vpop.eup %4124  ;;  %v2688_v7 = vmul.f32 0.6931472, %v4123_v21  ;;  %v3327_v52 = vand.u32 2147483647, %v6931_v3 }
 0x324   :  { %4134 = vlog2.f32 %v1510_v48  ;;  %v1903_v59 = vmul.f32 1.442695, %v1848_v17  ;;  %v3479_v61 = vadd.f32 %v6710_v5, %v3477_v41  ;;  %v7003_v8 = vadd.f32 %v1663_v43, %v6865_v28  ;;  %v7046_v21 = vpop.xlane.xlu0 %897 }
 0x325   :  { %v1132_v33 = vmax.f32 %v6926_v15, 0.0  ;;  %v2431_v16 = vsub.f32 0.0, %v2399_v53  ;;  %v3325_v54 = vadd.f32 1.0, %v3324_v45  ;;  %v1513_v63 = vmul.f32 -0.5, %v6960_v18 }
 0x326   :  { %4136 = vpow2.f32 %v1903_v59  ;;  %v3018_v62 = vand.u32 2147483647, %v6996_v30  ;;  %v2127_v32 = vsel %vm6968_vm9, %v2124_v38, %v2121_v19  ;;  %v2107_v1 = vand.u32 2147483647, %v6942_v31 }
 0x327   :  { %v2713_v46 = vadd.f32 1.0, %v6998_v35  ;;  %v2484_v5 = vmul.f32 1.442695, %v2431_v16  ;;  %v2694_v28 = vsel %vm6990_vm10, %v2691_v39, %v2688_v7  ;;  %v1516_v26 = vand.u32 2147483647, %v6960_v18 }
 0x328   :  { %v7012_v12 = vpop.eup %4126  ;;  %v2104_v13 = vmul.f32 -0.5, %v6942_v31  ;;  %v3050_v6 = vsub.f32 0.0, %v3018_v62  ;;  %vm7018_vm11 = vcmp.lt.f32.partialorder %v3327_v52, 0.0004427343  ;;  %v7023_v2 = vadd.f32 %v6898_v29, %v3479_v61 }
 0x329   :  { %v4129_v23 = vpop.eup %4128  ;;  %v3303_v0 = vadd.f32 1.0, %v7012_v12  ;;  %v7027_v56 = vsub.f32 %v1132_v33, %v6926_v15  ;;  %v2231_v40 = vadd.f32 %v2127_v32, %v6869_v25  ;;  %v3326_v34 = vmul.f32 %v6931_v3, %v3325_v54  ;;  %v7064_v33 = vpop.xlane.xlu1 %1003 }
 0x32a   :  { %4138 = vpow2.f32 %v2484_v5  ;;  %v3105_v36 = vmul.f32 1.442695, %v3050_v6  ;;  %v2814_v22 = vadd.f32 %v2694_v28, %v6872_v20  ;;  %v1514_v14 = vadd.f32 1.0, %v1513_v63 }
 0x32b   :  { %v4131_v37 = vpop.eup %4130  ;;  %vm7034_vm12 = vcmp.lt.f32.partialorder %v2107_v1, 0.0004427343  ;;  %4140 = vlog2.f32 %v2713_v46  ;;  %v3323_v15 = vmul.f32 0.6931472, %v4129_v23  ;;  %vm7040_vm13 = vcmp.lt.f32.partialorder %v1516_v26, 0.0004427343 }
 0x32c   :  { %v7038_v44 = vpop.eup %4132  ;;  %v2105_v25 = vadd.f32 1.0, %v2104_v13  ;;  %v1720_v3 = vmax.f32 %v6964_v60, 0.0  ;;  %v1201_v24 = vand.u32 2147483647, %v7029_v10  ;;  %v2716_v20 = vmul.f32 -0.5, %v6998_v35 }
 0x32d   :  { %4142 = vlog2.f32 %v3303_v0  ;;  %v1492_v41 = vadd.f32 1.0, %v7038_v44  ;;  %v1752_v38 = vmul.f32 0.0, %v6964_v60  ;;  %v7052_v43 = vsel %vm1623_vm2, %v2231_v40, 0.0 }
 0x32e   :  { %v4135_v53 = vpop.eup %4134  ;;  %v2103_v45 = vmul.f32 0.6931472, %v4131_v37  ;;  %v2335_v17 = vmax.f32 %v6973_v57, 0.0  ;;  %4144 = vpow2.f32 %v3105_v36  ;;  %v2865_v19 = vsel %vm1623_vm2, %v2814_v22, 0.0  ;;  %v7095_v22 = vpop.xlane.xlu0 %1089 }
 0x32f   :  { %v2719_v39 = vand.u32 2147483647, %v6998_v35  ;;  %4146 = vlog2.f32 %v1492_v41  ;;  %v1814_v9 = vand.u32 2147483647, %v7046_v21  ;;  %v3329_v60 = vsel %vm7018_vm11, %v3326_v34, %v3323_v15  ;;  %v7107_v41 = vpop.xlane.xlu1 %807 }
 0x330   :  { %v7058_v7 = vpop.eup %4136  ;;  %v1515_v52 = vmul.f32 %v6960_v18, %v1514_v14  ;;  %v2106_v59 = vmul.f32 %v6942_v31, %v2105_v25  ;;  %v1233_v61 = vsub.f32 0.0, %v1201_v24  ;;  %v1512_v16 = vmul.f32 0.6931472, %v4135_v53 }
 0x331   :  { %v2717_v54 = vadd.f32 1.0, %v2716_v20  ;;  %v7066_v63 = vsub.f32 %v1720_v3, %v1752_v38  ;;  %v2128_v62 = vadd.f32 1.0, %v7058_v7  ;;  %v7070_v32 = vadd.f32 %v2865_v19, %v6893_v4 }
 0x332   :  { %v2109_v1 = vsel %vm7034_vm12, %v2106_v59, %v2103_v45  ;;  %v7075_v46 = vsub.f32 %v2335_v17, %v6973_v57  ;;  %v1846_v18 = vsub.f32 0.0, %v1814_v9  ;;  %v3433_v31 = vadd.f32 %v3329_v60, %v6918_v49 }
 0x333   :  { %vm7078_vm14 = vcmp.lt.f32.partialorder %v2719_v39, 0.0004427343  ;;  %v2922_v28 = vmax.f32 %v6996_v30, 0.0  ;;  %v2954_v26 = vmul.f32 0.0, %v6996_v30  ;;  %v2404_v4 = vand.u32 2147483647, %v7064_v33 }
 0x334   :  { %v7085_v13 = vpop.eup %4138  ;;  %v3306_v6 = vmul.f32 -0.5, %v7012_v12  ;;  %v1137_v57 = vmax.f32 %v7029_v10, 0.0  ;;  %v1291_v23 = vmul.f32 1.442695, %v1233_v61  ;;  %v1899_v50 = vmul.f32 1.442695, %v1846_v18 }
 0x335   :  { %v4141_v0 = vpop.eup %4140  ;;  %v1518_v49 = vsel %vm7040_vm13, %v1515_v52, %v1512_v16  ;;  %v2229_v40 = vadd.f32 %v2109_v1, %v6955_v42  ;;  %v3309_v34 = vand.u32 2147483647, %v7012_v12  ;;  %4148 = vlog2.f32 %v2128_v62 }
 0x336   :  { %v1495_v30 = vmul.f32 -0.5, %v7038_v44  ;;  %v2695_v36 = vadd.f32 1.0, %v7085_v13  ;;  %4150 = vpow2.f32 %v1899_v50  ;;  %v2436_v37 = vsub.f32 0.0, %v2404_v4 }
 0x337   :  { %v4143_v14 = vpop.eup %4142  ;;  %v7098_v29 = vsel %vm1623_vm2, %v3433_v31, 0.0  ;;  %v2718_v15 = vmul.f32 %v6998_v35, %v2717_v54  ;;  %v7101_v48 = vsub.f32 %v2922_v28, %v2954_v26  ;;  %v1718_v42 = vmax.f32 %v7046_v21, 0.0 }
 0x338   :  { %v7104_v25 = vpop.eup %4144  ;;  %v1614_v3 = vadd.f32 %v1518_v49, %v6951_v47  ;;  %v2715_v24 = vmul.f32 0.6931472, %v4141_v0  ;;  %v3307_v20 = vadd.f32 1.0, %v3306_v6  ;;  %4152 = vpow2.f32 %v1291_v23 }
 0x339   :  { %v4147_v38 = vpop.eup %4146  ;;  %vm7109_vm15 = vcmp.lt.f32.partialorder %v3309_v34, 0.0004427343  ;;  %v1498_v35 = vand.u32 2147483647, %v7038_v44  ;;  %v7115_v45 = vsub.f32 %v1137_v57, %v7029_v10  ;;  %v3016_v17 = vand.u32 2147483647, %v7095_v22 }
 0x33a   :  { %v2280_v19 = vsel %vm1623_vm2, %v2229_v40, 0.0  ;;  %v1496_v47 = vadd.f32 1.0, %v1495_v30  ;;  %4154 = vlog2.f32 %v2695_v36  ;;  %v2494_v39 = vmul.f32 1.442695, %v2436_v37 }
 0x33b   :  { %v3305_v9 = vmul.f32 0.6931472, %v4143_v14  ;;  %v3330_v60 = vadd.f32 1.0, %v7104_v25  ;;  %v3048_v52 = vsub.f32 0.0, %v3016_v17  ;;  %v1199_v59 = vand.u32 2147483647, %v7107_v41 }
 0x33c   :  { %v7122_v61 = vsel %vm1623_vm2, %v1614_v3, 0.0  ;;  %v2721_v10 = vsel %vm7078_vm14, %v2718_v15, %v2715_v24  ;;  %v1494_v16 = vmul.f32 0.6931472, %v4147_v38  ;;  %v1750_v54 = vmul.f32 0.0, %v7046_v21  ;;  %v7160_v24 = vpop.xlane.xlu0 %907 }
 0x33d   :  { %v7128_v62 = vadd.f32 %v2280_v19, %v6981_v58  ;;  %v3308_v1 = vmul.f32 %v7012_v12, %v3307_v20  ;;  %vm7131_vm0 = vcmp.lt.f32.partialorder %v1498_v35, 0.0004427343  ;;  %v2131_v31 = vmul.f32 -0.5, %v7058_v7 }
 0x33e   :  { %v1497_v28 = vmul.f32 %v7038_v44, %v1496_v47  ;;  %4156 = vpow2.f32 %v2494_v39  ;;  %v3101_v26 = vmul.f32 1.442695, %v3048_v52  ;;  %v1231_v5 = vsub.f32 0.0, %v1199_v59 }
 0x33f   :  { %v4149_v4 = vpop.eup %4148  ;;  %v2817_v6 = vadd.f32 %v2721_v10, %v6958_v27  ;;  %v3311_v58 = vsel %vm7109_vm15, %v3308_v1, %v3305_v9  ;;  %4158 = vlog2.f32 %v3330_v60  ;;  %v2340_v12 = vmax.f32 %v7064_v33, 0.0  ;;  %v7182_v9 = vpop.xlane.xlu1 %999 }
 0x340   :  { %v7141_v21 = vpop.eup %4150  ;;  %v1500_v57 = vsel %vm7131_vm0, %v1497_v28, %v1494_v16  ;;  %v2698_v23 = vmul.f32 -0.5, %v7085_v13  ;;  %4160 = vpow2.f32 %v3101_v26  ;;  %v1287_v44 = vmul.f32 1.442695, %v1231_v5 }
 0x341   :  { %v2132_v50 = vadd.f32 1.0, %v2131_v31  ;;  %v2134_v0 = vand.u32 2147483647, %v7058_v7  ;;  %v2920_v27 = vmax.f32 %v7095_v22, 0.0  ;;  %v2952_v49 = vmul.f32 0.0, %v7095_v22 }
 0x342   :  { %v7149_v40 = vpop.eup %4152  ;;  %v3431_v34 = vadd.f32 %v3311_v58, %v6994_v55  ;;  %v2701_v30 = vand.u32 2147483647, %v7085_v13  ;;  %v7153_v36 = vsub.f32 %v1718_v42, %v1750_v54  ;;  %4162 = vpow2.f32 %v1287_v44  ;;  %v7207_v44 = vpop.xlane.xlu0 %1099 }
 0x343   :  { %v1612_v37 = vadd.f32 %v1500_v57, %v7027_v56  ;;  %v2130_v14 = vmul.f32 0.6931472, %v4149_v4  ;;  %v2110_v15 = vadd.f32 1.0, %v7141_v21  ;;  %v7158_v3 = vsub.f32 %v2340_v12, %v7064_v33 }
 0x344   :  { %v4155_v22 = vpop.eup %4154  ;;  %v7163_v20 = vsel %vm1623_vm2, %v2817_v6, 0.0  ;;  %v2699_v55 = vadd.f32 1.0, %v2698_v23  ;;  %v3333_v38 = vmul.f32 -0.5, %v7104_v25  ;;  %v3336_v42 = vand.u32 2147483647, %v7104_v25 }
 0x345   :  { %v2133_v53 = vmul.f32 %v7058_v7, %v2132_v50  ;;  %vm7168_vm1 = vcmp.lt.f32.partialorder %v2134_v0, 0.0004427343  ;;  %v1537_v33 = vadd.f32 1.0, %v7149_v40  ;;  %v7173_v35 = vsub.f32 %v2920_v27, %v2952_v49 }
 0x346   :  { %v3482_v17 = vsel %vm1623_vm2, %v3431_v34, 0.0  ;;  %vm7176_vm3 = vcmp.lt.f32.partialorder %v2701_v30, 0.0004427343  ;;  %v1540_v47 = vmul.f32 -0.5, %v7149_v40  ;;  %v1819_v39 = vand.u32 2147483647, %v7160_v24  ;;  %v7216_v30 = vpop.xlane.xlu1 %813 }
 0x347   :  { %v1665_v7 = vsel %vm1623_vm2, %v1612_v37, 0.0  ;;  %v2136_v60 = vsel %vm7168_vm1, %v2133_v53, %v2130_v14  ;;  %v2697_v52 = vmul.f32 0.6931472, %v4155_v22  ;;  %4164 = vlog2.f32 %v2110_v15 }
 0x348   :  { %v7187_v59 = vpop.eup %4156  ;;  %v2700_v10 = vmul.f32 %v7085_v13, %v2699_v55  ;;  %v3334_v16 = vadd.f32 1.0, %v3333_v38  ;;  %vm7190_vm4 = vcmp.lt.f32.partialorder %v3336_v42, 0.0004427343  ;;  %v1851_v1 = vsub.f32 0.0, %v1819_v39 }
 0x349   :  { %v4159_v18 = vpop.eup %4158  ;;  %v7195_v31 = vadd.f32 %v3482_v17, %v7023_v2  ;;  %4166 = vlog2.f32 %v1537_v33  ;;  %v1135_v28 = vmax.f32 %v7107_v41, 0.0  ;;  %v2402_v26 = vand.u32 2147483647, %v7182_v9  ;;  %v7239_v33 = vpop.xlane.xlu0 %903 }
 0x34a   :  { %v7199_v5 = vpop.eup %4160  ;;  %v1666_v4 = vadd.f32 %v1665_v7, %v7003_v8  ;;  %v2232_v13 = vadd.f32 %v2136_v60, %v7066_v63  ;;  %v1541_v6 = vadd.f32 1.0, %v1540_v47  ;;  %v1909_v58 = vmul.f32 1.442695, %v1851_v1  ;;  %v7254_v54 = vpop.xlane.xlu1 %1005 }
 0x34b   :  { %v2703_v12 = vsel %vm7176_vm3, %v2700_v10, %v2697_v52  ;;  %v2740_v57 = vadd.f32 1.0, %v7187_v59  ;;  %v3312_v2 = vadd.f32 1.0, %v7199_v5  ;;  %v2434_v23 = vsub.f32 0.0, %v2402_v26 }
 0x34c   :  { %v7209_v50 = vpop.eup %4162  ;;  %v3332_v0 = vmul.f32 0.6931472, %v4159_v18  ;;  %v3335_v27 = vmul.f32 %v7104_v25, %v3334_v16  ;;  %v2113_v8 = vmul.f32 -0.5, %v7141_v21  ;;  %4168 = vpow2.f32 %v1909_v58 }
 0x34d   :  { %v1543_v63 = vand.u32 2147483647, %v7149_v40  ;;  %v2116_v49 = vand.u32 2147483647, %v7141_v21  ;;  %4170 = vlog2.f32 %v3312_v2  ;;  %v1723_v34 = vmax.f32 %v7160_v24, 0.0 }
 0x34e   :  { %v1668_v37 = vadd.f32 %v6911_v11, %v1666_v4  ;;  %v2815_v14 = vadd.f32 %v2703_v12, %v7075_v46  ;;  %v7221_v15 = vsub.f32 %v1135_v28, %v7107_v41  ;;  %v1519_v25 = vadd.f32 1.0, %v7209_v50 }
 0x34f   :  { %v7225_v22 = vsel %vm1623_vm2, %v2232_v13, 0.0  ;;  %v7228_v55 = vmul.f32 %v7149_v40, %v1541_v6  ;;  %4172 = vlog2.f32 %v2740_v57  ;;  %v2490_v38 = vmul.f32 1.442695, %v2434_v23 }
 0x350   :  { %v3338_v42 = vsel %vm7190_vm4, %v3335_v27, %v3332_v0  ;;  %v2114_v53 = vadd.f32 1.0, %v2113_v8  ;;  %4174 = vlog2.f32 %v1519_v25  ;;  %v1755_v11 = vmul.f32 0.0, %v7160_v24 }
 0x351   :  { %v4165_v46 = vpop.eup %4164  ;;  %vm7233_vm5 = vcmp.lt.f32.partialorder %v2116_v49, 0.0004427343  ;;  %v2743_v56 = vmul.f32 -0.5, %v7187_v59  ;;  %4176 = vpow2.f32 %v2490_v38  ;;  %v3021_v40 = vand.u32 2147483647, %v7207_v44 }
 0x352   :  { %v2867_v17 = vsel %vm1623_vm2, %v2815_v14, 0.0  ;;  %v3315_v19 = vmul.f32 -0.5, %v7199_v5  ;;  %v7244_v47 = vadd.f32 %v7122_v61, %v1668_v37  ;;  %v1202_v24 = vand.u32 2147483647, %v7216_v30 }
 0x353   :  { %v4167_v39 = vpop.eup %4166  ;;  %v3434_v7 = vadd.f32 %v3338_v42, %v7101_v48  ;;  %vm7248_vm6 = vcmp.lt.f32.partialorder %v1543_v63, 0.0004427343  ;;  %v2746_v52 = vand.u32 2147483647, %v7187_v59  ;;  %v1522_v10 = vmul.f32 -0.5, %v7209_v50 }
 0x354   :  { %v3053_v16 = vsub.f32 0.0, %v3021_v40  ;;  %v2112_v1 = vmul.f32 0.6931472, %v4165_v46  ;;  %v2115_v61 = vmul.f32 %v7141_v21, %v2114_v53  ;;  %v1234_v18 = vsub.f32 0.0, %v1202_v24  ;;  %v7281_v40 = vpop.xlane.xlu0 %1095 }
 0x355   :  { %v1817_v28 = vand.u32 2147483647, %v7239_v33  ;;  %v2868_v26 = vadd.f32 %v2867_v17, %v7070_v32  ;;  %v2744_v48 = vadd.f32 1.0, %v2743_v56  ;;  %v7259_v4 = vsub.f32 %v1723_v34, %v1755_v11 }
 0x356   :  { %v3111_v13 = vmul.f32 1.442695, %v3053_v16  ;;  %v7261_v6 = vpop.eup %4168  ;;  %v3316_v58 = vadd.f32 1.0, %v3315_v19  ;;  %v2338_v12 = vmax.f32 %v7182_v9, 0.0  ;;  %v2405_v2 = vand.u32 2147483647, %v7254_v54 }
 0x357   :  { %v1849_v57 = vsub.f32 0.0, %v1817_v28  ;;  %v4171_v23 = vpop.eup %4170  ;;  %v7266_v21 = vsel %vm1623_vm2, %v3434_v7, 0.0  ;;  %v1539_v0 = vmul.f32 0.6931472, %v4167_v39  ;;  %v1523_v27 = vadd.f32 1.0, %v1522_v10 }
 0x358   :  { %v1293_v8 = vmul.f32 1.442695, %v1234_v18  ;;  %v2118_v32 = vsel %vm7233_vm5, %v2115_v61, %v2112_v1  ;;  %v3318_v63 = vand.u32 2147483647, %v7199_v5  ;;  %v1525_v49 = vand.u32 2147483647, %v7209_v50 }
 0x359   :  { %v1905_v34 = vmul.f32 1.442695, %v1849_v57  ;;  %v4173_v37 = vpop.eup %4172  ;;  %v2745_v14 = vmul.f32 %v7187_v59, %v2744_v48  ;;  %vm7273_vm7 = vcmp.lt.f32.partialorder %v2746_v52, 0.0004427343  ;;  %v3314_v38 = vmul.f32 0.6931472, %v4171_v23 }
 0x35a   :  { %v2925_v42 = vmax.f32 %v7207_v44, 0.0  ;;  %4178 = vpow2.f32 %v3111_v13  ;;  %v4175_v53 = vpop.eup %4174  ;;  %v2870_v11 = vadd.f32 %v6977_v51, %v2868_v26  ;;  %v3317_v46 = vmul.f32 %v7199_v5, %v3316_v58 }
 0x35b   :  { %v2155_v41 = vadd.f32 1.0, %v7261_v6  ;;  %v2437_v56 = vsub.f32 0.0, %v2405_v2  ;;  %v7283_v17 = vpop.eup %4176  ;;  %v2230_v59 = vadd.f32 %v2118_v32, %v7153_v36  ;;  %v1521_v19 = vmul.f32 0.6931472, %v4175_v53 }
 0x35c   :  { %v1524_v24 = vmul.f32 %v7209_v50, %v1523_v27  ;;  %4180 = vpow2.f32 %v1293_v8  ;;  %v1545_v39 = vsel %vm7248_vm6, %v7228_v55, %v1539_v0  ;;  %vm7290_vm8 = vcmp.lt.f32.partialorder %v3318_v63, 0.0004427343  ;;  %v7299_v55 = vpop.xlane.xlu1 %809 }
 0x35d   :  { %vm1526_vm9 = vcmp.lt.f32.partialorder %v1525_v49, 0.0004427343  ;;  %4182 = vpow2.f32 %v1905_v34  ;;  %v3320_v5 = vsel %vm7290_vm8, %v3317_v46, %v3314_v38  ;;  %v2496_v52 = vmul.f32 1.442695, %v2437_v56 }
 0x35e   :  { %v1527_v7 = vsel %vm1526_vm9, %v1524_v24, %v1521_v19  ;;  %v3019_v36 = vand.u32 2147483647, %v7281_v40  ;;  %v2742_v10 = vmul.f32 0.6931472, %v4173_v37  ;;  %4184 = vlog2.f32 %v2155_v41 }
 0x35f   :  { %v1615_v50 = vadd.f32 %v1527_v7, %v7221_v15  ;;  %v2722_v60 = vadd.f32 1.0, %v7283_v17  ;;  %v2282_v16 = vsel %vm1623_vm2, %v2230_v59, 0.0  ;;  %v7303_v1 = vsub.f32 %v2338_v12, %v7182_v9  ;;  %v7314_v9 = vpop.xlane.xlu0 %909 }
 0x360   :  { %v2957_v61 = vmul.f32 0.0, %v7207_v44  ;;  %v3051_v18 = vsub.f32 0.0, %v3019_v36  ;;  %v1617_v28 = vadd.f32 %v1545_v39, %v7115_v45  ;;  %v3432_v26 = vadd.f32 %v3320_v5, %v7173_v35 }
 0x361   :  { %v1671_v48 = vsel %vm1623_vm2, %v1615_v50, 0.0  ;;  %v1138_v15 = vmax.f32 %v7216_v30, 0.0  ;;  %4186 = vpow2.f32 %v2496_v52  ;;  %v1200_v57 = vand.u32 2147483647, %v7299_v55 }
 0x362   :  { %v7311_v13 = vadd.f32 %v1671_v48, %v7244_v47  ;;  %v3107_v58 = vmul.f32 1.442695, %v3051_v18  ;;  %v2283_v44 = vadd.f32 %v2282_v16, %v7128_v62  ;;  %v2748_v45 = vsel %vm7273_vm7, %v2745_v14, %v2742_v10 }
 0x363   :  { %4188 = vlog2.f32 %v2722_v60  ;;  %v7320_v35 = vadd.f32 %v7163_v20, %v2870_v11  ;;  %v2158_v47 = vmul.f32 -0.5, %v7261_v6  ;;  %v1721_v2 = vmax.f32 %v7239_v33, 0.0 }
 0x364   :  { %v7322_v12 = vpop.eup %4178  ;;  %v1753_v23 = vmul.f32 0.0, %v7239_v33  ;;  %4190 = vpow2.f32 %v3107_v58  ;;  %v7328_v0 = vsel %vm1623_vm2, %v1617_v28, 0.0  ;;  %v3484_v62 = vsel %vm1623_vm2, %v3432_v26, 0.0 }
 0x365   :  { %v7331_v27 = vsub.f32 %v2925_v42, %v2957_v61  ;;  %v1820_v8 = vand.u32 2147483647, %v7314_v9  ;;  %v2820_v32 = vadd.f32 %v2748_v45, %v7158_v3  ;;  %v2725_v63 = vmul.f32 -0.5, %v7283_v17 }
 0x366   :  { %v7334_v20 = vpop.eup %4180  ;;  %v7339_v49 = vsub.f32 %v1138_v15, %v7216_v30  ;;  %v1232_v33 = vsub.f32 0.0, %v1200_v57  ;;  %v2285_v37 = vadd.f32 %v7052_v43, %v2283_v44  ;;  %v2161_v14 = vand.u32 2147483647, %v7261_v6  ;;  %v7389_v15 = vpop.xlane.xlu0 %1101 }
 0x367   :  { %v7341_v34 = vpop.eup %4182  ;;  %v3357_v25 = vadd.f32 1.0, %v7322_v12  ;;  %v2341_v38 = vmax.f32 %v7254_v54, 0.0  ;;  %v3485_v42 = vadd.f32 %v3484_v62, %v7195_v31  ;;  %v2159_v53 = vadd.f32 1.0, %v2158_v47 }
 0x368   :  { %v7348_v3 = vsub.f32 %v1721_v2, %v1753_v23  ;;  %v2923_v11 = vmax.f32 %v7281_v40, 0.0  ;;  %v4185_v30 = vpop.eup %4184  ;;  %v2728_v46 = vand.u32 2147483647, %v7283_v17  ;;  %v1546_v41 = vadd.f32 1.0, %v7334_v20 }
 0x369   :  { %v2955_v43 = vmul.f32 0.0, %v7281_v40  ;;  %v1852_v56 = vsub.f32 0.0, %v1820_v8  ;;  %v7355_v59 = vsel %vm1623_vm2, %v2820_v32, 0.0  ;;  %v2726_v19 = vadd.f32 1.0, %v2725_v63  ;;  %v7368_v40 = vpop.xlane.xlu1 %1001 }
 0x36a   :  { %v2137_v24 = vadd.f32 1.0, %v7341_v34  ;;  %v1289_v31 = vmul.f32 1.442695, %v1232_v33  ;;  %vm7358_vm10 = vcmp.lt.f32.partialorder %v2161_v14, 0.0004427343  ;;  %4192 = vlog2.f32 %v3357_v25 }
 0x36b   :  { %v7363_v51 = vadd.f32 %v7225_v22, %v2285_v37  ;;  %v7366_v5 = vsub.f32 %v2341_v38, %v7254_v54  ;;  %v7370_v7 = vpop.eup %4186  ;;  %v3487_v52 = vadd.f32 %v7098_v29, %v3485_v42  ;;  %v2157_v36 = vmul.f32 0.6931472, %v4185_v30 }
 0x36c   :  { %v2160_v10 = vmul.f32 %v7261_v6, %v2159_v53  ;;  %4194 = vpow2.f32 %v1289_v31  ;;  %vm7374_vm11 = vcmp.lt.f32.partialorder %v2728_v46, 0.0004427343  ;;  %v7378_v22 = vsub.f32 %v2923_v11, %v2955_v43 }
 0x36d   :  { %v4189_v50 = vpop.eup %4188  ;;  %4196 = vlog2.f32 %v1546_v41  ;;  %v1911_v54 = vmul.f32 1.442695, %v1852_v56  ;;  %v2727_v61 = vmul.f32 %v7283_v17, %v2726_v19  ;;  %v3360_v18 = vmul.f32 -0.5, %v7322_v12  ;;  %v7401_v32 = vpop.xlane.xlu1 %819 }
 0x36e   :  { %v7380_v16 = vpop.eup %4190  ;;  %4198 = vlog2.f32 %v2137_v24  ;;  %v2403_v29 = vand.u32 2147483647, %v7368_v40  ;;  %v2749_v6 = vadd.f32 1.0, %v7370_v7  ;;  %v1136_v26 = vmax.f32 %v7299_v55, 0.0 }
 0x36f   :  { %v3339_v28 = vadd.f32 1.0, %v7380_v16  ;;  %v1724_v48 = vmax.f32 %v7314_v9, 0.0  ;;  %v2163_v58 = vsel %vm7358_vm10, %v2160_v10, %v2157_v36  ;;  %v1549_v17 = vmul.f32 -0.5, %v7334_v20 }
 0x370   :  { %v7395_v57 = vadd.f32 %v7266_v21, %v3487_v52  ;;  %4200 = vpow2.f32 %v1911_v54  ;;  %v2724_v44 = vmul.f32 0.6931472, %v4189_v50  ;;  %v3363_v45 = vand.u32 2147483647, %v7322_v12 }
 0x371   :  { %4202 = vlog2.f32 %v3339_v28  ;;  %v2435_v47 = vsub.f32 0.0, %v2403_v29  ;;  %v3361_v2 = vadd.f32 1.0, %v3360_v18  ;;  %v2140_v23 = vmul.f32 -0.5, %v7341_v34 }
 0x372   :  { %v1756_v62 = vmul.f32 0.0, %v7314_v9  ;;  %v3022_v8 = vand.u32 2147483647, %v7389_v15  ;;  %v2235_v63 = vadd.f32 %v2163_v58, %v7259_v4  ;;  %v1552_v21 = vand.u32 2147483647, %v7334_v20 }
 0x373   :  { %4204 = vlog2.f32 %v2749_v6  ;;  %v2492_v33 = vmul.f32 1.442695, %v2435_v47  ;;  %v1550_v37 = vadd.f32 1.0, %v1549_v17  ;;  %v3342_v14 = vmul.f32 -0.5, %v7380_v16 }
 0x374   :  { %v7407_v25 = vsub.f32 %v1136_v26, %v7299_v55  ;;  %v3054_v38 = vsub.f32 0.0, %v3022_v8  ;;  %v4193_v42 = vpop.eup %4192  ;;  %v2730_v9 = vsel %vm7374_vm11, %v2727_v61, %v2724_v44  ;;  %vm7411_vm12 = vcmp.lt.f32.partialorder %v3363_v45, 0.0004427343 }
 0x375   :  { %v2752_v4 = vmul.f32 -0.5, %v7370_v7  ;;  %4206 = vpow2.f32 %v2492_v33  ;;  %v1205_v11 = vand.u32 2147483647, %v7401_v32  ;;  %v2141_v46 = vadd.f32 1.0, %v2140_v23 }
 0x376   :  { %v7417_v30 = vpop.eup %4194  ;;  %v2143_v55 = vand.u32 2147483647, %v7341_v34  ;;  %v7420_v41 = vsub.f32 %v1724_v48, %v1756_v62  ;;  %v3113_v43 = vmul.f32 1.442695, %v3054_v38  ;;  %v7423_v19 = vsel %vm1623_vm2, %v2235_v63, 0.0 }
 0x377   :  { %v4197_v56 = vpop.eup %4196  ;;  %v3362_v24 = vmul.f32 %v7322_v12, %v3361_v2  ;;  %vm7426_vm13 = vcmp.lt.f32.partialorder %v1552_v21, 0.0004427343  ;;  %v1528_v39 = vadd.f32 1.0, %v7417_v30  ;;  %v2818_v36 = vadd.f32 %v2730_v9, %v7303_v1  ;;  %v7441_v1 = vpop.xlane.xlu0 %905 }
 0x378   :  { %v4199_v52 = vpop.eup %4198  ;;  %v3343_v10 = vadd.f32 1.0, %v3342_v14  ;;  %4208 = vpow2.f32 %v3113_v43  ;;  %v1237_v50 = vsub.f32 0.0, %v1205_v11  ;;  %v1551_v60 = vmul.f32 %v7334_v20, %v1550_v37  ;;  %v7448_v2 = vpop.xlane.xlu1 %1011 }
 0x379   :  { %v2753_v54 = vadd.f32 1.0, %v2752_v4  ;;  %v3345_v61 = vand.u32 2147483647, %v7380_v16  ;;  %4210 = vlog2.f32 %v1528_v39  ;;  %v3359_v12 = vmul.f32 0.6931472, %v4193_v42 }
 0x37a   :  { %v7434_v18 = vpop.eup %4200  ;;  %v1548_v29 = vmul.f32 0.6931472, %v4197_v56  ;;  %v2142_v6 = vmul.f32 %v7341_v34, %v2141_v46  ;;  %vm7437_vm14 = vcmp.lt.f32.partialorder %v2143_v55, 0.0004427343  ;;  %v2139_v48 = vmul.f32 0.6931472, %v4199_v52 }
 0x37b   :  { %v4203_v26 = vpop.eup %4202  ;;  %v2755_v20 = vand.u32 2147483647, %v7370_v7  ;;  %v2339_v58 = vmax.f32 %v7368_v40, 0.0  ;;  %v2926_v17 = vmax.f32 %v7389_v15, 0.0  ;;  %v2873_v44 = vsel %vm1623_vm2, %v2818_v36, 0.0  ;;  %v7474_v31 = vpop.xlane.xlu0 %1097 }
 0x37c   :  { %v3341_v45 = vmul.f32 0.6931472, %v4203_v26  ;;  %v3344_v47 = vmul.f32 %v7380_v16, %v3343_v10  ;;  %v1299_v34 = vmul.f32 1.442695, %v1237_v50  ;;  %v2754_v62 = vmul.f32 %v7370_v7, %v2753_v54  ;;  %v7499_v28 = vpop.xlane.xlu1 %815 }
 0x37d   :  { %v4205_v23 = vpop.eup %4204  ;;  %vm3346_vm15 = vcmp.lt.f32.partialorder %v3345_v61, 0.0004427343  ;;  %v2164_v8 = vadd.f32 1.0, %v7434_v18  ;;  %v1818_v63 = vand.u32 2147483647, %v7441_v1  ;;  %v3365_v21 = vsel %vm7411_vm12, %v3362_v24, %v3359_v12 }
 0x37e   :  { %v1554_v33 = vsel %vm7426_vm13, %v1551_v60, %v1548_v29  ;;  %v3347_v37 = vsel %vm3346_vm15, %v3344_v47, %v3341_v45  ;;  %v2958_v16 = vmul.f32 0.0, %v7389_v15  ;;  %v2145_v38 = vsel %vm7437_vm14, %v2142_v6, %v2139_v48 }
 0x37f   :  { %v7458_v14 = vpop.eup %4206  ;;  %v3435_v7 = vadd.f32 %v3347_v37, %v7378_v22  ;;  %v1850_v42 = vsub.f32 0.0, %v1818_v63  ;;  %v2408_v9 = vand.u32 2147483647, %v7448_v2  ;;  %v2751_v4 = vmul.f32 0.6931472, %v4205_v23 }
 0x380   :  { %v1531_v53 = vmul.f32 -0.5, %v7417_v30  ;;  %v2731_v11 = vadd.f32 1.0, %v7458_v14  ;;  %4212 = vpow2.f32 %v1299_v34  ;;  %v2233_v56 = vadd.f32 %v2145_v38, %v7348_v3  ;;  %v7519_v34 = vpop.xlane.xlu0 %915 }
 0x381   :  { %v3490_v46 = vsel %vm1623_vm2, %v3435_v7, 0.0  ;;  %4214 = vlog2.f32 %v2164_v8  ;;  %v1907_v15 = vmul.f32 1.442695, %v1850_v42  ;;  %v2440_v55 = vsub.f32 0.0, %v2408_v9 }
 0x382   :  { %v7467_v43 = vpop.eup %4208  ;;  %v7471_v22 = vadd.f32 %v3490_v46, %v7395_v57  ;;  %4216 = vlog2.f32 %v2731_v11  ;;  %v1141_v24 = vmax.f32 %v7401_v32, 0.0  ;;  %v3437_v52 = vadd.f32 %v3365_v21, %v7331_v27 }
 0x383   :  { %v4211_v39 = vpop.eup %4210  ;;  %v1618_v36 = vadd.f32 %v1554_v33, %v7339_v49  ;;  %vm7478_vm0 = vcmp.lt.f32.partialorder %v2755_v20, 0.0004427343  ;;  %4218 = vpow2.f32 %v1907_v15  ;;  %v7483_v3 = vadd.f32 %v2873_v44, %v7320_v35 }
 0x384   :  { %v2757_v57 = vsel %vm7478_vm0, %v2754_v62, %v2751_v4  ;;  %v1532_v50 = vadd.f32 1.0, %v1531_v53  ;;  %v3366_v60 = vadd.f32 1.0, %v7467_v43  ;;  %v1534_v54 = vand.u32 2147483647, %v7417_v30 }
 0x385   :  { %v7490_v27 = vsub.f32 %v2339_v58, %v7368_v40  ;;  %v2502_v49 = vmul.f32 1.442695, %v2440_v55  ;;  %v3020_v61 = vand.u32 2147483647, %v7474_v31  ;;  %v2288_v12 = vsel %vm1623_vm2, %v2233_v56, 0.0 }
 0x386   :  { %v1530_v29 = vmul.f32 0.6931472, %v4211_v39  ;;  %v7494_v6 = vsub.f32 %v2926_v17, %v2958_v16  ;;  %v7497_v35 = vsub.f32 %v1141_v24, %v7401_v32  ;;  %v7502_v26 = vsel %vm1623_vm2, %v3437_v52, 0.0 }
 0x387   :  { %v7505_v48 = vsel %vm1623_vm2, %v1618_v36, 0.0  ;;  %v2821_v40 = vadd.f32 %v2757_v57, %v7366_v5  ;;  %v2734_v20 = vmul.f32 -0.5, %v7458_v14  ;;  %v1533_v58 = vmul.f32 %v7417_v30, %v1532_v50 }
 0x388   :  { %v2167_v17 = vmul.f32 -0.5, %v7434_v18  ;;  %4220 = vlog2.f32 %v3366_v60  ;;  %v3052_v44 = vsub.f32 0.0, %v3020_v61  ;;  %v7512_v32 = vadd.f32 %v2288_v12, %v7363_v51  ;;  %v7558_v12 = vpop.xlane.xlu1 %1007 }
 0x389   :  { %vm7514_vm1 = vcmp.lt.f32.partialorder %v1534_v54, 0.0004427343  ;;  %4222 = vpow2.f32 %v2502_v49  ;;  %v1203_v47 = vand.u32 2147483647, %v7499_v28  ;;  %v2170_v23 = vand.u32 2147483647, %v7434_v18 }
 0x38a   :  { %v7521_v5 = vpop.eup %4212  ;;  %v1536_v30 = vsel %vm7514_vm1, %v1533_v58, %v1530_v29  ;;  %v1722_v62 = vmax.f32 %v7441_v1, 0.0  ;;  %v3109_v51 = vmul.f32 1.442695, %v3052_v44  ;;  %v7528_v63 = vsel %vm1623_vm2, %v2821_v40, 0.0 }
 0x38b   :  { %v4215_v8 = vpop.eup %4214  ;;  %v2735_v21 = vadd.f32 1.0, %v2734_v20  ;;  %v1754_v33 = vmul.f32 0.0, %v7441_v1  ;;  %v1235_v37 = vsub.f32 0.0, %v1203_v47  ;;  %v2168_v38 = vadd.f32 1.0, %v2167_v17  ;;  %v7571_v17 = vpop.xlane.xlu0 %911 }
 0x38c   :  { %v4217_v16 = vpop.eup %4216  ;;  %v3369_v7 = vmul.f32 -0.5, %v7467_v43  ;;  %4224 = vpow2.f32 %v3109_v51  ;;  %v1823_v42 = vand.u32 2147483647, %v7519_v34  ;;  %v1616_v4 = vadd.f32 %v1536_v30, %v7407_v25 }
 0x38d   :  { %v7533_v9 = vpop.eup %4218  ;;  %v2737_v53 = vand.u32 2147483647, %v7458_v14  ;;  %v1573_v11 = vadd.f32 1.0, %v7521_v5  ;;  %v1295_v46 = vmul.f32 1.442695, %v1235_v37  ;;  %v2344_v55 = vmax.f32 %v7448_v2, 0.0 }
 0x38e   :  { %v2733_v15 = vmul.f32 0.6931472, %v4217_v16  ;;  %v2146_v1 = vadd.f32 1.0, %v7533_v9  ;;  %v2924_v56 = vmax.f32 %v7474_v31, 0.0  ;;  %v2736_v24 = vmul.f32 %v7458_v14, %v2735_v21 }
 0x38f   :  { %v3372_v39 = vand.u32 2147483647, %v7467_v43  ;;  %4226 = vpow2.f32 %v1295_v46  ;;  %v1855_v52 = vsub.f32 0.0, %v1823_v42  ;;  %v2166_v36 = vmul.f32 0.6931472, %v4215_v8 }
 0x390   :  { %v3370_v25 = vadd.f32 1.0, %v3369_v7  ;;  %4228 = vlog2.f32 %v2146_v1  ;;  %v2956_v10 = vmul.f32 0.0, %v7474_v31  ;;  %v1673_v57 = vsel %vm1623_vm2, %v1616_v4, 0.0 }
 0x391   :  { %vm7545_vm3 = vcmp.lt.f32.partialorder %v2170_v23, 0.0004427343  ;;  %vm7549_vm4 = vcmp.lt.f32.partialorder %v2737_v53, 0.0004427343  ;;  %4230 = vlog2.f32 %v1573_v11  ;;  %v2169_v54 = vmul.f32 %v7434_v18, %v2168_v38 }
 0x392   :  { %v4221_v14 = vpop.eup %4220  ;;  %v2739_v49 = vsel %vm7549_vm4, %v2736_v24, %v2733_v15  ;;  %v7556_v61 = vsub.f32 %v1722_v62, %v1754_v33  ;;  %v1917_v31 = vmul.f32 1.442695, %v1855_v52  ;;  %vm7562_vm5 = vcmp.lt.f32.partialorder %v3372_v39, 0.0004427343 }
 0x393   :  { %v7560_v29 = vpop.eup %4222  ;;  %v1576_v20 = vmul.f32 -0.5, %v7521_v5  ;;  %v7568_v58 = vsub.f32 %v2344_v55, %v7448_v2  ;;  %v1139_v18 = vmax.f32 %v7499_v28, 0.0  ;;  %v1674_v44 = vadd.f32 %v1673_v57, %v7311_v13 }
 0x394   :  { %v2172_v45 = vsel %vm7545_vm3, %v2169_v54, %v2166_v36  ;;  %v3371_v47 = vmul.f32 %v7467_v43, %v3370_v25  ;;  %v7577_v30 = vsub.f32 %v2924_v56, %v2956_v10  ;;  %v2819_v23 = vadd.f32 %v2739_v49, %v7490_v27  ;;  %v7617_v49 = vpop.xlane.xlu0 %1103 }
 0x395   :  { %v1579_v62 = vand.u32 2147483647, %v7521_v5  ;;  %v2149_v2 = vmul.f32 -0.5, %v7533_v9  ;;  %v2406_v51 = vand.u32 2147483647, %v7558_v12  ;;  %v2776_v13 = vadd.f32 1.0, %v7560_v29 }
 0x396   :  { %v7583_v8 = vpop.eup %4224  ;;  %v3368_v21 = vmul.f32 0.6931472, %v4221_v14  ;;  %4232 = vpow2.f32 %v1917_v31  ;;  %v1821_v33 = vand.u32 2147483647, %v7571_v17  ;;  %v2236_v43 = vadd.f32 %v2172_v45, %v7420_v41 }
 0x397   :  { %v1577_v37 = vadd.f32 1.0, %v1576_v20  ;;  %v3348_v16 = vadd.f32 1.0, %v7583_v8  ;;  %v7590_v27 = vsub.f32 %v1139_v18, %v7499_v28  ;;  %v1676_v38 = vadd.f32 %v7328_v0, %v1674_v44  ;;  %v7602_v28 = vpop.xlane.xlu1 %821 }
 0x398   :  { %v1727_v7 = vmax.f32 %v7519_v34, 0.0  ;;  %v2438_v42 = vsub.f32 0.0, %v2406_v51  ;;  %v1853_v4 = vsub.f32 0.0, %v1821_v33  ;;  %vm7596_vm6 = vcmp.lt.f32.partialorder %v1579_v62, 0.0004427343 }
 0x399   :  { %v7594_v53 = vpop.eup %4226  ;;  %v2150_v46 = vadd.f32 1.0, %v2149_v2  ;;  %v2779_v41 = vmul.f32 -0.5, %v7560_v29  ;;  %4234 = vlog2.f32 %v3348_v16  ;;  %v1759_v15 = vmul.f32 0.0, %v7519_v34 }
 0x39a   :  { %v4229_v1 = vpop.eup %4228  ;;  %v2875_v0 = vsel %vm1623_vm2, %v2819_v23, 0.0  ;;  %v3374_v55 = vsel %vm7562_vm5, %v3371_v47, %v3368_v21  ;;  %4236 = vlog2.f32 %v2776_v13  ;;  %v2498_v56 = vmul.f32 1.442695, %v2438_v42 }
 0x39b   :  { %v4231_v24 = vpop.eup %4230  ;;  %v7608_v39 = vsel %vm1623_vm2, %v2236_v43, 0.0  ;;  %v2152_v52 = vand.u32 2147483647, %v7533_v9  ;;  %v1555_v36 = vadd.f32 1.0, %v7594_v53  ;;  %v2342_v34 = vmax.f32 %v7558_v12, 0.0 }
 0x39c   :  { %v1578_v25 = vmul.f32 %v7521_v5, %v1577_v37  ;;  %v2148_v10 = vmul.f32 0.6931472, %v4229_v1  ;;  %v1913_v57 = vmul.f32 1.442695, %v1853_v4  ;;  %v1206_v50 = vand.u32 2147483647, %v7602_v28 }
 0x39d   :  { %v2876_v60 = vadd.f32 %v2875_v0, %v7483_v3  ;;  %v3438_v14 = vadd.f32 %v3374_v55, %v7494_v6  ;;  %v2780_v54 = vadd.f32 1.0, %v2779_v41  ;;  %4238 = vpow2.f32 %v2498_v56 }
 0x39e   :  { %v1575_v31 = vmul.f32 0.6931472, %v4231_v24  ;;  %v2151_v40 = vmul.f32 %v7533_v9, %v2150_v46  ;;  %v2782_v20 = vand.u32 2147483647, %v7560_v29  ;;  %v7622_v18 = vadd.f32 %v7505_v48, %v1676_v38  ;;  %v7636_v48 = vpop.xlane.xlu1 %817 }
 0x39f   :  { %vm7624_vm7 = vcmp.lt.f32.partialorder %v2152_v52, 0.0004427343  ;;  %v3351_v3 = vmul.f32 -0.5, %v7583_v8  ;;  %4240 = vlog2.f32 %v1555_v36  ;;  %v1238_v6 = vsub.f32 0.0, %v1206_v50 }
 0x3a0   :  { %v7629_v44 = vpop.eup %4232  ;;  %v2154_v45 = vsel %vm7624_vm7, %v2151_v40, %v2148_v10  ;;  %v7633_v47 = vsub.f32 %v1727_v7, %v1759_v15  ;;  %4242 = vpow2.f32 %v1913_v57  ;;  %v3023_v9 = vand.u32 2147483647, %v7617_v49 }
 0x3a1   :  { %v2878_v23 = vadd.f32 %v7355_v59, %v2876_v60  ;;  %v7640_v62 = vsel %vm1623_vm2, %v3438_v14, 0.0  ;;  %v2781_v2 = vmul.f32 %v7560_v29, %v2780_v54  ;;  %v7644_v51 = vsub.f32 %v2342_v34, %v7558_v12  ;;  %v918_v34 = vpop.xlane.xlu0 %917 }
 0x3a2   :  { %v1581_v21 = vsel %vm7596_vm6, %v1578_v25, %v1575_v31  ;;  %vm7648_vm8 = vcmp.lt.f32.partialorder %v2782_v20, 0.0004427343  ;;  %v1725_v33 = vmax.f32 %v7571_v17, 0.0  ;;  %v1301_v43 = vmul.f32 1.442695, %v1238_v6  ;;  %v7672_v25 = vpop.xlane.xlu1 %1009 }
 0x3a3   :  { %v3055_v37 = vsub.f32 0.0, %v3023_v9  ;;  %v4235_v59 = vpop.eup %4234  ;;  %v2234_v16 = vadd.f32 %v2154_v45, %v7556_v61  ;;  %v3352_v38 = vadd.f32 1.0, %v3351_v3  ;;  %v2191_v29 = vadd.f32 1.0, %v7629_v44 }
 0x3a4   :  { %v1204_v12 = vand.u32 2147483647, %v7636_v48  ;;  %v4237_v7 = vpop.eup %4236  ;;  %v3354_v42 = vand.u32 2147483647, %v7583_v8  ;;  %v1757_v4 = vmul.f32 0.0, %v7571_v17  ;;  %4244 = vpow2.f32 %v1301_v43 }
 0x3a5   :  { %v3115_v11 = vmul.f32 1.442695, %v3055_v37  ;;  %v3350_v46 = vmul.f32 0.6931472, %v4235_v59  ;;  %v1558_v41 = vmul.f32 -0.5, %v7594_v53  ;;  %v1142_v15 = vmax.f32 %v7602_v28, 0.0 }
 0x3a6   :  { %v1236_v1 = vsub.f32 0.0, %v1204_v12  ;;  %v7661_v61 = vadd.f32 %v1581_v21, %v7497_v35  ;;  %v1561_v0 = vand.u32 2147483647, %v7594_v53  ;;  %v2194_v55 = vmul.f32 -0.5, %v7629_v44 }
 0x3a7   :  { %v7666_v56 = vadd.f32 %v7528_v63, %v2878_v23  ;;  %v7668_v24 = vpop.eup %4238  ;;  %v2290_v17 = vsel %vm1623_vm2, %v2234_v16, 0.0  ;;  %v2778_v52 = vmul.f32 0.6931472, %v4237_v7  ;;  %v3353_v36 = vmul.f32 %v7583_v8, %v3352_v38 }
 0x3a8   :  { %4246 = vlog2.f32 %v2191_v29  ;;  %vm7674_vm9 = vcmp.lt.f32.partialorder %v3354_v42, 0.0004427343  ;;  %v2758_v10 = vadd.f32 1.0, %v7668_v24  ;;  %v7679_v57 = vsub.f32 %v1725_v33, %v1757_v4 }
 0x3a9   :  { %4248 = vpow2.f32 %v3115_v11  ;;  %v4241_v63 = vpop.eup %4240  ;;  %v3356_v50 = vsel %vm7674_vm9, %v3353_v36, %v3350_v46  ;;  %v1559_v60 = vadd.f32 1.0, %v1558_v41  ;;  %v7684_v8 = vsub.f32 %v1142_v15, %v7602_v28  ;;  %v7732_v15 = vpop.xlane.xlu1 %1013 }
 0x3aa   :  { %v1297_v14 = vmul.f32 1.442695, %v1236_v1  ;;  %v7686_v54 = vpop.eup %4242  ;;  %v2291_v31 = vadd.f32 %v2290_v17, %v7512_v32  ;;  %vm7689_vm10 = vcmp.lt.f32.partialorder %v1561_v0, 0.0004427343  ;;  %v2195_v20 = vadd.f32 1.0, %v2194_v55 }
 0x3ab   :  { %v2407_v5 = vand.u32 2147483647, %v7672_v25  ;;  %v2784_v3 = vsel %vm7648_vm8, %v2781_v2, %v2778_v52  ;;  %v2197_v6 = vand.u32 2147483647, %v7629_v44  ;;  %4250 = vlog2.f32 %v2758_v10  ;;  %v7705_v2 = vpop.xlane.xlu0 %913 }
 0x3ac   :  { %v1824_v28 = vand.u32 2147483647, %v918_v34  ;;  %v3436_v45 = vadd.f32 %v3356_v50, %v7577_v30  ;;  %v1557_v9 = vmul.f32 0.6931472, %v4241_v63  ;;  %v2927_v23 = vmax.f32 %v7617_v49, 0.0 }
 0x3ad   :  { %v7700_v32 = vmul.f32 0.0, %v7617_v49  ;;  %v1560_v21 = vmul.f32 %v7594_v53, %v1559_v60  ;;  %v2173_v33 = vadd.f32 1.0, %v7686_v54  ;;  %v1140_v43 = vmax.f32 %v7636_v48, 0.0  ;;  %v7772_v53 = vpop.xlane.xlu1 %1109 }
 0x3ae   :  { %4252 = vpow2.f32 %v1297_v14  ;;  %v7707_v13 = vpop.eup %4244  ;;  %v7710_v37 = vadd.f32 %v7423_v19, %v2291_v31  ;;  %v7713_v30 = vadd.f32 %v2784_v3, %v7568_v58  ;;  %v7716_v59 = vmul.f32 %v7629_v44, %v2195_v20 }
 0x3af   :  { %v2439_v16 = vsub.f32 0.0, %v2407_v5  ;;  %vm7718_vm11 = vcmp.lt.f32.partialorder %v2197_v6, 0.0004427343  ;;  %v2761_v38 = vmul.f32 -0.5, %v7668_v24  ;;  %v1728_v29 = vmax.f32 %v918_v34, 0.0  ;;  %v7741_v10 = vpop.xlane.xlu0 %1105 }
 0x3b0   :  { %v1760_v12 = vmul.f32 0.0, %v918_v34  ;;  %v1856_v7 = vsub.f32 0.0, %v1824_v28  ;;  %v3492_v42 = vsel %vm1623_vm2, %v3436_v45, 0.0  ;;  %v1563_v19 = vsel %vm7689_vm10, %v1560_v21, %v1557_v9 }
 0x3b1   :  { %v2500_v58 = vmul.f32 1.442695, %v2439_v16  ;;  %v1822_v4 = vand.u32 2147483647, %v7705_v2  ;;  %v2764_v11 = vand.u32 2147483647, %v7668_v24  ;;  %4254 = vlog2.f32 %v2173_v33 }
 0x3b2   :  { %v4247_v44 = vpop.eup %4246  ;;  %v1582_v46 = vadd.f32 1.0, %v7707_v13  ;;  %v7730_v41 = vsub.f32 %v1140_v43, %v7636_v48  ;;  %v2176_v0 = vmul.f32 -0.5, %v7686_v54  ;;  %v2343_v55 = vmax.f32 %v7672_v25, 0.0 }
 0x3b3   :  { %v7734_v1 = vpop.eup %4248  ;;  %4256 = vpow2.f32 %v2500_v58  ;;  %v1726_v17 = vmax.f32 %v7705_v2, 0.0  ;;  %v3493_v52 = vadd.f32 %v3492_v42, %v7471_v22  ;;  %v1619_v36 = vadd.f32 %v1563_v19, %v7590_v27 }
 0x3b4   :  { %v2762_v34 = vadd.f32 1.0, %v2761_v38  ;;  %v1854_v35 = vsub.f32 0.0, %v1822_v4  ;;  %v2193_v48 = vmul.f32 0.6931472, %v4247_v44  ;;  %v7743_v63 = vsub.f32 %v1728_v29, %v1760_v12 }
 0x3b5   :  { %v1919_v50 = vmul.f32 1.442695, %v1856_v7  ;;  %v2409_v60 = vand.u32 2147483647, %v7732_v15  ;;  %v4251_v14 = vpop.eup %4250  ;;  %vm7746_vm12 = vcmp.lt.f32.partialorder %v2764_v11, 0.0004427343  ;;  %4258 = vlog2.f32 %v1582_v46 }
 0x3b6   :  { %v3375_v22 = vadd.f32 1.0, %v7734_v1  ;;  %v1915_v40 = vmul.f32 1.442695, %v1854_v35  ;;  %v2177_v27 = vadd.f32 1.0, %v2176_v0  ;;  %v2179_v20 = vand.u32 2147483647, %v7686_v54 }
 0x3b7   :  { %v2441_v5 = vsub.f32 0.0, %v2409_v60  ;;  %v3024_v3 = vand.u32 2147483647, %v7741_v10  ;;  %v7756_v28 = vadd.f32 %v7502_v26, %v3493_v52  ;;  %v1679_v45 = vsel %vm1623_vm2, %v1619_v36, 0.0 }
 0x3b8   :  { %v7753_v6 = vpop.eup %4252  ;;  %v2763_v9 = vmul.f32 %v7668_v24, %v2762_v34  ;;  %4260 = vpow2.f32 %v1915_v40  ;;  %v2199_v21 = vsel %vm7718_vm11, %v7716_v59, %v2193_v48  ;;  %v2760_v33 = vmul.f32 0.6931472, %v4251_v14 }
 0x3b9   :  { %v1564_v43 = vadd.f32 1.0, %v7753_v6  ;;  %4262 = vpow2.f32 %v1919_v50  ;;  %v1585_v16 = vmul.f32 -0.5, %v7707_v13  ;;  %v2504_v38 = vmul.f32 1.442695, %v2441_v5 }
 0x3ba   :  { %4264 = vlog2.f32 %v3375_v22  ;;  %v3056_v29 = vsub.f32 0.0, %v3024_v3  ;;  %v7766_v26 = vadd.f32 %v1679_v45, %v7622_v18  ;;  %v7769_v12 = vmul.f32 %v7686_v54, %v2177_v27 }
 0x3bb   :  { %v1588_v24 = vand.u32 2147483647, %v7707_v13  ;;  %4266 = vlog2.f32 %v1564_v43  ;;  %v4255_v59 = vpop.eup %4254  ;;  %vm7774_vm13 = vcmp.lt.f32.partialorder %v2179_v20, 0.0004427343  ;;  %v3378_v42 = vmul.f32 -0.5, %v7734_v1 }
 0x3bc   :  { %v7780_v19 = vsub.f32 %v2343_v55, %v7672_v25  ;;  %4268 = vpow2.f32 %v2504_v38  ;;  %v7785_v54 = vadd.f32 %v2199_v21, %v7633_v47  ;;  %v2766_v58 = vsel %vm7746_vm12, %v2763_v9, %v2760_v33  ;;  %v7793_v55 = vpop.xlane.xlu0 %1107 }
 0x3bd   :  { %v7782_v18 = vpop.eup %4256  ;;  %v1567_v4 = vmul.f32 -0.5, %v7753_v6  ;;  %v3117_v44 = vmul.f32 1.442695, %v3056_v29  ;;  %v1586_v11 = vadd.f32 1.0, %v1585_v16  ;;  %v1758_v0 = vmul.f32 0.0, %v7705_v2 }
 0x3be   :  { %v2767_v46 = vadd.f32 1.0, %v7782_v18  ;;  %v3026_v25 = vand.u32 2147483647, %v7772_v53  ;;  %vm7795_vm14 = vcmp.lt.f32.partialorder %v1588_v24, 0.0004427343  ;;  %v2345_v36 = vmax.f32 %v7732_v15, 0.0 }
 0x3bf   :  { %v3381_v47 = vand.u32 2147483647, %v7734_v1  ;;  %4270 = vpow2.f32 %v3117_v44  ;;  %v4259_v34 = vpop.eup %4258  ;;  %v2822_v35 = vadd.f32 %v2766_v58, %v7644_v51  ;;  %v2175_v48 = vmul.f32 0.6931472, %v4255_v59 }
 0x3c0   :  { %v3379_v50 = vadd.f32 1.0, %v3378_v42  ;;  %4272 = vlog2.f32 %v2767_v46  ;;  %v1568_v60 = vadd.f32 1.0, %v1567_v4  ;;  %v2770_v14 = vmul.f32 -0.5, %v7782_v18 }
 0x3c1   :  { %v3058_v31 = vsub.f32 0.0, %v3026_v25  ;;  %v3025_v22 = vand.u32 2147483647, %v7793_v55  ;;  %v1587_v27 = vmul.f32 %v7707_v13, %v1586_v11  ;;  %v1570_v20 = vand.u32 2147483647, %v7753_v6 }
 0x3c2   :  { %v7804_v40 = vpop.eup %4260  ;;  %v7810_v5 = vsub.f32 %v1726_v17, %v1758_v0  ;;  %v2928_v51 = vmax.f32 %v7741_v10, 0.0  ;;  %v1584_v45 = vmul.f32 0.6931472, %v4259_v34  ;;  %v7817_v21 = vsub.f32 %v2345_v36, %v7732_v15 }
 0x3c3   :  { %v7813_v3 = vpop.eup %4262  ;;  %v2182_v9 = vadd.f32 1.0, %v7804_v40  ;;  %v3121_v33 = vmul.f32 1.442695, %v3058_v31  ;;  %v2181_v13 = vsel %vm7774_vm13, %v7769_v12, %v2175_v48  ;;  %v7823_v2 = vmul.f32 %v7734_v1, %v3379_v50 }
 0x3c4   :  { %v4265_v43 = vpop.eup %4264  ;;  %v7826_v17 = vmul.f32 0.0, %v7741_v10  ;;  %v3057_v16 = vsub.f32 0.0, %v3025_v22  ;;  %v2881_v29 = vsel %vm1623_vm2, %v2822_v35, 0.0  ;;  %v1569_v24 = vmul.f32 %v7753_v6, %v1568_v60 }
 0x3c5   :  { %v4267_v38 = vpop.eup %4266  ;;  %v2771_v15 = vadd.f32 1.0, %v2770_v14  ;;  %4274 = vlog2.f32 %v2182_v9  ;;  %vm7830_vm15 = vcmp.lt.f32.partialorder %v3381_v47, 0.0004427343  ;;  %v2200_v7 = vadd.f32 1.0, %v7813_v3 }
 0x3c6   :  { %v4269_v59 = vpop.eup %4268  ;;  %v1566_v12 = vmul.f32 0.6931472, %v4267_v38  ;;  %4276 = vpow2.f32 %v3121_v33  ;;  %v3119_v1 = vmul.f32 1.442695, %v3057_v16  ;;  %v1590_v58 = vsel %vm7795_vm14, %v1587_v27, %v1584_v45 }
 0x3c7   :  { %vm1571_vm0 = vcmp.lt.f32.partialorder %v1570_v20, 0.0004427343  ;;  %v2185_v4 = vmul.f32 -0.5, %v7804_v40  ;;  %v2785_v44 = vadd.f32 1.0, %v4269_v59  ;;  %v2237_v6 = vadd.f32 %v2181_v13, %v7679_v57 }
 0x3c8   :  { %v1572_v11 = vsel %vm1571_vm0, %v1569_v24, %v1566_v12  ;;  %v2773_v46 = vand.u32 2147483647, %v7782_v18  ;;  %4278 = vpow2.f32 %v3119_v1  ;;  %v2882_v25 = vadd.f32 %v2881_v29, %v7666_v56 }
 0x3c9   :  { %v7840_v0 = vpop.eup %4270  ;;  %v7843_v47 = vmul.f32 0.6931472, %v4265_v43  ;;  %v1620_v36 = vadd.f32 %v1572_v11, %v7730_v41  ;;  %4280 = vlog2.f32 %v2785_v44  ;;  %v1622_v34 = vadd.f32 %v1590_v58, %v7684_v8 }
 0x3ca   :  { %v4273_v52 = vpop.eup %4272  ;;  %v2772_v35 = vmul.f32 %v7782_v18, %v2771_v15  ;;  %v3384_v57 = vadd.f32 1.0, %v7840_v0  ;;  %4282 = vlog2.f32 %v2200_v7  ;;  %v2186_v60 = vadd.f32 1.0, %v2185_v4 }
 0x3cb   :  { %v1681_v48 = vsel %vm1623_vm2, %v1620_v36, 0.0  ;;  %v2769_v50 = vmul.f32 0.6931472, %v4273_v52  ;;  %v2788_v14 = vmul.f32 -0.5, %v4269_v59  ;;  %v2296_v56 = vsel %vm1623_vm2, %v2237_v6, 0.0 }
 0x3cc   :  { %vm2774_vm1 = vcmp.lt.f32.partialorder %v2773_v46, 0.0004427343  ;;  %4284 = vlog2.f32 %v3384_v57  ;;  %v1682_v41 = vadd.f32 %v1681_v48, %v7766_v26  ;;  %v2188_v22 = vand.u32 2147483647, %v7804_v40 }
 0x3cd   :  { %v2775_v31 = vsel %vm2774_vm1, %v2772_v35, %v2769_v50  ;;  %v1683_v8 = vsel %vm1623_vm2, %v7661_v61, 0.0  ;;  %v2203_v18 = vmul.f32 -0.5, %v7813_v3  ;;  %v2791_v20 = vand.u32 2147483647, %v4269_v59 }
 0x3ce   :  { %v2823_v27 = vadd.f32 %v2775_v31, %v7780_v19  ;;  %v1684_v45 = vadd.f32 %v1683_v8, %v1682_v41  ;;  %v7859_v9 = vadd.f32 %v7640_v62, %v7756_v28  ;;  %v3383_v26 = vsel %vm7830_vm15, %v7823_v2, %v7843_v47 }
 0x3cf   :  { %v4275_v33 = vpop.eup %4274  ;;  %v2187_v43 = vmul.f32 %v7804_v40, %v2186_v60  ;;  %v2789_v13 = vadd.f32 1.0, %v2788_v14  ;;  %v1685_v61 = vsel %vm1623_vm2, %v1622_v34, 0.0  ;;  %v3387_v29 = vmul.f32 -0.5, %v7840_v0 }
 0x3d0   :  { %v7867_v16 = vpop.eup %4276  ;;  %v2883_v19 = vsel %vm1623_vm2, %v2823_v27, 0.0  ;;  %v2184_v38 = vmul.f32 0.6931472, %v4275_v33  ;;  %v1686_v62 = vadd.f32 %v1685_v61, %v1684_v45  ;;  %vm2189_vm3 = vcmp.lt.f32.partialorder %v2188_v22, 0.0004427343 }
 0x3d1   :  { %v2204_v28 = vadd.f32 1.0, %v2203_v18  ;;  %v2206_v24 = vand.u32 2147483647, %v7813_v3  ;;  %v3402_v15 = vadd.f32 1.0, %v7867_v16  ;;  %vm7875_vm4 = vcmp.lt.f32.partialorder %v2791_v20, 0.0004427343 }
 0x3d2   :  { %v7873_v2 = vpop.eup %4278  ;;  %v2190_v40 = vsel %vm2189_vm3, %v2187_v43, %v2184_v38  ;;  %1687 = vadd.xlane.f32.xlu0 %v1686_v62  ;;  %v2884_v12 = vadd.f32 %v2883_v19, %v2882_v25  ;;  %v2885_v1 = vsel %vm1623_vm2, %v7713_v30, 0.0  ;;  %v2790_v4 = vmul.f32 %v4269_v59, %v2789_v13 }
 0x3d3   :  { %v4281_v7 = vpop.eup %4280  ;;  %v2238_v58 = vadd.f32 %v2190_v40, %v7810_v5  ;;  %v3390_v44 = vand.u32 2147483647, %v7840_v0  ;;  %v3393_v6 = vadd.f32 1.0, %v7873_v2  ;;  %v3388_v47 = vadd.f32 1.0, %v3387_v29 }
 0x3d4   :  { %v4283_v11 = vpop.eup %4282  ;;  %v2787_v46 = vmul.f32 0.6931472, %v4281_v7  ;;  %v2295_v36 = vadd.f32 %v7608_v39, %v7710_v37  ;;  %4286 = vlog2.f32 %v3402_v15  ;;  %v2205_v52 = vmul.f32 %v7813_v3, %v2204_v28 }
 0x3d5   :  { %4288 = vlog2.f32 %v3393_v6  ;;  %v2202_v25 = vmul.f32 0.6931472, %v4283_v11  ;;  %vm2207_vm5 = vcmp.lt.f32.partialorder %v2206_v24, 0.0004427343  ;;  %v2886_v59 = vadd.f32 %v2885_v1, %v2884_v12 }
 0x3d6   :  { %v4285_v30 = vpop.eup %4284  ;;  %v2793_v5 = vsel %vm7875_vm4, %v2790_v4, %v2787_v46  ;;  %v2297_v34 = vadd.f32 %v2296_v56, %v2295_v36  ;;  %v2298_v35 = vsel %vm1623_vm2, %v2238_v58, 0.0  ;;  %v3405_v39 = vmul.f32 -0.5, %v7867_v16 }
 0x3d7   :  { %v2825_v57 = vadd.f32 %v2793_v5, %v7817_v21  ;;  %v3386_v48 = vmul.f32 0.6931472, %v4285_v30  ;;  %v2208_v50 = vsel %vm2207_vm5, %v2205_v52, %v2202_v25  ;;  %v3389_v37 = vmul.f32 %v7840_v0, %v3388_v47 }
 0x3d8   :  { %v3396_v60 = vmul.f32 -0.5, %v7873_v2  ;;  %v2240_v3 = vadd.f32 %v2208_v50, %v7743_v63  ;;  %v2299_v14 = vadd.f32 %v2298_v35, %v2297_v34  ;;  %v2991_v41 = vsub.f32 %v2927_v23, %v7700_v32 }
 0x3d9   :  { %vm7898_vm6 = vcmp.lt.f32.partialorder %v3390_v44, 0.0004427343  ;;  %v2887_v21 = vsel %vm1623_vm2, %v2825_v57, 0.0  ;;  %v2300_v31 = vsel %vm1623_vm2, %v7785_v54, 0.0  ;;  %v2992_v0 = vsub.f32 %v2928_v51, %v7826_v17 }
 0x3da   :  { %v3392_v63 = vsel %vm7898_vm6, %v3389_v37, %v3386_v48  ;;  %v2888_v22 = vadd.f32 %v2887_v21, %v2886_v59  ;;  %v2301_v8 = vadd.f32 %v2300_v31, %v2299_v14  ;;  %v3439_v49 = vadd.f32 %v3383_v26, %v2991_v41 }
 0x3db   :  { %v2930_v23 = vmax.f32 %v7772_v53, 0.0  ;;  %v2302_v32 = vsel %vm1623_vm2, %v2240_v3, 0.0  ;;  %v3406_v18 = vadd.f32 1.0, %v3405_v39  ;;  %v2962_v27 = vmul.f32 0.0, %v7772_v53 }
 0x3dc   :  { %v3397_v20 = vadd.f32 1.0, %v3396_v60  ;;  %2889 = vadd.xlane.f32.xlu0 %v2888_v22  ;;  %v2303_v54 = vadd.f32 %v2302_v32, %v2301_v8  ;;  %v3408_v45 = vand.u32 2147483647, %v7867_v16  ;;  %v3440_v10 = vadd.f32 %v3392_v63, %v2992_v0 }
 0x3dd   :  { %v2929_v51 = vmax.f32 %v7793_v55, 0.0  ;;  %v2961_v17 = vmul.f32 0.0, %v7793_v55  ;;  %v3399_v33 = vand.u32 2147483647, %v7873_v2  ;;  %v3498_v13 = vsel %vm1623_vm2, %v3439_v49, 0.0 }
 0x3de   :  { %v4287_v26 = vpop.eup %4286  ;;  %2304 = vadd.xlane.f32.xlu1 %v2303_v54  ;;  %v3407_v53 = vmul.f32 %v7867_v16, %v3406_v18  ;;  %v2994_v19 = vsub.f32 %v2930_v23, %v2962_v27  ;;  %v3398_v29 = vmul.f32 %v7873_v2, %v3397_v20  ;;  %vm3409_vm7 = vcmp.lt.f32.partialorder %v3408_v45, 0.0004427343 }
 0x3df   :  { %v4289_v43 = vpop.eup %4288  ;;  %v3404_v61 = vmul.f32 0.6931472, %v4287_v26  ;;  %v2993_v62 = vsub.f32 %v2929_v51, %v2961_v17  ;;  %vm3400_vm8 = vcmp.lt.f32.partialorder %v3399_v33, 0.0004427343  ;;  %v3500_v55 = vsel %vm1623_vm2, %v3440_v10, 0.0 }
 0x3e0   :  { %v3395_v38 = vmul.f32 0.6931472, %v4289_v43  ;;  %v3499_v15 = vadd.f32 %v3498_v13, %v7859_v9  ;;  %v3516_v0 = vlaneseq }
 0x3e1   :  { %v3410_v28 = vsel %vm3409_vm7, %v3407_v53, %v3404_v61 }
 0x3e2   :  { %v3401_v24 = vsel %vm3400_vm8, %v3398_v29, %v3395_v38  ;;  %v3442_v42 = vadd.f32 %v3410_v28, %v2994_v19  ;;  %v3501_v12 = vadd.f32 %v3500_v55, %v3499_v15  ;;  %v3517_v63 = vshrl.u32 %v3516_v0, 7 }
 0x3e3   :  { %v3441_v40 = vadd.f32 %v3401_v24, %v2993_v62  ;;  %v3519_v22 = vand.u32 127, %v3516_v0 }
 0x3e4   :  { %v3504_v16 = vsel %vm1623_vm2, %v3442_v42, 0.0  ;;  %vm3520_vm9 = vcmp.eq.s32.totalorder %v3517_v63, 0 }
 0x3e5   :  { %v3502_v1 = vsel %vm1623_vm2, %v3441_v40, 0.0  ;;  %vm3526_vm2 = vcmp.eq.s32.totalorder %v3519_v22, 1  ;;  %vm3521_vm10 = vcmp.eq.s32.totalorder %v3519_v22, 0  ;;  %vm3531_vm13 = vcmp.eq.s32.totalorder %v3519_v22, 2 }
 0x3e6   :  { %v3503_v7 = vadd.f32 %v3502_v1, %v3501_v12  ;;  %vm3527_vm11 = vmand %vm3520_vm9, %vm3526_vm2  ;;  %vm3536_vm14 = vcmp.eq.s32.totalorder %v3519_v22, 3 }
 0x3e7   :  { %vm3522_vm12 = vmand %vm3520_vm9, %vm3521_vm10 }
 0x3e8   :  { %v3505_v58 = vadd.f32 %v3504_v16, %v3503_v7  ;;  %vm3532_vm15 = vmand %vm3520_vm9, %vm3531_vm13 }
 0x3e9   :  { %vm3537_vm0 = vmand %vm3520_vm9, %vm3536_vm14 }
 0x3ea   :  { %3506 = vadd.xlane.f32.xlu1 %v3505_v58 }
 0x45f   :  { %v1688_v2 = vpop.xlane.xlu0 %1687 }
 0x460   :  { %v1689_v4 = vrot.slane %v1688_v2, 4 }
 0x462   :  { %v1690_v44 = vadd.f32 %v1689_v4, %v1688_v2 }
 0x464   :  { %v1691_v6 = vrot.slane %v1690_v44, 2 }
 0x466   :  { %v1692_v11 = vadd.f32 %v1691_v6, %v1690_v44 }
 0x468   :  { %v1693_v46 = vrot.slane %v1692_v11, 1 }
 0x469   :  { %v2890_v47 = vpop.xlane.xlu0 %2889 }
 0x46a   :  { %v2891_v36 = vrot.slane %v2890_v47, 4  ;;  %v1694_v25 = vadd.f32 %v1693_v46, %v1692_v11 }
 0x46b   :  { %v2305_v9 = vpop.xlane.xlu1 %2304 }
 0x46c   :  { %v2306_v52 = vrot.slane %v2305_v9, 4  ;;  %v2892_v30 = vadd.f32 %v2891_v36, %v2890_v47  ;;  %3730 = vpush %v1694_v25 }
 0x46e   :  { %v2307_v5 = vadd.f32 %v2306_v52, %v2305_v9  ;;  %v2893_v59 = vrot.slane %v2892_v30, 2 }
 0x470   :  { %v2308_v34 = vrot.slane %v2307_v5, 2  ;;  %v2894_v35 = vadd.f32 %v2893_v59, %v2892_v30 }
 0x472   :  { %v2309_v57 = vadd.f32 %v2308_v34, %v2307_v5  ;;  %v2895_v48 = vrot.slane %v2894_v35, 1 }
 0x474   :  { %v2310_v50 = vrot.slane %v2309_v57, 1  ;;  %v2896_v39 = vadd.f32 %v2895_v48, %v2894_v35 }
 0x476   :  { %v2311_v37 = vadd.f32 %v2310_v50, %v2309_v57 }
 0x477   :  { %v3507_v60 = vpop.xlane.xlu1 %3506 }
 0x478   :  { %v3508_v3 = vrot.slane %v3507_v60, 4  ;;  %3732 = vpush %v2311_v37 }
 0x479   :  { %3734 = vpush %v2896_v39 }
 0x47a   :  { %v3509_v14 = vadd.f32 %v3508_v3, %v3507_v60 }
 0x47c   :  { %v3510_v41 = vrot.slane %v3509_v14, 2 }
 0x47e   :  { %v3511_v56 = vadd.f32 %v3510_v41, %v3509_v14 }
 0x480   :  { %v3512_v21 = vrot.slane %v3511_v56, 1 }
 0x482   :  { %v3513_v31 = vadd.f32 %v3512_v21, %v3511_v56 }
 0x484   :  { %3736 = vpush %v3513_v31 }
 0x49d   :  { %s3731_s0 = spop %3730 }
 0x49e   :  { %s1696_s10 = smul.f32 0.00390625, %s3731_s0 }
 0x4a0   :  { %v3523_v49 = vstv %s1696_s10 }
 0x4a1   :  { %v3524_v32 = vsel %vm3522_vm12, %v3523_v49, 0.0 }
 0x4a9   :  { %s3733_s1 = spop %3732 }
 0x4aa   :  { %s2313_s9 = smul.f32 0.00390625, %s3733_s1  ;;  %s3735_s11 = spop %3734 }
 0x4ab   :  { %s2898_s12 = smul.f32 0.00390625, %s3735_s11 }
 0x4ac   :  { %v3528_v8 = vstv %s2313_s9 }
 0x4ad   :  { %v3529_v23 = vsel %vm3527_vm11, %v3528_v8, 0.0  ;;  %v3533_v27 = vstv %s2898_s12 }
 0x4ae   :  { %v3530_v18 = vadd.f32 %v3529_v23, %v3524_v32  ;;  %v3534_v20 = vsel %vm3532_vm15, %v3533_v27, 0.0 }
 0x4b0   :  { %v3535_v54 = vadd.f32 %v3534_v20, %v3530_v18 }
 0x4b5   :  { %s3737_s13 = spop %3736 }
 0x4b6   :  { %s3515_s14 = smul.f32 0.00390625, %s3737_s13 }
 0x4b8   :  { %v3538_v45 = vstv %s3515_s14 }
 0x4b9   :  { %v3539_v10 = vsel %vm3537_vm0, %v3538_v45, 0.0 }
 0x4ba   :  { %v3540_v51 = vadd.f32 %v3539_v10, %v3535_v54 }
 0x4bc   :  { %3541 = vst [vmem:[%s7936_s5] sm:$0xff] %v3540_v51 }

// kernel: informax_forward.9
= control target key start
LH: loop header
LB: loop body
LE: loop exit
PB: predicated region body
PF: predicated region fallthrough
CT: control target
= control target key end

     0   :  { %s3309_s12 = smov 0   ;;  %s4199_s0 = inlined_call_operand.vmem [shape: f32[4096,128], index: 0, kind: input, shape index: {}]   ;;  %s4200_s1 = inlined_call_operand.vmem [shape: f32[4096,128], index: 1, kind: input, shape index: {}]   ;;  %s4201_s2 = inlined_call_operand.vmem [shape: f32[4096,1], index: 2, kind: input, shape index: {}]   ;;  %s4202_s3 = inlined_call_operand.vmem [shape: f32[4,8,128], index: 3, kind: output, shape index: {}]  }
   0x1 LB: > { %s3315_s13 = sadd.s32 4294967295, %s3287_s12   ;;  %p2493_p0 = scmp.ge.s32.totalorder %s3287_s12, 1  ;;  %s3287_s12 = sphi %s3309_s12, %s13_s12  }
   0x2   : > { %p160_p1 = scmp.lt.s32.totalorder %s3287_s12, 5 }
   0x4   : > { %p161_p2 = pnand %p2493_p0, %p160_p1 }
   0x5   : > { %s2494_s14 = sshll.u32 (!%p161_p2), %s3315_s13, 7  ;;  %vm2135_vm0 = vcmask (!%p161_p2), 7168   ;;  %p211_p4 = scmp.lt.s32.totalorder (!%p161_p2), %s3315_s13, 3 }
   0x6   : > { %164 = sbr.rel (%p161_p2) target bundleno = 728 (0x2d8), region = 32  ;;  %p194_p3 = scmp.lt.s32.totalorder (!%p161_p2), %s2494_s14, 511 }
   0xd   : > { %s4204_s14 = smov (!%p194_p3, %s2494_s14), 511  ;;  %s4206_s13 = smov (!%p211_p4, %s3315_s13), 3 }
   0xe   : > { %s3320_s15 = sshll.u32 %s4204_s14, 3  ;;  %s2500_s25 = sshll.u32 %s4206_s13, 3 }
   0xf   : > { %s3326_s18 = scalar_lea.vmem %s4199_s0, %s3320_s15  ;;  %s3332_s21 = scalar_lea.vmem %s4200_s1, %s3320_s15 }
  0x10   : > { %v215_v0 = vld [vmem:[%s3326_s18] sm:$0xff]  ;;  %v217_v2 = vld [vmem:[%s3326_s18 + $0x10] sm:$0xff]  ;;  %v216_v5 = vld [vmem:[%s3326_s18 + $0x8] sm:$0xff]  ;;  %s3589_s24 = scalar_lea.vmem %s4201_s2, %s3320_s15  ;;  %s214_s30 = scalar_lea.vmem %s4202_s3, %s2500_s25 }
  0x11   : > { %v343_v1 = vld [vmem:[%s3332_s21] sm:$0xff]  ;;  %v345_v4 = vld [vmem:[%s3332_s21 + $0x10] sm:$0xff]  ;;  %v344_v6 = vld [vmem:[%s3332_s21 + $0x8] sm:$0xff] }
  0x12   : > { %v471_v3 = vmul.f32 %v343_v1, %v215_v0  ;;  %v473_v7 = vmul.f32 %v345_v4, %v217_v2  ;;  %v218_v8 = vld [vmem:[%s3326_s18 + $0x18] sm:$0xff]  ;;  %v472_v10 = vmul.f32 %v344_v6, %v216_v5  ;;  %v219_v12 = vld [vmem:[%s3326_s18 + $0x20] sm:$0xff]  ;;  %v220_v14 = vld [vmem:[%s3326_s18 + $0x28] sm:$0xff] }
  0x13   : > { %v346_v9 = vld [vmem:[%s3332_s21 + $0x18] sm:$0xff]  ;;  %v347_v13 = vld [vmem:[%s3332_s21 + $0x20] sm:$0xff]  ;;  %v348_v15 = vld [vmem:[%s3332_s21 + $0x28] sm:$0xff] }
  0x14   : > { %599 = vadd.xlane.f32.xlu0 %v471_v3  ;;  %603 = vadd.xlane.f32.xlu1 %v473_v7  ;;  %v474_v11 = vmul.f32 %v346_v9, %v218_v8  ;;  %v475_v16 = vmul.f32 %v347_v13, %v219_v12  ;;  %v476_v17 = vmul.f32 %v348_v15, %v220_v14  ;;  %v221_v18 = vld [vmem:[%s3326_s18 + $0x30] sm:$0xff]  ;;  %v222_v20 = vld [vmem:[%s3326_s18 + $0x38] sm:$0xff]  ;;  %v223_v24 = vld [vmem:[%s3326_s18 + $0x40] sm:$0xff] }
  0x15   : > { %v349_v19 = vld [vmem:[%s3332_s21 + $0x30] sm:$0xff]  ;;  %v350_v21 = vld [vmem:[%s3332_s21 + $0x38] sm:$0xff]  ;;  %v351_v25 = vld [vmem:[%s3332_s21 + $0x40] sm:$0xff] }
  0x16   : > { %v477_v22 = vmul.f32 %v349_v19, %v221_v18  ;;  %v478_v23 = vmul.f32 %v350_v21, %v222_v20  ;;  %v224_v26 = vld [vmem:[%s3326_s18 + $0x48] sm:$0xff]  ;;  %v479_v28 = vmul.f32 %v351_v25, %v223_v24  ;;  %v225_v30 = vld [vmem:[%s3326_s18 + $0x50] sm:$0xff]  ;;  %v226_v32 = vld [vmem:[%s3326_s18 + $0x58] sm:$0xff] }
  0x17   : > { %v352_v27 = vld [vmem:[%s3332_s21 + $0x48] sm:$0xff]  ;;  %v353_v31 = vld [vmem:[%s3332_s21 + $0x50] sm:$0xff]  ;;  %v354_v33 = vld [vmem:[%s3332_s21 + $0x58] sm:$0xff] }
  0x18   : > { %601 = vadd.xlane.f32.xlu0 %v472_v10  ;;  %605 = vadd.xlane.f32.xlu1 %v474_v11  ;;  %v480_v29 = vmul.f32 %v352_v27, %v224_v26  ;;  %v481_v34 = vmul.f32 %v353_v31, %v225_v30  ;;  %v482_v35 = vmul.f32 %v354_v33, %v226_v32  ;;  %v227_v36 = vld [vmem:[%s3326_s18 + $0x60] sm:$0xff]  ;;  %v228_v38 = vld [vmem:[%s3326_s18 + $0x68] sm:$0xff]  ;;  %v229_v42 = vld [vmem:[%s3326_s18 + $0x70] sm:$0xff] }
  0x19   : > { %v355_v37 = vld [vmem:[%s3332_s21 + $0x60] sm:$0xff]  ;;  %v356_v39 = vld [vmem:[%s3332_s21 + $0x68] sm:$0xff]  ;;  %v357_v43 = vld [vmem:[%s3332_s21 + $0x70] sm:$0xff] }
  0x1a   : > { %v483_v40 = vmul.f32 %v355_v37, %v227_v36  ;;  %v484_v41 = vmul.f32 %v356_v39, %v228_v38  ;;  %v230_v44 = vld [vmem:[%s3326_s18 + $0x78] sm:$0xff]  ;;  %v485_v46 = vmul.f32 %v357_v43, %v229_v42  ;;  %v231_v48 = vld [vmem:[%s3326_s18 + $0x80] sm:$0xff]  ;;  %v232_v50 = vld [vmem:[%s3326_s18 + $0x88] sm:$0xff] }
  0x1b   : > { %v358_v45 = vld [vmem:[%s3332_s21 + $0x78] sm:$0xff]  ;;  %v359_v49 = vld [vmem:[%s3332_s21 + $0x80] sm:$0xff]  ;;  %v360_v51 = vld [vmem:[%s3332_s21 + $0x88] sm:$0xff] }
  0x1c   : > { %607 = vadd.xlane.f32.xlu0 %v475_v16  ;;  %609 = vadd.xlane.f32.xlu1 %v476_v17  ;;  %v486_v47 = vmul.f32 %v358_v45, %v230_v44  ;;  %v487_v52 = vmul.f32 %v359_v49, %v231_v48  ;;  %v488_v53 = vmul.f32 %v360_v51, %v232_v50  ;;  %v233_v54 = vld [vmem:[%s3326_s18 + $0x90] sm:$0xff]  ;;  %v234_v56 = vld [vmem:[%s3326_s18 + $0x98] sm:$0xff]  ;;  %v235_v60 = vld [vmem:[%s3326_s18 + $0xa0] sm:$0xff] }
  0x1d   : > { %v361_v55 = vld [vmem:[%s3332_s21 + $0x90] sm:$0xff]  ;;  %v362_v57 = vld [vmem:[%s3332_s21 + $0x98] sm:$0xff]  ;;  %v363_v61 = vld [vmem:[%s3332_s21 + $0xa0] sm:$0xff] }
  0x1e   : > { %v489_v58 = vmul.f32 %v361_v55, %v233_v54  ;;  %v490_v59 = vmul.f32 %v362_v57, %v234_v56  ;;  %v236_v62 = vld [vmem:[%s3326_s18 + $0xa8] sm:$0xff]  ;;  %v491_v0 = vmul.f32 %v363_v61, %v235_v60  ;;  %v237_v2 = vld [vmem:[%s3326_s18 + $0xb0] sm:$0xff]  ;;  %v238_v4 = vld [vmem:[%s3326_s18 + $0xb8] sm:$0xff] }
  0x1f   : > { %v364_v63 = vld [vmem:[%s3332_s21 + $0xa8] sm:$0xff]  ;;  %v365_v3 = vld [vmem:[%s3332_s21 + $0xb0] sm:$0xff]  ;;  %v366_v5 = vld [vmem:[%s3332_s21 + $0xb8] sm:$0xff] }
  0x20   : > { %611 = vadd.xlane.f32.xlu0 %v477_v22  ;;  %613 = vadd.xlane.f32.xlu1 %v478_v23  ;;  %v492_v1 = vmul.f32 %v364_v63, %v236_v62  ;;  %v493_v6 = vmul.f32 %v365_v3, %v237_v2  ;;  %v494_v7 = vmul.f32 %v366_v5, %v238_v4  ;;  %v239_v8 = vld [vmem:[%s3326_s18 + $0xc0] sm:$0xff]  ;;  %v240_v10 = vld [vmem:[%s3326_s18 + $0xc8] sm:$0xff]  ;;  %v241_v14 = vld [vmem:[%s3326_s18 + $0xd0] sm:$0xff] }
  0x21   : > { %v367_v9 = vld [vmem:[%s3332_s21 + $0xc0] sm:$0xff]  ;;  %v368_v11 = vld [vmem:[%s3332_s21 + $0xc8] sm:$0xff]  ;;  %v369_v15 = vld [vmem:[%s3332_s21 + $0xd0] sm:$0xff] }
  0x22   : > { %v495_v12 = vmul.f32 %v367_v9, %v239_v8  ;;  %v496_v13 = vmul.f32 %v368_v11, %v240_v10  ;;  %v242_v16 = vld [vmem:[%s3326_s18 + $0xd8] sm:$0xff]  ;;  %v497_v18 = vmul.f32 %v369_v15, %v241_v14  ;;  %v243_v20 = vld [vmem:[%s3326_s18 + $0xe0] sm:$0xff]  ;;  %v244_v22 = vld [vmem:[%s3326_s18 + $0xe8] sm:$0xff] }
  0x23   : > { %v370_v17 = vld [vmem:[%s3332_s21 + $0xd8] sm:$0xff]  ;;  %v371_v21 = vld [vmem:[%s3332_s21 + $0xe0] sm:$0xff]  ;;  %v372_v23 = vld [vmem:[%s3332_s21 + $0xe8] sm:$0xff] }
  0x24   : > { %615 = vadd.xlane.f32.xlu0 %v479_v28  ;;  %617 = vadd.xlane.f32.xlu1 %v480_v29  ;;  %v498_v19 = vmul.f32 %v370_v17, %v242_v16  ;;  %v499_v24 = vmul.f32 %v371_v21, %v243_v20  ;;  %v500_v25 = vmul.f32 %v372_v23, %v244_v22  ;;  %v245_v26 = vld [vmem:[%s3326_s18 + $0xf0] sm:$0xff]  ;;  %v246_v28 = vld [vmem:[%s3326_s18 + $0xf8] sm:$0xff]  ;;  %v247_v32 = vld [vmem:[%s3326_s18 + $0x100] sm:$0xff] }
  0x25   : > { %v373_v27 = vld [vmem:[%s3332_s21 + $0xf0] sm:$0xff]  ;;  %v374_v29 = vld [vmem:[%s3332_s21 + $0xf8] sm:$0xff]  ;;  %v375_v33 = vld [vmem:[%s3332_s21 + $0x100] sm:$0xff] }
  0x26   : > { %v501_v30 = vmul.f32 %v373_v27, %v245_v26  ;;  %v502_v31 = vmul.f32 %v374_v29, %v246_v28  ;;  %v503_v36 = vmul.f32 %v375_v33, %v247_v32  ;;  %v249_v38 = vld [vmem:[%s3326_s18 + $0x110] sm:$0xff]  ;;  %v251_v44 = vld [vmem:[%s3326_s18 + $0x120] sm:$0xff] }
  0x27   : > { %v377_v39 = vld [vmem:[%s3332_s21 + $0x110] sm:$0xff]  ;;  %v379_v45 = vld [vmem:[%s3332_s21 + $0x120] sm:$0xff] }
  0x28   : > { %619 = vadd.xlane.f32.xlu0 %v481_v34  ;;  %621 = vadd.xlane.f32.xlu1 %v482_v35  ;;  %v248_v34 = vld [vmem:[%s3326_s18 + $0x108] sm:$0xff]  ;;  %v505_v42 = vmul.f32 %v377_v39, %v249_v38  ;;  %v507_v48 = vmul.f32 %v379_v45, %v251_v44  ;;  %v253_v50 = vld [vmem:[%s3326_s18 + $0x130] sm:$0xff]  ;;  %v255_v56 = vld [vmem:[%s3326_s18 + $0x140] sm:$0xff] }
  0x29   : > { %v376_v35 = vld [vmem:[%s3332_s21 + $0x108] sm:$0xff]  ;;  %v381_v51 = vld [vmem:[%s3332_s21 + $0x130] sm:$0xff]  ;;  %v383_v57 = vld [vmem:[%s3332_s21 + $0x140] sm:$0xff] }
  0x2a   : > { %v504_v37 = vmul.f32 %v376_v35, %v248_v34  ;;  %v509_v54 = vmul.f32 %v381_v51, %v253_v50  ;;  %v511_v60 = vmul.f32 %v383_v57, %v255_v56  ;;  %v257_v62 = vld [vmem:[%s3326_s18 + $0x150] sm:$0xff]  ;;  %v259_v4 = vld [vmem:[%s3326_s18 + $0x160] sm:$0xff] }
  0x2b   : > { %v385_v63 = vld [vmem:[%s3332_s21 + $0x150] sm:$0xff]  ;;  %v387_v5 = vld [vmem:[%s3332_s21 + $0x160] sm:$0xff] }
  0x2c   : > { %623 = vadd.xlane.f32.xlu0 %v483_v40  ;;  %625 = vadd.xlane.f32.xlu1 %v484_v41  ;;  %v250_v40 = vld [vmem:[%s3326_s18 + $0x118] sm:$0xff]  ;;  %v513_v2 = vmul.f32 %v385_v63, %v257_v62  ;;  %v515_v8 = vmul.f32 %v387_v5, %v259_v4  ;;  %v261_v10 = vld [vmem:[%s3326_s18 + $0x170] sm:$0xff]  ;;  %v263_v16 = vld [vmem:[%s3326_s18 + $0x180] sm:$0xff] }
  0x2d   : > { %v378_v41 = vld [vmem:[%s3332_s21 + $0x118] sm:$0xff]  ;;  %v389_v11 = vld [vmem:[%s3332_s21 + $0x170] sm:$0xff]  ;;  %v391_v17 = vld [vmem:[%s3332_s21 + $0x180] sm:$0xff] }
  0x2e   : > { %v506_v43 = vmul.f32 %v378_v41, %v250_v40  ;;  %v517_v14 = vmul.f32 %v389_v11, %v261_v10  ;;  %v519_v20 = vmul.f32 %v391_v17, %v263_v16  ;;  %v265_v22 = vld [vmem:[%s3326_s18 + $0x190] sm:$0xff]  ;;  %v267_v28 = vld [vmem:[%s3326_s18 + $0x1a0] sm:$0xff] }
  0x2f   : > { %v393_v23 = vld [vmem:[%s3332_s21 + $0x190] sm:$0xff]  ;;  %v395_v29 = vld [vmem:[%s3332_s21 + $0x1a0] sm:$0xff] }
  0x30   : > { %627 = vadd.xlane.f32.xlu0 %v485_v46  ;;  %629 = vadd.xlane.f32.xlu1 %v486_v47  ;;  %v252_v46 = vld [vmem:[%s3326_s18 + $0x128] sm:$0xff]  ;;  %v521_v26 = vmul.f32 %v393_v23, %v265_v22  ;;  %v523_v32 = vmul.f32 %v395_v29, %v267_v28  ;;  %v269_v34 = vld [vmem:[%s3326_s18 + $0x1b0] sm:$0xff]  ;;  %v271_v40 = vld [vmem:[%s3326_s18 + $0x1c0] sm:$0xff] }
  0x31   : > { %v380_v47 = vld [vmem:[%s3332_s21 + $0x128] sm:$0xff]  ;;  %v397_v35 = vld [vmem:[%s3332_s21 + $0x1b0] sm:$0xff]  ;;  %v399_v41 = vld [vmem:[%s3332_s21 + $0x1c0] sm:$0xff] }
  0x32   : > { %v508_v49 = vmul.f32 %v380_v47, %v252_v46  ;;  %v525_v38 = vmul.f32 %v397_v35, %v269_v34  ;;  %v527_v44 = vmul.f32 %v399_v41, %v271_v40  ;;  %v273_v46 = vld [vmem:[%s3326_s18 + $0x1d0] sm:$0xff]  ;;  %v290_v35 = vld [vmem:[%s3326_s18 + $0x258] sm:$0xff]  ;;  %v291_v41 = vld [vmem:[%s3326_s18 + $0x260] sm:$0xff] }
  0x33   : > { %v401_v47 = vld [vmem:[%s3332_s21 + $0x1d0] sm:$0xff] }
  0x34   : > { %631 = vadd.xlane.f32.xlu0 %v487_v52  ;;  %633 = vadd.xlane.f32.xlu1 %v488_v53  ;;  %v254_v52 = vld [vmem:[%s3326_s18 + $0x138] sm:$0xff]  ;;  %v529_v50 = vmul.f32 %v401_v47, %v273_v46  ;;  %v420_v46 = vld [vmem:[%s3332_s21 + $0x268] sm:$0xff] }
  0x35   : > { %v382_v53 = vld [vmem:[%s3332_s21 + $0x138] sm:$0xff] }
  0x36   : > { %v510_v55 = vmul.f32 %v382_v53, %v254_v52  ;;  %v275_v52 = vld [vmem:[%s3326_s18 + $0x1e0] sm:$0xff] }
  0x37   : > { %v403_v53 = vld [vmem:[%s3332_s21 + $0x1e0] sm:$0xff] }
  0x38   : > { %635 = vadd.xlane.f32.xlu0 %v489_v58  ;;  %637 = vadd.xlane.f32.xlu1 %v490_v59  ;;  %v256_v58 = vld [vmem:[%s3326_s18 + $0x148] sm:$0xff]  ;;  %v531_v56 = vmul.f32 %v403_v53, %v275_v52  ;;  %v422_v52 = vld [vmem:[%s3332_s21 + $0x278] sm:$0xff] }
  0x39   : > { %v384_v59 = vld [vmem:[%s3332_s21 + $0x148] sm:$0xff] }
  0x3a   : > { %v512_v61 = vmul.f32 %v384_v59, %v256_v58  ;;  %v277_v58 = vld [vmem:[%s3326_s18 + $0x1f0] sm:$0xff] }
  0x3b   : > { %v405_v59 = vld [vmem:[%s3332_s21 + $0x1f0] sm:$0xff] }
  0x3c   : > { %639 = vadd.xlane.f32.xlu0 %v491_v0  ;;  %641 = vadd.xlane.f32.xlu1 %v492_v1  ;;  %v258_v0 = vld [vmem:[%s3326_s18 + $0x158] sm:$0xff]  ;;  %v533_v62 = vmul.f32 %v405_v59, %v277_v58  ;;  %v424_v58 = vld [vmem:[%s3332_s21 + $0x288] sm:$0xff] }
  0x3d   : > { %v386_v1 = vld [vmem:[%s3332_s21 + $0x158] sm:$0xff] }
  0x3e   : > { %v514_v3 = vmul.f32 %v386_v1, %v258_v0  ;;  %v279_v0 = vld [vmem:[%s3326_s18 + $0x200] sm:$0xff] }
  0x3f   : > { %v407_v1 = vld [vmem:[%s3332_s21 + $0x200] sm:$0xff] }
  0x40   : > { %643 = vadd.xlane.f32.xlu0 %v493_v6  ;;  %645 = vadd.xlane.f32.xlu1 %v494_v7  ;;  %v260_v6 = vld [vmem:[%s3326_s18 + $0x168] sm:$0xff]  ;;  %v535_v4 = vmul.f32 %v407_v1, %v279_v0  ;;  %v426_v0 = vld [vmem:[%s3332_s21 + $0x298] sm:$0xff] }
  0x41   : > { %v388_v7 = vld [vmem:[%s3332_s21 + $0x168] sm:$0xff] }
  0x42   : > { %v516_v9 = vmul.f32 %v388_v7, %v260_v6  ;;  %v281_v6 = vld [vmem:[%s3326_s18 + $0x210] sm:$0xff] }
  0x43   : > { %v409_v7 = vld [vmem:[%s3332_s21 + $0x210] sm:$0xff] }
  0x44   : > { %647 = vadd.xlane.f32.xlu0 %v495_v12  ;;  %649 = vadd.xlane.f32.xlu1 %v496_v13  ;;  %v262_v12 = vld [vmem:[%s3326_s18 + $0x178] sm:$0xff]  ;;  %v537_v10 = vmul.f32 %v409_v7, %v281_v6  ;;  %v301_v7 = vld [vmem:[%s3326_s18 + $0x2b0] sm:$0xff] }
  0x45   : > { %v390_v13 = vld [vmem:[%s3332_s21 + $0x178] sm:$0xff] }
  0x46   : > { %v518_v15 = vmul.f32 %v390_v13, %v262_v12  ;;  %v283_v12 = vld [vmem:[%s3326_s18 + $0x220] sm:$0xff] }
  0x47   : > { %v411_v13 = vld [vmem:[%s3332_s21 + $0x220] sm:$0xff] }
  0x48   : > { %651 = vadd.xlane.f32.xlu0 %v497_v18  ;;  %653 = vadd.xlane.f32.xlu1 %v498_v19  ;;  %v264_v18 = vld [vmem:[%s3326_s18 + $0x188] sm:$0xff]  ;;  %v539_v16 = vmul.f32 %v411_v13, %v283_v12  ;;  %v431_v12 = vld [vmem:[%s3332_s21 + $0x2c0] sm:$0xff] }
  0x49   : > { %v392_v19 = vld [vmem:[%s3332_s21 + $0x188] sm:$0xff] }
  0x4a   : > { %v520_v21 = vmul.f32 %v392_v19, %v264_v18  ;;  %v285_v18 = vld [vmem:[%s3326_s18 + $0x230] sm:$0xff] }
  0x4b   : > { %v413_v19 = vld [vmem:[%s3332_s21 + $0x230] sm:$0xff] }
  0x4c   : > { %655 = vadd.xlane.f32.xlu0 %v499_v24  ;;  %657 = vadd.xlane.f32.xlu1 %v500_v25  ;;  %v266_v24 = vld [vmem:[%s3326_s18 + $0x198] sm:$0xff]  ;;  %v541_v22 = vmul.f32 %v413_v19, %v285_v18 }
  0x4d   : > { %v394_v25 = vld [vmem:[%s3332_s21 + $0x198] sm:$0xff] }
  0x4e   : > { %v522_v27 = vmul.f32 %v394_v25, %v266_v24  ;;  %v287_v24 = vld [vmem:[%s3326_s18 + $0x240] sm:$0xff] }
  0x4f   : > { %v415_v25 = vld [vmem:[%s3332_s21 + $0x240] sm:$0xff] }
  0x50   : > { %659 = vadd.xlane.f32.xlu0 %v501_v30  ;;  %661 = vadd.xlane.f32.xlu1 %v502_v31  ;;  %v268_v30 = vld [vmem:[%s3326_s18 + $0x1a8] sm:$0xff]  ;;  %v543_v28 = vmul.f32 %v415_v25, %v287_v24  ;;  %v306_v24 = vld [vmem:[%s3326_s18 + $0x2d8] sm:$0xff] }
  0x51   : > { %v396_v31 = vld [vmem:[%s3332_s21 + $0x1a8] sm:$0xff]  ;;  %v434_v25 = vld [vmem:[%s3332_s21 + $0x2d8] sm:$0xff] }
  0x52   : > { %v524_v33 = vmul.f32 %v396_v31, %v268_v30  ;;  %v289_v31 = vld [vmem:[%s3326_s18 + $0x250] sm:$0xff] }
  0x54   : > { %663 = vadd.xlane.f32.xlu0 %v503_v36  ;;  %665 = vadd.xlane.f32.xlu1 %v504_v37  ;;  %v270_v36 = vld [vmem:[%s3326_s18 + $0x1b8] sm:$0xff] }
  0x55   : > { %v398_v37 = vld [vmem:[%s3332_s21 + $0x1b8] sm:$0xff] }
  0x56   : > { %v526_v39 = vmul.f32 %v398_v37, %v270_v36  ;;  %v418_v36 = vld [vmem:[%s3332_s21 + $0x258] sm:$0xff] }
  0x57   : > { %v546_v40 = vmul.f32 %v418_v36, %v290_v35 }
  0x58   : > { %667 = vadd.xlane.f32.xlu0 %v505_v42  ;;  %669 = vadd.xlane.f32.xlu1 %v506_v43  ;;  %v272_v42 = vld [vmem:[%s3326_s18 + $0x1c8] sm:$0xff] }
  0x59   : > { %v400_v43 = vld [vmem:[%s3332_s21 + $0x1c8] sm:$0xff] }
  0x5a   : > { %v528_v45 = vmul.f32 %v400_v43, %v272_v42  ;;  %v419_v42 = vld [vmem:[%s3332_s21 + $0x260] sm:$0xff] }
  0x5c   : > { %671 = vadd.xlane.f32.xlu0 %v507_v48  ;;  %673 = vadd.xlane.f32.xlu1 %v508_v49  ;;  %v274_v48 = vld [vmem:[%s3326_s18 + $0x1d8] sm:$0xff] }
  0x5d   : > { %v402_v49 = vld [vmem:[%s3332_s21 + $0x1d8] sm:$0xff] }
  0x5e   : > { %v530_v51 = vmul.f32 %v402_v49, %v274_v48  ;;  %v293_v48 = vld [vmem:[%s3326_s18 + $0x270] sm:$0xff]  ;;  %v547_v49 = vmul.f32 %v419_v42, %v291_v41  ;;  %v438_v41 = vld [vmem:[%s3332_s21 + $0x2f8] sm:$0xff]  ;;  %v311_v42 = vld [vmem:[%s3326_s18 + $0x300] sm:$0xff] }
  0x60   : > { %675 = vadd.xlane.f32.xlu0 %v509_v54  ;;  %677 = vadd.xlane.f32.xlu1 %v510_v55  ;;  %v276_v54 = vld [vmem:[%s3326_s18 + $0x1e8] sm:$0xff] }
  0x61   : > { %v404_v55 = vld [vmem:[%s3332_s21 + $0x1e8] sm:$0xff] }
  0x62   : > { %v532_v57 = vmul.f32 %v404_v55, %v276_v54  ;;  %v295_v55 = vld [vmem:[%s3326_s18 + $0x280] sm:$0xff] }
  0x64   : > { %679 = vadd.xlane.f32.xlu0 %v511_v60  ;;  %681 = vadd.xlane.f32.xlu1 %v512_v61  ;;  %v278_v60 = vld [vmem:[%s3326_s18 + $0x1f8] sm:$0xff] }
  0x65   : > { %v406_v61 = vld [vmem:[%s3332_s21 + $0x1f8] sm:$0xff] }
  0x66   : > { %v534_v63 = vmul.f32 %v406_v61, %v278_v60  ;;  %v297_v61 = vld [vmem:[%s3326_s18 + $0x290] sm:$0xff] }
  0x68   : > { %683 = vadd.xlane.f32.xlu0 %v513_v2  ;;  %685 = vadd.xlane.f32.xlu1 %v514_v3  ;;  %v280_v2 = vld [vmem:[%s3326_s18 + $0x208] sm:$0xff] }
  0x69   : > { %v408_v3 = vld [vmem:[%s3332_s21 + $0x208] sm:$0xff] }
  0x6a   : > { %v536_v5 = vmul.f32 %v408_v3, %v280_v2  ;;  %v299_v2 = vld [vmem:[%s3326_s18 + $0x2a0] sm:$0xff] }
  0x6b   : > { %v427_v3 = vld [vmem:[%s3332_s21 + $0x2a0] sm:$0xff] }
  0x6c   : > { %687 = vadd.xlane.f32.xlu0 %v515_v8  ;;  %689 = vadd.xlane.f32.xlu1 %v516_v9  ;;  %v282_v8 = vld [vmem:[%s3326_s18 + $0x218] sm:$0xff]  ;;  %v3526_v36 = vmul.f32 %v427_v3, %v299_v2 }
  0x6d   : > { %v410_v9 = vld [vmem:[%s3332_s21 + $0x218] sm:$0xff] }
  0x6e   : > { %v538_v11 = vmul.f32 %v410_v9, %v282_v8  ;;  %v429_v8 = vld [vmem:[%s3332_s21 + $0x2b0] sm:$0xff]  ;;  %v302_v9 = vld [vmem:[%s3326_s18 + $0x2b8] sm:$0xff] }
  0x70   : > { %691 = vadd.xlane.f32.xlu0 %v517_v14  ;;  %693 = vadd.xlane.f32.xlu1 %v518_v15  ;;  %v284_v14 = vld [vmem:[%s3326_s18 + $0x228] sm:$0xff] }
  0x71   : > { %v412_v15 = vld [vmem:[%s3332_s21 + $0x228] sm:$0xff] }
  0x72   : > { %v540_v17 = vmul.f32 %v412_v15, %v284_v14  ;;  %v304_v15 = vld [vmem:[%s3326_s18 + $0x2c8] sm:$0xff] }
  0x74   : > { %695 = vadd.xlane.f32.xlu0 %v519_v20  ;;  %697 = vadd.xlane.f32.xlu1 %v520_v21  ;;  %v286_v20 = vld [vmem:[%s3326_s18 + $0x238] sm:$0xff] }
  0x75   : > { %v414_v21 = vld [vmem:[%s3332_s21 + $0x238] sm:$0xff] }
  0x76   : > { %v542_v23 = vmul.f32 %v414_v21, %v286_v20 }
  0x78   : > { %699 = vadd.xlane.f32.xlu0 %v521_v26  ;;  %701 = vadd.xlane.f32.xlu1 %v522_v27  ;;  %v288_v26 = vld [vmem:[%s3326_s18 + $0x248] sm:$0xff] }
  0x79   : > { %v416_v27 = vld [vmem:[%s3332_s21 + $0x248] sm:$0xff] }
  0x7a   : > { %v544_v30 = vmul.f32 %v416_v27, %v288_v26 }
  0x7c   : > { %703 = vadd.xlane.f32.xlu0 %v523_v32  ;;  %705 = vadd.xlane.f32.xlu1 %v524_v33  ;;  %v417_v32 = vld [vmem:[%s3332_s21 + $0x250] sm:$0xff] }
  0x80   : > { %707 = vadd.xlane.f32.xlu0 %v525_v38  ;;  %709 = vadd.xlane.f32.xlu1 %v526_v39  ;;  %v545_v38 = vmul.f32 %v417_v32, %v289_v31  ;;  %v307_v31 = vld [vmem:[%s3326_s18 + $0x2e0] sm:$0xff] }
  0x81   : > { %v435_v32 = vld [vmem:[%s3332_s21 + $0x2e0] sm:$0xff] }
  0x82   : > { %v3557_v3 = vmul.f32 %v435_v32, %v307_v31  ;;  %v322_v31 = vld [vmem:[%s3326_s18 + $0x358] sm:$0xff] }
  0x84   : > { %711 = vadd.xlane.f32.xlu0 %v527_v44  ;;  %713 = vadd.xlane.f32.xlu1 %v528_v45  ;;  %v292_v45 = vld [vmem:[%s3326_s18 + $0x268] sm:$0xff] }
  0x85   : > { %v548_v54 = vmul.f32 %v420_v46, %v292_v45  ;;  %v3536_v45 = vmul.f32 %v429_v8, %v301_v7  ;;  %v445_v7 = vld [vmem:[%s3332_s21 + $0x330] sm:$0xff] }
  0x88   : > { %715 = vadd.xlane.f32.xlu0 %v529_v50  ;;  %717 = vadd.xlane.f32.xlu1 %v530_v51  ;;  %v421_v50 = vld [vmem:[%s3332_s21 + $0x270] sm:$0xff]  ;;  %v294_v51 = vld [vmem:[%s3326_s18 + $0x278] sm:$0xff] }
  0x89   : > { %v549_v6 = vmul.f32 %v421_v50, %v293_v48  ;;  %v550_v14 = vmul.f32 %v422_v52, %v294_v51  ;;  %v312_v48 = vld [vmem:[%s3326_s18 + $0x308] sm:$0xff]  ;;  %v313_v50 = vld [vmem:[%s3326_s18 + $0x310] sm:$0xff] }
  0x8c   : > { %719 = vadd.xlane.f32.xlu0 %v531_v56  ;;  %721 = vadd.xlane.f32.xlu1 %v532_v57  ;;  %v423_v56 = vld [vmem:[%s3332_s21 + $0x280] sm:$0xff]  ;;  %v296_v57 = vld [vmem:[%s3326_s18 + $0x288] sm:$0xff] }
  0x8d   : > { %v551_v21 = vmul.f32 %v423_v56, %v295_v55  ;;  %v441_v56 = vld [vmem:[%s3332_s21 + $0x310] sm:$0xff] }
  0x90   : > { %723 = vadd.xlane.f32.xlu0 %v533_v62  ;;  %725 = vadd.xlane.f32.xlu1 %v534_v63  ;;  %v425_v62 = vld [vmem:[%s3332_s21 + $0x290] sm:$0xff]  ;;  %v298_v63 = vld [vmem:[%s3326_s18 + $0x298] sm:$0xff] }
  0x94   : > { %727 = vadd.xlane.f32.xlu0 %v535_v4  ;;  %729 = vadd.xlane.f32.xlu1 %v536_v5  ;;  %v300_v4 = vld [vmem:[%s3326_s18 + $0x2a8] sm:$0xff] }
  0x95   : > { %v428_v5 = vld [vmem:[%s3332_s21 + $0x2a8] sm:$0xff] }
  0x98   : > { %731 = vadd.xlane.f32.xlu0 %v537_v10  ;;  %733 = vadd.xlane.f32.xlu1 %v538_v11  ;;  %v430_v10 = vld [vmem:[%s3332_s21 + $0x2b8] sm:$0xff]  ;;  %v303_v11 = vld [vmem:[%s3326_s18 + $0x2c0] sm:$0xff] }
  0x99   : > { %v3538_v46 = vmul.f32 %v430_v10, %v302_v9 }
  0x9c   : > { %735 = vadd.xlane.f32.xlu0 %v539_v16  ;;  %737 = vadd.xlane.f32.xlu1 %v540_v17  ;;  %v432_v16 = vld [vmem:[%s3332_s21 + $0x2c8] sm:$0xff]  ;;  %v305_v17 = vld [vmem:[%s3326_s18 + $0x2d0] sm:$0xff] }
  0xa0   : > { %739 = vadd.xlane.f32.xlu0 %v541_v22  ;;  %741 = vadd.xlane.f32.xlu1 %v542_v23  ;;  %v552_v22 = vmul.f32 %v424_v58, %v296_v57  ;;  %v433_v23 = vld [vmem:[%s3332_s21 + $0x2d0] sm:$0xff]  ;;  %v314_v57 = vld [vmem:[%s3326_s18 + $0x318] sm:$0xff] }
  0xa1   : > { %v600_v29 = vpop.xlane.xlu0 %599  ;;  %v604_v34 = vpop.xlane.xlu1 %603  ;;  %v3547_v55 = vmul.f32 %v433_v23, %v305_v17  ;;  %v442_v58 = vld [vmem:[%s3332_s21 + $0x318] sm:$0xff] }
  0xa2   : > { %v2501_v33 = vmul.f32 -1.442695, %v600_v29  ;;  %v2503_v37 = vmul.f32 -1.442695, %v604_v34  ;;  %v3518_v29 = vmul.f32 %v425_v62, %v297_v61  ;;  %v436_v34 = vld [vmem:[%s3332_s21 + $0x2e8] sm:$0xff]  ;;  %v3552_v62 = vmul.f32 %v434_v25, %v306_v24 }
  0xa4   : > { %2769 = vpow2.f32 %v2501_v33  ;;  %743 = vadd.xlane.f32.xlu0 %v543_v28  ;;  %745 = vadd.xlane.f32.xlu1 %v544_v30  ;;  %v3520_v30 = vmul.f32 %v426_v0, %v298_v63  ;;  %v308_v33 = vld [vmem:[%s3326_s18 + $0x2e8] sm:$0xff]  ;;  %v315_v63 = vld [vmem:[%s3326_s18 + $0x320] sm:$0xff] }
  0xa5   : > { %2771 = vpow2.f32 %v2503_v37  ;;  %v602_v39 = vpop.xlane.xlu0 %601  ;;  %v606_v44 = vpop.xlane.xlu1 %605  ;;  %v3528_v37 = vmul.f32 %v428_v5, %v300_v4  ;;  %v443_v0 = vld [vmem:[%s3332_s21 + $0x320] sm:$0xff]  ;;  %v3559_v4 = vmul.f32 %v436_v34, %v308_v33  ;;  %v444_v5 = vld [vmem:[%s3332_s21 + $0x328] sm:$0xff] }
  0xa6   : > { %v2502_v43 = vmul.f32 -1.442695, %v602_v39  ;;  %v2504_v47 = vmul.f32 -1.442695, %v606_v44  ;;  %v437_v39 = vld [vmem:[%s3332_s21 + $0x2f0] sm:$0xff]  ;;  %v3592_v33 = vmul.f32 %v443_v0, %v315_v63 }
  0xa8   : > { %2773 = vpow2.f32 %v2502_v43  ;;  %747 = vadd.xlane.f32.xlu0 %v545_v38  ;;  %749 = vadd.xlane.f32.xlu1 %v546_v40  ;;  %v309_v38 = vld [vmem:[%s3326_s18 + $0x2f0] sm:$0xff]  ;;  %v310_v40 = vld [vmem:[%s3326_s18 + $0x2f8] sm:$0xff]  ;;  %v439_v43 = vld [vmem:[%s3332_s21 + $0x300] sm:$0xff] }
  0xa9   : > { %2775 = vpow2.f32 %v2504_v47  ;;  %v608_v53 = vpop.xlane.xlu0 %607  ;;  %v610_v60 = vpop.xlane.xlu1 %609  ;;  %v3540_v47 = vmul.f32 %v431_v12, %v303_v11  ;;  %v3564_v9 = vmul.f32 %v437_v39, %v309_v38  ;;  %v3566_v10 = vmul.f32 %v438_v41, %v310_v40  ;;  %v318_v12 = vld [vmem:[%s3326_s18 + $0x338] sm:$0xff]  ;;  %v323_v38 = vld [vmem:[%s3326_s18 + $0x360] sm:$0xff] }
  0xaa   : > { %v2505_v59 = vmul.f32 -1.442695, %v608_v53  ;;  %v2506_v1 = vmul.f32 -1.442695, %v610_v60  ;;  %v3568_v11 = vmul.f32 %v439_v43, %v311_v42  ;;  %v451_v39 = vld [vmem:[%s3332_s21 + $0x360] sm:$0xff]  ;;  %v324_v43 = vld [vmem:[%s3326_s18 + $0x368] sm:$0xff] }
  0xac   : > { %2777 = vpow2.f32 %v2505_v59  ;;  %751 = vadd.xlane.f32.xlu0 %v547_v49  ;;  %753 = vadd.xlane.f32.xlu1 %v548_v54  ;;  %v440_v49 = vld [vmem:[%s3332_s21 + $0x308] sm:$0xff]  ;;  %v3545_v54 = vmul.f32 %v432_v16, %v304_v15 }
  0xad   : > { %2779 = vpow2.f32 %v2506_v1  ;;  %v612_v13 = vpop.xlane.xlu0 %611  ;;  %v614_v20 = vpop.xlane.xlu1 %613  ;;  %v316_v1 = vld [vmem:[%s3326_s18 + $0x328] sm:$0xff] }
  0xae   : > { %v2770_v18 = vpop.eup %2769  ;;  %v2507_v19 = vmul.f32 -1.442695, %v612_v13  ;;  %v2508_v28 = vmul.f32 -1.442695, %v614_v20  ;;  %v446_v13 = vld [vmem:[%s3332_s21 + $0x338] sm:$0xff]  ;;  %v447_v20 = vld [vmem:[%s3332_s21 + $0x340] sm:$0xff]  ;;  %v3594_v34 = vmul.f32 %v444_v5, %v316_v1  ;;  %v3621_v5 = vmul.f32 %v451_v39, %v323_v38 }
  0xaf   : > { %v2772_v26 = vpop.eup %2771  ;;  %v1239_v27 = vadd.f32 1.0, %v2770_v18  ;;  %v3573_v18 = vmul.f32 %v440_v49, %v312_v48  ;;  %v3602_v42 = vmul.f32 %v446_v13, %v318_v12  ;;  %v325_v48 = vld [vmem:[%s3326_s18 + $0x370] sm:$0xff] }
  0xb0   : > { %v1241_v35 = vadd.f32 1.0, %v2772_v26  ;;  %2781 = vpow2.f32 %v2507_v19  ;;  %755 = vadd.xlane.f32.xlu0 %v549_v6  ;;  %757 = vadd.xlane.f32.xlu1 %v550_v14  ;;  %v317_v6 = vld [vmem:[%s3326_s18 + $0x330] sm:$0xff]  ;;  %v319_v14 = vld [vmem:[%s3326_s18 + $0x340] sm:$0xff]  ;;  %v3575_v19 = vmul.f32 %v441_v56, %v313_v50  ;;  %v3580_v26 = vmul.f32 %v442_v58, %v314_v57  ;;  %v326_v56 = vld [vmem:[%s3326_s18 + $0x378] sm:$0xff] }
  0xb1   : > { %2783 = vrcp.f32 %v1239_v27  ;;  %v616_v44 = vpop.xlane.xlu0 %615  ;;  %v618_v53 = vpop.xlane.xlu1 %617  ;;  %v321_v27 = vld [vmem:[%s3326_s18 + $0x350] sm:$0xff]  ;;  %v3600_v41 = vmul.f32 %v445_v7, %v317_v6  ;;  %v454_v57 = vld [vmem:[%s3332_s21 + $0x378] sm:$0xff]  ;;  %v327_v7 = vld [vmem:[%s3326_s18 + $0x380] sm:$0xff] }
  0xb2   : > { %v2774_v51 = vpop.eup %2773  ;;  %2785 = vrcp.f32 %v1241_v35  ;;  %v2509_v52 = vmul.f32 -1.442695, %v616_v44  ;;  %v2510_v61 = vmul.f32 -1.442695, %v618_v53  ;;  %v450_v35 = vld [vmem:[%s3332_s21 + $0x358] sm:$0xff]  ;;  %v452_v44 = vld [vmem:[%s3332_s21 + $0x368] sm:$0xff] }
  0xb3   : > { %v2776_v59 = vpop.eup %2775  ;;  %v1240_v60 = vadd.f32 1.0, %v2774_v51  ;;  %2787 = vpow2.f32 %v2508_v28  ;;  %v449_v28 = vld [vmem:[%s3332_s21 + $0x350] sm:$0xff]  ;;  %v3617_v63 = vmul.f32 %v450_v35, %v322_v31  ;;  %v3623_v6 = vmul.f32 %v452_v44, %v324_v43  ;;  %v1754_v44 = vld [vmem:[%s3589_s24 + $0x18] sm:$0xff] }
  0xb4   : > { %v1242_v2 = vadd.f32 1.0, %v2776_v59  ;;  %2789 = vpow2.f32 %v2509_v52  ;;  %759 = vadd.xlane.f32.xlu0 %v551_v21  ;;  %761 = vadd.xlane.f32.xlu1 %v552_v22  ;;  %v320_v21 = vld [vmem:[%s3326_s18 + $0x348] sm:$0xff]  ;;  %v3611_v53 = vmul.f32 %v449_v28, %v321_v27  ;;  %v1751_v59 = vld [vmem:[%s3589_s24] sm:$0xff]  ;;  %v457_v27 = vld [vmem:[%s3332_s21 + $0x390] sm:$0xff] }
  0xb5   : > { %2791 = vrcp.f32 %v1240_v60  ;;  %v620_v8 = vpop.xlane.xlu0 %619  ;;  %v622_v17 = vpop.xlane.xlu1 %621  ;;  %v448_v22 = vld [vmem:[%s3332_s21 + $0x348] sm:$0xff] }
  0xb6   : > { %v2778_v15 = vpop.eup %2777  ;;  %2793 = vrcp.f32 %v1242_v2  ;;  %v2511_v16 = vmul.f32 -1.442695, %v620_v8  ;;  %v2512_v25 = vmul.f32 -1.442695, %v622_v17  ;;  %v3609_v52 = vmul.f32 %v448_v22, %v320_v21  ;;  %v1753_v2 = vld [vmem:[%s3589_s24 + $0x10] sm:$0xff]  ;;  %v455_v8 = vld [vmem:[%s3332_s21 + $0x380] sm:$0xff] }
  0xb7   : > { %v2780_v23 = vpop.eup %2779  ;;  %v1243_v24 = vadd.f32 1.0, %v2778_v15  ;;  %2795 = vpow2.f32 %v2510_v61  ;;  %v456_v17 = vld [vmem:[%s3332_s21 + $0x388] sm:$0xff]  ;;  %v3637_v38 = vmul.f32 %v455_v8, %v327_v7 }
  0xb8   : > { %v1244_v32 = vadd.f32 1.0, %v2780_v23  ;;  %2797 = vpow2.f32 %v2511_v16  ;;  %763 = vadd.xlane.f32.xlu0 %v3518_v29  ;;  %765 = vadd.xlane.f32.xlu1 %v3520_v30  ;;  %v3604_v29 = vmul.f32 %v447_v20, %v319_v14  ;;  %v453_v30 = vld [vmem:[%s3332_s21 + $0x370] sm:$0xff]  ;;  %v3630_v16 = vmul.f32 %v454_v57, %v326_v56 }
  0xb9   : > { %2799 = vrcp.f32 %v1243_v24  ;;  %v624_v40 = vpop.xlane.xlu0 %623  ;;  %v626_v51 = vpop.xlane.xlu1 %625  ;;  %v3628_v15 = vmul.f32 %v453_v30, %v325_v48 }
  0xba   : > { %v2782_v49 = vpop.eup %2781  ;;  %2801 = vrcp.f32 %v1244_v32  ;;  %v2513_v50 = vmul.f32 -1.442695, %v624_v40  ;;  %v2514_v61 = vmul.f32 -1.442695, %v626_v51  ;;  %v1752_v32 = vld [vmem:[%s3589_s24 + $0x8] sm:$0xff] }
  0xbb   : > { %v2784_v58 = vpop.eup %2783  ;;  %v1245_v60 = vadd.f32 1.0, %v2782_v49  ;;  %2803 = vpow2.f32 %v2512_v25  ;;  %v329_v25 = vld [vmem:[%s3326_s18 + $0x390] sm:$0xff] }
  0xbc   : > { %v2786_v0 = vpop.eup %2785  ;;  %v2629_v1 = vadd.f32 -1.0, %v2784_v58  ;;  %2805 = vpow2.f32 %v2513_v50  ;;  %767 = vadd.xlane.f32.xlu0 %v3526_v36  ;;  %769 = vadd.xlane.f32.xlu1 %v3528_v37  ;;  %v328_v36 = vld [vmem:[%s3326_s18 + $0x388] sm:$0xff]  ;;  %v3644_v56 = vmul.f32 %v457_v27, %v329_v25 }
  0xbd   : > { %v2788_v12 = vpop.eup %2787  ;;  %v2631_v13 = vadd.f32 -1.0, %v2786_v0  ;;  %2807 = vrcp.f32 %v1245_v60  ;;  %v628_v14 = vpop.xlane.xlu0 %627  ;;  %v3641_v48 = vmul.f32 %v456_v17, %v328_v36 }
  0xbe   : > { %v2790_v20 = vpop.eup %2789  ;;  %v1879_v21 = vmul.f32 %v2629_v1, %v1751_v59  ;;  %v1246_v22 = vadd.f32 1.0, %v2788_v12  ;;  %2809 = vpow2.f32 %v2514_v61  ;;  %v2515_v23 = vmul.f32 -1.442695, %v628_v14  ;;  %v630_v24 = vpop.xlane.xlu1 %629 }
  0xbf   : > { %v2792_v28 = vpop.eup %2791  ;;  %v1881_v31 = vmul.f32 %v2631_v13, %v1753_v2  ;;  %v1247_v35 = vadd.f32 1.0, %v2790_v20  ;;  %v2516_v37 = vmul.f32 -1.442695, %v630_v24  ;;  %v1755_v2 = vld [vmem:[%s3589_s24 + $0x20] sm:$0xff] }
  0xc0   : > { %v2794_v39 = vpop.eup %2793  ;;  %v2007_v40 = vmul.f32 %v2629_v1, %v1879_v21  ;;  %v2630_v43 = vadd.f32 -1.0, %v2792_v28  ;;  %2811 = vrcp.f32 %v1246_v22  ;;  %771 = vadd.xlane.f32.xlu0 %v3536_v45  ;;  %773 = vadd.xlane.f32.xlu1 %v3538_v46 }
  0xc1   : > { %v2796_v49 = vpop.eup %2795  ;;  %v2009_v50 = vmul.f32 %v2631_v13, %v1881_v31  ;;  %v2632_v51 = vadd.f32 -1.0, %v2794_v39  ;;  %2813 = vrcp.f32 %v1247_v35  ;;  %v632_v30 = vpop.xlane.xlu0 %631  ;;  %v1756_v13 = vld [vmem:[%s3589_s24 + $0x28] sm:$0xff] }
  0xc2   : > { %v2798_v57 = vpop.eup %2797  ;;  %v2136_v58 = vsel %vm2135_vm0, %v2007_v40, 0.0  ;;  %v1880_v59 = vmul.f32 %v2630_v43, %v1752_v32  ;;  %v1248_v60 = vadd.f32 1.0, %v2796_v49  ;;  %2815 = vpow2.f32 %v2515_v23  ;;  %v634_v45 = vpop.xlane.xlu1 %633 }
  0xc3   : > { %v2800_v61 = vpop.eup %2799  ;;  %v2139_v0 = vsel %vm2135_vm0, %v2009_v50, 0.0  ;;  %v1882_v1 = vmul.f32 %v2632_v51, %v1754_v44  ;;  %v1249_v7 = vadd.f32 1.0, %v2798_v57  ;;  %2817 = vpow2.f32 %v2516_v37  ;;  %v1757_v37 = vld [vmem:[%s3589_s24 + $0x30] sm:$0xff] }
  0xc4   : > { %v2802_v8 = vpop.eup %2801  ;;  %v2008_v12 = vmul.f32 %v2630_v43, %v1880_v59  ;;  %v2633_v46 = vadd.f32 -1.0, %v2800_v61  ;;  %2819 = vrcp.f32 %v1248_v60  ;;  %v2517_v14 = vmul.f32 -1.442695, %v632_v30  ;;  %775 = vadd.xlane.f32.xlu0 %v3540_v47  ;;  %777 = vadd.xlane.f32.xlu1 %v3545_v54  ;;  %v1758_v60 = vld [vmem:[%s3589_s24 + $0x38] sm:$0xff] }
  0xc5   : > { %v2804_v36 = vpop.eup %2803  ;;  %v2010_v17 = vmul.f32 %v2632_v51, %v1882_v1  ;;  %v2634_v20 = vadd.f32 -1.0, %v2802_v8  ;;  %2821 = vrcp.f32 %v1249_v7  ;;  %v2518_v21 = vmul.f32 -1.442695, %v634_v45  ;;  %v636_v22 = vpop.xlane.xlu0 %635  ;;  %v1759_v7 = vld [vmem:[%s3589_s24 + $0x40] sm:$0xff] }
  0xc6   : > { %v2806_v23 = vpop.eup %2805  ;;  %v2137_v24 = vsel %vm2135_vm0, %v2008_v12, 0.0  ;;  %v1883_v25 = vmul.f32 %v2633_v46, %v1755_v2  ;;  %v1250_v27 = vadd.f32 1.0, %v2804_v36  ;;  %2823 = vpow2.f32 %v2517_v14  ;;  %v638_v28 = vpop.xlane.xlu1 %637 }
  0xc7   : > { %v2808_v31 = vpop.eup %2807  ;;  %v2138_v32 = vadd.f32 %v2137_v24, %v2136_v58  ;;  %v2141_v47 = vsel %vm2135_vm0, %v2010_v17, 0.0  ;;  %v1884_v35 = vmul.f32 %v2634_v20, %v1756_v13  ;;  %v1251_v39 = vadd.f32 1.0, %v2806_v23  ;;  %v1760_v24 = vld [vmem:[%s3589_s24 + $0x48] sm:$0xff] }
  0xc8   : > { %v2810_v40 = vpop.eup %2809  ;;  %v2011_v43 = vmul.f32 %v2633_v46, %v1883_v25  ;;  %v2635_v44 = vadd.f32 -1.0, %v2808_v31  ;;  %2825 = vrcp.f32 %v1250_v27  ;;  %v2519_v54 = vmul.f32 -1.442695, %v636_v22  ;;  %779 = vadd.xlane.f32.xlu0 %v3547_v55  ;;  %781 = vadd.xlane.f32.xlu1 %v3552_v62 }
  0xc9   : > { %v2140_v49 = vadd.f32 %v2139_v0, %v2138_v32  ;;  %v2012_v50 = vmul.f32 %v2634_v20, %v1884_v35  ;;  %2827 = vrcp.f32 %v1251_v39  ;;  %v1252_v51 = vadd.f32 1.0, %v2810_v40  ;;  %v640_v30 = vpop.xlane.xlu0 %639 }
  0xca   : > { %v2812_v57 = vpop.eup %2811  ;;  %v2143_v58 = vsel %vm2135_vm0, %v2011_v43, 0.0  ;;  %v1885_v59 = vmul.f32 %v2635_v44, %v1757_v37  ;;  %2829 = vpow2.f32 %v2518_v21  ;;  %v2520_v45 = vmul.f32 -1.442695, %v638_v28  ;;  %v642_v61 = vpop.xlane.xlu1 %641 }
  0xcb   : > { %v2814_v1 = vpop.eup %2813  ;;  %v2142_v2 = vadd.f32 %v2141_v47, %v2140_v49  ;;  %v2145_v55 = vsel %vm2135_vm0, %v2012_v50, 0.0  ;;  %v2636_v0 = vadd.f32 -1.0, %v2812_v57  ;;  %2831 = vrcp.f32 %v1252_v51  ;;  %v1761_v47 = vld [vmem:[%s3589_s24 + $0x50] sm:$0xff]  ;;  %v1762_v57 = vld [vmem:[%s3589_s24 + $0x58] sm:$0xff] }
  0xcc   : > { %v2816_v8 = vpop.eup %2815  ;;  %v2013_v12 = vmul.f32 %v2635_v44, %v1885_v59  ;;  %v2637_v46 = vadd.f32 -1.0, %v2814_v1  ;;  %2833 = vpow2.f32 %v2519_v54  ;;  %v2521_v62 = vmul.f32 -1.442695, %v640_v30  ;;  %783 = vadd.xlane.f32.xlu0 %v3557_v3  ;;  %785 = vadd.xlane.f32.xlu1 %v3559_v4  ;;  %v1763_v1 = vld [vmem:[%s3589_s24 + $0x60] sm:$0xff] }
  0xcd   : > { %v2818_v13 = vpop.eup %2817  ;;  %v2144_v14 = vadd.f32 %v2143_v58, %v2142_v2  ;;  %v1886_v36 = vmul.f32 %v2636_v0, %v1758_v60  ;;  %v1253_v17 = vadd.f32 1.0, %v2816_v8  ;;  %2835 = vpow2.f32 %v2520_v45  ;;  %v644_v20 = vpop.xlane.xlu0 %643 }
  0xce   : > { %v2820_v21 = vpop.eup %2819  ;;  %v2147_v22 = vsel %vm2135_vm0, %v2013_v12, 0.0  ;;  %v1887_v23 = vmul.f32 %v2637_v46, %v1759_v7  ;;  %v1254_v25 = vadd.f32 1.0, %v2818_v13  ;;  %2837 = vpow2.f32 %v2521_v62  ;;  %v646_v27 = vpop.xlane.xlu1 %645  ;;  %v1764_v62 = vld [vmem:[%s3589_s24 + $0x68] sm:$0xff] }
  0xcf   : > { %v2822_v28 = vpop.eup %2821  ;;  %v2146_v31 = vadd.f32 %v2145_v55, %v2144_v14  ;;  %v2014_v3 = vmul.f32 %v2636_v0, %v1886_v36  ;;  %v2638_v32 = vadd.f32 -1.0, %v2820_v21  ;;  %2839 = vrcp.f32 %v1253_v17 }
  0xd0   : > { %v2824_v35 = vpop.eup %2823  ;;  %v2015_v37 = vmul.f32 %v2637_v46, %v1887_v23  ;;  %v2639_v39 = vadd.f32 -1.0, %v2822_v28  ;;  %2841 = vrcp.f32 %v1254_v25  ;;  %v2522_v4 = vmul.f32 -1.442695, %v642_v61  ;;  %787 = vadd.xlane.f32.xlu0 %v3564_v9  ;;  %789 = vadd.xlane.f32.xlu1 %v3566_v10 }
  0xd1   : > { %v2148_v40 = vadd.f32 %v2147_v22, %v2146_v31  ;;  %v2149_v43 = vsel %vm2135_vm0, %v2014_v3, 0.0  ;;  %v1888_v44 = vmul.f32 %v2638_v32, %v1760_v24  ;;  %v1255_v54 = vadd.f32 1.0, %v2824_v35  ;;  %v648_v49 = vpop.xlane.xlu0 %647 }
  0xd2   : > { %v2826_v50 = vpop.eup %2825  ;;  %v2151_v51 = vsel %vm2135_vm0, %v2015_v37, 0.0  ;;  %v1889_v30 = vmul.f32 %v2639_v39, %v1761_v47  ;;  %2843 = vpow2.f32 %v2522_v4  ;;  %v2523_v58 = vmul.f32 -1.442695, %v644_v20  ;;  %v650_v59 = vpop.xlane.xlu1 %649  ;;  %v1765_v37 = vld [vmem:[%s3589_s24 + $0x70] sm:$0xff] }
  0xd3   : > { %v2828_v60 = vpop.eup %2827  ;;  %v2150_v9 = vadd.f32 %v2149_v43, %v2148_v40  ;;  %v2016_v45 = vmul.f32 %v2638_v32, %v1888_v44  ;;  %v2640_v61 = vadd.f32 -1.0, %v2826_v50  ;;  %2845 = vrcp.f32 %v1255_v54  ;;  %v1766_v50 = vld [vmem:[%s3589_s24 + $0x78] sm:$0xff] }
  0xd4   : > { %v2830_v2 = vpop.eup %2829  ;;  %v2017_v55 = vmul.f32 %v2639_v39, %v1889_v30  ;;  %v2641_v0 = vadd.f32 -1.0, %v2828_v60  ;;  %2847 = vpow2.f32 %v2523_v58  ;;  %v2524_v10 = vmul.f32 -1.442695, %v646_v27  ;;  %791 = vadd.xlane.f32.xlu0 %v3568_v11  ;;  %793 = vadd.xlane.f32.xlu1 %v3573_v18 }
  0xd5   : > { %v2832_v7 = vpop.eup %2831  ;;  %v2152_v8 = vadd.f32 %v2151_v51, %v2150_v9  ;;  %v2153_v12 = vsel %vm2135_vm0, %v2016_v45, 0.0  ;;  %v1890_v46 = vmul.f32 %v2640_v61, %v1762_v57  ;;  %v1256_v13 = vadd.f32 1.0, %v2830_v2  ;;  %v652_v14 = vpop.xlane.xlu0 %651 }
  0xd6   : > { %v2834_v36 = vpop.eup %2833  ;;  %v2155_v17 = vsel %vm2135_vm0, %v2017_v55, 0.0  ;;  %v1891_v20 = vmul.f32 %v2641_v0, %v1763_v1  ;;  %v2642_v21 = vadd.f32 -1.0, %v2832_v7  ;;  %2849 = vpow2.f32 %v2524_v10  ;;  %v654_v22 = vpop.xlane.xlu1 %653  ;;  %v1767_v1 = vld [vmem:[%s3589_s24 + $0x80] sm:$0xff] }
  0xd7   : > { %v2836_v23 = vpop.eup %2835  ;;  %v2154_v11 = vadd.f32 %v2153_v12, %v2152_v8  ;;  %v2018_v24 = vmul.f32 %v2640_v61, %v1890_v46  ;;  %2851 = vrcp.f32 %v1256_v13  ;;  %v1257_v25 = vadd.f32 1.0, %v2834_v36 }
  0xd8   : > { %v2838_v27 = vpop.eup %2837  ;;  %v2019_v28 = vmul.f32 %v2641_v0, %v1891_v20  ;;  %v1892_v31 = vmul.f32 %v2642_v21, %v1764_v62  ;;  %v1258_v3 = vadd.f32 1.0, %v2836_v23  ;;  %v2525_v32 = vmul.f32 -1.442695, %v648_v49  ;;  %795 = vadd.xlane.f32.xlu0 %v3575_v19  ;;  %797 = vadd.xlane.f32.xlu1 %v3580_v26 }
  0xd9   : > { %v2840_v18 = vpop.eup %2839  ;;  %v2156_v47 = vadd.f32 %v2155_v17, %v2154_v11  ;;  %v2157_v35 = vsel %vm2135_vm0, %v2018_v24, 0.0  ;;  %2853 = vrcp.f32 %v1257_v25  ;;  %v1259_v39 = vadd.f32 1.0, %v2838_v27  ;;  %v656_v4 = vpop.xlane.xlu0 %655 }
  0xda   : > { %v2842_v40 = vpop.eup %2841  ;;  %v2159_v43 = vsel %vm2135_vm0, %v2019_v28, 0.0  ;;  %v2020_v44 = vmul.f32 %v2642_v21, %v1892_v31  ;;  %v2643_v54 = vadd.f32 -1.0, %v2840_v18  ;;  %2855 = vrcp.f32 %v1258_v3  ;;  %v658_v49 = vpop.xlane.xlu1 %657  ;;  %v1768_v21 = vld [vmem:[%s3589_s24 + $0x88] sm:$0xff]  ;;  %v1769_v31 = vld [vmem:[%s3589_s24 + $0x90] sm:$0xff] }
  0xdb   : > { %v2158_v19 = vadd.f32 %v2157_v35, %v2156_v47  ;;  %v2644_v51 = vadd.f32 -1.0, %v2842_v40  ;;  %2857 = vrcp.f32 %v1259_v39  ;;  %v2526_v30 = vmul.f32 -1.442695, %v650_v59  ;;  %v1770_v39 = vld [vmem:[%s3589_s24 + $0x98] sm:$0xff] }
  0xdc   : > { %v2844_v57 = vpop.eup %2843  ;;  %v2161_v58 = vsel %vm2135_vm0, %v2020_v44, 0.0  ;;  %v1893_v60 = vmul.f32 %v2643_v54, %v1765_v37  ;;  %2859 = vpow2.f32 %v2525_v32  ;;  %v2527_v9 = vmul.f32 -1.442695, %v652_v14  ;;  %799 = vadd.xlane.f32.xlu0 %v3592_v33  ;;  %801 = vadd.xlane.f32.xlu1 %v3594_v34 }
  0xdd   : > { %v2846_v26 = vpop.eup %2845  ;;  %v2160_v45 = vadd.f32 %v2159_v43, %v2158_v19  ;;  %v1894_v61 = vmul.f32 %v2644_v51, %v1766_v50  ;;  %v1260_v2 = vadd.f32 1.0, %v2844_v57  ;;  %2861 = vpow2.f32 %v2526_v30  ;;  %v660_v55 = vpop.xlane.xlu0 %659  ;;  %v1771_v43 = vld [vmem:[%s3589_s24 + $0xa0] sm:$0xff] }
  0xde   : > { %v2848_v0 = vpop.eup %2847  ;;  %v2021_v10 = vmul.f32 %v2643_v54, %v1893_v60  ;;  %v2645_v59 = vadd.f32 -1.0, %v2846_v26  ;;  %2863 = vpow2.f32 %v2527_v9  ;;  %v2528_v7 = vmul.f32 -1.442695, %v654_v22  ;;  %v662_v8 = vpop.xlane.xlu1 %661 }
  0xdf   : > { %v2162_v12 = vadd.f32 %v2161_v58, %v2160_v45  ;;  %v2022_v46 = vmul.f32 %v2644_v51, %v1894_v61  ;;  %2865 = vrcp.f32 %v1260_v2  ;;  %v1261_v33 = vadd.f32 1.0, %v2848_v0  ;;  %v458_v2 = vld [vmem:[%s3332_s21 + $0x398] sm:$0xff] }
  0xe0   : > { %v2850_v62 = vpop.eup %2849  ;;  %v2163_v13 = vsel %vm2135_vm0, %v2021_v10, 0.0  ;;  %v1895_v14 = vmul.f32 %v2645_v59, %v1767_v1  ;;  %2867 = vpow2.f32 %v2528_v7  ;;  %v2529_v36 = vmul.f32 -1.442695, %v656_v4  ;;  %803 = vadd.xlane.f32.xlu0 %v3600_v41  ;;  %805 = vadd.xlane.f32.xlu1 %v3602_v42  ;;  %v330_v1 = vld [vmem:[%s3326_s18 + $0x398] sm:$0xff] }
  0xe1   : > { %v2852_v34 = vpop.eup %2851  ;;  %v2164_v17 = vadd.f32 %v2163_v13, %v2162_v12  ;;  %v2165_v20 = vsel %vm2135_vm0, %v2022_v46, 0.0  ;;  %2869 = vrcp.f32 %v1261_v33  ;;  %v1262_v22 = vadd.f32 1.0, %v2850_v62  ;;  %v664_v23 = vpop.xlane.xlu0 %663  ;;  %v331_v13 = vld [vmem:[%s3326_s18 + $0x3a0] sm:$0xff] }
  0xe2   : > { %v2023_v11 = vmul.f32 %v2645_v59, %v1895_v14  ;;  %v2646_v24 = vadd.f32 -1.0, %v2852_v34  ;;  %2871 = vpow2.f32 %v2529_v36  ;;  %v2530_v25 = vmul.f32 -1.442695, %v658_v49  ;;  %v666_v27 = vpop.xlane.xlu1 %665  ;;  %v1772_v59 = vld [vmem:[%s3589_s24 + $0xa8] sm:$0xff]  ;;  %v459_v14 = vld [vmem:[%s3332_s21 + $0x3a0] sm:$0xff] }
  0xe3   : > { %v2854_v28 = vpop.eup %2853  ;;  %v2166_v41 = vadd.f32 %v2165_v20, %v2164_v17  ;;  %2873 = vrcp.f32 %v1262_v22  ;;  %v2531_v3 = vmul.f32 -1.442695, %v660_v55  ;;  %v2532_v32 = vmul.f32 -1.442695, %v662_v8  ;;  %v1773_v17 = vld [vmem:[%s3589_s24 + $0xb0] sm:$0xff] }
  0xe4   : > { %v2856_v18 = vpop.eup %2855  ;;  %v2167_v47 = vsel %vm2135_vm0, %v2023_v11, 0.0  ;;  %v1896_v35 = vmul.f32 %v2646_v24, %v1768_v21  ;;  %v2647_v37 = vadd.f32 -1.0, %v2854_v28  ;;  %2875 = vpow2.f32 %v2530_v25  ;;  %807 = vadd.xlane.f32.xlu0 %v3604_v29  ;;  %809 = vadd.xlane.f32.xlu1 %v3609_v52 }
  0xe5   : > { %v2858_v42 = vpop.eup %2857  ;;  %v2168_v4 = vadd.f32 %v2167_v47, %v2166_v41  ;;  %v2648_v40 = vadd.f32 -1.0, %v2856_v18  ;;  %2877 = vpow2.f32 %v2531_v3  ;;  %v2533_v44 = vmul.f32 -1.442695, %v664_v23  ;;  %v3697_v54 = vpop.xlane.xlu0 %667 }
  0xe6   : > { %v2860_v50 = vpop.eup %2859  ;;  %v2024_v49 = vmul.f32 %v2646_v24, %v1896_v35  ;;  %v1897_v19 = vmul.f32 %v2647_v37, %v1769_v31  ;;  %v2649_v51 = vadd.f32 -1.0, %v2858_v42  ;;  %2879 = vpow2.f32 %v2532_v32  ;;  %v3700_v30 = vpop.xlane.xlu1 %669 }
  0xe7   : > { %v2862_v29 = vpop.eup %2861  ;;  %v1898_v57 = vmul.f32 %v2648_v40, %v1770_v39  ;;  %v1263_v58 = vadd.f32 1.0, %v2860_v50  ;;  %2881 = vpow2.f32 %v2533_v44  ;;  %v2534_v60 = vmul.f32 -1.442695, %v666_v27  ;;  %v1774_v27 = vld [vmem:[%s3589_s24 + $0xb8] sm:$0xff] }
  0xe8   : > { %v2864_v9 = vpop.eup %2863  ;;  %v2169_v26 = vsel %vm2135_vm0, %v2024_v49, 0.0  ;;  %v2025_v45 = vmul.f32 %v2647_v37, %v1897_v19  ;;  %v1899_v52 = vmul.f32 %v2649_v51, %v1771_v43  ;;  %v1264_v61 = vadd.f32 1.0, %v2862_v29  ;;  %811 = vadd.xlane.f32.xlu0 %v3611_v53  ;;  %813 = vadd.xlane.f32.xlu1 %v3617_v63  ;;  %v332_v49 = vld [vmem:[%s3326_s18 + $0x3a8] sm:$0xff] }
  0xe9   : > { %v2866_v55 = vpop.eup %2865  ;;  %v2170_v0 = vadd.f32 %v2169_v26, %v2168_v4  ;;  %v2026_v10 = vmul.f32 %v2648_v40, %v1898_v57  ;;  %2883 = vrcp.f32 %v1263_v58  ;;  %v1265_v7 = vadd.f32 1.0, %v2864_v9  ;;  %v3707_v8 = vpop.xlane.xlu0 %671  ;;  %v460_v19 = vld [vmem:[%s3332_s21 + $0x3a8] sm:$0xff]  ;;  %v461_v9 = vld [vmem:[%s3332_s21 + $0x3b0] sm:$0xff] }
  0xea   : > { %v2868_v12 = vpop.eup %2867  ;;  %v2171_v46 = vsel %vm2135_vm0, %v2025_v45, 0.0  ;;  %v2027_v33 = vmul.f32 %v2649_v51, %v1899_v52  ;;  %v2650_v53 = vadd.f32 -1.0, %v2866_v55  ;;  %2885 = vrcp.f32 %v1264_v61  ;;  %v3711_v62 = vpop.xlane.xlu1 %673  ;;  %v334_v61 = vld [vmem:[%s3326_s18 + $0x3b8] sm:$0xff] }
  0xeb   : > { %v2870_v36 = vpop.eup %2869  ;;  %v2172_v34 = vadd.f32 %v2171_v46, %v2170_v0  ;;  %2887 = vrcp.f32 %v1265_v7  ;;  %v1266_v20 = vadd.f32 1.0, %v2868_v12  ;;  %v3716_v21 = vmul.f32 %v458_v2, %v330_v1  ;;  %v462_v1 = vld [vmem:[%s3332_s21 + $0x3b8] sm:$0xff]  ;;  %v1776_v7 = vld [vmem:[%s3589_s24 + $0xc8] sm:$0xff] }
  0xec   : > { %v2872_v22 = vpop.eup %2871  ;;  %v2173_v63 = vsel %vm2135_vm0, %v2026_v10, 0.0  ;;  %v1900_v23 = vmul.f32 %v2650_v53, %v1772_v59  ;;  %v2651_v11 = vadd.f32 -1.0, %v2870_v36  ;;  %2889 = vpow2.f32 %v2534_v60  ;;  %815 = vadd.xlane.f32.xlu0 %v3621_v5  ;;  %817 = vadd.xlane.f32.xlu1 %v3623_v6  ;;  %v333_v60 = vld [vmem:[%s3326_s18 + $0x3b0] sm:$0xff] }
  0xed   : > { %v2874_v24 = vpop.eup %2873  ;;  %v2174_v25 = vadd.f32 %v2173_v63, %v2172_v34  ;;  %2891 = vrcp.f32 %v1266_v20  ;;  %v1267_v28 = vadd.f32 1.0, %v2872_v22  ;;  %v676_v41 = vpop.xlane.xlu0 %675  ;;  %v3722_v31 = vmul.f32 %v459_v14, %v331_v13  ;;  %v1777_v13 = vld [vmem:[%s3589_s24 + $0xd0] sm:$0xff]  ;;  %v335_v22 = vld [vmem:[%s3326_s18 + $0x3c0] sm:$0xff] }
  0xee   : > { %v2876_v3 = vpop.eup %2875  ;;  %v2175_v32 = vsel %vm2135_vm0, %v2027_v33, 0.0  ;;  %v2028_v18 = vmul.f32 %v2650_v53, %v1900_v23  ;;  %v1901_v47 = vmul.f32 %v2651_v11, %v1773_v17  ;;  %v2652_v35 = vadd.f32 -1.0, %v2874_v24  ;;  %v3725_v37 = vpop.xlane.xlu1 %677  ;;  %v463_v63 = vld [vmem:[%s3332_s21 + $0x3c0] sm:$0xff] }
  0xef   : > { %v2878_v5 = vpop.eup %2877  ;;  %v2176_v39 = vadd.f32 %v2175_v32, %v2174_v25  ;;  %2893 = vrcp.f32 %v1267_v28  ;;  %v1268_v42 = vadd.f32 1.0, %v2876_v3  ;;  %v2535_v4 = vmul.f32 -1.442695, %v3697_v54  ;;  %v1778_v25 = vld [vmem:[%s3589_s24 + $0xd8] sm:$0xff]  ;;  %v336_v3 = vld [vmem:[%s3326_s18 + $0x3c8] sm:$0xff] }
  0xf0   : > { %v2880_v6 = vpop.eup %2879  ;;  %v2177_v40 = vsel %vm2135_vm0, %v2028_v18, 0.0  ;;  %v2029_v43 = vmul.f32 %v2651_v11, %v1901_v47  ;;  %v1902_v44 = vmul.f32 %v2652_v35, %v1774_v27  ;;  %v1269_v50 = vadd.f32 1.0, %v2878_v5  ;;  %819 = vadd.xlane.f32.xlu0 %v3628_v15  ;;  %821 = vadd.xlane.f32.xlu1 %v3630_v16  ;;  %v464_v32 = vld [vmem:[%s3332_s21 + $0x3c8] sm:$0xff] }
  0xf1   : > { %v2882_v51 = vpop.eup %2881  ;;  %v2178_v29 = vadd.f32 %v2177_v40, %v2176_v39  ;;  %2895 = vrcp.f32 %v1268_v42  ;;  %v1270_v57 = vadd.f32 1.0, %v2880_v6  ;;  %v2536_v54 = vmul.f32 -1.442695, %v3700_v30  ;;  %v3733_v58 = vpop.xlane.xlu0 %679  ;;  %v1775_v30 = vld [vmem:[%s3589_s24 + $0xc0] sm:$0xff] }
  0xf2   : > { %v2179_v15 = vsel %vm2135_vm0, %v2029_v43, 0.0  ;;  %v2030_v26 = vmul.f32 %v2652_v35, %v1902_v44  ;;  %2897 = vrcp.f32 %v1269_v50  ;;  %v1271_v45 = vadd.f32 1.0, %v2882_v51  ;;  %v3739_v52 = vpop.xlane.xlu1 %681  ;;  %v1779_v35 = vld [vmem:[%s3589_s24 + $0xe0] sm:$0xff]  ;;  %v337_v44 = vld [vmem:[%s3326_s18 + $0x3d0] sm:$0xff] }
  0xf3   : > { %v2884_v2 = vpop.eup %2883  ;;  %v2180_v55 = vadd.f32 %v2179_v15, %v2178_v29  ;;  %2899 = vrcp.f32 %v1270_v57  ;;  %v2537_v0 = vmul.f32 -1.442695, %v3707_v8  ;;  %v3745_v16 = vmul.f32 %v460_v19, %v332_v49  ;;  %v465_v50 = vld [vmem:[%s3332_s21 + $0x3d0] sm:$0xff] }
  0xf4   : > { %v2886_v10 = vpop.eup %2885  ;;  %v2653_v59 = vadd.f32 -1.0, %v2884_v2  ;;  %2901 = vrcp.f32 %v1271_v45  ;;  %v2538_v12 = vmul.f32 -1.442695, %v3711_v62  ;;  %823 = vadd.xlane.f32.xlu0 %v3637_v38  ;;  %v3750_v46 = vmul.f32 %v461_v9, %v333_v60  ;;  %825 = vadd.xlane.f32.xlu1 %v3641_v48  ;;  %v1781_v15 = vld [vmem:[%s3589_s24 + $0xf0] sm:$0xff] }
  0xf5   : > { %v2888_v33 = vpop.eup %2887  ;;  %v2654_v53 = vadd.f32 -1.0, %v2886_v10  ;;  %2903 = vpow2.f32 %v2535_v4  ;;  %v2539_v8 = vmul.f32 -1.442695, %v676_v41  ;;  %v3753_v14 = vpop.xlane.xlu0 %683  ;;  %v3756_v36 = vmul.f32 %v462_v1, %v334_v61  ;;  %v1782_v1 = vld [vmem:[%s3589_s24 + $0xf8] sm:$0xff] }
  0xf6   : > { %v2890_v34 = vpop.eup %2889  ;;  %v2181_v62 = vsel %vm2135_vm0, %v2030_v26, 0.0  ;;  %v1903_v38 = vmul.f32 %v2653_v59, %v1775_v30  ;;  %v2655_v17 = vadd.f32 -1.0, %v2888_v33  ;;  %2905 = vpow2.f32 %v2536_v54  ;;  %v3759_v20 = vpop.xlane.xlu1 %685 }
  0xf7   : > { %v2892_v23 = vpop.eup %2891  ;;  %v2182_v11 = vadd.f32 %v2181_v62, %v2180_v55  ;;  %v1904_v24 = vmul.f32 %v2654_v53, %v1776_v7  ;;  %v1272_v48 = vadd.f32 1.0, %v2890_v34  ;;  %2907 = vpow2.f32 %v2537_v0  ;;  %v1783_v62 = vld [vmem:[%s3589_s24 + $0x100] sm:$0xff] }
  0xf8   : > { %v2031_v27 = vmul.f32 %v2653_v59, %v1903_v38  ;;  %v1905_v28 = vmul.f32 %v2655_v17, %v1777_v13  ;;  %v2656_v41 = vadd.f32 -1.0, %v2892_v23  ;;  %2909 = vpow2.f32 %v2538_v12  ;;  %827 = vadd.xlane.f32.xlu0 %v3644_v56  ;;  %829 = vadd.xlane.f32.xlu1 %v3716_v21 }
  0xf9   : > { %v2894_v18 = vpop.eup %2893  ;;  %v2032_v47 = vmul.f32 %v2654_v53, %v1904_v24  ;;  %2911 = vrcp.f32 %v1272_v48  ;;  %v2540_v5 = vmul.f32 -1.442695, %v3725_v37  ;;  %v3769_v39 = vpop.xlane.xlu0 %687  ;;  %v3772_v42 = vmul.f32 %v463_v63, %v335_v22  ;;  %v1780_v37 = vld [vmem:[%s3589_s24 + $0xe8] sm:$0xff] }
  0xfa   : > { %v2183_v4 = vsel %vm2135_vm0, %v2031_v27, 0.0  ;;  %v2033_v56 = vmul.f32 %v2655_v17, %v1905_v28  ;;  %v1906_v6 = vmul.f32 %v2656_v41, %v1778_v25  ;;  %v2657_v40 = vadd.f32 -1.0, %v2894_v18  ;;  %v3775_v43 = vpop.xlane.xlu1 %689 }
  0xfb   : > { %v2896_v49 = vpop.eup %2895  ;;  %v2184_v19 = vadd.f32 %v2183_v4, %v2182_v11  ;;  %2913 = vpow2.f32 %v2539_v8  ;;  %v2541_v51 = vmul.f32 -1.442695, %v3733_v58  ;;  %v3781_v21 = vmul.f32 %v464_v32, %v336_v3  ;;  %v466_v3 = vld [vmem:[%s3332_s21 + $0x3d8] sm:$0xff] }
  0xfc   : > { %v2898_v29 = vpop.eup %2897  ;;  %v2185_v57 = vsel %vm2135_vm0, %v2032_v47, 0.0  ;;  %v2034_v54 = vmul.f32 %v2656_v41, %v1906_v6  ;;  %v1907_v60 = vmul.f32 %v2657_v40, %v1779_v35  ;;  %v2658_v9 = vadd.f32 -1.0, %v2896_v49  ;;  %831 = vadd.xlane.f32.xlu0 %v3722_v31  ;;  %833 = vadd.xlane.f32.xlu1 %v3745_v16  ;;  %v467_v49 = vld [vmem:[%s3332_s21 + $0x3e0] sm:$0xff] }
  0xfd   : > { %v2900_v26 = vpop.eup %2899  ;;  %v2186_v45 = vadd.f32 %v2185_v57, %v2184_v19  ;;  %v2659_v61 = vadd.f32 -1.0, %v2898_v29  ;;  %2915 = vpow2.f32 %v2540_v5  ;;  %v3787_v2 = vpop.xlane.xlu0 %691  ;;  %v3790_v58 = vmul.f32 %v465_v50, %v337_v44  ;;  %v339_v50 = vld [vmem:[%s3326_s18 + $0x3e0] sm:$0xff]  ;;  %v340_v29 = vld [vmem:[%s3326_s18 + $0x3e8] sm:$0xff] }
  0xfe   : > { %v2902_v55 = vpop.eup %2901  ;;  %v2187_v30 = vsel %vm2135_vm0, %v2033_v56, 0.0  ;;  %v2035_v0 = vmul.f32 %v2657_v40, %v1907_v60  ;;  %v1908_v10 = vmul.f32 %v2658_v9, %v1780_v37  ;;  %v2660_v59 = vadd.f32 -1.0, %v2900_v26  ;;  %v3793_v7 = vpop.xlane.xlu1 %693  ;;  %v468_v57 = vld [vmem:[%s3332_s21 + $0x3e8] sm:$0xff] }
  0xff   : > { %v2904_v31 = vpop.eup %2903  ;;  %v2188_v12 = vadd.f32 %v2187_v30, %v2186_v45  ;;  %v1909_v33 = vmul.f32 %v2659_v61, %v1781_v15  ;;  %v2661_v53 = vadd.f32 -1.0, %v2902_v55  ;;  %2917 = vpow2.f32 %v2541_v51  ;;  %v341_v30 = vld [vmem:[%s3326_s18 + $0x3f0] sm:$0xff] }
 0x100   : > { %v2906_v13 = vpop.eup %2905  ;;  %v2189_v8 = vsel %vm2135_vm0, %v2034_v54, 0.0  ;;  %v2036_v16 = vmul.f32 %v2658_v9, %v1908_v10  ;;  %v1910_v34 = vmul.f32 %v2660_v59, %v1782_v1  ;;  %v1273_v38 = vadd.f32 1.0, %v2904_v31  ;;  %835 = vadd.xlane.f32.xlu0 %v3750_v46  ;;  %837 = vadd.xlane.f32.xlu1 %v3756_v36  ;;  %v338_v46 = vld [vmem:[%s3326_s18 + $0x3d8] sm:$0xff]  ;;  %v1784_v36 = vld [vmem:[%s3589_s24 + $0x108] sm:$0xff] }
 0x101   : > { %v2908_v17 = vpop.eup %2907  ;;  %v2190_v22 = vadd.f32 %v2189_v8, %v2188_v12  ;;  %v1274_v63 = vadd.f32 1.0, %v2906_v13  ;;  %v2542_v23 = vmul.f32 -1.442695, %v3739_v52  ;;  %v2543_v11 = vmul.f32 -1.442695, %v3753_v14  ;;  %v3800_v24 = vpop.xlane.xlu0 %695  ;;  %v470_v12 = vld [vmem:[%s3332_s21 + $0x3f8] sm:$0xff] }
 0x102   : > { %v2910_v25 = vpop.eup %2909  ;;  %v2191_v48 = vsel %vm2135_vm0, %v2035_v0, 0.0  ;;  %v2037_v27 = vmul.f32 %v2659_v61, %v1909_v33  ;;  %2919 = vrcp.f32 %v1273_v38  ;;  %v1275_v28 = vadd.f32 1.0, %v2908_v17  ;;  %v3804_v41 = vpop.xlane.xlu1 %697  ;;  %v469_v0 = vld [vmem:[%s3332_s21 + $0x3f0] sm:$0xff]  ;;  %v1786_v17 = vld [vmem:[%s3589_s24 + $0x118] sm:$0xff] }
 0x103   : > { %v2912_v32 = vpop.eup %2911  ;;  %v2192_v18 = vadd.f32 %v2191_v48, %v2190_v22  ;;  %v2193_v52 = vsel %vm2135_vm0, %v2036_v16, 0.0  ;;  %v1911_v14 = vmul.f32 %v2661_v53, %v1783_v62  ;;  %2921 = vrcp.f32 %v1274_v63  ;;  %v1785_v16 = vld [vmem:[%s3589_s24 + $0x110] sm:$0xff] }
 0x104   : > { %v2038_v47 = vmul.f32 %v2660_v59, %v1910_v34  ;;  %v2662_v35 = vadd.f32 -1.0, %v2912_v32  ;;  %2923 = vrcp.f32 %v1275_v28  ;;  %v1276_v5 = vadd.f32 1.0, %v2910_v25  ;;  %839 = vadd.xlane.f32.xlu0 %v3772_v42  ;;  %841 = vadd.xlane.f32.xlu1 %v3781_v21  ;;  %v1787_v25 = vld [vmem:[%s3589_s24 + $0x120] sm:$0xff] }
 0x105   : > { %v2914_v4 = vpop.eup %2913  ;;  %v2194_v56 = vadd.f32 %v2193_v52, %v2192_v18  ;;  %2925 = vpow2.f32 %v2542_v23  ;;  %v2544_v6 = vmul.f32 -1.442695, %v3759_v20  ;;  %v3812_v40 = vpop.xlane.xlu0 %699  ;;  %v594_v44 = vmul.f32 %v466_v3, %v338_v46  ;;  %v1788_v18 = vld [vmem:[%s3589_s24 + $0x128] sm:$0xff] }
 0x106   : > { %v2195_v19 = vsel %vm2135_vm0, %v2037_v27, 0.0  ;;  %2927 = vrcp.f32 %v1276_v5  ;;  %v1277_v37 = vadd.f32 1.0, %v2914_v4  ;;  %v2545_v51 = vmul.f32 -1.442695, %v3769_v39  ;;  %v3819_v42 = vpop.xlane.xlu1 %701 }
 0x107   : > { %v2916_v54 = vpop.eup %2915  ;;  %v2196_v60 = vadd.f32 %v2195_v19, %v2194_v56  ;;  %v2039_v20 = vmul.f32 %v2661_v53, %v1911_v14  ;;  %v1912_v9 = vmul.f32 %v2662_v35, %v1784_v36  ;;  %2929 = vpow2.f32 %v2543_v11 }
 0x108   : > { %v2197_v21 = vsel %vm2135_vm0, %v2038_v47, 0.0  ;;  %2931 = vrcp.f32 %v1277_v37  ;;  %v1278_v15 = vadd.f32 1.0, %v2916_v54  ;;  %843 = vadd.xlane.f32.xlu0 %v3790_v58  ;;  %v595_v39 = vmul.f32 %v467_v49, %v339_v50  ;;  %845 = vadd.xlane.f32.xlu1 %v594_v44  ;;  %v342_v58 = vld [vmem:[%s3326_s18 + $0x3f8] sm:$0xff] }
 0x109   : > { %v2918_v26 = vpop.eup %2917  ;;  %v2198_v45 = vadd.f32 %v2197_v21, %v2196_v60  ;;  %2933 = vpow2.f32 %v2544_v6  ;;  %v2546_v61 = vmul.f32 -1.442695, %v3775_v43  ;;  %v3826_v1 = vpop.xlane.xlu0 %703  ;;  %v596_v55 = vmul.f32 %v468_v57, %v340_v29  ;;  %v1789_v6 = vld [vmem:[%s3589_s24 + $0x130] sm:$0xff]  ;;  %v1790_v60 = vld [vmem:[%s3589_s24 + $0x138] sm:$0xff] }
 0x10a   : > { %2935 = vrcp.f32 %v1278_v15  ;;  %v1279_v10 = vadd.f32 1.0, %v2918_v26  ;;  %v2547_v59 = vmul.f32 -1.442695, %v3787_v2  ;;  %v3831_v31 = vpop.xlane.xlu1 %705  ;;  %v2199_v33 = vsel %vm2135_vm0, %v2039_v20, 0.0 }
 0x10b   : > { %v2040_v53 = vmul.f32 %v2662_v35, %v1912_v9  ;;  %2937 = vpow2.f32 %v2545_v51  ;;  %v2548_v43 = vmul.f32 -1.442695, %v3793_v7  ;;  %v2200_v8 = vadd.f32 %v2199_v33, %v2198_v45 }
 0x10c   : > { %v2920_v13 = vpop.eup %2919  ;;  %2939 = vrcp.f32 %v1279_v10  ;;  %v2549_v34 = vmul.f32 -1.442695, %v3800_v24  ;;  %847 = vadd.xlane.f32.xlu0 %v595_v39  ;;  %v597_v2 = vmul.f32 %v469_v0, %v341_v30  ;;  %v2550_v22 = vmul.f32 -1.442695, %v3804_v41  ;;  %849 = vadd.xlane.f32.xlu1 %v596_v55  ;;  %v1791_v30 = vld [vmem:[%s3589_s24 + $0x140] sm:$0xff] }
 0x10d   : > { %v2922_v62 = vpop.eup %2921  ;;  %v2663_v38 = vadd.f32 -1.0, %v2920_v13  ;;  %2941 = vpow2.f32 %v2546_v61  ;;  %v3841_v63 = vpop.xlane.xlu0 %707  ;;  %v598_v7 = vmul.f32 %v470_v12, %v342_v58  ;;  %v2201_v27 = vsel %vm2135_vm0, %v2040_v53, 0.0 }
 0x10e   : > { %v2924_v23 = vpop.eup %2923  ;;  %v2664_v11 = vadd.f32 -1.0, %v2922_v62  ;;  %2943 = vpow2.f32 %v2547_v59  ;;  %v3844_v48 = vpop.xlane.xlu1 %709  ;;  %v2202_v41 = vadd.f32 %v2201_v27, %v2200_v8 }
 0x10f   : > { %v2926_v24 = vpop.eup %2925  ;;  %v1913_v28 = vmul.f32 %v2663_v38, %v1785_v16  ;;  %v2665_v46 = vadd.f32 -1.0, %v2924_v23  ;;  %2945 = vpow2.f32 %v2548_v43 }
 0x110   : > { %v2928_v3 = vpop.eup %2927  ;;  %v1914_v32 = vmul.f32 %v2664_v11, %v1786_v17  ;;  %v1280_v52 = vadd.f32 1.0, %v2926_v24  ;;  %2947 = vpow2.f32 %v2549_v34  ;;  %851 = vadd.xlane.f32.xlu0 %v597_v2  ;;  %853 = vadd.xlane.f32.xlu1 %v598_v7 }
 0x111   : > { %v2930_v14 = vpop.eup %2929  ;;  %v2041_v47 = vmul.f32 %v2663_v38, %v1913_v28  ;;  %v1915_v36 = vmul.f32 %v2665_v46, %v1787_v25  ;;  %v2666_v35 = vadd.f32 -1.0, %v2928_v3  ;;  %2949 = vpow2.f32 %v2550_v22  ;;  %v3848_v5 = vpop.xlane.xlu0 %711 }
 0x112   : > { %v2932_v4 = vpop.eup %2931  ;;  %v2042_v56 = vmul.f32 %v2664_v11, %v1914_v32  ;;  %2951 = vrcp.f32 %v1280_v52  ;;  %v1281_v44 = vadd.f32 1.0, %v2930_v14  ;;  %v3851_v50 = vpop.xlane.xlu1 %713  ;;  %v2551_v11 = vmul.f32 -1.442695, %v3812_v40  ;;  %v1792_v32 = vld [vmem:[%s3589_s24 + $0x148] sm:$0xff] }
 0x113   : > { %v2934_v49 = vpop.eup %2933  ;;  %v2203_v19 = vsel %vm2135_vm0, %v2041_v47, 0.0  ;;  %v2043_v37 = vmul.f32 %v2665_v46, %v1915_v36  ;;  %v1916_v51 = vmul.f32 %v2666_v35, %v1788_v18  ;;  %v2667_v29 = vadd.f32 -1.0, %v2932_v4 }
 0x114   : > { %v2936_v57 = vpop.eup %2935  ;;  %v2204_v54 = vadd.f32 %v2203_v19, %v2202_v41  ;;  %2953 = vrcp.f32 %v1281_v44  ;;  %v1282_v20 = vadd.f32 1.0, %v2934_v49  ;;  %v2205_v21 = vsel %vm2135_vm0, %v2042_v56, 0.0  ;;  %v1793_v56 = vld [vmem:[%s3589_s24 + $0x150] sm:$0xff] }
 0x115   : > { %v2938_v9 = vpop.eup %2937  ;;  %v2044_v15 = vmul.f32 %v2666_v35, %v1916_v51  ;;  %v1917_v39 = vmul.f32 %v2667_v29, %v1789_v6  ;;  %v2668_v26 = vadd.f32 -1.0, %v2936_v57  ;;  %v3856_v45 = vpop.xlane.xlu0 %715  ;;  %v2207_v58 = vsel %vm2135_vm0, %v2043_v37, 0.0 }
 0x116   : > { %v2940_v61 = vpop.eup %2939  ;;  %v2206_v55 = vadd.f32 %v2205_v21, %v2204_v54  ;;  %2955 = vrcp.f32 %v1282_v20  ;;  %v1283_v0 = vadd.f32 1.0, %v2938_v9  ;;  %v3859_v10 = vpop.xlane.xlu1 %717  ;;  %v2552_v52 = vmul.f32 -1.442695, %v3819_v42  ;;  %v1795_v9 = vld [vmem:[%s3589_s24 + $0x160] sm:$0xff] }
 0x117   : > { %v2942_v59 = vpop.eup %2941  ;;  %v2045_v12 = vmul.f32 %v2667_v29, %v1917_v39  ;;  %v1918_v33 = vmul.f32 %v2668_v26, %v1790_v60  ;;  %v2669_v53 = vadd.f32 -1.0, %v2940_v61  ;;  %v2209_v34 = vsel %vm2135_vm0, %v2044_v15, 0.0  ;;  %v1794_v29 = vld [vmem:[%s3589_s24 + $0x158] sm:$0xff] }
 0x118   : > { %v2944_v43 = vpop.eup %2943  ;;  %v2208_v13 = vadd.f32 %v2207_v58, %v2206_v55  ;;  %2957 = vrcp.f32 %v1283_v0  ;;  %v1284_v8 = vadd.f32 1.0, %v2942_v59  ;;  %v2553_v40 = vmul.f32 -1.442695, %v3826_v1  ;;  %v1796_v0 = vld [vmem:[%s3589_s24 + $0x168] sm:$0xff] }
 0x119   : > { %v2946_v16 = vpop.eup %2945  ;;  %v2046_v2 = vmul.f32 %v2668_v26, %v1918_v33  ;;  %v1919_v62 = vmul.f32 %v2669_v53, %v1791_v30  ;;  %v1285_v38 = vadd.f32 1.0, %v2944_v43  ;;  %v3863_v17 = vpop.xlane.xlu0 %719  ;;  %v2211_v27 = vsel %vm2135_vm0, %v2045_v12, 0.0  ;;  %v1797_v43 = vld [vmem:[%s3589_s24 + $0x170] sm:$0xff] }
 0x11a   : > { %v2948_v22 = vpop.eup %2947  ;;  %v2210_v7 = vadd.f32 %v2209_v34, %v2208_v13  ;;  %2959 = vrcp.f32 %v1284_v8  ;;  %v1286_v23 = vadd.f32 1.0, %v2946_v16  ;;  %v3866_v25 = vpop.xlane.xlu1 %721  ;;  %v2554_v6 = vmul.f32 -1.442695, %v3831_v31 }
 0x11b   : > { %v2950_v24 = vpop.eup %2949  ;;  %v2047_v28 = vmul.f32 %v2669_v53, %v1919_v62  ;;  %2961 = vrcp.f32 %v1285_v38  ;;  %v1287_v46 = vadd.f32 1.0, %v2948_v22  ;;  %v2213_v14 = vsel %vm2135_vm0, %v2046_v2, 0.0  ;;  %v1798_v2 = vld [vmem:[%s3589_s24 + $0x178] sm:$0xff] }
 0x11c   : > { %v2952_v3 = vpop.eup %2951  ;;  %v2212_v41 = vadd.f32 %v2211_v27, %v2210_v7  ;;  %2963 = vrcp.f32 %v1286_v23  ;;  %v1288_v18 = vadd.f32 1.0, %v2950_v24  ;;  %v2555_v1 = vmul.f32 -1.442695, %v3841_v63 }
 0x11d   : > { %v2670_v47 = vadd.f32 -1.0, %v2952_v3  ;;  %2965 = vrcp.f32 %v1287_v46  ;;  %v3873_v36 = vpop.xlane.xlu0 %723  ;;  %v2215_v42 = vsel %vm2135_vm0, %v2047_v28, 0.0  ;;  %v2556_v21 = vmul.f32 -1.442695, %v3844_v48 }
 0x11e   : > { %v2954_v35 = vpop.eup %2953  ;;  %v2214_v4 = vadd.f32 %v2213_v14, %v2212_v41  ;;  %2967 = vrcp.f32 %v1288_v18  ;;  %v3877_v44 = vpop.xlane.xlu1 %725  ;;  %v2557_v59 = vmul.f32 -1.442695, %v3848_v5  ;;  %v1799_v18 = vld [vmem:[%s3589_s24 + $0x180] sm:$0xff] }
 0x11f   : > { %v1920_v49 = vmul.f32 %v2670_v47, %v1792_v32  ;;  %v2671_v19 = vadd.f32 -1.0, %v2954_v35  ;;  %2969 = vpow2.f32 %v2551_v11  ;;  %v2558_v35 = vmul.f32 -1.442695, %v3851_v50 }
 0x120   : > { %v2956_v37 = vpop.eup %2955  ;;  %v2216_v51 = vadd.f32 %v2215_v42, %v2214_v4  ;;  %2971 = vpow2.f32 %v2552_v52 }
 0x121   : > { %v2048_v57 = vmul.f32 %v2670_v47, %v1920_v49  ;;  %v1921_v54 = vmul.f32 %v2671_v19, %v1793_v56  ;;  %v2672_v60 = vadd.f32 -1.0, %v2956_v37  ;;  %2973 = vpow2.f32 %v2553_v40  ;;  %v3882_v31 = vpop.xlane.xlu0 %727 }
 0x122   : > { %v2958_v20 = vpop.eup %2957  ;;  %2975 = vpow2.f32 %v2554_v6  ;;  %v3886_v15 = vpop.xlane.xlu1 %729 }
 0x123   : > { %v2217_v39 = vsel %vm2135_vm0, %v2048_v57, 0.0  ;;  %v2049_v26 = vmul.f32 %v2671_v19, %v1921_v54  ;;  %v1922_v61 = vmul.f32 %v2672_v60, %v1794_v29  ;;  %v2673_v63 = vadd.f32 -1.0, %v2958_v20  ;;  %v1800_v54 = vld [vmem:[%s3589_s24 + $0x188] sm:$0xff] }
 0x124   : > { %v2960_v55 = vpop.eup %2959  ;;  %v2218_v30 = vadd.f32 %v2217_v39, %v2216_v51  ;;  %2977 = vpow2.f32 %v2555_v1 }
 0x125   : > { %v2962_v58 = vpop.eup %2961  ;;  %v2219_v12 = vsel %vm2135_vm0, %v2049_v26, 0.0  ;;  %v2050_v33 = vmul.f32 %v2672_v60, %v1922_v61  ;;  %v1923_v48 = vmul.f32 %v2673_v63, %v1795_v9  ;;  %v2674_v53 = vadd.f32 -1.0, %v2960_v55  ;;  %v3893_v13 = vpop.xlane.xlu0 %731 }
 0x126   : > { %v2964_v8 = vpop.eup %2963  ;;  %v2220_v16 = vadd.f32 %v2219_v12, %v2218_v30  ;;  %v2675_v34 = vadd.f32 -1.0, %v2962_v58  ;;  %2979 = vpow2.f32 %v2556_v21  ;;  %v3896_v62 = vpop.xlane.xlu1 %733  ;;  %v2559_v21 = vmul.f32 -1.442695, %v3856_v45 }
 0x127   : > { %v2966_v38 = vpop.eup %2965  ;;  %v2221_v5 = vsel %vm2135_vm0, %v2050_v33, 0.0  ;;  %v2051_v22 = vmul.f32 %v2673_v63, %v1923_v48  ;;  %v1924_v7 = vmul.f32 %v2674_v53, %v1796_v0  ;;  %v2676_v23 = vadd.f32 -1.0, %v2964_v8 }
 0x128   : > { %v2968_v11 = vpop.eup %2967  ;;  %v2222_v24 = vadd.f32 %v2221_v5, %v2220_v16  ;;  %v1925_v27 = vmul.f32 %v2675_v34, %v1797_v43  ;;  %v2677_v28 = vadd.f32 -1.0, %v2966_v38  ;;  %2981 = vpow2.f32 %v2557_v59  ;;  %v1801_v38 = vld [vmem:[%s3589_s24 + $0x190] sm:$0xff] }
 0x129   : > { %v2970_v46 = vpop.eup %2969  ;;  %v2223_v3 = vsel %vm2135_vm0, %v2051_v22, 0.0  ;;  %v2052_v41 = vmul.f32 %v2674_v53, %v1924_v7  ;;  %v1926_v32 = vmul.f32 %v2676_v23, %v1798_v2  ;;  %v3902_v4 = vpop.xlane.xlu0 %735  ;;  %v2678_v29 = vadd.f32 -1.0, %v2968_v11  ;;  %v1802_v7 = vld [vmem:[%s3589_s24 + $0x198] sm:$0xff] }
 0x12a   : > { %v2972_v52 = vpop.eup %2971  ;;  %v2224_v14 = vadd.f32 %v2223_v3, %v2222_v24  ;;  %v2053_v47 = vmul.f32 %v2675_v34, %v1925_v27  ;;  %v1289_v40 = vadd.f32 1.0, %v2970_v46  ;;  %v3905_v49 = vpop.xlane.xlu1 %737  ;;  %v1927_v51 = vmul.f32 %v2677_v28, %v1799_v18  ;;  %v1803_v46 = vld [vmem:[%s3589_s24 + $0x1a0] sm:$0xff] }
 0x12b   : > { %v2974_v56 = vpop.eup %2973  ;;  %v2225_v6 = vsel %vm2135_vm0, %v2052_v41, 0.0  ;;  %v1290_v42 = vadd.f32 1.0, %v2972_v52  ;;  %v2054_v57 = vmul.f32 %v2676_v23, %v1926_v32  ;;  %v1928_v61 = vmul.f32 %v2678_v29, %v1800_v54 }
 0x12c   : > { %v2976_v19 = vpop.eup %2975  ;;  %v2226_v37 = vadd.f32 %v2225_v6, %v2224_v14  ;;  %2983 = vrcp.f32 %v1289_v40  ;;  %v2227_v1 = vsel %vm2135_vm0, %v2053_v47, 0.0  ;;  %v1291_v60 = vadd.f32 1.0, %v2974_v56  ;;  %v1804_v14 = vld [vmem:[%s3589_s24 + $0x1a8] sm:$0xff] }
 0x12d   : > { %2985 = vrcp.f32 %v1290_v42  ;;  %v1292_v9 = vadd.f32 1.0, %v2976_v19  ;;  %v2560_v63 = vmul.f32 -1.442695, %v3859_v10  ;;  %v3911_v55 = vpop.xlane.xlu0 %739  ;;  %v2229_v30 = vsel %vm2135_vm0, %v2054_v57, 0.0 }
 0x12e   : > { %v2978_v50 = vpop.eup %2977  ;;  %v2228_v20 = vadd.f32 %v2227_v1, %v2226_v37  ;;  %2987 = vpow2.f32 %v2558_v35  ;;  %v2055_v0 = vmul.f32 %v2677_v28, %v1927_v51  ;;  %v3914_v58 = vpop.xlane.xlu1 %741  ;;  %v2561_v45 = vmul.f32 -1.442695, %v3863_v17 }
 0x12f   : > { %2989 = vrcp.f32 %v1291_v60  ;;  %v1293_v39 = vadd.f32 1.0, %v2978_v50  ;;  %v2562_v10 = vmul.f32 -1.442695, %v3866_v25  ;;  %v2563_v53 = vmul.f32 -1.442695, %v3873_v36 }
 0x130   : > { %v2980_v26 = vpop.eup %2979  ;;  %2991 = vrcp.f32 %v1292_v9  ;;  %v2230_v33 = vadd.f32 %v2229_v30, %v2228_v20  ;;  %v2231_v43 = vsel %vm2135_vm0, %v2055_v0, 0.0  ;;  %v2056_v8 = vmul.f32 %v2678_v29, %v1928_v61 }
 0x131   : > { %2993 = vrcp.f32 %v1293_v39  ;;  %v1294_v59 = vadd.f32 1.0, %v2980_v26  ;;  %v2564_v16 = vmul.f32 -1.442695, %v3877_v44  ;;  %v2565_v17 = vmul.f32 -1.442695, %v3882_v31  ;;  %v3923_v5 = vpop.xlane.xlu0 %743 }
 0x132   : > { %v2982_v12 = vpop.eup %2981  ;;  %2995 = vpow2.f32 %v2559_v21  ;;  %v2232_v2 = vadd.f32 %v2231_v43, %v2230_v33  ;;  %v3926_v36 = vpop.xlane.xlu1 %745  ;;  %v2566_v44 = vmul.f32 -1.442695, %v3886_v15  ;;  %v2567_v24 = vmul.f32 -1.442695, %v3893_v13  ;;  %v1805_v15 = vld [vmem:[%s3589_s24 + $0x1b0] sm:$0xff]  ;;  %v1806_v21 = vld [vmem:[%s3589_s24 + $0x1b8] sm:$0xff] }
 0x133   : > { %2997 = vrcp.f32 %v1294_v59  ;;  %v1295_v48 = vadd.f32 1.0, %v2982_v12  ;;  %v2233_v31 = vsel %vm2135_vm0, %v2056_v8, 0.0 }
 0x134   : > { %2999 = vpow2.f32 %v2560_v63  ;;  %v2234_v32 = vadd.f32 %v2233_v31, %v2232_v2  ;;  %v1807_v63 = vld [vmem:[%s3589_s24 + $0x1c0] sm:$0xff] }
 0x135   : > { %3001 = vrcp.f32 %v1295_v48  ;;  %v3934_v19 = vpop.xlane.xlu0 %747 }
 0x136   : > { %v2984_v34 = vpop.eup %2983  ;;  %3003 = vpow2.f32 %v2561_v45  ;;  %v3937_v57 = vpop.xlane.xlu1 %749 }
 0x137   : > { %v2986_v22 = vpop.eup %2985  ;;  %v2679_v25 = vadd.f32 -1.0, %v2984_v34  ;;  %3005 = vpow2.f32 %v2562_v10 }
 0x138   : > { %v2988_v23 = vpop.eup %2987  ;;  %v2680_v11 = vadd.f32 -1.0, %v2986_v22  ;;  %3007 = vpow2.f32 %v2563_v53 }
 0x139   : > { %v2990_v27 = vpop.eup %2989  ;;  %v1929_v28 = vmul.f32 %v2679_v25, %v1801_v38  ;;  %v1296_v3 = vadd.f32 1.0, %v2988_v23  ;;  %3009 = vpow2.f32 %v2564_v16  ;;  %v3943_v2 = vpop.xlane.xlu0 %751 }
 0x13a   : > { %v2992_v41 = vpop.eup %2991  ;;  %v1930_v18 = vmul.f32 %v2680_v11, %v1802_v7  ;;  %v2681_v52 = vadd.f32 -1.0, %v2990_v27  ;;  %3011 = vpow2.f32 %v2565_v17  ;;  %v3946_v7 = vpop.xlane.xlu1 %753 }
 0x13b   : > { %v2994_v47 = vpop.eup %2993  ;;  %v2057_v40 = vmul.f32 %v2679_v25, %v1929_v28  ;;  %v2682_v35 = vadd.f32 -1.0, %v2992_v41  ;;  %3013 = vrcp.f32 %v1296_v3 }
 0x13c   : > { %v2996_v13 = vpop.eup %2995  ;;  %v2058_v56 = vmul.f32 %v2680_v11, %v1930_v18  ;;  %v1931_v6 = vmul.f32 %v2681_v52, %v1803_v46  ;;  %v2683_v42 = vadd.f32 -1.0, %v2994_v47  ;;  %3015 = vpow2.f32 %v2566_v44  ;;  %v1808_v46 = vld [vmem:[%s3589_s24 + $0x1c8] sm:$0xff] }
 0x13d   : > { %v2998_v37 = vpop.eup %2997  ;;  %v2235_v51 = vsel %vm2135_vm0, %v2057_v40, 0.0  ;;  %v1932_v29 = vmul.f32 %v2682_v35, %v1804_v14  ;;  %v1297_v1 = vadd.f32 1.0, %v2996_v13  ;;  %3017 = vpow2.f32 %v2567_v24 }
 0x13e   : > { %v3000_v54 = vpop.eup %2999  ;;  %v2236_v60 = vadd.f32 %v2235_v51, %v2234_v32  ;;  %v2237_v50 = vsel %vm2135_vm0, %v2058_v56, 0.0  ;;  %v2059_v20 = vmul.f32 %v2681_v52, %v1931_v6  ;;  %v1933_v9 = vmul.f32 %v2683_v42, %v1805_v15  ;;  %v3954_v56 = vpop.xlane.xlu0 %755 }
 0x13f   : > { %v3002_v39 = vpop.eup %3001  ;;  %v2060_v26 = vmul.f32 %v2682_v35, %v1932_v29  ;;  %v2684_v61 = vadd.f32 -1.0, %v2998_v37  ;;  %3019 = vrcp.f32 %v1297_v1  ;;  %v1298_v30 = vadd.f32 1.0, %v3000_v54  ;;  %v1809_v37 = vld [vmem:[%s3589_s24 + $0x1d0] sm:$0xff]  ;;  %v3960_v29 = vpop.xlane.xlu1 %757 }
 0x140   : > { %v3004_v0 = vpop.eup %3003  ;;  %v2238_v59 = vadd.f32 %v2237_v50, %v2236_v60  ;;  %v2239_v12 = vsel %vm2135_vm0, %v2059_v20, 0.0  ;;  %v2685_v33 = vadd.f32 -1.0, %v3002_v39  ;;  %v2061_v48 = vmul.f32 %v2683_v42, %v1933_v9  ;;  %v1810_v50 = vld [vmem:[%s3589_s24 + $0x1d8] sm:$0xff] }
 0x141   : > { %v3006_v45 = vpop.eup %3005  ;;  %v1934_v10 = vmul.f32 %v2684_v61, %v1806_v21  ;;  %3021 = vrcp.f32 %v1298_v30  ;;  %v1299_v53 = vadd.f32 1.0, %v3004_v0  ;;  %v2241_v17 = vsel %vm2135_vm0, %v2060_v26, 0.0  ;;  %v1811_v26 = vld [vmem:[%s3589_s24 + $0x1e0] sm:$0xff] }
 0x142   : > { %v3008_v43 = vpop.eup %3007  ;;  %v2240_v8 = vadd.f32 %v2239_v12, %v2238_v59  ;;  %v1935_v16 = vmul.f32 %v2685_v33, %v1807_v63  ;;  %v1300_v34 = vadd.f32 1.0, %v3006_v45  ;;  %v2568_v24 = vmul.f32 -1.442695, %v3896_v62  ;;  %v1812_v12 = vld [vmem:[%s3589_s24 + $0x1e8] sm:$0xff] }
 0x143   : > { %v3010_v38 = vpop.eup %3009  ;;  %v2062_v22 = vmul.f32 %v2684_v61, %v1934_v10  ;;  %3023 = vrcp.f32 %v1299_v53  ;;  %v1301_v25 = vadd.f32 1.0, %v3008_v43  ;;  %v2243_v31 = vsel %vm2135_vm0, %v2061_v48, 0.0  ;;  %v1813_v48 = vld [vmem:[%s3589_s24 + $0x1f0] sm:$0xff]  ;;  %v3971_v10 = vpop.xlane.xlu1 %761 }
 0x144   : > { %v3012_v23 = vpop.eup %3011  ;;  %v2242_v11 = vadd.f32 %v2241_v17, %v2240_v8  ;;  %3025 = vrcp.f32 %v1300_v34  ;;  %v1302_v44 = vadd.f32 1.0, %v3010_v38  ;;  %v2063_v28 = vmul.f32 %v2685_v33, %v1935_v16  ;;  %v1814_v34 = vld [vmem:[%s3589_s24 + $0x1f8] sm:$0xff] }
 0x145   : > { %v3014_v27 = vpop.eup %3013  ;;  %3027 = vrcp.f32 %v1301_v25  ;;  %v1303_v3 = vadd.f32 1.0, %v3012_v23  ;;  %v2569_v52 = vmul.f32 -1.442695, %v3902_v4  ;;  %v2245_v47 = vsel %vm2135_vm0, %v2062_v22, 0.0  ;;  %v1815_v23 = vld [vmem:[%s3589_s24 + $0x200] sm:$0xff] }
 0x146   : > { %v3016_v41 = vpop.eup %3015  ;;  %v2244_v32 = vadd.f32 %v2243_v31, %v2242_v11  ;;  %v2686_v18 = vadd.f32 -1.0, %v3014_v27  ;;  %3029 = vrcp.f32 %v1302_v44  ;;  %v2570_v62 = vmul.f32 -1.442695, %v3905_v49 }
 0x147   : > { %v3018_v14 = vpop.eup %3017  ;;  %3031 = vrcp.f32 %v1303_v3  ;;  %v1304_v40 = vadd.f32 1.0, %v3016_v41  ;;  %v2247_v42 = vsel %vm2135_vm0, %v2063_v28, 0.0  ;;  %v2571_v4 = vmul.f32 -1.442695, %v3911_v55 }
 0x148   : > { %v2246_v35 = vadd.f32 %v2245_v47, %v2244_v32  ;;  %v1936_v15 = vmul.f32 %v2686_v18, %v1808_v46  ;;  %v1305_v13 = vadd.f32 1.0, %v3018_v14  ;;  %3033 = vpow2.f32 %v2568_v24 }
 0x149   : > { %v3020_v6 = vpop.eup %3019  ;;  %3035 = vrcp.f32 %v1304_v40  ;;  %v2572_v51 = vmul.f32 -1.442695, %v3914_v58  ;;  %v2573_v20 = vmul.f32 -1.442695, %v3923_v5  ;;  %v2574_v61 = vmul.f32 -1.442695, %v3926_v36  ;;  %v3968_v5 = vpop.xlane.xlu0 %759 }
 0x14a   : > { %v2248_v49 = vadd.f32 %v2247_v42, %v2246_v35  ;;  %v2064_v1 = vmul.f32 %v2686_v18, %v1936_v15  ;;  %v2687_v54 = vadd.f32 -1.0, %v3020_v6  ;;  %3037 = vrcp.f32 %v1305_v13  ;;  %v1816_v40 = vld [vmem:[%s3589_s24 + $0x208] sm:$0xff]  ;;  %v3981_v6 = vpop.xlane.xlu1 %765 }
 0x14b   : > { %v3022_v60 = vpop.eup %3021  ;;  %3039 = vpow2.f32 %v2569_v52 }
 0x14c   : > { %v2249_v9 = vsel %vm2135_vm0, %v2064_v1, 0.0  ;;  %v1937_v21 = vmul.f32 %v2687_v54, %v1809_v37  ;;  %v2688_v39 = vadd.f32 -1.0, %v3022_v60  ;;  %3041 = vpow2.f32 %v2570_v62 }
 0x14d   : > { %v3024_v55 = vpop.eup %3023  ;;  %v2250_v58 = vadd.f32 %v2249_v9, %v2248_v49  ;;  %3043 = vpow2.f32 %v2571_v4  ;;  %v3979_v35 = vpop.xlane.xlu0 %763 }
 0x14e   : > { %v3026_v63 = vpop.eup %3025  ;;  %v2065_v30 = vmul.f32 %v2687_v54, %v1937_v21  ;;  %v1938_v0 = vmul.f32 %v2688_v39, %v1810_v50  ;;  %v2689_v59 = vadd.f32 -1.0, %v3024_v55  ;;  %3045 = vpow2.f32 %v2572_v51  ;;  %v1817_v21 = vld [vmem:[%s3589_s24 + $0x210] sm:$0xff] }
 0x14f   : > { %v3028_v33 = vpop.eup %3027  ;;  %v2690_v45 = vadd.f32 -1.0, %v3026_v63  ;;  %3047 = vpow2.f32 %v2573_v20 }
 0x150   : > { %v3030_v53 = vpop.eup %3029  ;;  %v2251_v43 = vsel %vm2135_vm0, %v2065_v30, 0.0  ;;  %v2066_v36 = vmul.f32 %v2688_v39, %v1938_v0  ;;  %v1939_v8 = vmul.f32 %v2689_v59, %v1811_v26  ;;  %v2691_v16 = vadd.f32 -1.0, %v3028_v33 }
 0x151   : > { %v3032_v38 = vpop.eup %3031  ;;  %v2252_v17 = vadd.f32 %v2251_v43, %v2250_v58  ;;  %v1940_v22 = vmul.f32 %v2690_v45, %v1812_v12  ;;  %v2692_v25 = vadd.f32 -1.0, %v3030_v53  ;;  %3049 = vpow2.f32 %v2574_v61  ;;  %v3990_v53 = vpop.xlane.xlu1 %769 }
 0x152   : > { %v3034_v11 = vpop.eup %3033  ;;  %v2253_v44 = vsel %vm2135_vm0, %v2066_v36, 0.0  ;;  %v2067_v24 = vmul.f32 %v2689_v59, %v1939_v8  ;;  %v1941_v27 = vmul.f32 %v2691_v16, %v1813_v48  ;;  %v2693_v31 = vadd.f32 -1.0, %v3032_v38  ;;  %v3988_v59 = vpop.xlane.xlu0 %767 }
 0x153   : > { %v3036_v28 = vpop.eup %3035  ;;  %v2254_v46 = vadd.f32 %v2253_v44, %v2252_v17  ;;  %v2068_v3 = vmul.f32 %v2690_v45, %v1940_v22  ;;  %v1942_v41 = vmul.f32 %v2692_v25, %v1814_v34  ;;  %v1306_v32 = vadd.f32 1.0, %v3034_v11  ;;  %v1818_v11 = vld [vmem:[%s3589_s24 + $0x218] sm:$0xff] }
 0x154   : > { %v3038_v18 = vpop.eup %3037  ;;  %v2255_v52 = vsel %vm2135_vm0, %v2067_v24, 0.0  ;;  %v2069_v14 = vmul.f32 %v2691_v16, %v1941_v27  ;;  %v1943_v47 = vmul.f32 %v2693_v31, %v1815_v23  ;;  %v2694_v62 = vadd.f32 -1.0, %v3036_v28 }
 0x155   : > { %v3040_v15 = vpop.eup %3039  ;;  %v2256_v13 = vadd.f32 %v2255_v52, %v2254_v46  ;;  %v2257_v37 = vsel %vm2135_vm0, %v2068_v3, 0.0  ;;  %v2070_v4 = vmul.f32 %v2692_v25, %v1942_v41  ;;  %3051 = vrcp.f32 %v1306_v32  ;;  %v4003_v24 = vpop.xlane.xlu1 %773  ;;  %v1819_v46 = vld [vmem:[%s3589_s24 + $0x220] sm:$0xff] }
 0x156   : > { %v3042_v42 = vpop.eup %3041  ;;  %v1944_v1 = vmul.f32 %v2694_v62, %v1816_v40  ;;  %v2695_v54 = vadd.f32 -1.0, %v3038_v18  ;;  %v1307_v60 = vadd.f32 1.0, %v3040_v15  ;;  %v2259_v20 = vsel %vm2135_vm0, %v2069_v14, 0.0  ;;  %v4000_v44 = vpop.xlane.xlu0 %771  ;;  %v1820_v18 = vld [vmem:[%s3589_s24 + $0x228] sm:$0xff] }
 0x157   : > { %v3044_v51 = vpop.eup %3043  ;;  %v2258_v49 = vadd.f32 %v2257_v37, %v2256_v13  ;;  %v2071_v9 = vmul.f32 %v2693_v31, %v1943_v47  ;;  %v1308_v39 = vadd.f32 1.0, %v3042_v42  ;;  %v2261_v63 = vsel %vm2135_vm0, %v2070_v4, 0.0  ;;  %v1821_v47 = vld [vmem:[%s3589_s24 + $0x230] sm:$0xff]  ;;  %v1822_v13 = vld [vmem:[%s3589_s24 + $0x238] sm:$0xff] }
 0x158   : > { %v3046_v50 = vpop.eup %3045  ;;  %v1309_v55 = vadd.f32 1.0, %v3044_v51  ;;  %3053 = vrcp.f32 %v1307_v60  ;;  %v2575_v0 = vmul.f32 -1.442695, %v3934_v19  ;;  %v2072_v45 = vmul.f32 %v2694_v62, %v1944_v1 }
 0x159   : > { %v3048_v58 = vpop.eup %3047  ;;  %v2260_v26 = vadd.f32 %v2259_v20, %v2258_v49  ;;  %v1310_v61 = vadd.f32 1.0, %v3046_v50  ;;  %3055 = vrcp.f32 %v1308_v39  ;;  %v1945_v48 = vmul.f32 %v2695_v54, %v1817_v21  ;;  %v4016_v49 = vpop.xlane.xlu1 %777 }
 0x15a   : > { %v1311_v30 = vadd.f32 1.0, %v3048_v58  ;;  %3057 = vrcp.f32 %v1309_v55  ;;  %v2263_v43 = vsel %vm2135_vm0, %v2071_v9, 0.0  ;;  %v2576_v8 = vmul.f32 -1.442695, %v3937_v57  ;;  %v4013_v42 = vpop.xlane.xlu0 %775 }
 0x15b   : > { %v3050_v12 = vpop.eup %3049  ;;  %v2262_v33 = vadd.f32 %v2261_v63, %v2260_v26  ;;  %3059 = vrcp.f32 %v1310_v61  ;;  %v2577_v19 = vmul.f32 -1.442695, %v3943_v2  ;;  %v2578_v34 = vmul.f32 -1.442695, %v3946_v7  ;;  %v1823_v26 = vld [vmem:[%s3589_s24 + $0x240] sm:$0xff] }
 0x15c   : > { %v1312_v36 = vadd.f32 1.0, %v3050_v12  ;;  %3061 = vrcp.f32 %v1311_v30  ;;  %v2265_v38 = vsel %vm2135_vm0, %v2072_v45, 0.0  ;;  %v2073_v17 = vmul.f32 %v2695_v54, %v1945_v48 }
 0x15d   : > { %v2264_v16 = vadd.f32 %v2263_v43, %v2262_v33  ;;  %v2579_v22 = vmul.f32 -1.442695, %v3954_v56  ;;  %v2580_v57 = vmul.f32 -1.442695, %v3960_v29  ;;  %v2581_v7 = vmul.f32 -1.442695, %v3968_v5 }
 0x15e   : > { %3063 = vrcp.f32 %v1312_v36  ;;  %v2582_v56 = vmul.f32 -1.442695, %v3971_v10  ;;  %v2267_v31 = vsel %vm2135_vm0, %v2073_v17, 0.0  ;;  %v2583_v29 = vmul.f32 -1.442695, %v3979_v35  ;;  %v4021_v48 = vpop.xlane.xlu0 %779 }
 0x15f   : > { %3065 = vpow2.f32 %v2575_v0  ;;  %v3052_v25 = vpop.eup %3051  ;;  %v2266_v23 = vadd.f32 %v2265_v38, %v2264_v16  ;;  %v2584_v10 = vmul.f32 -1.442695, %v3981_v6  ;;  %v4024_v38 = vpop.xlane.xlu1 %781 }
 0x160   : > { %3067 = vpow2.f32 %v2576_v8  ;;  %v2696_v2 = vadd.f32 -1.0, %v3052_v25 }
 0x161   : > { %3069 = vpow2.f32 %v2577_v19  ;;  %v2268_v41 = vadd.f32 %v2267_v31, %v2266_v23  ;;  %v1824_v19 = vld [vmem:[%s3589_s24 + $0x248] sm:$0xff] }
 0x162   : > { %3071 = vpow2.f32 %v2578_v34  ;;  %v3054_v27 = vpop.eup %3053  ;;  %v1946_v28 = vmul.f32 %v2696_v2, %v1818_v11 }
 0x163   : > { %3073 = vpow2.f32 %v2579_v22  ;;  %v3056_v3 = vpop.eup %3055  ;;  %v2697_v32 = vadd.f32 -1.0, %v3054_v27 }
 0x164   : > { %3075 = vpow2.f32 %v2580_v57  ;;  %v3058_v5 = vpop.eup %3057  ;;  %v2074_v52 = vmul.f32 %v2696_v2, %v1946_v28  ;;  %v2698_v14 = vadd.f32 -1.0, %v3056_v3 }
 0x165   : > { %3077 = vpow2.f32 %v2581_v7  ;;  %v3060_v40 = vpop.eup %3059  ;;  %v1947_v62 = vmul.f32 %v2697_v32, %v1819_v46  ;;  %v2699_v15 = vadd.f32 -1.0, %v3058_v5  ;;  %v2585_v5 = vmul.f32 -1.442695, %v3988_v59 }
 0x166   : > { %3079 = vpow2.f32 %v2582_v56  ;;  %v3062_v35 = vpop.eup %3061  ;;  %v2269_v37 = vsel %vm2135_vm0, %v2074_v52, 0.0  ;;  %v1948_v4 = vmul.f32 %v2698_v14, %v1820_v18  ;;  %v2700_v51 = vadd.f32 -1.0, %v3060_v40  ;;  %v4031_v52 = vpop.xlane.xlu1 %785 }
 0x167   : > { %3081 = vpow2.f32 %v2583_v29  ;;  %v2270_v54 = vadd.f32 %v2269_v37, %v2268_v41  ;;  %v2075_v60 = vmul.f32 %v2697_v32, %v1947_v62  ;;  %v1949_v6 = vmul.f32 %v2699_v15, %v1821_v47  ;;  %v4028_v32 = vpop.xlane.xlu0 %783 }
 0x168   : > { %v3064_v1 = vpop.eup %3063  ;;  %v2076_v20 = vmul.f32 %v2698_v14, %v1948_v4  ;;  %v1950_v9 = vmul.f32 %v2700_v51, %v1822_v13  ;;  %v2701_v21 = vadd.f32 -1.0, %v3062_v35  ;;  %3083 = vpow2.f32 %v2584_v10  ;;  %v1825_v35 = vld [vmem:[%s3589_s24 + $0x250] sm:$0xff] }
 0x169   : > { %v3066_v50 = vpop.eup %3065  ;;  %v2271_v55 = vsel %vm2135_vm0, %v2075_v60, 0.0  ;;  %v2077_v58 = vmul.f32 %v2699_v15, %v1949_v6  ;;  %v2702_v33 = vadd.f32 -1.0, %v3064_v1  ;;  %v2586_v47 = vmul.f32 -1.442695, %v3990_v53  ;;  %v1826_v53 = vld [vmem:[%s3589_s24 + $0x258] sm:$0xff] }
 0x16a   : > { %v3068_v39 = vpop.eup %3067  ;;  %v1313_v61 = vadd.f32 1.0, %v3066_v50  ;;  %v2272_v30 = vadd.f32 %v2271_v55, %v2270_v54  ;;  %v2273_v12 = vsel %vm2135_vm0, %v2076_v20, 0.0  ;;  %v2078_v8 = vmul.f32 %v2700_v51, %v1950_v9  ;;  %v1827_v20 = vld [vmem:[%s3589_s24 + $0x260] sm:$0xff] }
 0x16b   : > { %v3070_v63 = vpop.eup %3069  ;;  %v1314_v45 = vadd.f32 1.0, %v3068_v39  ;;  %v1951_v16 = vmul.f32 %v2701_v21, %v1823_v26  ;;  %v2275_v22 = vsel %vm2135_vm0, %v2077_v58, 0.0  ;;  %v1952_v56 = vmul.f32 %v2702_v33, %v1824_v19  ;;  %v4041_v54 = vpop.xlane.xlu0 %787  ;;  %v1828_v39 = vld [vmem:[%s3589_s24 + $0x268] sm:$0xff] }
 0x16c   : > { %v3072_v0 = vpop.eup %3071  ;;  %3085 = vrcp.f32 %v1313_v61  ;;  %v2274_v36 = vadd.f32 %v2273_v12, %v2272_v30  ;;  %v1315_v34 = vadd.f32 1.0, %v3070_v63  ;;  %v2277_v28 = vsel %vm2135_vm0, %v2078_v8, 0.0  ;;  %v1829_v61 = vld [vmem:[%s3589_s24 + $0x270] sm:$0xff]  ;;  %v1830_v12 = vld [vmem:[%s3589_s24 + $0x278] sm:$0xff] }
 0x16d   : > { %v3074_v43 = vpop.eup %3073  ;;  %3087 = vrcp.f32 %v1314_v45  ;;  %v1316_v25 = vadd.f32 1.0, %v3072_v0  ;;  %v2079_v46 = vmul.f32 %v2701_v21, %v1951_v16  ;;  %v2080_v40 = vmul.f32 %v2702_v33, %v1952_v56  ;;  %v1831_v16 = vld [vmem:[%s3589_s24 + $0x280] sm:$0xff] }
 0x16e   : > { %v3076_v17 = vpop.eup %3075  ;;  %v1317_v23 = vadd.f32 1.0, %v3074_v43  ;;  %v2276_v57 = vadd.f32 %v2275_v22, %v2274_v36  ;;  %3089 = vrcp.f32 %v1315_v34  ;;  %v2587_v62 = vmul.f32 -1.442695, %v4000_v44 }
 0x16f   : > { %v3078_v11 = vpop.eup %3077  ;;  %v1318_v2 = vadd.f32 1.0, %v3076_v17  ;;  %3091 = vrcp.f32 %v1316_v25  ;;  %v2279_v10 = vsel %vm2135_vm0, %v2079_v46, 0.0  ;;  %v2588_v59 = vmul.f32 -1.442695, %v4003_v24  ;;  %v4045_v24 = vpop.xlane.xlu1 %789 }
 0x170   : > { %v3080_v7 = vpop.eup %3079  ;;  %v1319_v27 = vadd.f32 1.0, %v3078_v11  ;;  %3093 = vrcp.f32 %v1317_v23  ;;  %v2278_v3 = vadd.f32 %v2277_v28, %v2276_v57  ;;  %v2589_v4 = vmul.f32 -1.442695, %v4013_v42  ;;  %v4052_v23 = vpop.xlane.xlu0 %791 }
 0x171   : > { %v3082_v31 = vpop.eup %3081  ;;  %v1320_v29 = vadd.f32 1.0, %v3080_v7  ;;  %3095 = vrcp.f32 %v1318_v2  ;;  %v2590_v1 = vmul.f32 -1.442695, %v4016_v49  ;;  %v2281_v60 = vsel %vm2135_vm0, %v2080_v40, 0.0 }
 0x172   : > { %v1321_v41 = vadd.f32 1.0, %v3082_v31  ;;  %v3084_v18 = vpop.eup %3083  ;;  %3097 = vrcp.f32 %v1319_v27  ;;  %v2280_v13 = vadd.f32 %v2279_v10, %v2278_v3  ;;  %v1832_v3 = vld [vmem:[%s3589_s24 + $0x288] sm:$0xff] }
 0x173   : > { %3099 = vrcp.f32 %v1320_v29  ;;  %v1322_v14 = vadd.f32 1.0, %v3084_v18  ;;  %v4055_v27 = vpop.xlane.xlu1 %793 }
 0x174   : > { %3101 = vrcp.f32 %v1321_v41  ;;  %v2282_v9 = vadd.f32 %v2281_v60, %v2280_v13  ;;  %v1833_v13 = vld [vmem:[%s3589_s24 + $0x290] sm:$0xff] }
 0x175   : > { %3103 = vrcp.f32 %v1322_v14 }
 0x176   : > { %v3086_v15 = vpop.eup %3085  ;;  %3105 = vpow2.f32 %v2585_v5 }
 0x177   : > { %v2703_v37 = vadd.f32 -1.0, %v3086_v15  ;;  %v3088_v51 = vpop.eup %3087  ;;  %3107 = vpow2.f32 %v2586_v47 }
 0x178   : > { %v3090_v44 = vpop.eup %3089  ;;  %v2704_v50 = vadd.f32 -1.0, %v3088_v51  ;;  %3109 = vpow2.f32 %v2587_v62 }
 0x179   : > { %v1953_v6 = vmul.f32 %v2703_v37, %v1825_v35  ;;  %v3092_v42 = vpop.eup %3091  ;;  %v2705_v21 = vadd.f32 -1.0, %v3090_v44  ;;  %3111 = vpow2.f32 %v2588_v59  ;;  %v2591_v59 = vmul.f32 -1.442695, %v4021_v48  ;;  %v796_v44 = vpop.xlane.xlu0 %795 }
 0x17a   : > { %v3094_v55 = vpop.eup %3093  ;;  %v1954_v58 = vmul.f32 %v2704_v50, %v1826_v53  ;;  %v2706_v26 = vadd.f32 -1.0, %v3092_v42  ;;  %3113 = vpow2.f32 %v2589_v4  ;;  %v798_v42 = vpop.xlane.xlu1 %797 }
 0x17b   : > { %v2081_v49 = vmul.f32 %v2703_v37, %v1953_v6  ;;  %v3096_v63 = vpop.eup %3095  ;;  %v1955_v30 = vmul.f32 %v2705_v21, %v1827_v20  ;;  %v2707_v0 = vadd.f32 -1.0, %v3094_v55  ;;  %3115 = vpow2.f32 %v2590_v1 }
 0x17c   : > { %v3098_v33 = vpop.eup %3097  ;;  %v2082_v43 = vmul.f32 %v2704_v50, %v1954_v58  ;;  %v1956_v36 = vmul.f32 %v2706_v26, %v1828_v39  ;;  %v2708_v8 = vadd.f32 -1.0, %v3096_v63  ;;  %v2592_v63 = vmul.f32 -1.442695, %v4024_v38 }
 0x17d   : > { %v2283_v45 = vsel %vm2135_vm0, %v2081_v49, 0.0  ;;  %v3100_v19 = vpop.eup %3099  ;;  %v2083_v17 = vmul.f32 %v2705_v21, %v1955_v30  ;;  %v1957_v22 = vmul.f32 %v2707_v0, %v1829_v61  ;;  %v2709_v25 = vadd.f32 -1.0, %v3098_v33  ;;  %v1834_v49 = vld [vmem:[%s3589_s24 + $0x298] sm:$0xff] }
 0x17e   : > { %v2284_v34 = vadd.f32 %v2283_v45, %v2282_v9  ;;  %v3102_v11 = vpop.eup %3101  ;;  %v2285_v57 = vsel %vm2135_vm0, %v2082_v43, 0.0  ;;  %v2084_v2 = vmul.f32 %v2706_v26, %v1956_v36  ;;  %v1958_v7 = vmul.f32 %v2708_v8, %v1830_v12  ;;  %v800_v36 = vpop.xlane.xlu0 %799 }
 0x17f   : > { %v2710_v56 = vadd.f32 -1.0, %v3100_v19  ;;  %v3104_v31 = vpop.eup %3103  ;;  %v2085_v46 = vmul.f32 %v2707_v0, %v1957_v22  ;;  %v1959_v29 = vmul.f32 %v2709_v25, %v1831_v16  ;;  %v2287_v18 = vsel %vm2135_vm0, %v2083_v17, 0.0  ;;  %v4071_v19 = vpop.xlane.xlu1 %801 }
 0x180   : > { %v2286_v28 = vadd.f32 %v2285_v57, %v2284_v34  ;;  %v3106_v41 = vpop.eup %3105  ;;  %v2086_v5 = vmul.f32 %v2708_v8, %v1958_v7  ;;  %v2711_v10 = vadd.f32 -1.0, %v3102_v11  ;;  %v2289_v62 = vsel %vm2135_vm0, %v2084_v2, 0.0 }
 0x181   : > { %v3108_v14 = vpop.eup %3107  ;;  %v1960_v15 = vmul.f32 %v2710_v56, %v1832_v3  ;;  %v1323_v35 = vadd.f32 1.0, %v3106_v41  ;;  %v2291_v51 = vsel %vm2135_vm0, %v2085_v46, 0.0  ;;  %v2087_v53 = vmul.f32 %v2709_v25, %v1959_v29  ;;  %v1837_v46 = vld [vmem:[%s3589_s24 + $0x2b0] sm:$0xff] }
 0x182   : > { %v2288_v47 = vadd.f32 %v2287_v18, %v2286_v28  ;;  %v3110_v40 = vpop.eup %3109  ;;  %v1324_v1 = vadd.f32 1.0, %v3108_v14  ;;  %v2293_v6 = vsel %vm2135_vm0, %v2086_v5, 0.0  ;;  %v2712_v50 = vadd.f32 -1.0, %v3104_v31  ;;  %v4079_v31 = vpop.xlane.xlu0 %803  ;;  %v1838_v14 = vld [vmem:[%s3589_s24 + $0x2b8] sm:$0xff] }
 0x183   : > { %v3112_v37 = vpop.eup %3111  ;;  %3117 = vrcp.f32 %v1323_v35  ;;  %v1325_v20 = vadd.f32 1.0, %v3110_v40  ;;  %v1961_v39 = vmul.f32 %v2711_v10, %v1833_v13  ;;  %v2088_v55 = vmul.f32 %v2710_v56, %v1960_v15  ;;  %v1836_v56 = vld [vmem:[%s3589_s24 + $0x2a8] sm:$0xff]  ;;  %v4082_v3 = vpop.xlane.xlu1 %805 }
 0x184   : > { %v2290_v4 = vadd.f32 %v2289_v62, %v2288_v47  ;;  %v3114_v60 = vpop.eup %3113  ;;  %3119 = vrcp.f32 %v1324_v1  ;;  %v1326_v48 = vadd.f32 1.0, %v3112_v37  ;;  %v2295_v30 = vsel %vm2135_vm0, %v2087_v53, 0.0 }
 0x185   : > { %v3116_v9 = vpop.eup %3115  ;;  %3121 = vrcp.f32 %v1325_v20  ;;  %v1327_v58 = vadd.f32 1.0, %v3114_v60  ;;  %v2593_v0 = vmul.f32 -1.442695, %v4028_v32  ;;  %v2594_v12 = vmul.f32 -1.442695, %v4031_v52  ;;  %v1839_v60 = vld [vmem:[%s3589_s24 + $0x2c0] sm:$0xff] }
 0x186   : > { %v2292_v21 = vadd.f32 %v2291_v51, %v2290_v4  ;;  %v1328_v26 = vadd.f32 1.0, %v3116_v9  ;;  %3123 = vrcp.f32 %v1326_v48  ;;  %v2089_v45 = vmul.f32 %v2711_v10, %v1961_v39 }
 0x187   : > { %3125 = vrcp.f32 %v1327_v58  ;;  %v1962_v43 = vmul.f32 %v2712_v50, %v1834_v49  ;;  %v2297_v8 = vsel %vm2135_vm0, %v2088_v55, 0.0  ;;  %v2595_v16 = vmul.f32 -1.442695, %v4041_v54  ;;  %v1835_v54 = vld [vmem:[%s3589_s24 + $0x2a0] sm:$0xff]  ;;  %v810_v9 = vpop.xlane.xlu1 %809 }
 0x188   : > { %v2294_v61 = vadd.f32 %v2293_v6, %v2292_v21  ;;  %3127 = vrcp.f32 %v1328_v26  ;;  %v2596_v32 = vmul.f32 -1.442695, %v4045_v24  ;;  %v2597_v52 = vmul.f32 -1.442695, %v4052_v23 }
 0x189   : > { %3129 = vpow2.f32 %v2591_v59  ;;  %v2299_v34 = vsel %vm2135_vm0, %v2089_v45, 0.0  ;;  %v2090_v17 = vmul.f32 %v2712_v50, %v1962_v43  ;;  %v2598_v22 = vmul.f32 -1.442695, %v4055_v27  ;;  %v808_v50 = vpop.xlane.xlu0 %807 }
 0x18a   : > { %v2296_v33 = vadd.f32 %v2295_v30, %v2294_v61  ;;  %3131 = vpow2.f32 %v2592_v63  ;;  %v2599_v57 = vmul.f32 -1.442695, %v796_v44  ;;  %v2600_v24 = vmul.f32 -1.442695, %v798_v42  ;;  %v1840_v63 = vld [vmem:[%s3589_s24 + $0x2c8] sm:$0xff] }
 0x18b   : > { %3133 = vpow2.f32 %v2593_v0  ;;  %v2601_v29 = vmul.f32 -1.442695, %v800_v36  ;;  %v2301_v41 = vsel %vm2135_vm0, %v2090_v17, 0.0 }
 0x18c   : > { %v2298_v38 = vadd.f32 %v2297_v8, %v2296_v33  ;;  %3135 = vpow2.f32 %v2594_v12 }
 0x18d   : > { %v3118_v25 = vpop.eup %3117  ;;  %3137 = vpow2.f32 %v2595_v16 }
 0x18e   : > { %v2300_v11 = vadd.f32 %v2299_v34, %v2298_v38  ;;  %v3120_v2 = vpop.eup %3119  ;;  %v2713_v7 = vadd.f32 -1.0, %v3118_v25  ;;  %3139 = vpow2.f32 %v2596_v32 }
 0x18f   : > { %v3122_v23 = vpop.eup %3121  ;;  %v2714_v28 = vadd.f32 -1.0, %v3120_v2  ;;  %3141 = vpow2.f32 %v2597_v52  ;;  %v4091_v52 = vpop.xlane.xlu0 %811 }
 0x190   : > { %v3124_v27 = vpop.eup %3123  ;;  %v1963_v18 = vmul.f32 %v2713_v7, %v1835_v54  ;;  %v2715_v5 = vadd.f32 -1.0, %v3122_v23  ;;  %3143 = vpow2.f32 %v2598_v22  ;;  %v2302_v10 = vadd.f32 %v2301_v41, %v2300_v11  ;;  %v4094_v11 = vpop.xlane.xlu1 %813 }
 0x191   : > { %v3126_v47 = vpop.eup %3125  ;;  %v1964_v40 = vmul.f32 %v2714_v28, %v1836_v56  ;;  %v2716_v62 = vadd.f32 -1.0, %v3124_v27  ;;  %3145 = vpow2.f32 %v2599_v57  ;;  %v2602_v23 = vmul.f32 -1.442695, %v4071_v19 }
 0x192   : > { %v3128_v15 = vpop.eup %3127  ;;  %v2091_v13 = vmul.f32 %v2713_v7, %v1963_v18  ;;  %v1965_v35 = vmul.f32 %v2715_v5, %v1837_v46  ;;  %3147 = vpow2.f32 %v2600_v24  ;;  %v2717_v51 = vadd.f32 -1.0, %v3126_v47  ;;  %v1841_v18 = vld [vmem:[%s3589_s24 + $0x2d0] sm:$0xff] }
 0x193   : > { %v3130_v59 = vpop.eup %3129  ;;  %v2092_v37 = vmul.f32 %v2714_v28, %v1964_v40  ;;  %v1966_v4 = vmul.f32 %v2716_v62, %v1838_v14  ;;  %3149 = vpow2.f32 %v2601_v29  ;;  %v2718_v48 = vadd.f32 -1.0, %v3128_v15  ;;  %v4101_v14 = vpop.xlane.xlu0 %815 }
 0x194   : > { %v3132_v53 = vpop.eup %3131  ;;  %v2303_v1 = vsel %vm2135_vm0, %v2091_v13, 0.0  ;;  %v2093_v44 = vmul.f32 %v2715_v5, %v1965_v35  ;;  %v1329_v6 = vadd.f32 1.0, %v3130_v59  ;;  %v1967_v61 = vmul.f32 %v2717_v51, %v1839_v60 }
 0x195   : > { %v3134_v20 = vpop.eup %3133  ;;  %v2304_v42 = vadd.f32 %v2303_v1, %v2302_v10  ;;  %v2305_v39 = vsel %vm2135_vm0, %v2092_v37, 0.0  ;;  %v1330_v55 = vadd.f32 1.0, %v3132_v53  ;;  %v2094_v26 = vmul.f32 %v2716_v62, %v1966_v4  ;;  %v4103_v10 = vpop.xlane.xlu1 %817  ;;  %v1842_v62 = vld [vmem:[%s3589_s24 + $0x2d8] sm:$0xff]  ;;  %v1843_v37 = vld [vmem:[%s3589_s24 + $0x2e0] sm:$0xff]  ;;  %v1844_v53 = vld [vmem:[%s3589_s24 + $0x2e8] sm:$0xff] }
 0x196   : > { %v3136_v21 = vpop.eup %3135  ;;  %3151 = vrcp.f32 %v1329_v6  ;;  %v1331_v30 = vadd.f32 1.0, %v3134_v20  ;;  %v2307_v12 = vsel %vm2135_vm0, %v2093_v44, 0.0  ;;  %v1968_v38 = vmul.f32 %v2718_v48, %v1840_v63 }
 0x197   : > { %v3138_v49 = vpop.eup %3137  ;;  %v2306_v58 = vadd.f32 %v2305_v39, %v2304_v42  ;;  %3153 = vrcp.f32 %v1330_v55  ;;  %v1332_v33 = vadd.f32 1.0, %v3136_v21  ;;  %v2309_v17 = vsel %vm2135_vm0, %v2094_v26, 0.0  ;;  %v1846_v21 = vld [vmem:[%s3589_s24 + $0x2f8] sm:$0xff]  ;;  %v4111_v39 = vpop.xlane.xlu0 %819 }
 0x198   : > { %v3140_v0 = vpop.eup %3139  ;;  %v1333_v45 = vadd.f32 1.0, %v3138_v49  ;;  %3155 = vrcp.f32 %v1331_v30  ;;  %v2095_v22 = vmul.f32 %v2717_v51, %v1967_v61  ;;  %v2096_v46 = vmul.f32 %v2718_v48, %v1968_v38  ;;  %v1848_v38 = vld [vmem:[%s3589_s24 + $0x308] sm:$0xff] }
 0x199   : > { %v3142_v43 = vpop.eup %3141  ;;  %v2308_v36 = vadd.f32 %v2307_v12, %v2306_v58  ;;  %v1334_v8 = vadd.f32 1.0, %v3140_v0  ;;  %3157 = vrcp.f32 %v1332_v33  ;;  %v2603_v29 = vmul.f32 -1.442695, %v4079_v31  ;;  %v4114_v61 = vpop.xlane.xlu1 %821  ;;  %v1847_v33 = vld [vmem:[%s3589_s24 + $0x300] sm:$0xff] }
 0x19a   : > { %v3144_v16 = vpop.eup %3143  ;;  %v1335_v32 = vadd.f32 1.0, %v3142_v43  ;;  %3159 = vrcp.f32 %v1333_v45  ;;  %v2311_v28 = vsel %vm2135_vm0, %v2095_v22, 0.0  ;;  %v2604_v5 = vmul.f32 -1.442695, %v4082_v3 }
 0x19b   : > { %v3146_v34 = vpop.eup %3145  ;;  %v1336_v25 = vadd.f32 1.0, %v3144_v16  ;;  %v2310_v57 = vadd.f32 %v2309_v17, %v2308_v36  ;;  %3161 = vrcp.f32 %v1334_v8  ;;  %v2605_v19 = vmul.f32 -1.442695, %v808_v50  ;;  %v1845_v50 = vld [vmem:[%s3589_s24 + $0x2f0] sm:$0xff] }
 0x19c   : > { %v3148_v54 = vpop.eup %3147  ;;  %v1337_v2 = vadd.f32 1.0, %v3146_v34  ;;  %3163 = vrcp.f32 %v1335_v32  ;;  %v2606_v15 = vmul.f32 -1.442695, %v810_v9  ;;  %v2313_v13 = vsel %vm2135_vm0, %v2096_v46, 0.0  ;;  %v824_v46 = vpop.xlane.xlu0 %823 }
 0x19d   : > { %v3150_v7 = vpop.eup %3149  ;;  %v1338_v56 = vadd.f32 1.0, %v3148_v54  ;;  %3165 = vrcp.f32 %v1336_v25  ;;  %v2312_v41 = vadd.f32 %v2311_v28, %v2310_v57  ;;  %v1849_v28 = vld [vmem:[%s3589_s24 + $0x310] sm:$0xff] }
 0x19e   : > { %v1339_v24 = vadd.f32 1.0, %v3150_v7  ;;  %3167 = vrcp.f32 %v1337_v2 }
 0x19f   : > { %3169 = vrcp.f32 %v1338_v56  ;;  %v2314_v4 = vadd.f32 %v2313_v13, %v2312_v41 }
 0x1a0   : > { %v3152_v27 = vpop.eup %3151  ;;  %3171 = vrcp.f32 %v1339_v24 }
 0x1a1   : > { %v2719_v47 = vadd.f32 -1.0, %v3152_v27  ;;  %v3154_v40 = vpop.eup %3153  ;;  %3173 = vpow2.f32 %v2602_v23 }
 0x1a2   : > { %v3156_v31 = vpop.eup %3155  ;;  %v2720_v59 = vadd.f32 -1.0, %v3154_v40  ;;  %3175 = vpow2.f32 %v2603_v29  ;;  %v1850_v40 = vld [vmem:[%s3589_s24 + $0x318] sm:$0xff] }
 0x1a3   : > { %v1969_v35 = vmul.f32 %v2719_v47, %v1841_v18  ;;  %v3158_v3 = vpop.eup %3157  ;;  %v2721_v51 = vadd.f32 -1.0, %v3156_v31  ;;  %3177 = vpow2.f32 %v2604_v5  ;;  %v826_v18 = vpop.xlane.xlu1 %825 }
 0x1a4   : > { %v3160_v1 = vpop.eup %3159  ;;  %v1970_v60 = vmul.f32 %v2720_v59, %v1842_v62  ;;  %v2722_v6 = vadd.f32 -1.0, %v3158_v3  ;;  %3179 = vpow2.f32 %v2605_v19 }
 0x1a5   : > { %v2097_v44 = vmul.f32 %v2719_v47, %v1969_v35  ;;  %v3162_v20 = vpop.eup %3161  ;;  %v1971_v42 = vmul.f32 %v2721_v51, %v1843_v37  ;;  %v2723_v9 = vadd.f32 -1.0, %v3160_v1  ;;  %3181 = vpow2.f32 %v2606_v15 }
 0x1a6   : > { %v3164_v48 = vpop.eup %3163  ;;  %v2098_v49 = vmul.f32 %v2720_v59, %v1970_v60  ;;  %v1972_v58 = vmul.f32 %v2722_v6, %v1844_v53  ;;  %v2724_v26 = vadd.f32 -1.0, %v3162_v20  ;;  %v2607_v15 = vmul.f32 -1.442695, %v4091_v52 }
 0x1a7   : > { %v2315_v55 = vsel %vm2135_vm0, %v2097_v44, 0.0  ;;  %v3166_v63 = vpop.eup %3165  ;;  %v2099_v0 = vmul.f32 %v2721_v51, %v1971_v42  ;;  %v1973_v12 = vmul.f32 %v2723_v9, %v1845_v50  ;;  %v2725_v45 = vadd.f32 -1.0, %v3164_v48  ;;  %v1851_v50 = vld [vmem:[%s3589_s24 + $0x320] sm:$0xff]  ;;  %v828_v42 = vpop.xlane.xlu0 %827 }
 0x1a8   : > { %v2316_v30 = vadd.f32 %v2315_v55, %v2314_v4  ;;  %v3168_v43 = vpop.eup %3167  ;;  %v2317_v36 = vsel %vm2135_vm0, %v2098_v49, 0.0  ;;  %v2100_v8 = vmul.f32 %v2722_v6, %v1972_v58  ;;  %v1974_v16 = vmul.f32 %v2724_v26, %v1846_v21  ;;  %v830_v55 = vpop.xlane.xlu1 %829 }
 0x1a9   : > { %v2726_v32 = vadd.f32 -1.0, %v3166_v63  ;;  %v3170_v34 = vpop.eup %3169  ;;  %v2101_v22 = vmul.f32 %v2723_v9, %v1973_v12  ;;  %v2319_v54 = vsel %vm2135_vm0, %v2099_v0, 0.0  ;;  %v1975_v2 = vmul.f32 %v2725_v45, %v1847_v33 }
 0x1aa   : > { %v2318_v17 = vadd.f32 %v2317_v36, %v2316_v30  ;;  %v3172_v25 = vpop.eup %3171  ;;  %v2102_v57 = vmul.f32 %v2724_v26, %v1974_v16  ;;  %v2727_v7 = vadd.f32 -1.0, %v3168_v43  ;;  %v2321_v27 = vsel %vm2135_vm0, %v2100_v8, 0.0 }
 0x1ab   : > { %v3174_v56 = vpop.eup %3173  ;;  %v1976_v23 = vmul.f32 %v2726_v32, %v1848_v38  ;;  %v2728_v41 = vadd.f32 -1.0, %v3170_v34  ;;  %v2323_v19 = vsel %vm2135_vm0, %v2101_v22, 0.0  ;;  %v2103_v35 = vmul.f32 %v2725_v45, %v1975_v2  ;;  %v832_v43 = vpop.xlane.xlu0 %831  ;;  %v1852_v34 = vld [vmem:[%s3589_s24 + $0x328] sm:$0xff] }
 0x1ac   : > { %v2320_v24 = vadd.f32 %v2319_v54, %v2318_v17  ;;  %v3176_v29 = vpop.eup %3175  ;;  %v1340_v62 = vadd.f32 1.0, %v3174_v56  ;;  %v2325_v13 = vsel %vm2135_vm0, %v2102_v57, 0.0  ;;  %v1977_v59 = vmul.f32 %v2727_v7, %v1849_v28  ;;  %v834_v16 = vpop.xlane.xlu1 %833 }
 0x1ad   : > { %v3178_v5 = vpop.eup %3177  ;;  %v1341_v37 = vadd.f32 1.0, %v3176_v29  ;;  %v2104_v51 = vmul.f32 %v2726_v32, %v1976_v23  ;;  %v1978_v1 = vmul.f32 %v2728_v41, %v1850_v40  ;;  %v2729_v44 = vadd.f32 -1.0, %v3172_v25  ;;  %v1853_v25 = vld [vmem:[%s3589_s24 + $0x330] sm:$0xff]  ;;  %v1855_v40 = vld [vmem:[%s3589_s24 + $0x340] sm:$0xff] }
 0x1ae   : > { %v2322_v47 = vadd.f32 %v2321_v27, %v2320_v24  ;;  %v3180_v31 = vpop.eup %3179  ;;  %3183 = vrcp.f32 %v1340_v62  ;;  %v1342_v53 = vadd.f32 1.0, %v3178_v5  ;;  %v2608_v20 = vmul.f32 -1.442695, %v4094_v11 }
 0x1af   : > { %v3182_v3 = vpop.eup %3181  ;;  %3185 = vrcp.f32 %v1341_v37  ;;  %v1343_v60 = vadd.f32 1.0, %v3180_v31  ;;  %v2327_v9 = vsel %vm2135_vm0, %v2103_v35, 0.0  ;;  %v2105_v21 = vmul.f32 %v2727_v7, %v1977_v59  ;;  %v1854_v7 = vld [vmem:[%s3589_s24 + $0x338] sm:$0xff] }
 0x1b0   : > { %v2324_v4 = vadd.f32 %v2323_v19, %v2322_v47  ;;  %3187 = vrcp.f32 %v1342_v53  ;;  %v1344_v52 = vadd.f32 1.0, %v3182_v3  ;;  %v2609_v48 = vmul.f32 -1.442695, %v4101_v14 }
 0x1b1   : > { %3189 = vrcp.f32 %v1343_v60  ;;  %v2610_v58 = vmul.f32 -1.442695, %v4103_v10  ;;  %v2611_v26 = vmul.f32 -1.442695, %v4111_v39  ;;  %v2329_v63 = vsel %vm2135_vm0, %v2104_v51, 0.0 }
 0x1b2   : > { %v2326_v6 = vadd.f32 %v2325_v13, %v2324_v4  ;;  %3191 = vrcp.f32 %v1344_v52  ;;  %v2106_v30 = vmul.f32 %v2728_v41, %v1978_v1  ;;  %v1979_v0 = vmul.f32 %v2729_v44, %v1851_v50  ;;  %v836_v13 = vpop.xlane.xlu0 %835 }
 0x1b3   : > { %3193 = vpow2.f32 %v2607_v15  ;;  %v2612_v12 = vmul.f32 -1.442695, %v4114_v61  ;;  %v2331_v33 = vsel %vm2135_vm0, %v2105_v21, 0.0  ;;  %v2613_v14 = vmul.f32 -1.442695, %v824_v46 }
 0x1b4   : > { %v2328_v49 = vadd.f32 %v2327_v9, %v2326_v6  ;;  %3195 = vpow2.f32 %v2608_v20  ;;  %v2614_v10 = vmul.f32 -1.442695, %v826_v18  ;;  %v2333_v39 = vsel %vm2135_vm0, %v2106_v30, 0.0  ;;  %v1856_v6 = vld [vmem:[%s3589_s24 + $0x348] sm:$0xff] }
 0x1b5   : > { %3197 = vpow2.f32 %v2609_v48  ;;  %v2107_v36 = vmul.f32 %v2729_v44, %v1979_v0  ;;  %v2615_v8 = vmul.f32 -1.442695, %v828_v42  ;;  %v2616_v61 = vmul.f32 -1.442695, %v830_v55  ;;  %v838_v55 = vpop.xlane.xlu1 %837 }
 0x1b6   : > { %v2330_v11 = vadd.f32 %v2329_v63, %v2328_v49  ;;  %3199 = vpow2.f32 %v2610_v58  ;;  %v2617_v54 = vmul.f32 -1.442695, %v832_v43  ;;  %v2618_v56 = vmul.f32 -1.442695, %v834_v16  ;;  %v840_v63 = vpop.xlane.xlu0 %839 }
 0x1b7   : > { %3201 = vpow2.f32 %v2611_v26  ;;  %v2335_v23 = vsel %vm2135_vm0, %v2107_v36, 0.0 }
 0x1b8   : > { %v2332_v45 = vadd.f32 %v2331_v33, %v2330_v11  ;;  %v3184_v38 = vpop.eup %3183  ;;  %3203 = vpow2.f32 %v2612_v12 }
 0x1b9   : > { %v3186_v17 = vpop.eup %3185  ;;  %v2730_v22 = vadd.f32 -1.0, %v3184_v38  ;;  %3205 = vpow2.f32 %v2613_v14 }
 0x1ba   : > { %v2334_v32 = vadd.f32 %v2333_v39, %v2332_v45  ;;  %v3188_v57 = vpop.eup %3187  ;;  %v2731_v2 = vadd.f32 -1.0, %v3186_v17  ;;  %3207 = vpow2.f32 %v2614_v10 }
 0x1bb   : > { %v3190_v24 = vpop.eup %3189  ;;  %v1980_v28 = vmul.f32 %v2730_v22, %v1852_v34  ;;  %v2732_v46 = vadd.f32 -1.0, %v3188_v57  ;;  %3209 = vpow2.f32 %v2615_v8  ;;  %v2619_v8 = vmul.f32 -1.442695, %v836_v13  ;;  %v842_v34 = vpop.xlane.xlu1 %841  ;;  %v1861_v13 = vld [vmem:[%s3589_s24 + $0x370] sm:$0xff] }
 0x1bc   : > { %v3192_v29 = vpop.eup %3191  ;;  %v2336_v27 = vadd.f32 %v2335_v23, %v2334_v32  ;;  %v1981_v41 = vmul.f32 %v2731_v2, %v1853_v25  ;;  %v2733_v18 = vadd.f32 -1.0, %v3190_v24  ;;  %3211 = vpow2.f32 %v2616_v61 }
 0x1bd   : > { %v3194_v5 = vpop.eup %3193  ;;  %v2108_v47 = vmul.f32 %v2730_v22, %v1980_v28  ;;  %v1982_v19 = vmul.f32 %v2732_v46, %v1854_v7  ;;  %3213 = vpow2.f32 %v2617_v54  ;;  %v2734_v53 = vadd.f32 -1.0, %v3192_v29  ;;  %v1857_v22 = vld [vmem:[%s3589_s24 + $0x350] sm:$0xff]  ;;  %v844_v54 = vpop.xlane.xlu0 %843  ;;  %v1858_v7 = vld [vmem:[%s3589_s24 + $0x358] sm:$0xff] }
 0x1be   : > { %v3196_v62 = vpop.eup %3195  ;;  %v2109_v15 = vmul.f32 %v2731_v2, %v1981_v41  ;;  %v1345_v31 = vadd.f32 1.0, %v3194_v5  ;;  %3215 = vpow2.f32 %v2618_v56  ;;  %v1983_v51 = vmul.f32 %v2733_v18, %v1855_v40  ;;  %v1860_v40 = vld [vmem:[%s3589_s24 + $0x368] sm:$0xff] }
 0x1bf   : > { %v3198_v35 = vpop.eup %3197  ;;  %v2337_v59 = vsel %vm2135_vm0, %v2108_v47, 0.0  ;;  %v1346_v37 = vadd.f32 1.0, %v3196_v62  ;;  %v2110_v60 = vmul.f32 %v2732_v46, %v1982_v19  ;;  %v1984_v58 = vmul.f32 %v2734_v53, %v1856_v6 }
 0x1c0   : > { %v3200_v3 = vpop.eup %3199  ;;  %v2338_v4 = vadd.f32 %v2337_v59, %v2336_v27  ;;  %3217 = vrcp.f32 %v1345_v31  ;;  %v2339_v44 = vsel %vm2135_vm0, %v2109_v15, 0.0  ;;  %v1347_v50 = vadd.f32 1.0, %v3198_v35  ;;  %v1859_v27 = vld [vmem:[%s3589_s24 + $0x360] sm:$0xff] }
 0x1c1   : > { %v3202_v1 = vpop.eup %3201  ;;  %3219 = vrcp.f32 %v1346_v37  ;;  %v1348_v42 = vadd.f32 1.0, %v3200_v3  ;;  %v2341_v0 = vsel %vm2135_vm0, %v2110_v60, 0.0  ;;  %v2111_v11 = vmul.f32 %v2733_v18, %v1983_v51 }
 0x1c2   : > { %v3204_v52 = vpop.eup %3203  ;;  %v2340_v20 = vadd.f32 %v2339_v44, %v2338_v4  ;;  %v1349_v9 = vadd.f32 1.0, %v3202_v1  ;;  %3221 = vrcp.f32 %v1347_v50  ;;  %v2112_v38 = vmul.f32 %v2734_v53, %v1984_v58  ;;  %v1862_v4 = vld [vmem:[%s3589_s24 + $0x378] sm:$0xff]  ;;  %v1864_v58 = vld [vmem:[%s3589_s24 + $0x388] sm:$0xff] }
 0x1c3   : > { %v3206_v21 = vpop.eup %3205  ;;  %v1350_v48 = vadd.f32 1.0, %v3204_v52  ;;  %3223 = vrcp.f32 %v1348_v42  ;;  %v2343_v16 = vsel %vm2135_vm0, %v2111_v11, 0.0  ;;  %v2620_v25 = vmul.f32 -1.442695, %v838_v55  ;;  %v1863_v42 = vld [vmem:[%s3589_s24 + $0x380] sm:$0xff] }
 0x1c4   : > { %v3208_v49 = vpop.eup %3207  ;;  %v1351_v26 = vadd.f32 1.0, %v3206_v21  ;;  %3225 = vrcp.f32 %v1349_v9  ;;  %v2342_v14 = vadd.f32 %v2341_v0, %v2340_v20  ;;  %v2621_v56 = vmul.f32 -1.442695, %v840_v63  ;;  %v846_v9 = vpop.xlane.xlu1 %845 }
 0x1c5   : > { %v3210_v30 = vpop.eup %3209  ;;  %v1352_v12 = vadd.f32 1.0, %v3208_v49  ;;  %3227 = vrcp.f32 %v1350_v48  ;;  %v2622_v23 = vmul.f32 -1.442695, %v842_v34  ;;  %v2345_v46 = vsel %vm2135_vm0, %v2112_v38, 0.0 }
 0x1c6   : > { %v3212_v33 = vpop.eup %3211  ;;  %v1353_v45 = vadd.f32 1.0, %v3210_v30  ;;  %3229 = vrcp.f32 %v1351_v26  ;;  %v2344_v17 = vadd.f32 %v2343_v16, %v2342_v14  ;;  %v2623_v41 = vmul.f32 -1.442695, %v844_v54 }
 0x1c7   : > { %v3214_v10 = vpop.eup %3213  ;;  %v1354_v43 = vadd.f32 1.0, %v3212_v33  ;;  %3231 = vrcp.f32 %v1352_v12 }
 0x1c8   : > { %v3216_v39 = vpop.eup %3215  ;;  %v1355_v36 = vadd.f32 1.0, %v3214_v10  ;;  %3233 = vrcp.f32 %v1353_v45  ;;  %v2346_v5 = vadd.f32 %v2345_v46, %v2344_v17  ;;  %v1865_v45 = vld [vmem:[%s3589_s24 + $0x390] sm:$0xff] }
 0x1c9   : > { %v1356_v32 = vadd.f32 1.0, %v3216_v39  ;;  %3235 = vrcp.f32 %v1354_v43 }
 0x1ca   : > { %v3218_v61 = vpop.eup %3217  ;;  %3237 = vrcp.f32 %v1355_v36 }
 0x1cb   : > { %v3220_v57 = vpop.eup %3219  ;;  %v2735_v2 = vadd.f32 -1.0, %v3218_v61  ;;  %3239 = vrcp.f32 %v1356_v32  ;;  %v848_v32 = vpop.xlane.xlu0 %847 }
 0x1cc   : > { %v2736_v24 = vadd.f32 -1.0, %v3220_v57  ;;  %v3222_v28 = vpop.eup %3221  ;;  %3241 = vpow2.f32 %v2619_v8 }
 0x1cd   : > { %v1985_v29 = vmul.f32 %v2735_v2, %v1857_v22  ;;  %v3224_v18 = vpop.eup %3223  ;;  %v2737_v19 = vadd.f32 -1.0, %v3222_v28  ;;  %3243 = vpow2.f32 %v2620_v25  ;;  %v1866_v22 = vld [vmem:[%s3589_s24 + $0x398] sm:$0xff]  ;;  %v850_v25 = vpop.xlane.xlu1 %849 }
 0x1ce   : > { %v1986_v47 = vmul.f32 %v2736_v24, %v1858_v7  ;;  %v3226_v62 = vpop.eup %3225  ;;  %v2738_v31 = vadd.f32 -1.0, %v3224_v18  ;;  %3245 = vpow2.f32 %v2621_v56 }
 0x1cf   : > { %v2113_v15 = vmul.f32 %v2735_v2, %v1985_v29  ;;  %v3228_v35 = vpop.eup %3227  ;;  %v1987_v37 = vmul.f32 %v2737_v19, %v1859_v27  ;;  %v2739_v3 = vadd.f32 -1.0, %v3226_v62  ;;  %3247 = vpow2.f32 %v2622_v23  ;;  %v1867_v29 = vld [vmem:[%s3589_s24 + $0x3a0] sm:$0xff] }
 0x1d0   : > { %v2114_v59 = vmul.f32 %v2736_v24, %v1986_v47  ;;  %v3230_v51 = vpop.eup %3229  ;;  %v1988_v1 = vmul.f32 %v2738_v31, %v1860_v40  ;;  %v2740_v44 = vadd.f32 -1.0, %v3228_v35  ;;  %3249 = vpow2.f32 %v2623_v41  ;;  %v1868_v35 = vld [vmem:[%s3589_s24 + $0x3a8] sm:$0xff] }
 0x1d1   : > { %v2347_v53 = vsel %vm2135_vm0, %v2113_v15, 0.0  ;;  %v3232_v60 = vpop.eup %3231  ;;  %v2115_v52 = vmul.f32 %v2737_v19, %v1987_v37  ;;  %v1989_v20 = vmul.f32 %v2739_v3, %v1861_v13  ;;  %v2741_v49 = vadd.f32 -1.0, %v3230_v51  ;;  %v852_v37 = vpop.xlane.xlu0 %851 }
 0x1d2   : > { %v2348_v6 = vadd.f32 %v2347_v53, %v2346_v5  ;;  %v2349_v50 = vsel %vm2135_vm0, %v2114_v59, 0.0  ;;  %v3234_v21 = vpop.eup %3233  ;;  %v2116_v48 = vmul.f32 %v2738_v31, %v1988_v1  ;;  %v1990_v55 = vmul.f32 %v2740_v44, %v1862_v4  ;;  %v854_v51 = vpop.xlane.xlu1 %853 }
 0x1d3   : > { %v2742_v26 = vadd.f32 -1.0, %v3232_v60  ;;  %v3236_v63 = vpop.eup %3235  ;;  %v2743_v0 = vadd.f32 -1.0, %v3234_v21  ;;  %v2351_v12 = vsel %vm2135_vm0, %v2115_v52, 0.0  ;;  %v2117_v33 = vmul.f32 %v2739_v3, %v1989_v20 }
 0x1d4   : > { %v2350_v30 = vadd.f32 %v2349_v50, %v2348_v6  ;;  %v3238_v11 = vpop.eup %3237  ;;  %v1991_v14 = vmul.f32 %v2741_v49, %v1863_v42  ;;  %v2118_v39 = vmul.f32 %v2740_v44, %v1990_v55  ;;  %v2353_v16 = vsel %vm2135_vm0, %v2116_v48, 0.0 }
 0x1d5   : > { %v3240_v10 = vpop.eup %3239  ;;  %v1992_v36 = vmul.f32 %v2742_v26, %v1864_v58  ;;  %v2744_v38 = vadd.f32 -1.0, %v3236_v63  ;;  %v1993_v17 = vmul.f32 %v2743_v0, %v1865_v45  ;;  %v2355_v57 = vsel %vm2135_vm0, %v2117_v33, 0.0 }
 0x1d6   : > { %v2352_v43 = vadd.f32 %v2351_v12, %v2350_v30  ;;  %v3242_v8 = vpop.eup %3241  ;;  %v2119_v2 = vmul.f32 %v2741_v49, %v1991_v14  ;;  %v2745_v7 = vadd.f32 -1.0, %v3238_v11  ;;  %v2357_v28 = vsel %vm2135_vm0, %v2118_v39, 0.0  ;;  %v1870_v11 = vld [vmem:[%s3589_s24 + $0x3b8] sm:$0xff] }
 0x1d7   : > { %v3244_v34 = vpop.eup %3243  ;;  %v1357_v56 = vadd.f32 1.0, %v3242_v8  ;;  %v2120_v46 = vmul.f32 %v2742_v26, %v1992_v36  ;;  %v2624_v27 = vmul.f32 -1.442695, %v846_v9  ;;  %v1994_v18 = vmul.f32 %v2744_v38, %v1866_v22  ;;  %v1869_v26 = vld [vmem:[%s3589_s24 + $0x3b0] sm:$0xff] }
 0x1d8   : > { %v2354_v61 = vadd.f32 %v2353_v16, %v2352_v43  ;;  %v3246_v54 = vpop.eup %3245  ;;  %v1358_v5 = vadd.f32 1.0, %v3244_v34  ;;  %v2121_v40 = vmul.f32 %v2743_v0, %v1993_v17  ;;  %v2746_v62 = vadd.f32 -1.0, %v3240_v10  ;;  %v1871_v10 = vld [vmem:[%s3589_s24 + $0x3c0] sm:$0xff] }
 0x1d9   : > { %v3248_v24 = vpop.eup %3247  ;;  %3251 = vrcp.f32 %v1357_v56  ;;  %v1359_v47 = vadd.f32 1.0, %v3246_v54  ;;  %v2359_v31 = vsel %vm2135_vm0, %v2119_v2, 0.0  ;;  %v1995_v13 = vmul.f32 %v2745_v7, %v1867_v29  ;;  %v1872_v54 = vld [vmem:[%s3589_s24 + $0x3c8] sm:$0xff] }
 0x1da   : > { %v2356_v23 = vadd.f32 %v2355_v57, %v2354_v61  ;;  %v3250_v41 = vpop.eup %3249  ;;  %v1360_v15 = vadd.f32 1.0, %v3248_v24  ;;  %3253 = vrcp.f32 %v1358_v5  ;;  %v2625_v4 = vmul.f32 -1.442695, %v848_v32  ;;  %v1873_v5 = vld [vmem:[%s3589_s24 + $0x3d0] sm:$0xff] }
 0x1db   : > { %v1361_v59 = vadd.f32 1.0, %v3250_v41  ;;  %3255 = vrcp.f32 %v1359_v47  ;;  %v2361_v53 = vsel %vm2135_vm0, %v2120_v46, 0.0  ;;  %v2122_v1 = vmul.f32 %v2744_v38, %v1994_v18 }
 0x1dc   : > { %v2358_v19 = vadd.f32 %v2357_v28, %v2356_v23  ;;  %3257 = vrcp.f32 %v1360_v15  ;;  %v2626_v44 = vmul.f32 -1.442695, %v850_v25  ;;  %v1996_v6 = vmul.f32 %v2746_v62, %v1868_v35 }
 0x1dd   : > { %3259 = vrcp.f32 %v1361_v59  ;;  %v2627_v50 = vmul.f32 -1.442695, %v852_v37  ;;  %v2363_v52 = vsel %vm2135_vm0, %v2121_v40, 0.0  ;;  %v2123_v20 = vmul.f32 %v2745_v7, %v1995_v13 }
 0x1de   : > { %v2360_v3 = vadd.f32 %v2359_v31, %v2358_v19  ;;  %3261 = vpow2.f32 %v2624_v27  ;;  %v2628_v42 = vmul.f32 -1.442695, %v854_v51  ;;  %v2365_v21 = vsel %vm2135_vm0, %v2122_v1, 0.0 }
 0x1df   : > { %3263 = vpow2.f32 %v2625_v4  ;;  %v2124_v55 = vmul.f32 %v2746_v62, %v1996_v6  ;;  %v2367_v58 = vsel %vm2135_vm0, %v2123_v20, 0.0 }
 0x1e0   : > { %v2362_v60 = vadd.f32 %v2361_v53, %v2360_v3  ;;  %3265 = vpow2.f32 %v2626_v44  ;;  %v1874_v3 = vld [vmem:[%s3589_s24 + $0x3d8] sm:$0xff]  ;;  %v1875_v53 = vld [vmem:[%s3589_s24 + $0x3e0] sm:$0xff] }
 0x1e1   : > { %3267 = vpow2.f32 %v2627_v50  ;;  %v2369_v33 = vsel %vm2135_vm0, %v2124_v55, 0.0 }
 0x1e2   : > { %v2364_v9 = vadd.f32 %v2363_v52, %v2362_v60  ;;  %3269 = vpow2.f32 %v2628_v42  ;;  %v1876_v60 = vld [vmem:[%s3589_s24 + $0x3e8] sm:$0xff] }
 0x1e3   : > { %v3252_v49 = vpop.eup %3251 }
 0x1e4   : > { %v2366_v48 = vadd.f32 %v2365_v21, %v2364_v9  ;;  %v2747_v30 = vadd.f32 -1.0, %v3252_v49  ;;  %v3254_v0 = vpop.eup %3253  ;;  %v1877_v21 = vld [vmem:[%s3589_s24 + $0x3f0] sm:$0xff] }
 0x1e5   : > { %v3256_v12 = vpop.eup %3255  ;;  %v2748_v45 = vadd.f32 -1.0, %v3254_v0 }
 0x1e6   : > { %v2368_v63 = vadd.f32 %v2367_v58, %v2366_v48  ;;  %v1997_v14 = vmul.f32 %v2747_v30, %v1869_v26  ;;  %v3258_v43 = vpop.eup %3257  ;;  %v2749_v36 = vadd.f32 -1.0, %v3256_v12  ;;  %v1878_v26 = vld [vmem:[%s3589_s24 + $0x3f8] sm:$0xff] }
 0x1e7   : > { %v3260_v8 = vpop.eup %3259  ;;  %v1998_v38 = vmul.f32 %v2748_v45, %v1870_v11  ;;  %v2750_v61 = vadd.f32 -1.0, %v3258_v43 }
 0x1e8   : > { %v2370_v39 = vadd.f32 %v2369_v33, %v2368_v63  ;;  %v2125_v16 = vmul.f32 %v2747_v30, %v1997_v14  ;;  %v3262_v32 = vpop.eup %3261  ;;  %v1999_v34 = vmul.f32 %v2749_v36, %v1871_v10  ;;  %v2751_v23 = vadd.f32 -1.0, %v3260_v8 }
 0x1e9   : > { %v3264_v17 = vpop.eup %3263  ;;  %v2126_v25 = vmul.f32 %v2748_v45, %v1998_v38  ;;  %v1362_v57 = vadd.f32 1.0, %v3262_v32  ;;  %v2000_v41 = vmul.f32 %v2750_v61, %v1872_v54 }
 0x1ea   : > { %v2371_v22 = vsel %vm2135_vm0, %v2125_v16, 0.0  ;;  %v3266_v2 = vpop.eup %3265  ;;  %v1363_v56 = vadd.f32 1.0, %v3264_v17  ;;  %v2127_v27 = vmul.f32 %v2749_v36, %v1999_v34  ;;  %v2001_v15 = vmul.f32 %v2751_v23, %v1873_v5 }
 0x1eb   : > { %v2372_v7 = vadd.f32 %v2371_v22, %v2370_v39  ;;  %v3268_v24 = vpop.eup %3267  ;;  %3271 = vrcp.f32 %v1362_v57  ;;  %v1364_v28 = vadd.f32 1.0, %v3266_v2  ;;  %v2373_v29 = vsel %vm2135_vm0, %v2126_v25, 0.0 }
 0x1ec   : > { %v3270_v46 = vpop.eup %3269  ;;  %3273 = vrcp.f32 %v1363_v56  ;;  %v1365_v47 = vadd.f32 1.0, %v3268_v24  ;;  %v2375_v40 = vsel %vm2135_vm0, %v2127_v27, 0.0  ;;  %v2128_v62 = vmul.f32 %v2750_v61, %v2000_v41 }
 0x1ed   : > { %v2374_v18 = vadd.f32 %v2373_v29, %v2372_v7  ;;  %3275 = vrcp.f32 %v1364_v28  ;;  %v1366_v19 = vadd.f32 1.0, %v3270_v46  ;;  %v2129_v35 = vmul.f32 %v2751_v23, %v2001_v15 }
 0x1ee   : > { %3277 = vrcp.f32 %v1365_v47  ;;  %v2377_v13 = vsel %vm2135_vm0, %v2128_v62, 0.0  ;;  %v2401_v7 = vlaneseq }
 0x1ef   : > { %3279 = vrcp.f32 %v1366_v19  ;;  %v2376_v31 = vadd.f32 %v2375_v40, %v2374_v18  ;;  %v2379_v6 = vsel %vm2135_vm0, %v2129_v35, 0.0 }
 0x1f0   : > { %v2402_v56 = vshrl.u32 %v2401_v7, 7  ;;  %v2404_v24 = vand.u32 127, %v2401_v7 }
 0x1f1   : > { %v2378_v37 = vadd.f32 %v2377_v13, %v2376_v31 }
 0x1f2   : > { %vm2405_vm1 = vcmp.eq.s32.totalorder %v2402_v56, 0  ;;  %vm2406_vm2 = vcmp.eq.s32.totalorder %v2404_v24, 0 }
 0x1f3   : > { %v2380_v42 = vadd.f32 %v2379_v6, %v2378_v37  ;;  %vm2407_vm3 = vmand %vm2405_vm1, %vm2406_vm2 }
 0x1f5   : > { %v3272_v59 = vpop.eup %3271 }
 0x1f6   : > { %v3274_v4 = vpop.eup %3273  ;;  %v2752_v51 = vadd.f32 -1.0, %v3272_v59 }
 0x1f7   : > { %v3276_v1 = vpop.eup %3275  ;;  %v2753_v44 = vadd.f32 -1.0, %v3274_v4 }
 0x1f8   : > { %v2002_v50 = vmul.f32 %v2752_v51, %v1874_v3  ;;  %v2754_v52 = vadd.f32 -1.0, %v3276_v1  ;;  %v3278_v20 = vpop.eup %3277 }
 0x1f9   : > { %v2003_v9 = vmul.f32 %v2753_v44, %v1875_v53  ;;  %v3280_v48 = vpop.eup %3279  ;;  %v2755_v58 = vadd.f32 -1.0, %v3278_v20 }
 0x1fa   : > { %v2130_v55 = vmul.f32 %v2752_v51, %v2002_v50  ;;  %v2004_v49 = vmul.f32 %v2754_v52, %v1876_v60  ;;  %v2756_v30 = vadd.f32 -1.0, %v3280_v48 }
 0x1fb   : > { %v2131_v63 = vmul.f32 %v2753_v44, %v2003_v9  ;;  %v2005_v12 = vmul.f32 %v2755_v58, %v1877_v21 }
 0x1fc   : > { %v2381_v0 = vsel %vm2135_vm0, %v2130_v55, 0.0  ;;  %v2132_v11 = vmul.f32 %v2754_v52, %v2004_v49  ;;  %v2006_v33 = vmul.f32 %v2756_v30, %v1878_v26 }
 0x1fd   : > { %v2382_v14 = vadd.f32 %v2381_v0, %v2380_v42  ;;  %v2133_v45 = vmul.f32 %v2755_v58, %v2005_v12  ;;  %v2383_v10 = vsel %vm2135_vm0, %v2131_v63, 0.0 }
 0x1fe   : > { %v2134_v39 = vmul.f32 %v2756_v30, %v2006_v33  ;;  %v2385_v36 = vsel %vm2135_vm0, %v2132_v11, 0.0 }
 0x1ff   : > { %v2384_v43 = vadd.f32 %v2383_v10, %v2382_v14  ;;  %v2387_v16 = vsel %vm2135_vm0, %v2133_v45, 0.0 }
 0x200   : > { %v2389_v32 = vsel %vm2135_vm0, %v2134_v39, 0.0 }
 0x201   : > { %v2386_v8 = vadd.f32 %v2385_v36, %v2384_v43 }
 0x203   : > { %v2388_v38 = vadd.f32 %v2387_v16, %v2386_v8 }
 0x205   : > { %v2390_v34 = vadd.f32 %v2389_v32, %v2388_v38 }
 0x207   : > { %2391 = vadd.xlane.f32.xlu0 %v2390_v34 }
 0x294   : > { %v2392_v61 = vpop.xlane.xlu0 %2391 }
 0x295   : > { %v2393_v17 = vrot.slane %v2392_v61, 4 }
 0x297   : > { %v2394_v22 = vadd.f32 %v2393_v17, %v2392_v61 }
 0x299   : > { %v2395_v25 = vrot.slane %v2394_v22, 2 }
 0x29b   : > { %v2396_v54 = vadd.f32 %v2395_v25, %v2394_v22 }
 0x29d   : > { %v2397_v57 = vrot.slane %v2396_v54, 1 }
 0x29f   : > { %v2398_v2 = vadd.f32 %v2397_v57, %v2396_v54 }
 0x2a1   : > { %2759 = vpush %v2398_v2 }
 0x2d2   : > { %s2760_s26 = spop %2759 }
 0x2d3   : > { %s2400_s27 = smul.f32 0.00390625, %s2760_s26 }
 0x2d5   : > { %v2408_v23 = vstv %s2400_s27 }
 0x2d6   : > { %v2409_v28 = vsel %vm2407_vm3, %v2408_v23, 0.0 }
 0x2d7   : > { %2411 = vst [vmem:[%s214_s30] sm:$0xff] %v2409_v28 }
 0x2d8 PF: > { %s13_s12 = sadd.s32 1, %s3287_s12  }
 0x2d9   : > { %p10_p5 = scmp.ge.s32.totalorder %s13_s12, 6  }
 0x2db   :  { %12 = sbr.rel (!%p10_p5) target bundleno = 1 (0x1), region = 68 }

</bundles_post_ra>
